<compile_context>
chip_gen: v7x
topology: tpu7x:2x2x1
jax: 0.10.0
libtpu: 0.0.40
codegen_flags: <defaults>
</compile_context>

<pallas_src>
import functools

import numpy as np
import jax
import jax.numpy as jnp
from jax import lax
from jax.experimental import pallas as pl
from jax.experimental.pallas import tpu as pltpu


def _round_up(x, m):
    return ((x + m - 1) // m) * m


# ----------------------------- Pallas kernel -------------------------------------
def tree_lstm_kernel(leaf_base,                         # static python int: first internal row
                     lc_ref, rc_ref,                    # SMEM scalar prefetch (n_levels*Wmax,)
                     x_ref, wx_ref, u4_ref, blou_ref, b5_ref,   # VMEM inputs
                     state_ref,                         # VMEM output (n_rows, 2H) = [h | c]
                     sc_ref):                           # VMEM scratch (Wmax, 4H) = [h_l|c_l|h_r|c_r]
    H2 = state_ref.shape[1]                             # 2H
    H = H2 // 2
    wmax = sc_ref.shape[0]
    n_levels = lc_ref.shape[0] // wmax

    # ---- leaves: one batched bf16 MXU matmul over all trees' leaves ----
    # Wx restricted to i|o|u gate columns (f_l/f_r are multiplied by c=0 at leaves).
    g0 = jnp.dot(x_ref[...], wx_ref[...], preferred_element_type=jnp.float32) + blou_ref[...]
    i_g = jax.nn.sigmoid(g0[:, 0:H])
    o_g = jax.nn.sigmoid(g0[:, H:2 * H])
    u_g = jnp.tanh(g0[:, 2 * H:3 * H])
    c_leaf = i_g * u_g
    h_leaf = o_g * jnp.tanh(c_leaf)
    # one lane-dense 2H-wide aligned store for all leaves (pad rows are junk, never read
    # via row_of; gather padding indices point at row 0, a real leaf written here).
    state_ref[0:leaf_base, :] = jnp.concatenate([h_leaf, c_leaf], axis=1)

    # invariants hoisted out of the level loop (JAX does not CSE broadcast_in_dim)
    u4 = u4_ref[...]                                    # (4H, 5H) bf16
    bias5 = jnp.broadcast_to(b5_ref[...], (wmax, 5 * H))

    # ---- internal nodes, one forest level at a time (children are in earlier levels) ----
    def level_body(lvl, carry):
        base = lvl * wmax

        # gather child [h|c] rows into lane-packed [h_l|c_l | h_r|c_r] (2 copies / node)
        def gather_body(w, c2):
            li = lc_ref[base + w]
            ri = rc_ref[base + w]
            sc_ref[pl.ds(w, 1), 0:H2] = state_ref[pl.ds(li, 1), :]
            sc_ref[pl.ds(w, 1), H2:2 * H2] = state_ref[pl.ds(ri, 1), :]
            return c2

        # full unroll for small levels; partial unroll (not rolled) for large ones so the
        # LLO scheduler can overlap address math with the copies.
        lax.fori_loop(0, wmax, gather_body, 0,
                      unroll=(True if wmax <= 32 else 8))

        sc = sc_ref[...]                                # (Wmax, 4H) f32
        # single fused recurrent matmul for the whole level; c-rows of U4 are zero.
        g = jnp.dot(sc.astype(jnp.bfloat16), u4,
                    preferred_element_type=jnp.float32) + bias5
        ii = jax.nn.sigmoid(g[:, 0:H])
        fl = jax.nn.sigmoid(g[:, H:2 * H])
        fr = jax.nn.sigmoid(g[:, 2 * H:3 * H])
        oo = jax.nn.sigmoid(g[:, 3 * H:4 * H])
        uu = jnp.tanh(g[:, 4 * H:5 * H])
        c_new = ii * uu + fl * sc[:, H:H2] + fr * sc[:, H2 + H:2 * H2]
        h_new = oo * jnp.tanh(c_new)

        # one sublane-aligned, 2H-lane-dense block store for the whole level
        row0 = pl.multiple_of(leaf_base + lvl * wmax, 8)
        state_ref[pl.ds(row0, wmax), :] = jnp.concatenate([h_new, c_new], axis=1)
        return carry

    lax.fori_loop(0, n_levels, level_body, 0,
                  unroll=(True if n_levels <= 8 else 2))


# ----------------------------- host-side forest schedule ---------------------------
def build_forest_schedule(trees):
    """trees: list of (n_leaf, left_child, right_child), children in topological order.
    Merges the internal nodes of ALL trees into per-depth 'forest levels' so each level
    is one batched matmul; pads each level to a sublane-aligned width."""
    leaf_offsets = []
    total_leaves = 0
    for (n_leaf, _, _) in trees:
        leaf_offsets.append(total_leaves)
        total_leaves += n_leaf
    # 16-row rounding: the bf16 leaf block is then a whole (16,128) packed tile, and it
    # trivially satisfies the f32 (8,128) alignment of the state stores.
    leaf_base = _round_up(total_leaves, 16)

    depths = []
    max_depth = 0
    for (n_leaf, lc, rc) in trees:
        n_internal = int(lc.shape[0])
        assert n_internal >= 1, "each tree must have at least one internal node"
        depth = np.zeros(n_leaf + n_internal, dtype=np.int64)
        for t in range(n_internal):
            li, ri = int(lc[t]), int(rc[t])
            assert li < n_leaf + t and ri < n_leaf + t, "children must precede parents"
            depth[n_leaf + t] = max(depth[li], depth[ri]) + 1
        depths.append(depth)
        max_depth = max(max_depth, int(depth[n_leaf:].max()))

    n_levels = max_depth
    levels = [[] for _ in range(n_levels)]
    for ti, (n_leaf, lc, rc) in enumerate(trees):
        for t in range(int(lc.shape[0])):
            levels[int(depths[ti][n_leaf + t]) - 1].append((ti, t))
    wmax = _round_up(max(len(lv) for lv in levels), 8)

    # per-tree node -> global forest row (leaves first, then level-ordered internals)
    row_of = []
    for ti, (n_leaf, lc, rc) in enumerate(trees):
        r = np.zeros(n_leaf + int(lc.shape[0]), dtype=np.int32)
        r[:n_leaf] = leaf_offsets[ti] + np.arange(n_leaf, dtype=np.int32)
        row_of.append(r)
    for lvl, lv in enumerate(levels):
        for w, (ti, t) in enumerate(lv):
            row_of[ti][trees[ti][0] + t] = leaf_base + lvl * wmax + w

    # padding slots point at row 0 (a valid, already-written leaf), so the kernel never
    # reads uninitialized VMEM.
    lc_flat = np.zeros(n_levels * wmax, dtype=np.int32)
    rc_flat = np.zeros(n_levels * wmax, dtype=np.int32)
    for lvl, lv in enumerate(levels):
        for w, (ti, t) in enumerate(lv):
            n_leaf, lc, rc = trees[ti]
            lc_flat[lvl * wmax + w] = row_of[ti][int(lc[t])]
            rc_flat[lvl * wmax + w] = row_of[ti][int(rc[t])]

    n_rows = leaf_base + n_levels * wmax
    row_of_cat = np.concatenate(row_of).astype(np.int32)
    return lc_flat, rc_flat, row_of_cat, n_rows, wmax, leaf_base, leaf_offsets, total_leaves


# ----------------------------- jitted pallas wrapper -------------------------------
@functools.partial(jax.jit, static_argnames=("n_rows", "wmax", "leaf_base"))
def _tree_lstm_jit(word_ids_pad, lc_flat, rc_flat, row_of_cat,
                   embedding, Wx, U, b, *, n_rows, wmax, leaf_base):
    word_pad = embedding[word_ids_pad]                  # (leaf_base, word_dim) f32
    # dropout_in: eval-mode identity; leaf_rnn=False => seq_output == word embeddings
    word_dim = word_pad.shape[1]
    H = Wx.shape[1] // 5

    # kernel-ready params: leaf weights restricted to i|o|u gates; recurrent weights
    # expanded to (4H,5H) with zero rows at the c positions of the fused gather; bf16
    # for the MXU (f32 accumulation inside the kernel).
    wx_lou = jnp.concatenate([Wx[:, 0:H], Wx[:, 3 * H:4 * H], Wx[:, 4 * H:5 * H]],
                             axis=1).astype(jnp.bfloat16)
    b_lou = jnp.concatenate([b[:, 0:H], b[:, 3 * H:4 * H], b[:, 4 * H:5 * H]], axis=1)
    zH = jnp.zeros((H, 5 * H), Wx.dtype)
    u4 = jnp.concatenate([U[0:H], zH, U[H:2 * H], zH], axis=0).astype(jnp.bfloat16)
    x_bf = word_pad.astype(jnp.bfloat16)

    # explicit VMEM budget (operands double-buffered by BlockSpec) + headroom; keeps the
    # kernel portable to v7x's 64 MiB VMEM when H scales.
    est = 2 * (x_bf.size * 2 + wx_lou.size * 2 + u4.size * 2
               + b_lou.size * 4 + b.size * 4 + n_rows * 2 * H * 4) \
        + wmax * 4 * H * 4 + (2 << 20)
    vmem_limit = int(min(max(est, 4 << 20), 48 << 20))

    state = pl.pallas_call(
        functools.partial(tree_lstm_kernel, leaf_base),
        out_shape=jax.ShapeDtypeStruct((n_rows, 2 * H), jnp.float32),
        grid_spec=pltpu.PrefetchScalarGridSpec(
            num_scalar_prefetch=2,
            grid=(1,),
            in_specs=[
                pl.BlockSpec((leaf_base, word_dim), lambda i, lc, rc: (0, 0)),
                pl.BlockSpec((word_dim, 3 * H), lambda i, lc, rc: (0, 0)),
                pl.BlockSpec((4 * H, 5 * H), lambda i, lc, rc: (0, 0)),
                pl.BlockSpec((1, 3 * H), lambda i, lc, rc: (0, 0)),
                pl.BlockSpec((1, 5 * H), lambda i, lc, rc: (0, 0)),
            ],
            out_specs=pl.BlockSpec((n_rows, 2 * H), lambda i, lc, rc: (0, 0)),
            scratch_shapes=[pltpu.VMEM((wmax, 4 * H), jnp.float32)],
        ),
        # TODO(synk): on v7x add a leading "parallel" grid axis over tree groups so the
        # second TensorCore is used; with grid=(1,) one TC idles.
        compiler_params=pltpu.CompilerParams(
            dimension_semantics=("arbitrary",),
            vmem_limit_bytes=vmem_limit),
    )(lc_flat, rc_flat, x_bf, wx_lou, u4, b_lou, b)

    # Single fused gather ([h|c] together) from level-ordered rows back to per-tree node
    # order.  TODO(synk): fold this remap into the consumer / output index_maps when
    # batching many trees to avoid the extra HBM round trip.
    nodes_cat = state[row_of_cat]
    return word_pad, nodes_cat


# ----------------------------- user-facing wrappers --------------------------------
def tree_lstm_forward_batch(tree_batch, params):
    """tree_batch: list of (word_ids, left_child, right_child). Returns per-tree
    (seq_output, h_nodes, c_nodes). All trees run in ONE kernel launch (forest batch)."""
    sched_trees = [(int(np.asarray(w).shape[0]),
                    np.asarray(l, dtype=np.int64), np.asarray(r, dtype=np.int64))
                   for (w, l, r) in tree_batch]
    (lc_flat, rc_flat, row_of_cat, n_rows, wmax, leaf_base,
     leaf_offsets, total_leaves) = build_forest_schedule(sched_trees)

    word_ids_pad = np.zeros(leaf_base, dtype=np.int32)
    word_ids_pad[:total_leaves] = np.concatenate(
        [np.asarray(w, dtype=np.int32) for (w, _, _) in tree_batch])

    word_pad, nodes_cat = _tree_lstm_jit(
        jnp.asarray(word_ids_pad), jnp.asarray(lc_flat), jnp.asarray(rc_flat),
        jnp.asarray(row_of_cat),
        params["embedding"], params["Wx"], params["U"], params["b"],
        n_rows=n_rows, wmax=wmax, leaf_base=leaf_base)

    H = params["Wx"].shape[1] // 5
    outs = []
    node_off = 0
    for ti, (w, l, r) in enumerate(tree_batch):
        n_leaf = int(np.asarray(w).shape[0])
        n_nodes = n_leaf + int(np.asarray(l).shape[0])
        seq_output = word_pad[leaf_offsets[ti]:leaf_offsets[ti] + n_leaf]
        t_nodes = nodes_cat[node_off:node_off + n_nodes]
        outs.append((seq_output, t_nodes[:, 0:H], t_nodes[:, H:2 * H]))
        node_off += n_nodes
    return outs


def tree_lstm_forward(word_ids, left_child, right_child, params):
    return tree_lstm_forward_batch([(word_ids, left_child, right_child)], params)[0]


# ----------------------------- pure-JAX reference ---------------------------------
def tree_lstm_reference(word, left_child, right_child, Wx, U, b):
    H = Wx.shape[1] // 5
    gates = word @ Wx + b
    i_g = jax.nn.sigmoid(gates[:, 0 * H:1 * H])
    o_g = jax.nn.sigmoid(gates[:, 3 * H:4 * H])
    u_g = jnp.tanh(gates[:, 4 * H:5 * H])
    c = i_g * u_g
    h = o_g * jnp.tanh(c)
    hs = [h[k] for k in range(h.shape[0])]
    cs = [c[k] for k in range(c.shape[0])]
    for t in range(len(left_child)):
        li = int(left_child[t]); ri = int(right_child[t])
        g = hs[li] @ U[:H] + hs[ri] @ U[H:] + b[0]
        ii = jax.nn.sigmoid(g[0 * H:1 * H])
        fl = jax.nn.sigmoid(g[1 * H:2 * H])
        fr = jax.nn.sigmoid(g[2 * H:3 * H])
        oo = jax.nn.sigmoid(g[3 * H:4 * H])
        uu = jnp.tanh(g[4 * H:5 * H])
        cc = ii * uu + fl * cs[li] + fr * cs[ri]
        hs.append(oo * jnp.tanh(cc))
        cs.append(cc)
    return jnp.stack(hs), jnp.stack(cs)


# ----------------------------- main -----------------------------------------------
if __name__ == "__main__":
    num_words = 100
    word_dim = 128          # nn.Embedding(num_words, word_dim)
    output_dim = 128        # H of TreeLSTMCell
    seq_len = 8             # number of leaves per tree

    key = jax.random.PRNGKey(0)
    k_emb, k_wx, k_u, k_b, k_ids = jax.random.split(key, 5)

    emb_scale = float(np.sqrt(3.0 / word_dim))     # reset_embedding semantics
    w_scale = float(1.0 / np.sqrt(word_dim))
    params = {
        "embedding": jax.random.uniform(k_emb, (num_words, word_dim),
                                        minval=-emb_scale, maxval=emb_scale, dtype=jnp.float32),
        "Wx": jax.random.uniform(k_wx, (word_dim, 5 * output_dim),
                                 minval=-w_scale, maxval=w_scale, dtype=jnp.float32),
        "U": jax.random.uniform(k_u, (2 * output_dim, 5 * output_dim),
                                minval=-w_scale, maxval=w_scale, dtype=jnp.float32),
        "b": jax.random.uniform(k_b, (1, 5 * output_dim),
                                minval=-w_scale, maxval=w_scale, dtype=jnp.float32),
    }
    word_ids = jax.random.randint(k_ids, (seq_len,), 0, num_words, dtype=jnp.int32)

    # two tree shapes (topological internal-node order): balanced + left-chain
    trees = {
        "balanced": (np.array([0, 2, 4, 6, 8, 10, 12], dtype=np.int32),
                     np.array([1, 3, 5, 7, 9, 11, 13], dtype=np.int32)),
        "left_chain": (np.array([0, 8, 9, 10, 11, 12, 13], dtype=np.int32),
                       np.array([1, 2, 3, 4, 5, 6, 7], dtype=np.int32)),
    }

    # batched (forest) call: both trees processed by ONE kernel launch
    batch = [(word_ids, lc, rc) for (lc, rc) in trees.values()]
    results = tree_lstm_forward_batch(batch, params)
    jax.block_until_ready(results)

    word = params["embedding"][word_ids]
    for (name, (lc, rc)), (seq_output, h_nodes, c_nodes) in zip(trees.items(), results):
        h_exp, c_exp = tree_lstm_reference(word, lc, rc,
                                           params["Wx"], params["U"], params["b"])
        assert jnp.allclose(seq_output, word), name
        # bf16 weights / matmul LHS with f32 accumulation -> bf16-level tolerance
        assert jnp.allclose(h_nodes, h_exp, atol=2e-3, rtol=2e-2), name
        assert jnp.allclose(c_nodes, c_exp, atol=2e-3, rtol=2e-2), name

    # single-tree entry point (batch of one)
    lc, rc = trees["balanced"]
    seq1, h1, c1 = tree_lstm_forward(word_ids, lc, rc, params)
    jax.block_until_ready((seq1, h1, c1))
    h_exp, c_exp = tree_lstm_reference(word, lc, rc, params["Wx"], params["U"], params["b"])
    assert jnp.allclose(seq1, word)
    assert jnp.allclose(h1, h_exp, atol=2e-3, rtol=2e-2)
    assert jnp.allclose(c1, c_exp, atol=2e-3, rtol=2e-2)

    print("KERNEL_OK")
</pallas_src>

<mosaic_0001>
module attributes {stable_mosaic.version = 11 : i64} {
  func.func @tree_lstm_kernel(%arg0: i32, %arg1: memref<56xi32, #tpu.memory_space<smem>>, %arg2: memref<56xi32, #tpu.memory_space<smem>>, %arg3: memref<16x128xbf16, #tpu.memory_space<vmem>>, %arg4: memref<128x384xbf16, #tpu.memory_space<vmem>>, %arg5: memref<512x640xbf16, #tpu.memory_space<vmem>>, %arg6: memref<1x384xf32, #tpu.memory_space<vmem>>, %arg7: memref<1x640xf32, #tpu.memory_space<vmem>>, %arg8: memref<72x256xf32, #tpu.memory_space<vmem>>, %arg9: memref<8x512xf32, #tpu.memory_space<vmem>>) attributes {dimension_semantics = [#tpu.dimension_semantics<arbitrary>], iteration_bounds = array<i64: 1>, scalar_prefetch = 2 : i64, scratch_operands = 1 : i64, tpu.core_type = #tpu.core_type<tc>, window_params = [{pipeline_mode = #tpu.pipeline_mode<synchronous>, transform_indices = @transform_0, window_bounds = array<i64: 16, 128>}, {pipeline_mode = #tpu.pipeline_mode<synchronous>, transform_indices = @transform_1, window_bounds = array<i64: 128, 384>}, {pipeline_mode = #tpu.pipeline_mode<synchronous>, transform_indices = @transform_2, window_bounds = array<i64: 512, 640>}, {pipeline_mode = #tpu.pipeline_mode<synchronous>, transform_indices = @transform_3, window_bounds = array<i64: 1, 384>}, {pipeline_mode = #tpu.pipeline_mode<synchronous>, transform_indices = @transform_4, window_bounds = array<i64: 1, 640>}, {pipeline_mode = #tpu.pipeline_mode<synchronous>, transform_indices = @transform_5, window_bounds = array<i64: 72, 256>}]} {
    %c0 = arith.constant 0 : index
    %c0_0 = arith.constant 0 : index
    %0 = vector.load %arg3[%c0, %c0_0] : memref<16x128xbf16, #tpu.memory_space<vmem>>, vector<16x128xbf16>
    %c0_1 = arith.constant 0 : index
    %c0_2 = arith.constant 0 : index
    %1 = vector.load %arg4[%c0_1, %c0_2] : memref<128x384xbf16, #tpu.memory_space<vmem>>, vector<128x384xbf16>
    %cst = arith.constant dense<0.000000e+00> : vector<16x384xf32>
    %2 = tpu.matmul %0, %1, %cst {dimension_numbers = #tpu.dot_dimension_numbers<[1], [0], [0], [1], [0, 0, 1, 1], [], []>} : vector<16x128xbf16>, vector<128x384xbf16>, vector<16x384xf32> -> vector<16x384xf32>
    %c0_3 = arith.constant 0 : index
    %c0_4 = arith.constant 0 : index
    %3 = vector.load %arg6[%c0_3, %c0_4] : memref<1x384xf32, #tpu.memory_space<vmem>>, vector<1x384xf32>
    %4 = vector.broadcast %3 : vector<1x384xf32> to vector<16x384xf32>
    %5 = arith.addf %2, %4 : vector<16x384xf32>
    %6 = vector.extract_strided_slice %5 {offsets = [0, 0], sizes = [16, 128], strides = [1, 1]} : vector<16x384xf32> to vector<16x128xf32>
    %7 = arith.negf %6 : vector<16x128xf32>
    %8 = math.exp %7 : vector<16x128xf32>
    %cst_5 = arith.constant 1.000000e+00 : f32
    %9 = vector.broadcast %cst_5 : f32 to vector<16x128xf32>
    %10 = arith.addf %9, %8 : vector<16x128xf32>
    %11 = arith.divf %9, %10 : vector<16x128xf32>
    %12 = vector.extract_strided_slice %5 {offsets = [0, 128], sizes = [16, 128], strides = [1, 1]} : vector<16x384xf32> to vector<16x128xf32>
    %13 = arith.negf %12 : vector<16x128xf32>
    %14 = math.exp %13 : vector<16x128xf32>
    %cst_6 = arith.constant 1.000000e+00 : f32
    %15 = vector.broadcast %cst_6 : f32 to vector<16x128xf32>
    %16 = arith.addf %15, %14 : vector<16x128xf32>
    %17 = arith.divf %15, %16 : vector<16x128xf32>
    %18 = vector.extract_strided_slice %5 {offsets = [0, 256], sizes = [16, 128], strides = [1, 1]} : vector<16x384xf32> to vector<16x128xf32>
    %19 = math.tanh %18 : vector<16x128xf32>
    %20 = arith.mulf %11, %19 : vector<16x128xf32>
    %21 = math.tanh %20 : vector<16x128xf32>
    %22 = arith.mulf %17, %21 : vector<16x128xf32>
    %23 = tpu.concatenate %22, %20 in 1 : vector<16x128xf32>, vector<16x128xf32> -> vector<16x256xf32>
    %c0_7 = arith.constant 0 : index
    %c0_8 = arith.constant 0 : index
    %24 = vector.load %arg8[%c0_7, %c0_8] : memref<72x256xf32, #tpu.memory_space<vmem>>, vector<16x256xf32>
    tpu.vector_store %arg8[%c0_7, %c0_8], %23 {strides = array<i32>} : memref<72x256xf32, #tpu.memory_space<vmem>>, vector<16x256xf32>,
    %c0_9 = arith.constant 0 : index
    %c0_10 = arith.constant 0 : index
    %25 = vector.load %arg5[%c0_9, %c0_10] : memref<512x640xbf16, #tpu.memory_space<vmem>>, vector<512x640xbf16>
    %c0_11 = arith.constant 0 : index
    %c0_12 = arith.constant 0 : index
    %26 = vector.load %arg7[%c0_11, %c0_12] : memref<1x640xf32, #tpu.memory_space<vmem>>, vector<1x640xf32>
    %27 = vector.shape_cast %26 : vector<1x640xf32> to vector<1x640xf32>
    %28 = vector.broadcast %27 : vector<1x640xf32> to vector<8x640xf32>
    %c0_i32 = arith.constant 0 : i32
    %c8_i32 = arith.constant 8 : i32
    %29 = arith.muli %c0_i32, %c8_i32 : i32
    %c0_i32_13 = arith.constant 0 : i32
    %30 = arith.addi %29, %c0_i32_13 : i32
    %31 = arith.index_cast %30 : i32 to index
    %32 = memref.load %arg1[%31] : memref<56xi32, #tpu.memory_space<smem>>
    %33 = arith.addi %29, %c0_i32_13 : i32
    %34 = arith.index_cast %33 : i32 to index
    %35 = memref.load %arg2[%34] : memref<56xi32, #tpu.memory_space<smem>>
    %36 = arith.index_cast %32 : i32 to index
    %c0_14 = arith.constant 0 : index
    %37 = vector.load %arg8[%36, %c0_14] : memref<72x256xf32, #tpu.memory_space<vmem>>, vector<1x256xf32>
    %38 = arith.index_cast %c0_i32_13 : i32 to index
    %c0_15 = arith.constant 0 : index
    %39 = vector.load %arg9[%38, %c0_15] : memref<8x512xf32, #tpu.memory_space<vmem>>, vector<1x256xf32>
    tpu.vector_store %arg9[%38, %c0_15], %37 {strides = array<i32>} : memref<8x512xf32, #tpu.memory_space<vmem>>, vector<1x256xf32>,
    %40 = arith.index_cast %35 : i32 to index
    %c0_16 = arith.constant 0 : index
    %41 = vector.load %arg8[%40, %c0_16] : memref<72x256xf32, #tpu.memory_space<vmem>>, vector<1x256xf32>
    %42 = arith.index_cast %c0_i32_13 : i32 to index
    %c256 = arith.constant 256 : index
    %43 = vector.load %arg9[%42, %c256] : memref<8x512xf32, #tpu.memory_space<vmem>>, vector<1x256xf32>
    tpu.vector_store %arg9[%42, %c256], %41 {strides = array<i32>} : memref<8x512xf32, #tpu.memory_space<vmem>>, vector<1x256xf32>,
    %c1_i32 = arith.constant 1 : i32
    %44 = arith.addi %29, %c1_i32 : i32
    %45 = arith.index_cast %44 : i32 to index
    %46 = memref.load %arg1[%45] : memref<56xi32, #tpu.memory_space<smem>>
    %47 = arith.addi %29, %c1_i32 : i32
    %48 = arith.index_cast %47 : i32 to index
    %49 = memref.load %arg2[%48] : memref<56xi32, #tpu.memory_space<smem>>
    %50 = arith.index_cast %46 : i32 to index
    %c0_17 = arith.constant 0 : index
    %51 = vector.load %arg8[%50, %c0_17] : memref<72x256xf32, #tpu.memory_space<vmem>>, vector<1x256xf32>
    %52 = arith.index_cast %c1_i32 : i32 to index
    %c0_18 = arith.constant 0 : index
    %53 = vector.load %arg9[%52, %c0_18] : memref<8x512xf32, #tpu.memory_space<vmem>>, vector<1x256xf32>
    tpu.vector_store %arg9[%52, %c0_18], %51 {strides = array<i32>} : memref<8x512xf32, #tpu.memory_space<vmem>>, vector<1x256xf32>,
    %54 = arith.index_cast %49 : i32 to index
    %c0_19 = arith.constant 0 : index
    %55 = vector.load %arg8[%54, %c0_19] : memref<72x256xf32, #tpu.memory_space<vmem>>, vector<1x256xf32>
    %56 = arith.index_cast %c1_i32 : i32 to index
    %c256_20 = arith.constant 256 : index
    %57 = vector.load %arg9[%56, %c256_20] : memref<8x512xf32, #tpu.memory_space<vmem>>, vector<1x256xf32>
    tpu.vector_store %arg9[%56, %c256_20], %55 {strides = array<i32>} : memref<8x512xf32, #tpu.memory_space<vmem>>, vector<1x256xf32>,
    %c2_i32 = arith.constant 2 : i32
    %58 = arith.addi %29, %c2_i32 : i32
    %59 = arith.index_cast %58 : i32 to index
    %60 = memref.load %arg1[%59] : memref<56xi32, #tpu.memory_space<smem>>
    %61 = arith.addi %29, %c2_i32 : i32
    %62 = arith.index_cast %61 : i32 to index
    %63 = memref.load %arg2[%62] : memref<56xi32, #tpu.memory_space<smem>>
    %64 = arith.index_cast %60 : i32 to index
    %c0_21 = arith.constant 0 : index
    %65 = vector.load %arg8[%64, %c0_21] : memref<72x256xf32, #tpu.memory_space<vmem>>, vector<1x256xf32>
    %66 = arith.index_cast %c2_i32 : i32 to index
    %c0_22 = arith.constant 0 : index
    %67 = vector.load %arg9[%66, %c0_22] : memref<8x512xf32, #tpu.memory_space<vmem>>, vector<1x256xf32>
    tpu.vector_store %arg9[%66, %c0_22], %65 {strides = array<i32>} : memref<8x512xf32, #tpu.memory_space<vmem>>, vector<1x256xf32>,
    %68 = arith.index_cast %63 : i32 to index
    %c0_23 = arith.constant 0 : index
    %69 = vector.load %arg8[%68, %c0_23] : memref<72x256xf32, #tpu.memory_space<vmem>>, vector<1x256xf32>
    %70 = arith.index_cast %c2_i32 : i32 to index
    %c256_24 = arith.constant 256 : index
    %71 = vector.load %arg9[%70, %c256_24] : memref<8x512xf32, #tpu.memory_space<vmem>>, vector<1x256xf32>
    tpu.vector_store %arg9[%70, %c256_24], %69 {strides = array<i32>} : memref<8x512xf32, #tpu.memory_space<vmem>>, vector<1x256xf32>,
    %c3_i32 = arith.constant 3 : i32
    %72 = arith.addi %29, %c3_i32 : i32
    %73 = arith.index_cast %72 : i32 to index
    %74 = memref.load %arg1[%73] : memref<56xi32, #tpu.memory_space<smem>>
    %75 = arith.addi %29, %c3_i32 : i32
    %76 = arith.index_cast %75 : i32 to index
    %77 = memref.load %arg2[%76] : memref<56xi32, #tpu.memory_space<smem>>
    %78 = arith.index_cast %74 : i32 to index
    %c0_25 = arith.constant 0 : index
    %79 = vector.load %arg8[%78, %c0_25] : memref<72x256xf32, #tpu.memory_space<vmem>>, vector<1x256xf32>
    %80 = arith.index_cast %c3_i32 : i32 to index
    %c0_26 = arith.constant 0 : index
    %81 = vector.load %arg9[%80, %c0_26] : memref<8x512xf32, #tpu.memory_space<vmem>>, vector<1x256xf32>
    tpu.vector_store %arg9[%80, %c0_26], %79 {strides = array<i32>} : memref<8x512xf32, #tpu.memory_space<vmem>>, vector<1x256xf32>,
    %82 = arith.index_cast %77 : i32 to index
    %c0_27 = arith.constant 0 : index
    %83 = vector.load %arg8[%82, %c0_27] : memref<72x256xf32, #tpu.memory_space<vmem>>, vector<1x256xf32>
    %84 = arith.index_cast %c3_i32 : i32 to index
    %c256_28 = arith.constant 256 : index
    %85 = vector.load %arg9[%84, %c256_28] : memref<8x512xf32, #tpu.memory_space<vmem>>, vector<1x256xf32>
    tpu.vector_store %arg9[%84, %c256_28], %83 {strides = array<i32>} : memref<8x512xf32, #tpu.memory_space<vmem>>, vector<1x256xf32>,
    %c4_i32 = arith.constant 4 : i32
    %86 = arith.addi %29, %c4_i32 : i32
    %87 = arith.index_cast %86 : i32 to index
    %88 = memref.load %arg1[%87] : memref<56xi32, #tpu.memory_space<smem>>
    %89 = arith.addi %29, %c4_i32 : i32
    %90 = arith.index_cast %89 : i32 to index
    %91 = memref.load %arg2[%90] : memref<56xi32, #tpu.memory_space<smem>>
    %92 = arith.index_cast %88 : i32 to index
    %c0_29 = arith.constant 0 : index
    %93 = vector.load %arg8[%92, %c0_29] : memref<72x256xf32, #tpu.memory_space<vmem>>, vector<1x256xf32>
    %94 = arith.index_cast %c4_i32 : i32 to index
    %c0_30 = arith.constant 0 : index
    %95 = vector.load %arg9[%94, %c0_30] : memref<8x512xf32, #tpu.memory_space<vmem>>, vector<1x256xf32>
    tpu.vector_store %arg9[%94, %c0_30], %93 {strides = array<i32>} : memref<8x512xf32, #tpu.memory_space<vmem>>, vector<1x256xf32>,
    %96 = arith.index_cast %91 : i32 to index
    %c0_31 = arith.constant 0 : index
    %97 = vector.load %arg8[%96, %c0_31] : memref<72x256xf32, #tpu.memory_space<vmem>>, vector<1x256xf32>
    %98 = arith.index_cast %c4_i32 : i32 to index
    %c256_32 = arith.constant 256 : index
    %99 = vector.load %arg9[%98, %c256_32] : memref<8x512xf32, #tpu.memory_space<vmem>>, vector<1x256xf32>
    tpu.vector_store %arg9[%98, %c256_32], %97 {strides = array<i32>} : memref<8x512xf32, #tpu.memory_space<vmem>>, vector<1x256xf32>,
    %c5_i32 = arith.constant 5 : i32
    %100 = arith.addi %29, %c5_i32 : i32
    %101 = arith.index_cast %100 : i32 to index
    %102 = memref.load %arg1[%101] : memref<56xi32, #tpu.memory_space<smem>>
    %103 = arith.addi %29, %c5_i32 : i32
    %104 = arith.index_cast %103 : i32 to index
    %105 = memref.load %arg2[%104] : memref<56xi32, #tpu.memory_space<smem>>
    %106 = arith.index_cast %102 : i32 to index
    %c0_33 = arith.constant 0 : index
    %107 = vector.load %arg8[%106, %c0_33] : memref<72x256xf32, #tpu.memory_space<vmem>>, vector<1x256xf32>
    %108 = arith.index_cast %c5_i32 : i32 to index
    %c0_34 = arith.constant 0 : index
    %109 = vector.load %arg9[%108, %c0_34] : memref<8x512xf32, #tpu.memory_space<vmem>>, vector<1x256xf32>
    tpu.vector_store %arg9[%108, %c0_34], %107 {strides = array<i32>} : memref<8x512xf32, #tpu.memory_space<vmem>>, vector<1x256xf32>,
    %110 = arith.index_cast %105 : i32 to index
    %c0_35 = arith.constant 0 : index
    %111 = vector.load %arg8[%110, %c0_35] : memref<72x256xf32, #tpu.memory_space<vmem>>, vector<1x256xf32>
    %112 = arith.index_cast %c5_i32 : i32 to index
    %c256_36 = arith.constant 256 : index
    %113 = vector.load %arg9[%112, %c256_36] : memref<8x512xf32, #tpu.memory_space<vmem>>, vector<1x256xf32>
    tpu.vector_store %arg9[%112, %c256_36], %111 {strides = array<i32>} : memref<8x512xf32, #tpu.memory_space<vmem>>, vector<1x256xf32>,
    %c6_i32 = arith.constant 6 : i32
    %114 = arith.addi %29, %c6_i32 : i32
    %115 = arith.index_cast %114 : i32 to index
    %116 = memref.load %arg1[%115] : memref<56xi32, #tpu.memory_space<smem>>
    %117 = arith.addi %29, %c6_i32 : i32
    %118 = arith.index_cast %117 : i32 to index
    %119 = memref.load %arg2[%118] : memref<56xi32, #tpu.memory_space<smem>>
    %120 = arith.index_cast %116 : i32 to index
    %c0_37 = arith.constant 0 : index
    %121 = vector.load %arg8[%120, %c0_37] : memref<72x256xf32, #tpu.memory_space<vmem>>, vector<1x256xf32>
    %122 = arith.index_cast %c6_i32 : i32 to index
    %c0_38 = arith.constant 0 : index
    %123 = vector.load %arg9[%122, %c0_38] : memref<8x512xf32, #tpu.memory_space<vmem>>, vector<1x256xf32>
    tpu.vector_store %arg9[%122, %c0_38], %121 {strides = array<i32>} : memref<8x512xf32, #tpu.memory_space<vmem>>, vector<1x256xf32>,
    %124 = arith.index_cast %119 : i32 to index
    %c0_39 = arith.constant 0 : index
    %125 = vector.load %arg8[%124, %c0_39] : memref<72x256xf32, #tpu.memory_space<vmem>>, vector<1x256xf32>
    %126 = arith.index_cast %c6_i32 : i32 to index
    %c256_40 = arith.constant 256 : index
    %127 = vector.load %arg9[%126, %c256_40] : memref<8x512xf32, #tpu.memory_space<vmem>>, vector<1x256xf32>
    tpu.vector_store %arg9[%126, %c256_40], %125 {strides = array<i32>} : memref<8x512xf32, #tpu.memory_space<vmem>>, vector<1x256xf32>,
    %c7_i32 = arith.constant 7 : i32
    %128 = arith.addi %29, %c7_i32 : i32
    %129 = arith.index_cast %128 : i32 to index
    %130 = memref.load %arg1[%129] : memref<56xi32, #tpu.memory_space<smem>>
    %131 = arith.addi %29, %c7_i32 : i32
    %132 = arith.index_cast %131 : i32 to index
    %133 = memref.load %arg2[%132] : memref<56xi32, #tpu.memory_space<smem>>
    %134 = arith.index_cast %130 : i32 to index
    %c0_41 = arith.constant 0 : index
    %135 = vector.load %arg8[%134, %c0_41] : memref<72x256xf32, #tpu.memory_space<vmem>>, vector<1x256xf32>
    %136 = arith.index_cast %c7_i32 : i32 to index
    %c0_42 = arith.constant 0 : index
    %137 = vector.load %arg9[%136, %c0_42] : memref<8x512xf32, #tpu.memory_space<vmem>>, vector<1x256xf32>
    tpu.vector_store %arg9[%136, %c0_42], %135 {strides = array<i32>} : memref<8x512xf32, #tpu.memory_space<vmem>>, vector<1x256xf32>,
    %138 = arith.index_cast %133 : i32 to index
    %c0_43 = arith.constant 0 : index
    %139 = vector.load %arg8[%138, %c0_43] : memref<72x256xf32, #tpu.memory_space<vmem>>, vector<1x256xf32>
    %140 = arith.index_cast %c7_i32 : i32 to index
    %c256_44 = arith.constant 256 : index
    %141 = vector.load %arg9[%140, %c256_44] : memref<8x512xf32, #tpu.memory_space<vmem>>, vector<1x256xf32>
    tpu.vector_store %arg9[%140, %c256_44], %139 {strides = array<i32>} : memref<8x512xf32, #tpu.memory_space<vmem>>, vector<1x256xf32>,
    %c8_i32_45 = arith.constant 8 : i32
    %c0_46 = arith.constant 0 : index
    %c0_47 = arith.constant 0 : index
    %142 = vector.load %arg9[%c0_46, %c0_47] : memref<8x512xf32, #tpu.memory_space<vmem>>, vector<8x512xf32>
    %143 = arith.truncf %142 : vector<8x512xf32> to vector<8x512xbf16>
    %cst_48 = arith.constant dense<0.000000e+00> : vector<8x640xf32>
    %144 = tpu.matmul %143, %25, %cst_48 {dimension_numbers = #tpu.dot_dimension_numbers<[1], [0], [0], [1], [0, 0, 1, 1], [], []>} : vector<8x512xbf16>, vector<512x640xbf16>, vector<8x640xf32> -> vector<8x640xf32>
    %145 = arith.addf %144, %28 : vector<8x640xf32>
    %146 = vector.extract_strided_slice %145 {offsets = [0, 0], sizes = [8, 128], strides = [1, 1]} : vector<8x640xf32> to vector<8x128xf32>
    %147 = arith.negf %146 : vector<8x128xf32>
    %148 = math.exp %147 : vector<8x128xf32>
    %cst_49 = arith.constant 1.000000e+00 : f32
    %149 = vector.broadcast %cst_49 : f32 to vector<8x128xf32>
    %150 = arith.addf %149, %148 : vector<8x128xf32>
    %151 = arith.divf %149, %150 : vector<8x128xf32>
    %152 = vector.extract_strided_slice %145 {offsets = [0, 128], sizes = [8, 128], strides = [1, 1]} : vector<8x640xf32> to vector<8x128xf32>
    %153 = arith.negf %152 : vector<8x128xf32>
    %154 = math.exp %153 : vector<8x128xf32>
    %cst_50 = arith.constant 1.000000e+00 : f32
    %155 = vector.broadcast %cst_50 : f32 to vector<8x128xf32>
    %156 = arith.addf %155, %154 : vector<8x128xf32>
    %157 = arith.divf %155, %156 : vector<8x128xf32>
    %158 = vector.extract_strided_slice %145 {offsets = [0, 256], sizes = [8, 128], strides = [1, 1]} : vector<8x640xf32> to vector<8x128xf32>
    %159 = arith.negf %158 : vector<8x128xf32>
    %160 = math.exp %159 : vector<8x128xf32>
    %cst_51 = arith.constant 1.000000e+00 : f32
    %161 = vector.broadcast %cst_51 : f32 to vector<8x128xf32>
    %162 = arith.addf %161, %160 : vector<8x128xf32>
    %163 = arith.divf %161, %162 : vector<8x128xf32>
    %164 = vector.extract_strided_slice %145 {offsets = [0, 384], sizes = [8, 128], strides = [1, 1]} : vector<8x640xf32> to vector<8x128xf32>
    %165 = arith.negf %164 : vector<8x128xf32>
    %166 = math.exp %165 : vector<8x128xf32>
    %cst_52 = arith.constant 1.000000e+00 : f32
    %167 = vector.broadcast %cst_52 : f32 to vector<8x128xf32>
    %168 = arith.addf %167, %166 : vector<8x128xf32>
    %169 = arith.divf %167, %168 : vector<8x128xf32>
    %170 = vector.extract_strided_slice %145 {offsets = [0, 512], sizes = [8, 128], strides = [1, 1]} : vector<8x640xf32> to vector<8x128xf32>
    %171 = math.tanh %170 : vector<8x128xf32>
    %172 = arith.mulf %151, %171 : vector<8x128xf32>
    %173 = vector.extract_strided_slice %142 {offsets = [0, 128], sizes = [8, 128], strides = [1, 1]} : vector<8x512xf32> to vector<8x128xf32>
    %174 = arith.mulf %157, %173 : vector<8x128xf32>
    %175 = arith.addf %172, %174 : vector<8x128xf32>
    %176 = vector.extract_strided_slice %142 {offsets = [0, 384], sizes = [8, 128], strides = [1, 1]} : vector<8x512xf32> to vector<8x128xf32>
    %177 = arith.mulf %163, %176 : vector<8x128xf32>
    %178 = arith.addf %175, %177 : vector<8x128xf32>
    %179 = math.tanh %178 : vector<8x128xf32>
    %180 = arith.mulf %169, %179 : vector<8x128xf32>
    %c8_i32_53 = arith.constant 8 : i32
    %181 = arith.muli %c0_i32, %c8_i32_53 : i32
    %c16_i32 = arith.constant 16 : i32
    %182 = arith.addi %c16_i32, %181 : i32
    %183 = tpu.assume_multiple %182, 8 : i32
    %184 = tpu.concatenate %180, %178 in 1 : vector<8x128xf32>, vector<8x128xf32> -> vector<8x256xf32>
    %185 = arith.index_cast %183 : i32 to index
    %c0_54 = arith.constant 0 : index
    %186 = vector.load %arg8[%185, %c0_54] : memref<72x256xf32, #tpu.memory_space<vmem>>, vector<8x256xf32>
    tpu.vector_store %arg8[%185, %c0_54], %184 {strides = array<i32>} : memref<72x256xf32, #tpu.memory_space<vmem>>, vector<8x256xf32>,
    %c1_i32_55 = arith.constant 1 : i32
    %c8_i32_56 = arith.constant 8 : i32
    %187 = arith.muli %c1_i32_55, %c8_i32_56 : i32
    %c0_i32_57 = arith.constant 0 : i32
    %188 = arith.addi %187, %c0_i32_57 : i32
    %189 = arith.index_cast %188 : i32 to index
    %190 = memref.load %arg1[%189] : memref<56xi32, #tpu.memory_space<smem>>
    %191 = arith.addi %187, %c0_i32_57 : i32
    %192 = arith.index_cast %191 : i32 to index
    %193 = memref.load %arg2[%192] : memref<56xi32, #tpu.memory_space<smem>>
    %194 = arith.index_cast %190 : i32 to index
    %c0_58 = arith.constant 0 : index
    %195 = vector.load %arg8[%194, %c0_58] : memref<72x256xf32, #tpu.memory_space<vmem>>, vector<1x256xf32>
    %196 = arith.index_cast %c0_i32_57 : i32 to index
    %c0_59 = arith.constant 0 : index
    %197 = vector.load %arg9[%196, %c0_59] : memref<8x512xf32, #tpu.memory_space<vmem>>, vector<1x256xf32>
    tpu.vector_store %arg9[%196, %c0_59], %195 {strides = array<i32>} : memref<8x512xf32, #tpu.memory_space<vmem>>, vector<1x256xf32>,
    %198 = arith.index_cast %193 : i32 to index
    %c0_60 = arith.constant 0 : index
    %199 = vector.load %arg8[%198, %c0_60] : memref<72x256xf32, #tpu.memory_space<vmem>>, vector<1x256xf32>
    %200 = arith.index_cast %c0_i32_57 : i32 to index
    %c256_61 = arith.constant 256 : index
    %201 = vector.load %arg9[%200, %c256_61] : memref<8x512xf32, #tpu.memory_space<vmem>>, vector<1x256xf32>
    tpu.vector_store %arg9[%200, %c256_61], %199 {strides = array<i32>} : memref<8x512xf32, #tpu.memory_space<vmem>>, vector<1x256xf32>,
    %c1_i32_62 = arith.constant 1 : i32
    %202 = arith.addi %187, %c1_i32_62 : i32
    %203 = arith.index_cast %202 : i32 to index
    %204 = memref.load %arg1[%203] : memref<56xi32, #tpu.memory_space<smem>>
    %205 = arith.addi %187, %c1_i32_62 : i32
    %206 = arith.index_cast %205 : i32 to index
    %207 = memref.load %arg2[%206] : memref<56xi32, #tpu.memory_space<smem>>
    %208 = arith.index_cast %204 : i32 to index
    %c0_63 = arith.constant 0 : index
    %209 = vector.load %arg8[%208, %c0_63] : memref<72x256xf32, #tpu.memory_space<vmem>>, vector<1x256xf32>
    %210 = arith.index_cast %c1_i32_62 : i32 to index
    %c0_64 = arith.constant 0 : index
    %211 = vector.load %arg9[%210, %c0_64] : memref<8x512xf32, #tpu.memory_space<vmem>>, vector<1x256xf32>
    tpu.vector_store %arg9[%210, %c0_64], %209 {strides = array<i32>} : memref<8x512xf32, #tpu.memory_space<vmem>>, vector<1x256xf32>,
    %212 = arith.index_cast %207 : i32 to index
    %c0_65 = arith.constant 0 : index
    %213 = vector.load %arg8[%212, %c0_65] : memref<72x256xf32, #tpu.memory_space<vmem>>, vector<1x256xf32>
    %214 = arith.index_cast %c1_i32_62 : i32 to index
    %c256_66 = arith.constant 256 : index
    %215 = vector.load %arg9[%214, %c256_66] : memref<8x512xf32, #tpu.memory_space<vmem>>, vector<1x256xf32>
    tpu.vector_store %arg9[%214, %c256_66], %213 {strides = array<i32>} : memref<8x512xf32, #tpu.memory_space<vmem>>, vector<1x256xf32>,
    %c2_i32_67 = arith.constant 2 : i32
    %216 = arith.addi %187, %c2_i32_67 : i32
    %217 = arith.index_cast %216 : i32 to index
    %218 = memref.load %arg1[%217] : memref<56xi32, #tpu.memory_space<smem>>
    %219 = arith.addi %187, %c2_i32_67 : i32
    %220 = arith.index_cast %219 : i32 to index
    %221 = memref.load %arg2[%220] : memref<56xi32, #tpu.memory_space<smem>>
    %222 = arith.index_cast %218 : i32 to index
    %c0_68 = arith.constant 0 : index
    %223 = vector.load %arg8[%222, %c0_68] : memref<72x256xf32, #tpu.memory_space<vmem>>, vector<1x256xf32>
    %224 = arith.index_cast %c2_i32_67 : i32 to index
    %c0_69 = arith.constant 0 : index
    %225 = vector.load %arg9[%224, %c0_69] : memref<8x512xf32, #tpu.memory_space<vmem>>, vector<1x256xf32>
    tpu.vector_store %arg9[%224, %c0_69], %223 {strides = array<i32>} : memref<8x512xf32, #tpu.memory_space<vmem>>, vector<1x256xf32>,
    %226 = arith.index_cast %221 : i32 to index
    %c0_70 = arith.constant 0 : index
    %227 = vector.load %arg8[%226, %c0_70] : memref<72x256xf32, #tpu.memory_space<vmem>>, vector<1x256xf32>
    %228 = arith.index_cast %c2_i32_67 : i32 to index
    %c256_71 = arith.constant 256 : index
    %229 = vector.load %arg9[%228, %c256_71] : memref<8x512xf32, #tpu.memory_space<vmem>>, vector<1x256xf32>
    tpu.vector_store %arg9[%228, %c256_71], %227 {strides = array<i32>} : memref<8x512xf32, #tpu.memory_space<vmem>>, vector<1x256xf32>,
    %c3_i32_72 = arith.constant 3 : i32
    %230 = arith.addi %187, %c3_i32_72 : i32
    %231 = arith.index_cast %230 : i32 to index
    %232 = memref.load %arg1[%231] : memref<56xi32, #tpu.memory_space<smem>>
    %233 = arith.addi %187, %c3_i32_72 : i32
    %234 = arith.index_cast %233 : i32 to index
    %235 = memref.load %arg2[%234] : memref<56xi32, #tpu.memory_space<smem>>
    %236 = arith.index_cast %232 : i32 to index
    %c0_73 = arith.constant 0 : index
    %237 = vector.load %arg8[%236, %c0_73] : memref<72x256xf32, #tpu.memory_space<vmem>>, vector<1x256xf32>
    %238 = arith.index_cast %c3_i32_72 : i32 to index
    %c0_74 = arith.constant 0 : index
    %239 = vector.load %arg9[%238, %c0_74] : memref<8x512xf32, #tpu.memory_space<vmem>>, vector<1x256xf32>
    tpu.vector_store %arg9[%238, %c0_74], %237 {strides = array<i32>} : memref<8x512xf32, #tpu.memory_space<vmem>>, vector<1x256xf32>,
    %240 = arith.index_cast %235 : i32 to index
    %c0_75 = arith.constant 0 : index
    %241 = vector.load %arg8[%240, %c0_75] : memref<72x256xf32, #tpu.memory_space<vmem>>, vector<1x256xf32>
    %242 = arith.index_cast %c3_i32_72 : i32 to index
    %c256_76 = arith.constant 256 : index
    %243 = vector.load %arg9[%242, %c256_76] : memref<8x512xf32, #tpu.memory_space<vmem>>, vector<1x256xf32>
    tpu.vector_store %arg9[%242, %c256_76], %241 {strides = array<i32>} : memref<8x512xf32, #tpu.memory_space<vmem>>, vector<1x256xf32>,
    %c4_i32_77 = arith.constant 4 : i32
    %244 = arith.addi %187, %c4_i32_77 : i32
    %245 = arith.index_cast %244 : i32 to index
    %246 = memref.load %arg1[%245] : memref<56xi32, #tpu.memory_space<smem>>
    %247 = arith.addi %187, %c4_i32_77 : i32
    %248 = arith.index_cast %247 : i32 to index
    %249 = memref.load %arg2[%248] : memref<56xi32, #tpu.memory_space<smem>>
    %250 = arith.index_cast %246 : i32 to index
    %c0_78 = arith.constant 0 : index
    %251 = vector.load %arg8[%250, %c0_78] : memref<72x256xf32, #tpu.memory_space<vmem>>, vector<1x256xf32>
    %252 = arith.index_cast %c4_i32_77 : i32 to index
    %c0_79 = arith.constant 0 : index
    %253 = vector.load %arg9[%252, %c0_79] : memref<8x512xf32, #tpu.memory_space<vmem>>, vector<1x256xf32>
    tpu.vector_store %arg9[%252, %c0_79], %251 {strides = array<i32>} : memref<8x512xf32, #tpu.memory_space<vmem>>, vector<1x256xf32>,
    %254 = arith.index_cast %249 : i32 to index
    %c0_80 = arith.constant 0 : index
    %255 = vector.load %arg8[%254, %c0_80] : memref<72x256xf32, #tpu.memory_space<vmem>>, vector<1x256xf32>
    %256 = arith.index_cast %c4_i32_77 : i32 to index
    %c256_81 = arith.constant 256 : index
    %257 = vector.load %arg9[%256, %c256_81] : memref<8x512xf32, #tpu.memory_space<vmem>>, vector<1x256xf32>
    tpu.vector_store %arg9[%256, %c256_81], %255 {strides = array<i32>} : memref<8x512xf32, #tpu.memory_space<vmem>>, vector<1x256xf32>,
    %c5_i32_82 = arith.constant 5 : i32
    %258 = arith.addi %187, %c5_i32_82 : i32
    %259 = arith.index_cast %258 : i32 to index
    %260 = memref.load %arg1[%259] : memref<56xi32, #tpu.memory_space<smem>>
    %261 = arith.addi %187, %c5_i32_82 : i32
    %262 = arith.index_cast %261 : i32 to index
    %263 = memref.load %arg2[%262] : memref<56xi32, #tpu.memory_space<smem>>
    %264 = arith.index_cast %260 : i32 to index
    %c0_83 = arith.constant 0 : index
    %265 = vector.load %arg8[%264, %c0_83] : memref<72x256xf32, #tpu.memory_space<vmem>>, vector<1x256xf32>
    %266 = arith.index_cast %c5_i32_82 : i32 to index
    %c0_84 = arith.constant 0 : index
    %267 = vector.load %arg9[%266, %c0_84] : memref<8x512xf32, #tpu.memory_space<vmem>>, vector<1x256xf32>
    tpu.vector_store %arg9[%266, %c0_84], %265 {strides = array<i32>} : memref<8x512xf32, #tpu.memory_space<vmem>>, vector<1x256xf32>,
    %268 = arith.index_cast %263 : i32 to index
    %c0_85 = arith.constant 0 : index
    %269 = vector.load %arg8[%268, %c0_85] : memref<72x256xf32, #tpu.memory_space<vmem>>, vector<1x256xf32>
    %270 = arith.index_cast %c5_i32_82 : i32 to index
    %c256_86 = arith.constant 256 : index
    %271 = vector.load %arg9[%270, %c256_86] : memref<8x512xf32, #tpu.memory_space<vmem>>, vector<1x256xf32>
    tpu.vector_store %arg9[%270, %c256_86], %269 {strides = array<i32>} : memref<8x512xf32, #tpu.memory_space<vmem>>, vector<1x256xf32>,
    %c6_i32_87 = arith.constant 6 : i32
    %272 = arith.addi %187, %c6_i32_87 : i32
    %273 = arith.index_cast %272 : i32 to index
    %274 = memref.load %arg1[%273] : memref<56xi32, #tpu.memory_space<smem>>
    %275 = arith.addi %187, %c6_i32_87 : i32
    %276 = arith.index_cast %275 : i32 to index
    %277 = memref.load %arg2[%276] : memref<56xi32, #tpu.memory_space<smem>>
    %278 = arith.index_cast %274 : i32 to index
    %c0_88 = arith.constant 0 : index
    %279 = vector.load %arg8[%278, %c0_88] : memref<72x256xf32, #tpu.memory_space<vmem>>, vector<1x256xf32>
    %280 = arith.index_cast %c6_i32_87 : i32 to index
    %c0_89 = arith.constant 0 : index
    %281 = vector.load %arg9[%280, %c0_89] : memref<8x512xf32, #tpu.memory_space<vmem>>, vector<1x256xf32>
    tpu.vector_store %arg9[%280, %c0_89], %279 {strides = array<i32>} : memref<8x512xf32, #tpu.memory_space<vmem>>, vector<1x256xf32>,
    %282 = arith.index_cast %277 : i32 to index
    %c0_90 = arith.constant 0 : index
    %283 = vector.load %arg8[%282, %c0_90] : memref<72x256xf32, #tpu.memory_space<vmem>>, vector<1x256xf32>
    %284 = arith.index_cast %c6_i32_87 : i32 to index
    %c256_91 = arith.constant 256 : index
    %285 = vector.load %arg9[%284, %c256_91] : memref<8x512xf32, #tpu.memory_space<vmem>>, vector<1x256xf32>
    tpu.vector_store %arg9[%284, %c256_91], %283 {strides = array<i32>} : memref<8x512xf32, #tpu.memory_space<vmem>>, vector<1x256xf32>,
    %c7_i32_92 = arith.constant 7 : i32
    %286 = arith.addi %187, %c7_i32_92 : i32
    %287 = arith.index_cast %286 : i32 to index
    %288 = memref.load %arg1[%287] : memref<56xi32, #tpu.memory_space<smem>>
    %289 = arith.addi %187, %c7_i32_92 : i32
    %290 = arith.index_cast %289 : i32 to index
    %291 = memref.load %arg2[%290] : memref<56xi32, #tpu.memory_space<smem>>
    %292 = arith.index_cast %288 : i32 to index
    %c0_93 = arith.constant 0 : index
    %293 = vector.load %arg8[%292, %c0_93] : memref<72x256xf32, #tpu.memory_space<vmem>>, vector<1x256xf32>
    %294 = arith.index_cast %c7_i32_92 : i32 to index
    %c0_94 = arith.constant 0 : index
    %295 = vector.load %arg9[%294, %c0_94] : memref<8x512xf32, #tpu.memory_space<vmem>>, vector<1x256xf32>
    tpu.vector_store %arg9[%294, %c0_94], %293 {strides = array<i32>} : memref<8x512xf32, #tpu.memory_space<vmem>>, vector<1x256xf32>,
    %296 = arith.index_cast %291 : i32 to index
    %c0_95 = arith.constant 0 : index
    %297 = vector.load %arg8[%296, %c0_95] : memref<72x256xf32, #tpu.memory_space<vmem>>, vector<1x256xf32>
    %298 = arith.index_cast %c7_i32_92 : i32 to index
    %c256_96 = arith.constant 256 : index
    %299 = vector.load %arg9[%298, %c256_96] : memref<8x512xf32, #tpu.memory_space<vmem>>, vector<1x256xf32>
    tpu.vector_store %arg9[%298, %c256_96], %297 {strides = array<i32>} : memref<8x512xf32, #tpu.memory_space<vmem>>, vector<1x256xf32>,
    %c8_i32_97 = arith.constant 8 : i32
    %c0_98 = arith.constant 0 : index
    %c0_99 = arith.constant 0 : index
    %300 = vector.load %arg9[%c0_98, %c0_99] : memref<8x512xf32, #tpu.memory_space<vmem>>, vector<8x512xf32>
    %301 = arith.truncf %300 : vector<8x512xf32> to vector<8x512xbf16>
    %cst_100 = arith.constant dense<0.000000e+00> : vector<8x640xf32>
    %302 = tpu.matmul %301, %25, %cst_100 {dimension_numbers = #tpu.dot_dimension_numbers<[1], [0], [0], [1], [0, 0, 1, 1], [], []>} : vector<8x512xbf16>, vector<512x640xbf16>, vector<8x640xf32> -> vector<8x640xf32>
    %303 = arith.addf %302, %28 : vector<8x640xf32>
    %304 = vector.extract_strided_slice %303 {offsets = [0, 0], sizes = [8, 128], strides = [1, 1]} : vector<8x640xf32> to vector<8x128xf32>
    %305 = arith.negf %304 : vector<8x128xf32>
    %306 = math.exp %305 : vector<8x128xf32>
    %cst_101 = arith.constant 1.000000e+00 : f32
    %307 = vector.broadcast %cst_101 : f32 to vector<8x128xf32>
    %308 = arith.addf %307, %306 : vector<8x128xf32>
    %309 = arith.divf %307, %308 : vector<8x128xf32>
    %310 = vector.extract_strided_slice %303 {offsets = [0, 128], sizes = [8, 128], strides = [1, 1]} : vector<8x640xf32> to vector<8x128xf32>
    %311 = arith.negf %310 : vector<8x128xf32>
    %312 = math.exp %311 : vector<8x128xf32>
    %cst_102 = arith.constant 1.000000e+00 : f32
    %313 = vector.broadcast %cst_102 : f32 to vector<8x128xf32>
    %314 = arith.addf %313, %312 : vector<8x128xf32>
    %315 = arith.divf %313, %314 : vector<8x128xf32>
    %316 = vector.extract_strided_slice %303 {offsets = [0, 256], sizes = [8, 128], strides = [1, 1]} : vector<8x640xf32> to vector<8x128xf32>
    %317 = arith.negf %316 : vector<8x128xf32>
    %318 = math.exp %317 : vector<8x128xf32>
    %cst_103 = arith.constant 1.000000e+00 : f32
    %319 = vector.broadcast %cst_103 : f32 to vector<8x128xf32>
    %320 = arith.addf %319, %318 : vector<8x128xf32>
    %321 = arith.divf %319, %320 : vector<8x128xf32>
    %322 = vector.extract_strided_slice %303 {offsets = [0, 384], sizes = [8, 128], strides = [1, 1]} : vector<8x640xf32> to vector<8x128xf32>
    %323 = arith.negf %322 : vector<8x128xf32>
    %324 = math.exp %323 : vector<8x128xf32>
    %cst_104 = arith.constant 1.000000e+00 : f32
    %325 = vector.broadcast %cst_104 : f32 to vector<8x128xf32>
    %326 = arith.addf %325, %324 : vector<8x128xf32>
    %327 = arith.divf %325, %326 : vector<8x128xf32>
    %328 = vector.extract_strided_slice %303 {offsets = [0, 512], sizes = [8, 128], strides = [1, 1]} : vector<8x640xf32> to vector<8x128xf32>
    %329 = math.tanh %328 : vector<8x128xf32>
    %330 = arith.mulf %309, %329 : vector<8x128xf32>
    %331 = vector.extract_strided_slice %300 {offsets = [0, 128], sizes = [8, 128], strides = [1, 1]} : vector<8x512xf32> to vector<8x128xf32>
    %332 = arith.mulf %315, %331 : vector<8x128xf32>
    %333 = arith.addf %330, %332 : vector<8x128xf32>
    %334 = vector.extract_strided_slice %300 {offsets = [0, 384], sizes = [8, 128], strides = [1, 1]} : vector<8x512xf32> to vector<8x128xf32>
    %335 = arith.mulf %321, %334 : vector<8x128xf32>
    %336 = arith.addf %333, %335 : vector<8x128xf32>
    %337 = math.tanh %336 : vector<8x128xf32>
    %338 = arith.mulf %327, %337 : vector<8x128xf32>
    %c8_i32_105 = arith.constant 8 : i32
    %339 = arith.muli %c1_i32_55, %c8_i32_105 : i32
    %c16_i32_106 = arith.constant 16 : i32
    %340 = arith.addi %c16_i32_106, %339 : i32
    %341 = tpu.assume_multiple %340, 8 : i32
    %342 = tpu.concatenate %338, %336 in 1 : vector<8x128xf32>, vector<8x128xf32> -> vector<8x256xf32>
    %343 = arith.index_cast %341 : i32 to index
    %c0_107 = arith.constant 0 : index
    %344 = vector.load %arg8[%343, %c0_107] : memref<72x256xf32, #tpu.memory_space<vmem>>, vector<8x256xf32>
    tpu.vector_store %arg8[%343, %c0_107], %342 {strides = array<i32>} : memref<72x256xf32, #tpu.memory_space<vmem>>, vector<8x256xf32>,
    %c2_i32_108 = arith.constant 2 : i32
    %c8_i32_109 = arith.constant 8 : i32
    %345 = arith.muli %c2_i32_108, %c8_i32_109 : i32
    %c0_i32_110 = arith.constant 0 : i32
    %346 = arith.addi %345, %c0_i32_110 : i32
    %347 = arith.index_cast %346 : i32 to index
    %348 = memref.load %arg1[%347] : memref<56xi32, #tpu.memory_space<smem>>
    %349 = arith.addi %345, %c0_i32_110 : i32
    %350 = arith.index_cast %349 : i32 to index
    %351 = memref.load %arg2[%350] : memref<56xi32, #tpu.memory_space<smem>>
    %352 = arith.index_cast %348 : i32 to index
    %c0_111 = arith.constant 0 : index
    %353 = vector.load %arg8[%352, %c0_111] : memref<72x256xf32, #tpu.memory_space<vmem>>, vector<1x256xf32>
    %354 = arith.index_cast %c0_i32_110 : i32 to index
    %c0_112 = arith.constant 0 : index
    %355 = vector.load %arg9[%354, %c0_112] : memref<8x512xf32, #tpu.memory_space<vmem>>, vector<1x256xf32>
    tpu.vector_store %arg9[%354, %c0_112], %353 {strides = array<i32>} : memref<8x512xf32, #tpu.memory_space<vmem>>, vector<1x256xf32>,
    %356 = arith.index_cast %351 : i32 to index
    %c0_113 = arith.constant 0 : index
    %357 = vector.load %arg8[%356, %c0_113] : memref<72x256xf32, #tpu.memory_space<vmem>>, vector<1x256xf32>
    %358 = arith.index_cast %c0_i32_110 : i32 to index
    %c256_114 = arith.constant 256 : index
    %359 = vector.load %arg9[%358, %c256_114] : memref<8x512xf32, #tpu.memory_space<vmem>>, vector<1x256xf32>
    tpu.vector_store %arg9[%358, %c256_114], %357 {strides = array<i32>} : memref<8x512xf32, #tpu.memory_space<vmem>>, vector<1x256xf32>,
    %c1_i32_115 = arith.constant 1 : i32
    %360 = arith.addi %345, %c1_i32_115 : i32
    %361 = arith.index_cast %360 : i32 to index
    %362 = memref.load %arg1[%361] : memref<56xi32, #tpu.memory_space<smem>>
    %363 = arith.addi %345, %c1_i32_115 : i32
    %364 = arith.index_cast %363 : i32 to index
    %365 = memref.load %arg2[%364] : memref<56xi32, #tpu.memory_space<smem>>
    %366 = arith.index_cast %362 : i32 to index
    %c0_116 = arith.constant 0 : index
    %367 = vector.load %arg8[%366, %c0_116] : memref<72x256xf32, #tpu.memory_space<vmem>>, vector<1x256xf32>
    %368 = arith.index_cast %c1_i32_115 : i32 to index
    %c0_117 = arith.constant 0 : index
    %369 = vector.load %arg9[%368, %c0_117] : memref<8x512xf32, #tpu.memory_space<vmem>>, vector<1x256xf32>
    tpu.vector_store %arg9[%368, %c0_117], %367 {strides = array<i32>} : memref<8x512xf32, #tpu.memory_space<vmem>>, vector<1x256xf32>,
    %370 = arith.index_cast %365 : i32 to index
    %c0_118 = arith.constant 0 : index
    %371 = vector.load %arg8[%370, %c0_118] : memref<72x256xf32, #tpu.memory_space<vmem>>, vector<1x256xf32>
    %372 = arith.index_cast %c1_i32_115 : i32 to index
    %c256_119 = arith.constant 256 : index
    %373 = vector.load %arg9[%372, %c256_119] : memref<8x512xf32, #tpu.memory_space<vmem>>, vector<1x256xf32>
    tpu.vector_store %arg9[%372, %c256_119], %371 {strides = array<i32>} : memref<8x512xf32, #tpu.memory_space<vmem>>, vector<1x256xf32>,
    %c2_i32_120 = arith.constant 2 : i32
    %374 = arith.addi %345, %c2_i32_120 : i32
    %375 = arith.index_cast %374 : i32 to index
    %376 = memref.load %arg1[%375] : memref<56xi32, #tpu.memory_space<smem>>
    %377 = arith.addi %345, %c2_i32_120 : i32
    %378 = arith.index_cast %377 : i32 to index
    %379 = memref.load %arg2[%378] : memref<56xi32, #tpu.memory_space<smem>>
    %380 = arith.index_cast %376 : i32 to index
    %c0_121 = arith.constant 0 : index
    %381 = vector.load %arg8[%380, %c0_121] : memref<72x256xf32, #tpu.memory_space<vmem>>, vector<1x256xf32>
    %382 = arith.index_cast %c2_i32_120 : i32 to index
    %c0_122 = arith.constant 0 : index
    %383 = vector.load %arg9[%382, %c0_122] : memref<8x512xf32, #tpu.memory_space<vmem>>, vector<1x256xf32>
    tpu.vector_store %arg9[%382, %c0_122], %381 {strides = array<i32>} : memref<8x512xf32, #tpu.memory_space<vmem>>, vector<1x256xf32>,
    %384 = arith.index_cast %379 : i32 to index
    %c0_123 = arith.constant 0 : index
    %385 = vector.load %arg8[%384, %c0_123] : memref<72x256xf32, #tpu.memory_space<vmem>>, vector<1x256xf32>
    %386 = arith.index_cast %c2_i32_120 : i32 to index
    %c256_124 = arith.constant 256 : index
    %387 = vector.load %arg9[%386, %c256_124] : memref<8x512xf32, #tpu.memory_space<vmem>>, vector<1x256xf32>
    tpu.vector_store %arg9[%386, %c256_124], %385 {strides = array<i32>} : memref<8x512xf32, #tpu.memory_space<vmem>>, vector<1x256xf32>,
    %c3_i32_125 = arith.constant 3 : i32
    %388 = arith.addi %345, %c3_i32_125 : i32
    %389 = arith.index_cast %388 : i32 to index
    %390 = memref.load %arg1[%389] : memref<56xi32, #tpu.memory_space<smem>>
    %391 = arith.addi %345, %c3_i32_125 : i32
    %392 = arith.index_cast %391 : i32 to index
    %393 = memref.load %arg2[%392] : memref<56xi32, #tpu.memory_space<smem>>
    %394 = arith.index_cast %390 : i32 to index
    %c0_126 = arith.constant 0 : index
    %395 = vector.load %arg8[%394, %c0_126] : memref<72x256xf32, #tpu.memory_space<vmem>>, vector<1x256xf32>
    %396 = arith.index_cast %c3_i32_125 : i32 to index
    %c0_127 = arith.constant 0 : index
    %397 = vector.load %arg9[%396, %c0_127] : memref<8x512xf32, #tpu.memory_space<vmem>>, vector<1x256xf32>
    tpu.vector_store %arg9[%396, %c0_127], %395 {strides = array<i32>} : memref<8x512xf32, #tpu.memory_space<vmem>>, vector<1x256xf32>,
    %398 = arith.index_cast %393 : i32 to index
    %c0_128 = arith.constant 0 : index
    %399 = vector.load %arg8[%398, %c0_128] : memref<72x256xf32, #tpu.memory_space<vmem>>, vector<1x256xf32>
    %400 = arith.index_cast %c3_i32_125 : i32 to index
    %c256_129 = arith.constant 256 : index
    %401 = vector.load %arg9[%400, %c256_129] : memref<8x512xf32, #tpu.memory_space<vmem>>, vector<1x256xf32>
    tpu.vector_store %arg9[%400, %c256_129], %399 {strides = array<i32>} : memref<8x512xf32, #tpu.memory_space<vmem>>, vector<1x256xf32>,
    %c4_i32_130 = arith.constant 4 : i32
    %402 = arith.addi %345, %c4_i32_130 : i32
    %403 = arith.index_cast %402 : i32 to index
    %404 = memref.load %arg1[%403] : memref<56xi32, #tpu.memory_space<smem>>
    %405 = arith.addi %345, %c4_i32_130 : i32
    %406 = arith.index_cast %405 : i32 to index
    %407 = memref.load %arg2[%406] : memref<56xi32, #tpu.memory_space<smem>>
    %408 = arith.index_cast %404 : i32 to index
    %c0_131 = arith.constant 0 : index
    %409 = vector.load %arg8[%408, %c0_131] : memref<72x256xf32, #tpu.memory_space<vmem>>, vector<1x256xf32>
    %410 = arith.index_cast %c4_i32_130 : i32 to index
    %c0_132 = arith.constant 0 : index
    %411 = vector.load %arg9[%410, %c0_132] : memref<8x512xf32, #tpu.memory_space<vmem>>, vector<1x256xf32>
    tpu.vector_store %arg9[%410, %c0_132], %409 {strides = array<i32>} : memref<8x512xf32, #tpu.memory_space<vmem>>, vector<1x256xf32>,
    %412 = arith.index_cast %407 : i32 to index
    %c0_133 = arith.constant 0 : index
    %413 = vector.load %arg8[%412, %c0_133] : memref<72x256xf32, #tpu.memory_space<vmem>>, vector<1x256xf32>
    %414 = arith.index_cast %c4_i32_130 : i32 to index
    %c256_134 = arith.constant 256 : index
    %415 = vector.load %arg9[%414, %c256_134] : memref<8x512xf32, #tpu.memory_space<vmem>>, vector<1x256xf32>
    tpu.vector_store %arg9[%414, %c256_134], %413 {strides = array<i32>} : memref<8x512xf32, #tpu.memory_space<vmem>>, vector<1x256xf32>,
    %c5_i32_135 = arith.constant 5 : i32
    %416 = arith.addi %345, %c5_i32_135 : i32
    %417 = arith.index_cast %416 : i32 to index
    %418 = memref.load %arg1[%417] : memref<56xi32, #tpu.memory_space<smem>>
    %419 = arith.addi %345, %c5_i32_135 : i32
    %420 = arith.index_cast %419 : i32 to index
    %421 = memref.load %arg2[%420] : memref<56xi32, #tpu.memory_space<smem>>
    %422 = arith.index_cast %418 : i32 to index
    %c0_136 = arith.constant 0 : index
    %423 = vector.load %arg8[%422, %c0_136] : memref<72x256xf32, #tpu.memory_space<vmem>>, vector<1x256xf32>
    %424 = arith.index_cast %c5_i32_135 : i32 to index
    %c0_137 = arith.constant 0 : index
    %425 = vector.load %arg9[%424, %c0_137] : memref<8x512xf32, #tpu.memory_space<vmem>>, vector<1x256xf32>
    tpu.vector_store %arg9[%424, %c0_137], %423 {strides = array<i32>} : memref<8x512xf32, #tpu.memory_space<vmem>>, vector<1x256xf32>,
    %426 = arith.index_cast %421 : i32 to index
    %c0_138 = arith.constant 0 : index
    %427 = vector.load %arg8[%426, %c0_138] : memref<72x256xf32, #tpu.memory_space<vmem>>, vector<1x256xf32>
    %428 = arith.index_cast %c5_i32_135 : i32 to index
    %c256_139 = arith.constant 256 : index
    %429 = vector.load %arg9[%428, %c256_139] : memref<8x512xf32, #tpu.memory_space<vmem>>, vector<1x256xf32>
    tpu.vector_store %arg9[%428, %c256_139], %427 {strides = array<i32>} : memref<8x512xf32, #tpu.memory_space<vmem>>, vector<1x256xf32>,
    %c6_i32_140 = arith.constant 6 : i32
    %430 = arith.addi %345, %c6_i32_140 : i32
    %431 = arith.index_cast %430 : i32 to index
    %432 = memref.load %arg1[%431] : memref<56xi32, #tpu.memory_space<smem>>
    %433 = arith.addi %345, %c6_i32_140 : i32
    %434 = arith.index_cast %433 : i32 to index
    %435 = memref.load %arg2[%434] : memref<56xi32, #tpu.memory_space<smem>>
    %436 = arith.index_cast %432 : i32 to index
    %c0_141 = arith.constant 0 : index
    %437 = vector.load %arg8[%436, %c0_141] : memref<72x256xf32, #tpu.memory_space<vmem>>, vector<1x256xf32>
    %438 = arith.index_cast %c6_i32_140 : i32 to index
    %c0_142 = arith.constant 0 : index
    %439 = vector.load %arg9[%438, %c0_142] : memref<8x512xf32, #tpu.memory_space<vmem>>, vector<1x256xf32>
    tpu.vector_store %arg9[%438, %c0_142], %437 {strides = array<i32>} : memref<8x512xf32, #tpu.memory_space<vmem>>, vector<1x256xf32>,
    %440 = arith.index_cast %435 : i32 to index
    %c0_143 = arith.constant 0 : index
    %441 = vector.load %arg8[%440, %c0_143] : memref<72x256xf32, #tpu.memory_space<vmem>>, vector<1x256xf32>
    %442 = arith.index_cast %c6_i32_140 : i32 to index
    %c256_144 = arith.constant 256 : index
    %443 = vector.load %arg9[%442, %c256_144] : memref<8x512xf32, #tpu.memory_space<vmem>>, vector<1x256xf32>
    tpu.vector_store %arg9[%442, %c256_144], %441 {strides = array<i32>} : memref<8x512xf32, #tpu.memory_space<vmem>>, vector<1x256xf32>,
    %c7_i32_145 = arith.constant 7 : i32
    %444 = arith.addi %345, %c7_i32_145 : i32
    %445 = arith.index_cast %444 : i32 to index
    %446 = memref.load %arg1[%445] : memref<56xi32, #tpu.memory_space<smem>>
    %447 = arith.addi %345, %c7_i32_145 : i32
    %448 = arith.index_cast %447 : i32 to index
    %449 = memref.load %arg2[%448] : memref<56xi32, #tpu.memory_space<smem>>
    %450 = arith.index_cast %446 : i32 to index
    %c0_146 = arith.constant 0 : index
    %451 = vector.load %arg8[%450, %c0_146] : memref<72x256xf32, #tpu.memory_space<vmem>>, vector<1x256xf32>
    %452 = arith.index_cast %c7_i32_145 : i32 to index
    %c0_147 = arith.constant 0 : index
    %453 = vector.load %arg9[%452, %c0_147] : memref<8x512xf32, #tpu.memory_space<vmem>>, vector<1x256xf32>
    tpu.vector_store %arg9[%452, %c0_147], %451 {strides = array<i32>} : memref<8x512xf32, #tpu.memory_space<vmem>>, vector<1x256xf32>,
    %454 = arith.index_cast %449 : i32 to index
    %c0_148 = arith.constant 0 : index
    %455 = vector.load %arg8[%454, %c0_148] : memref<72x256xf32, #tpu.memory_space<vmem>>, vector<1x256xf32>
    %456 = arith.index_cast %c7_i32_145 : i32 to index
    %c256_149 = arith.constant 256 : index
    %457 = vector.load %arg9[%456, %c256_149] : memref<8x512xf32, #tpu.memory_space<vmem>>, vector<1x256xf32>
    tpu.vector_store %arg9[%456, %c256_149], %455 {strides = array<i32>} : memref<8x512xf32, #tpu.memory_space<vmem>>, vector<1x256xf32>,
    %c8_i32_150 = arith.constant 8 : i32
    %c0_151 = arith.constant 0 : index
    %c0_152 = arith.constant 0 : index
    %458 = vector.load %arg9[%c0_151, %c0_152] : memref<8x512xf32, #tpu.memory_space<vmem>>, vector<8x512xf32>
    %459 = arith.truncf %458 : vector<8x512xf32> to vector<8x512xbf16>
    %cst_153 = arith.constant dense<0.000000e+00> : vector<8x640xf32>
    %460 = tpu.matmul %459, %25, %cst_153 {dimension_numbers = #tpu.dot_dimension_numbers<[1], [0], [0], [1], [0, 0, 1, 1], [], []>} : vector<8x512xbf16>, vector<512x640xbf16>, vector<8x640xf32> -> vector<8x640xf32>
    %461 = arith.addf %460, %28 : vector<8x640xf32>
    %462 = vector.extract_strided_slice %461 {offsets = [0, 0], sizes = [8, 128], strides = [1, 1]} : vector<8x640xf32> to vector<8x128xf32>
    %463 = arith.negf %462 : vector<8x128xf32>
    %464 = math.exp %463 : vector<8x128xf32>
    %cst_154 = arith.constant 1.000000e+00 : f32
    %465 = vector.broadcast %cst_154 : f32 to vector<8x128xf32>
    %466 = arith.addf %465, %464 : vector<8x128xf32>
    %467 = arith.divf %465, %466 : vector<8x128xf32>
    %468 = vector.extract_strided_slice %461 {offsets = [0, 128], sizes = [8, 128], strides = [1, 1]} : vector<8x640xf32> to vector<8x128xf32>
    %469 = arith.negf %468 : vector<8x128xf32>
    %470 = math.exp %469 : vector<8x128xf32>
    %cst_155 = arith.constant 1.000000e+00 : f32
    %471 = vector.broadcast %cst_155 : f32 to vector<8x128xf32>
    %472 = arith.addf %471, %470 : vector<8x128xf32>
    %473 = arith.divf %471, %472 : vector<8x128xf32>
    %474 = vector.extract_strided_slice %461 {offsets = [0, 256], sizes = [8, 128], strides = [1, 1]} : vector<8x640xf32> to vector<8x128xf32>
    %475 = arith.negf %474 : vector<8x128xf32>
    %476 = math.exp %475 : vector<8x128xf32>
    %cst_156 = arith.constant 1.000000e+00 : f32
    %477 = vector.broadcast %cst_156 : f32 to vector<8x128xf32>
    %478 = arith.addf %477, %476 : vector<8x128xf32>
    %479 = arith.divf %477, %478 : vector<8x128xf32>
    %480 = vector.extract_strided_slice %461 {offsets = [0, 384], sizes = [8, 128], strides = [1, 1]} : vector<8x640xf32> to vector<8x128xf32>
    %481 = arith.negf %480 : vector<8x128xf32>
    %482 = math.exp %481 : vector<8x128xf32>
    %cst_157 = arith.constant 1.000000e+00 : f32
    %483 = vector.broadcast %cst_157 : f32 to vector<8x128xf32>
    %484 = arith.addf %483, %482 : vector<8x128xf32>
    %485 = arith.divf %483, %484 : vector<8x128xf32>
    %486 = vector.extract_strided_slice %461 {offsets = [0, 512], sizes = [8, 128], strides = [1, 1]} : vector<8x640xf32> to vector<8x128xf32>
    %487 = math.tanh %486 : vector<8x128xf32>
    %488 = arith.mulf %467, %487 : vector<8x128xf32>
    %489 = vector.extract_strided_slice %458 {offsets = [0, 128], sizes = [8, 128], strides = [1, 1]} : vector<8x512xf32> to vector<8x128xf32>
    %490 = arith.mulf %473, %489 : vector<8x128xf32>
    %491 = arith.addf %488, %490 : vector<8x128xf32>
    %492 = vector.extract_strided_slice %458 {offsets = [0, 384], sizes = [8, 128], strides = [1, 1]} : vector<8x512xf32> to vector<8x128xf32>
    %493 = arith.mulf %479, %492 : vector<8x128xf32>
    %494 = arith.addf %491, %493 : vector<8x128xf32>
    %495 = math.tanh %494 : vector<8x128xf32>
    %496 = arith.mulf %485, %495 : vector<8x128xf32>
    %c8_i32_158 = arith.constant 8 : i32
    %497 = arith.muli %c2_i32_108, %c8_i32_158 : i32
    %c16_i32_159 = arith.constant 16 : i32
    %498 = arith.addi %c16_i32_159, %497 : i32
    %499 = tpu.assume_multiple %498, 8 : i32
    %500 = tpu.concatenate %496, %494 in 1 : vector<8x128xf32>, vector<8x128xf32> -> vector<8x256xf32>
    %501 = arith.index_cast %499 : i32 to index
    %c0_160 = arith.constant 0 : index
    %502 = vector.load %arg8[%501, %c0_160] : memref<72x256xf32, #tpu.memory_space<vmem>>, vector<8x256xf32>
    tpu.vector_store %arg8[%501, %c0_160], %500 {strides = array<i32>} : memref<72x256xf32, #tpu.memory_space<vmem>>, vector<8x256xf32>,
    %c3_i32_161 = arith.constant 3 : i32
    %c8_i32_162 = arith.constant 8 : i32
    %503 = arith.muli %c3_i32_161, %c8_i32_162 : i32
    %c0_i32_163 = arith.constant 0 : i32
    %504 = arith.addi %503, %c0_i32_163 : i32
    %505 = arith.index_cast %504 : i32 to index
    %506 = memref.load %arg1[%505] : memref<56xi32, #tpu.memory_space<smem>>
    %507 = arith.addi %503, %c0_i32_163 : i32
    %508 = arith.index_cast %507 : i32 to index
    %509 = memref.load %arg2[%508] : memref<56xi32, #tpu.memory_space<smem>>
    %510 = arith.index_cast %506 : i32 to index
    %c0_164 = arith.constant 0 : index
    %511 = vector.load %arg8[%510, %c0_164] : memref<72x256xf32, #tpu.memory_space<vmem>>, vector<1x256xf32>
    %512 = arith.index_cast %c0_i32_163 : i32 to index
    %c0_165 = arith.constant 0 : index
    %513 = vector.load %arg9[%512, %c0_165] : memref<8x512xf32, #tpu.memory_space<vmem>>, vector<1x256xf32>
    tpu.vector_store %arg9[%512, %c0_165], %511 {strides = array<i32>} : memref<8x512xf32, #tpu.memory_space<vmem>>, vector<1x256xf32>,
    %514 = arith.index_cast %509 : i32 to index
    %c0_166 = arith.constant 0 : index
    %515 = vector.load %arg8[%514, %c0_166] : memref<72x256xf32, #tpu.memory_space<vmem>>, vector<1x256xf32>
    %516 = arith.index_cast %c0_i32_163 : i32 to index
    %c256_167 = arith.constant 256 : index
    %517 = vector.load %arg9[%516, %c256_167] : memref<8x512xf32, #tpu.memory_space<vmem>>, vector<1x256xf32>
    tpu.vector_store %arg9[%516, %c256_167], %515 {strides = array<i32>} : memref<8x512xf32, #tpu.memory_space<vmem>>, vector<1x256xf32>,
    %c1_i32_168 = arith.constant 1 : i32
    %518 = arith.addi %503, %c1_i32_168 : i32
    %519 = arith.index_cast %518 : i32 to index
    %520 = memref.load %arg1[%519] : memref<56xi32, #tpu.memory_space<smem>>
    %521 = arith.addi %503, %c1_i32_168 : i32
    %522 = arith.index_cast %521 : i32 to index
    %523 = memref.load %arg2[%522] : memref<56xi32, #tpu.memory_space<smem>>
    %524 = arith.index_cast %520 : i32 to index
    %c0_169 = arith.constant 0 : index
    %525 = vector.load %arg8[%524, %c0_169] : memref<72x256xf32, #tpu.memory_space<vmem>>, vector<1x256xf32>
    %526 = arith.index_cast %c1_i32_168 : i32 to index
    %c0_170 = arith.constant 0 : index
    %527 = vector.load %arg9[%526, %c0_170] : memref<8x512xf32, #tpu.memory_space<vmem>>, vector<1x256xf32>
    tpu.vector_store %arg9[%526, %c0_170], %525 {strides = array<i32>} : memref<8x512xf32, #tpu.memory_space<vmem>>, vector<1x256xf32>,
    %528 = arith.index_cast %523 : i32 to index
    %c0_171 = arith.constant 0 : index
    %529 = vector.load %arg8[%528, %c0_171] : memref<72x256xf32, #tpu.memory_space<vmem>>, vector<1x256xf32>
    %530 = arith.index_cast %c1_i32_168 : i32 to index
    %c256_172 = arith.constant 256 : index
    %531 = vector.load %arg9[%530, %c256_172] : memref<8x512xf32, #tpu.memory_space<vmem>>, vector<1x256xf32>
    tpu.vector_store %arg9[%530, %c256_172], %529 {strides = array<i32>} : memref<8x512xf32, #tpu.memory_space<vmem>>, vector<1x256xf32>,
    %c2_i32_173 = arith.constant 2 : i32
    %532 = arith.addi %503, %c2_i32_173 : i32
    %533 = arith.index_cast %532 : i32 to index
    %534 = memref.load %arg1[%533] : memref<56xi32, #tpu.memory_space<smem>>
    %535 = arith.addi %503, %c2_i32_173 : i32
    %536 = arith.index_cast %535 : i32 to index
    %537 = memref.load %arg2[%536] : memref<56xi32, #tpu.memory_space<smem>>
    %538 = arith.index_cast %534 : i32 to index
    %c0_174 = arith.constant 0 : index
    %539 = vector.load %arg8[%538, %c0_174] : memref<72x256xf32, #tpu.memory_space<vmem>>, vector<1x256xf32>
    %540 = arith.index_cast %c2_i32_173 : i32 to index
    %c0_175 = arith.constant 0 : index
    %541 = vector.load %arg9[%540, %c0_175] : memref<8x512xf32, #tpu.memory_space<vmem>>, vector<1x256xf32>
    tpu.vector_store %arg9[%540, %c0_175], %539 {strides = array<i32>} : memref<8x512xf32, #tpu.memory_space<vmem>>, vector<1x256xf32>,
    %542 = arith.index_cast %537 : i32 to index
    %c0_176 = arith.constant 0 : index
    %543 = vector.load %arg8[%542, %c0_176] : memref<72x256xf32, #tpu.memory_space<vmem>>, vector<1x256xf32>
    %544 = arith.index_cast %c2_i32_173 : i32 to index
    %c256_177 = arith.constant 256 : index
    %545 = vector.load %arg9[%544, %c256_177] : memref<8x512xf32, #tpu.memory_space<vmem>>, vector<1x256xf32>
    tpu.vector_store %arg9[%544, %c256_177], %543 {strides = array<i32>} : memref<8x512xf32, #tpu.memory_space<vmem>>, vector<1x256xf32>,
    %c3_i32_178 = arith.constant 3 : i32
    %546 = arith.addi %503, %c3_i32_178 : i32
    %547 = arith.index_cast %546 : i32 to index
    %548 = memref.load %arg1[%547] : memref<56xi32, #tpu.memory_space<smem>>
    %549 = arith.addi %503, %c3_i32_178 : i32
    %550 = arith.index_cast %549 : i32 to index
    %551 = memref.load %arg2[%550] : memref<56xi32, #tpu.memory_space<smem>>
    %552 = arith.index_cast %548 : i32 to index
    %c0_179 = arith.constant 0 : index
    %553 = vector.load %arg8[%552, %c0_179] : memref<72x256xf32, #tpu.memory_space<vmem>>, vector<1x256xf32>
    %554 = arith.index_cast %c3_i32_178 : i32 to index
    %c0_180 = arith.constant 0 : index
    %555 = vector.load %arg9[%554, %c0_180] : memref<8x512xf32, #tpu.memory_space<vmem>>, vector<1x256xf32>
    tpu.vector_store %arg9[%554, %c0_180], %553 {strides = array<i32>} : memref<8x512xf32, #tpu.memory_space<vmem>>, vector<1x256xf32>,
    %556 = arith.index_cast %551 : i32 to index
    %c0_181 = arith.constant 0 : index
    %557 = vector.load %arg8[%556, %c0_181] : memref<72x256xf32, #tpu.memory_space<vmem>>, vector<1x256xf32>
    %558 = arith.index_cast %c3_i32_178 : i32 to index
    %c256_182 = arith.constant 256 : index
    %559 = vector.load %arg9[%558, %c256_182] : memref<8x512xf32, #tpu.memory_space<vmem>>, vector<1x256xf32>
    tpu.vector_store %arg9[%558, %c256_182], %557 {strides = array<i32>} : memref<8x512xf32, #tpu.memory_space<vmem>>, vector<1x256xf32>,
    %c4_i32_183 = arith.constant 4 : i32
    %560 = arith.addi %503, %c4_i32_183 : i32
    %561 = arith.index_cast %560 : i32 to index
    %562 = memref.load %arg1[%561] : memref<56xi32, #tpu.memory_space<smem>>
    %563 = arith.addi %503, %c4_i32_183 : i32
    %564 = arith.index_cast %563 : i32 to index
    %565 = memref.load %arg2[%564] : memref<56xi32, #tpu.memory_space<smem>>
    %566 = arith.index_cast %562 : i32 to index
    %c0_184 = arith.constant 0 : index
    %567 = vector.load %arg8[%566, %c0_184] : memref<72x256xf32, #tpu.memory_space<vmem>>, vector<1x256xf32>
    %568 = arith.index_cast %c4_i32_183 : i32 to index
    %c0_185 = arith.constant 0 : index
    %569 = vector.load %arg9[%568, %c0_185] : memref<8x512xf32, #tpu.memory_space<vmem>>, vector<1x256xf32>
    tpu.vector_store %arg9[%568, %c0_185], %567 {strides = array<i32>} : memref<8x512xf32, #tpu.memory_space<vmem>>, vector<1x256xf32>,
    %570 = arith.index_cast %565 : i32 to index
    %c0_186 = arith.constant 0 : index
    %571 = vector.load %arg8[%570, %c0_186] : memref<72x256xf32, #tpu.memory_space<vmem>>, vector<1x256xf32>
    %572 = arith.index_cast %c4_i32_183 : i32 to index
    %c256_187 = arith.constant 256 : index
    %573 = vector.load %arg9[%572, %c256_187] : memref<8x512xf32, #tpu.memory_space<vmem>>, vector<1x256xf32>
    tpu.vector_store %arg9[%572, %c256_187], %571 {strides = array<i32>} : memref<8x512xf32, #tpu.memory_space<vmem>>, vector<1x256xf32>,
    %c5_i32_188 = arith.constant 5 : i32
    %574 = arith.addi %503, %c5_i32_188 : i32
    %575 = arith.index_cast %574 : i32 to index
    %576 = memref.load %arg1[%575] : memref<56xi32, #tpu.memory_space<smem>>
    %577 = arith.addi %503, %c5_i32_188 : i32
    %578 = arith.index_cast %577 : i32 to index
    %579 = memref.load %arg2[%578] : memref<56xi32, #tpu.memory_space<smem>>
    %580 = arith.index_cast %576 : i32 to index
    %c0_189 = arith.constant 0 : index
    %581 = vector.load %arg8[%580, %c0_189] : memref<72x256xf32, #tpu.memory_space<vmem>>, vector<1x256xf32>
    %582 = arith.index_cast %c5_i32_188 : i32 to index
    %c0_190 = arith.constant 0 : index
    %583 = vector.load %arg9[%582, %c0_190] : memref<8x512xf32, #tpu.memory_space<vmem>>, vector<1x256xf32>
    tpu.vector_store %arg9[%582, %c0_190], %581 {strides = array<i32>} : memref<8x512xf32, #tpu.memory_space<vmem>>, vector<1x256xf32>,
    %584 = arith.index_cast %579 : i32 to index
    %c0_191 = arith.constant 0 : index
    %585 = vector.load %arg8[%584, %c0_191] : memref<72x256xf32, #tpu.memory_space<vmem>>, vector<1x256xf32>
    %586 = arith.index_cast %c5_i32_188 : i32 to index
    %c256_192 = arith.constant 256 : index
    %587 = vector.load %arg9[%586, %c256_192] : memref<8x512xf32, #tpu.memory_space<vmem>>, vector<1x256xf32>
    tpu.vector_store %arg9[%586, %c256_192], %585 {strides = array<i32>} : memref<8x512xf32, #tpu.memory_space<vmem>>, vector<1x256xf32>,
    %c6_i32_193 = arith.constant 6 : i32
    %588 = arith.addi %503, %c6_i32_193 : i32
    %589 = arith.index_cast %588 : i32 to index
    %590 = memref.load %arg1[%589] : memref<56xi32, #tpu.memory_space<smem>>
    %591 = arith.addi %503, %c6_i32_193 : i32
    %592 = arith.index_cast %591 : i32 to index
    %593 = memref.load %arg2[%592] : memref<56xi32, #tpu.memory_space<smem>>
    %594 = arith.index_cast %590 : i32 to index
    %c0_194 = arith.constant 0 : index
    %595 = vector.load %arg8[%594, %c0_194] : memref<72x256xf32, #tpu.memory_space<vmem>>, vector<1x256xf32>
    %596 = arith.index_cast %c6_i32_193 : i32 to index
    %c0_195 = arith.constant 0 : index
    %597 = vector.load %arg9[%596, %c0_195] : memref<8x512xf32, #tpu.memory_space<vmem>>, vector<1x256xf32>
    tpu.vector_store %arg9[%596, %c0_195], %595 {strides = array<i32>} : memref<8x512xf32, #tpu.memory_space<vmem>>, vector<1x256xf32>,
    %598 = arith.index_cast %593 : i32 to index
    %c0_196 = arith.constant 0 : index
    %599 = vector.load %arg8[%598, %c0_196] : memref<72x256xf32, #tpu.memory_space<vmem>>, vector<1x256xf32>
    %600 = arith.index_cast %c6_i32_193 : i32 to index
    %c256_197 = arith.constant 256 : index
    %601 = vector.load %arg9[%600, %c256_197] : memref<8x512xf32, #tpu.memory_space<vmem>>, vector<1x256xf32>
    tpu.vector_store %arg9[%600, %c256_197], %599 {strides = array<i32>} : memref<8x512xf32, #tpu.memory_space<vmem>>, vector<1x256xf32>,
    %c7_i32_198 = arith.constant 7 : i32
    %602 = arith.addi %503, %c7_i32_198 : i32
    %603 = arith.index_cast %602 : i32 to index
    %604 = memref.load %arg1[%603] : memref<56xi32, #tpu.memory_space<smem>>
    %605 = arith.addi %503, %c7_i32_198 : i32
    %606 = arith.index_cast %605 : i32 to index
    %607 = memref.load %arg2[%606] : memref<56xi32, #tpu.memory_space<smem>>
    %608 = arith.index_cast %604 : i32 to index
    %c0_199 = arith.constant 0 : index
    %609 = vector.load %arg8[%608, %c0_199] : memref<72x256xf32, #tpu.memory_space<vmem>>, vector<1x256xf32>
    %610 = arith.index_cast %c7_i32_198 : i32 to index
    %c0_200 = arith.constant 0 : index
    %611 = vector.load %arg9[%610, %c0_200] : memref<8x512xf32, #tpu.memory_space<vmem>>, vector<1x256xf32>
    tpu.vector_store %arg9[%610, %c0_200], %609 {strides = array<i32>} : memref<8x512xf32, #tpu.memory_space<vmem>>, vector<1x256xf32>,
    %612 = arith.index_cast %607 : i32 to index
    %c0_201 = arith.constant 0 : index
    %613 = vector.load %arg8[%612, %c0_201] : memref<72x256xf32, #tpu.memory_space<vmem>>, vector<1x256xf32>
    %614 = arith.index_cast %c7_i32_198 : i32 to index
    %c256_202 = arith.constant 256 : index
    %615 = vector.load %arg9[%614, %c256_202] : memref<8x512xf32, #tpu.memory_space<vmem>>, vector<1x256xf32>
    tpu.vector_store %arg9[%614, %c256_202], %613 {strides = array<i32>} : memref<8x512xf32, #tpu.memory_space<vmem>>, vector<1x256xf32>,
    %c8_i32_203 = arith.constant 8 : i32
    %c0_204 = arith.constant 0 : index
    %c0_205 = arith.constant 0 : index
    %616 = vector.load %arg9[%c0_204, %c0_205] : memref<8x512xf32, #tpu.memory_space<vmem>>, vector<8x512xf32>
    %617 = arith.truncf %616 : vector<8x512xf32> to vector<8x512xbf16>
    %cst_206 = arith.constant dense<0.000000e+00> : vector<8x640xf32>
    %618 = tpu.matmul %617, %25, %cst_206 {dimension_numbers = #tpu.dot_dimension_numbers<[1], [0], [0], [1], [0, 0, 1, 1], [], []>} : vector<8x512xbf16>, vector<512x640xbf16>, vector<8x640xf32> -> vector<8x640xf32>
    %619 = arith.addf %618, %28 : vector<8x640xf32>
    %620 = vector.extract_strided_slice %619 {offsets = [0, 0], sizes = [8, 128], strides = [1, 1]} : vector<8x640xf32> to vector<8x128xf32>
    %621 = arith.negf %620 : vector<8x128xf32>
    %622 = math.exp %621 : vector<8x128xf32>
    %cst_207 = arith.constant 1.000000e+00 : f32
    %623 = vector.broadcast %cst_207 : f32 to vector<8x128xf32>
    %624 = arith.addf %623, %622 : vector<8x128xf32>
    %625 = arith.divf %623, %624 : vector<8x128xf32>
    %626 = vector.extract_strided_slice %619 {offsets = [0, 128], sizes = [8, 128], strides = [1, 1]} : vector<8x640xf32> to vector<8x128xf32>
    %627 = arith.negf %626 : vector<8x128xf32>
    %628 = math.exp %627 : vector<8x128xf32>
    %cst_208 = arith.constant 1.000000e+00 : f32
    %629 = vector.broadcast %cst_208 : f32 to vector<8x128xf32>
    %630 = arith.addf %629, %628 : vector<8x128xf32>
    %631 = arith.divf %629, %630 : vector<8x128xf32>
    %632 = vector.extract_strided_slice %619 {offsets = [0, 256], sizes = [8, 128], strides = [1, 1]} : vector<8x640xf32> to vector<8x128xf32>
    %633 = arith.negf %632 : vector<8x128xf32>
    %634 = math.exp %633 : vector<8x128xf32>
    %cst_209 = arith.constant 1.000000e+00 : f32
    %635 = vector.broadcast %cst_209 : f32 to vector<8x128xf32>
    %636 = arith.addf %635, %634 : vector<8x128xf32>
    %637 = arith.divf %635, %636 : vector<8x128xf32>
    %638 = vector.extract_strided_slice %619 {offsets = [0, 384], sizes = [8, 128], strides = [1, 1]} : vector<8x640xf32> to vector<8x128xf32>
    %639 = arith.negf %638 : vector<8x128xf32>
    %640 = math.exp %639 : vector<8x128xf32>
    %cst_210 = arith.constant 1.000000e+00 : f32
    %641 = vector.broadcast %cst_210 : f32 to vector<8x128xf32>
    %642 = arith.addf %641, %640 : vector<8x128xf32>
    %643 = arith.divf %641, %642 : vector<8x128xf32>
    %644 = vector.extract_strided_slice %619 {offsets = [0, 512], sizes = [8, 128], strides = [1, 1]} : vector<8x640xf32> to vector<8x128xf32>
    %645 = math.tanh %644 : vector<8x128xf32>
    %646 = arith.mulf %625, %645 : vector<8x128xf32>
    %647 = vector.extract_strided_slice %616 {offsets = [0, 128], sizes = [8, 128], strides = [1, 1]} : vector<8x512xf32> to vector<8x128xf32>
    %648 = arith.mulf %631, %647 : vector<8x128xf32>
    %649 = arith.addf %646, %648 : vector<8x128xf32>
    %650 = vector.extract_strided_slice %616 {offsets = [0, 384], sizes = [8, 128], strides = [1, 1]} : vector<8x512xf32> to vector<8x128xf32>
    %651 = arith.mulf %637, %650 : vector<8x128xf32>
    %652 = arith.addf %649, %651 : vector<8x128xf32>
    %653 = math.tanh %652 : vector<8x128xf32>
    %654 = arith.mulf %643, %653 : vector<8x128xf32>
    %c8_i32_211 = arith.constant 8 : i32
    %655 = arith.muli %c3_i32_161, %c8_i32_211 : i32
    %c16_i32_212 = arith.constant 16 : i32
    %656 = arith.addi %c16_i32_212, %655 : i32
    %657 = tpu.assume_multiple %656, 8 : i32
    %658 = tpu.concatenate %654, %652 in 1 : vector<8x128xf32>, vector<8x128xf32> -> vector<8x256xf32>
    %659 = arith.index_cast %657 : i32 to index
    %c0_213 = arith.constant 0 : index
    %660 = vector.load %arg8[%659, %c0_213] : memref<72x256xf32, #tpu.memory_space<vmem>>, vector<8x256xf32>
    tpu.vector_store %arg8[%659, %c0_213], %658 {strides = array<i32>} : memref<72x256xf32, #tpu.memory_space<vmem>>, vector<8x256xf32>,
    %c4_i32_214 = arith.constant 4 : i32
    %c8_i32_215 = arith.constant 8 : i32
    %661 = arith.muli %c4_i32_214, %c8_i32_215 : i32
    %c0_i32_216 = arith.constant 0 : i32
    %662 = arith.addi %661, %c0_i32_216 : i32
    %663 = arith.index_cast %662 : i32 to index
    %664 = memref.load %arg1[%663] : memref<56xi32, #tpu.memory_space<smem>>
    %665 = arith.addi %661, %c0_i32_216 : i32
    %666 = arith.index_cast %665 : i32 to index
    %667 = memref.load %arg2[%666] : memref<56xi32, #tpu.memory_space<smem>>
    %668 = arith.index_cast %664 : i32 to index
    %c0_217 = arith.constant 0 : index
    %669 = vector.load %arg8[%668, %c0_217] : memref<72x256xf32, #tpu.memory_space<vmem>>, vector<1x256xf32>
    %670 = arith.index_cast %c0_i32_216 : i32 to index
    %c0_218 = arith.constant 0 : index
    %671 = vector.load %arg9[%670, %c0_218] : memref<8x512xf32, #tpu.memory_space<vmem>>, vector<1x256xf32>
    tpu.vector_store %arg9[%670, %c0_218], %669 {strides = array<i32>} : memref<8x512xf32, #tpu.memory_space<vmem>>, vector<1x256xf32>,
    %672 = arith.index_cast %667 : i32 to index
    %c0_219 = arith.constant 0 : index
    %673 = vector.load %arg8[%672, %c0_219] : memref<72x256xf32, #tpu.memory_space<vmem>>, vector<1x256xf32>
    %674 = arith.index_cast %c0_i32_216 : i32 to index
    %c256_220 = arith.constant 256 : index
    %675 = vector.load %arg9[%674, %c256_220] : memref<8x512xf32, #tpu.memory_space<vmem>>, vector<1x256xf32>
    tpu.vector_store %arg9[%674, %c256_220], %673 {strides = array<i32>} : memref<8x512xf32, #tpu.memory_space<vmem>>, vector<1x256xf32>,
    %c1_i32_221 = arith.constant 1 : i32
    %676 = arith.addi %661, %c1_i32_221 : i32
    %677 = arith.index_cast %676 : i32 to index
    %678 = memref.load %arg1[%677] : memref<56xi32, #tpu.memory_space<smem>>
    %679 = arith.addi %661, %c1_i32_221 : i32
    %680 = arith.index_cast %679 : i32 to index
    %681 = memref.load %arg2[%680] : memref<56xi32, #tpu.memory_space<smem>>
    %682 = arith.index_cast %678 : i32 to index
    %c0_222 = arith.constant 0 : index
    %683 = vector.load %arg8[%682, %c0_222] : memref<72x256xf32, #tpu.memory_space<vmem>>, vector<1x256xf32>
    %684 = arith.index_cast %c1_i32_221 : i32 to index
    %c0_223 = arith.constant 0 : index
    %685 = vector.load %arg9[%684, %c0_223] : memref<8x512xf32, #tpu.memory_space<vmem>>, vector<1x256xf32>
    tpu.vector_store %arg9[%684, %c0_223], %683 {strides = array<i32>} : memref<8x512xf32, #tpu.memory_space<vmem>>, vector<1x256xf32>,
    %686 = arith.index_cast %681 : i32 to index
    %c0_224 = arith.constant 0 : index
    %687 = vector.load %arg8[%686, %c0_224] : memref<72x256xf32, #tpu.memory_space<vmem>>, vector<1x256xf32>
    %688 = arith.index_cast %c1_i32_221 : i32 to index
    %c256_225 = arith.constant 256 : index
    %689 = vector.load %arg9[%688, %c256_225] : memref<8x512xf32, #tpu.memory_space<vmem>>, vector<1x256xf32>
    tpu.vector_store %arg9[%688, %c256_225], %687 {strides = array<i32>} : memref<8x512xf32, #tpu.memory_space<vmem>>, vector<1x256xf32>,
    %c2_i32_226 = arith.constant 2 : i32
    %690 = arith.addi %661, %c2_i32_226 : i32
    %691 = arith.index_cast %690 : i32 to index
    %692 = memref.load %arg1[%691] : memref<56xi32, #tpu.memory_space<smem>>
    %693 = arith.addi %661, %c2_i32_226 : i32
    %694 = arith.index_cast %693 : i32 to index
    %695 = memref.load %arg2[%694] : memref<56xi32, #tpu.memory_space<smem>>
    %696 = arith.index_cast %692 : i32 to index
    %c0_227 = arith.constant 0 : index
    %697 = vector.load %arg8[%696, %c0_227] : memref<72x256xf32, #tpu.memory_space<vmem>>, vector<1x256xf32>
    %698 = arith.index_cast %c2_i32_226 : i32 to index
    %c0_228 = arith.constant 0 : index
    %699 = vector.load %arg9[%698, %c0_228] : memref<8x512xf32, #tpu.memory_space<vmem>>, vector<1x256xf32>
    tpu.vector_store %arg9[%698, %c0_228], %697 {strides = array<i32>} : memref<8x512xf32, #tpu.memory_space<vmem>>, vector<1x256xf32>,
    %700 = arith.index_cast %695 : i32 to index
    %c0_229 = arith.constant 0 : index
    %701 = vector.load %arg8[%700, %c0_229] : memref<72x256xf32, #tpu.memory_space<vmem>>, vector<1x256xf32>
    %702 = arith.index_cast %c2_i32_226 : i32 to index
    %c256_230 = arith.constant 256 : index
    %703 = vector.load %arg9[%702, %c256_230] : memref<8x512xf32, #tpu.memory_space<vmem>>, vector<1x256xf32>
    tpu.vector_store %arg9[%702, %c256_230], %701 {strides = array<i32>} : memref<8x512xf32, #tpu.memory_space<vmem>>, vector<1x256xf32>,
    %c3_i32_231 = arith.constant 3 : i32
    %704 = arith.addi %661, %c3_i32_231 : i32
    %705 = arith.index_cast %704 : i32 to index
    %706 = memref.load %arg1[%705] : memref<56xi32, #tpu.memory_space<smem>>
    %707 = arith.addi %661, %c3_i32_231 : i32
    %708 = arith.index_cast %707 : i32 to index
    %709 = memref.load %arg2[%708] : memref<56xi32, #tpu.memory_space<smem>>
    %710 = arith.index_cast %706 : i32 to index
    %c0_232 = arith.constant 0 : index
    %711 = vector.load %arg8[%710, %c0_232] : memref<72x256xf32, #tpu.memory_space<vmem>>, vector<1x256xf32>
    %712 = arith.index_cast %c3_i32_231 : i32 to index
    %c0_233 = arith.constant 0 : index
    %713 = vector.load %arg9[%712, %c0_233] : memref<8x512xf32, #tpu.memory_space<vmem>>, vector<1x256xf32>
    tpu.vector_store %arg9[%712, %c0_233], %711 {strides = array<i32>} : memref<8x512xf32, #tpu.memory_space<vmem>>, vector<1x256xf32>,
    %714 = arith.index_cast %709 : i32 to index
    %c0_234 = arith.constant 0 : index
    %715 = vector.load %arg8[%714, %c0_234] : memref<72x256xf32, #tpu.memory_space<vmem>>, vector<1x256xf32>
    %716 = arith.index_cast %c3_i32_231 : i32 to index
    %c256_235 = arith.constant 256 : index
    %717 = vector.load %arg9[%716, %c256_235] : memref<8x512xf32, #tpu.memory_space<vmem>>, vector<1x256xf32>
    tpu.vector_store %arg9[%716, %c256_235], %715 {strides = array<i32>} : memref<8x512xf32, #tpu.memory_space<vmem>>, vector<1x256xf32>,
    %c4_i32_236 = arith.constant 4 : i32
    %718 = arith.addi %661, %c4_i32_236 : i32
    %719 = arith.index_cast %718 : i32 to index
    %720 = memref.load %arg1[%719] : memref<56xi32, #tpu.memory_space<smem>>
    %721 = arith.addi %661, %c4_i32_236 : i32
    %722 = arith.index_cast %721 : i32 to index
    %723 = memref.load %arg2[%722] : memref<56xi32, #tpu.memory_space<smem>>
    %724 = arith.index_cast %720 : i32 to index
    %c0_237 = arith.constant 0 : index
    %725 = vector.load %arg8[%724, %c0_237] : memref<72x256xf32, #tpu.memory_space<vmem>>, vector<1x256xf32>
    %726 = arith.index_cast %c4_i32_236 : i32 to index
    %c0_238 = arith.constant 0 : index
    %727 = vector.load %arg9[%726, %c0_238] : memref<8x512xf32, #tpu.memory_space<vmem>>, vector<1x256xf32>
    tpu.vector_store %arg9[%726, %c0_238], %725 {strides = array<i32>} : memref<8x512xf32, #tpu.memory_space<vmem>>, vector<1x256xf32>,
    %728 = arith.index_cast %723 : i32 to index
    %c0_239 = arith.constant 0 : index
    %729 = vector.load %arg8[%728, %c0_239] : memref<72x256xf32, #tpu.memory_space<vmem>>, vector<1x256xf32>
    %730 = arith.index_cast %c4_i32_236 : i32 to index
    %c256_240 = arith.constant 256 : index
    %731 = vector.load %arg9[%730, %c256_240] : memref<8x512xf32, #tpu.memory_space<vmem>>, vector<1x256xf32>
    tpu.vector_store %arg9[%730, %c256_240], %729 {strides = array<i32>} : memref<8x512xf32, #tpu.memory_space<vmem>>, vector<1x256xf32>,
    %c5_i32_241 = arith.constant 5 : i32
    %732 = arith.addi %661, %c5_i32_241 : i32
    %733 = arith.index_cast %732 : i32 to index
    %734 = memref.load %arg1[%733] : memref<56xi32, #tpu.memory_space<smem>>
    %735 = arith.addi %661, %c5_i32_241 : i32
    %736 = arith.index_cast %735 : i32 to index
    %737 = memref.load %arg2[%736] : memref<56xi32, #tpu.memory_space<smem>>
    %738 = arith.index_cast %734 : i32 to index
    %c0_242 = arith.constant 0 : index
    %739 = vector.load %arg8[%738, %c0_242] : memref<72x256xf32, #tpu.memory_space<vmem>>, vector<1x256xf32>
    %740 = arith.index_cast %c5_i32_241 : i32 to index
    %c0_243 = arith.constant 0 : index
    %741 = vector.load %arg9[%740, %c0_243] : memref<8x512xf32, #tpu.memory_space<vmem>>, vector<1x256xf32>
    tpu.vector_store %arg9[%740, %c0_243], %739 {strides = array<i32>} : memref<8x512xf32, #tpu.memory_space<vmem>>, vector<1x256xf32>,
    %742 = arith.index_cast %737 : i32 to index
    %c0_244 = arith.constant 0 : index
    %743 = vector.load %arg8[%742, %c0_244] : memref<72x256xf32, #tpu.memory_space<vmem>>, vector<1x256xf32>
    %744 = arith.index_cast %c5_i32_241 : i32 to index
    %c256_245 = arith.constant 256 : index
    %745 = vector.load %arg9[%744, %c256_245] : memref<8x512xf32, #tpu.memory_space<vmem>>, vector<1x256xf32>
    tpu.vector_store %arg9[%744, %c256_245], %743 {strides = array<i32>} : memref<8x512xf32, #tpu.memory_space<vmem>>, vector<1x256xf32>,
    %c6_i32_246 = arith.constant 6 : i32
    %746 = arith.addi %661, %c6_i32_246 : i32
    %747 = arith.index_cast %746 : i32 to index
    %748 = memref.load %arg1[%747] : memref<56xi32, #tpu.memory_space<smem>>
    %749 = arith.addi %661, %c6_i32_246 : i32
    %750 = arith.index_cast %749 : i32 to index
    %751 = memref.load %arg2[%750] : memref<56xi32, #tpu.memory_space<smem>>
    %752 = arith.index_cast %748 : i32 to index
    %c0_247 = arith.constant 0 : index
    %753 = vector.load %arg8[%752, %c0_247] : memref<72x256xf32, #tpu.memory_space<vmem>>, vector<1x256xf32>
    %754 = arith.index_cast %c6_i32_246 : i32 to index
    %c0_248 = arith.constant 0 : index
    %755 = vector.load %arg9[%754, %c0_248] : memref<8x512xf32, #tpu.memory_space<vmem>>, vector<1x256xf32>
    tpu.vector_store %arg9[%754, %c0_248], %753 {strides = array<i32>} : memref<8x512xf32, #tpu.memory_space<vmem>>, vector<1x256xf32>,
    %756 = arith.index_cast %751 : i32 to index
    %c0_249 = arith.constant 0 : index
    %757 = vector.load %arg8[%756, %c0_249] : memref<72x256xf32, #tpu.memory_space<vmem>>, vector<1x256xf32>
    %758 = arith.index_cast %c6_i32_246 : i32 to index
    %c256_250 = arith.constant 256 : index
    %759 = vector.load %arg9[%758, %c256_250] : memref<8x512xf32, #tpu.memory_space<vmem>>, vector<1x256xf32>
    tpu.vector_store %arg9[%758, %c256_250], %757 {strides = array<i32>} : memref<8x512xf32, #tpu.memory_space<vmem>>, vector<1x256xf32>,
    %c7_i32_251 = arith.constant 7 : i32
    %760 = arith.addi %661, %c7_i32_251 : i32
    %761 = arith.index_cast %760 : i32 to index
    %762 = memref.load %arg1[%761] : memref<56xi32, #tpu.memory_space<smem>>
    %763 = arith.addi %661, %c7_i32_251 : i32
    %764 = arith.index_cast %763 : i32 to index
    %765 = memref.load %arg2[%764] : memref<56xi32, #tpu.memory_space<smem>>
    %766 = arith.index_cast %762 : i32 to index
    %c0_252 = arith.constant 0 : index
    %767 = vector.load %arg8[%766, %c0_252] : memref<72x256xf32, #tpu.memory_space<vmem>>, vector<1x256xf32>
    %768 = arith.index_cast %c7_i32_251 : i32 to index
    %c0_253 = arith.constant 0 : index
    %769 = vector.load %arg9[%768, %c0_253] : memref<8x512xf32, #tpu.memory_space<vmem>>, vector<1x256xf32>
    tpu.vector_store %arg9[%768, %c0_253], %767 {strides = array<i32>} : memref<8x512xf32, #tpu.memory_space<vmem>>, vector<1x256xf32>,
    %770 = arith.index_cast %765 : i32 to index
    %c0_254 = arith.constant 0 : index
    %771 = vector.load %arg8[%770, %c0_254] : memref<72x256xf32, #tpu.memory_space<vmem>>, vector<1x256xf32>
    %772 = arith.index_cast %c7_i32_251 : i32 to index
    %c256_255 = arith.constant 256 : index
    %773 = vector.load %arg9[%772, %c256_255] : memref<8x512xf32, #tpu.memory_space<vmem>>, vector<1x256xf32>
    tpu.vector_store %arg9[%772, %c256_255], %771 {strides = array<i32>} : memref<8x512xf32, #tpu.memory_space<vmem>>, vector<1x256xf32>,
    %c8_i32_256 = arith.constant 8 : i32
    %c0_257 = arith.constant 0 : index
    %c0_258 = arith.constant 0 : index
    %774 = vector.load %arg9[%c0_257, %c0_258] : memref<8x512xf32, #tpu.memory_space<vmem>>, vector<8x512xf32>
    %775 = arith.truncf %774 : vector<8x512xf32> to vector<8x512xbf16>
    %cst_259 = arith.constant dense<0.000000e+00> : vector<8x640xf32>
    %776 = tpu.matmul %775, %25, %cst_259 {dimension_numbers = #tpu.dot_dimension_numbers<[1], [0], [0], [1], [0, 0, 1, 1], [], []>} : vector<8x512xbf16>, vector<512x640xbf16>, vector<8x640xf32> -> vector<8x640xf32>
    %777 = arith.addf %776, %28 : vector<8x640xf32>
    %778 = vector.extract_strided_slice %777 {offsets = [0, 0], sizes = [8, 128], strides = [1, 1]} : vector<8x640xf32> to vector<8x128xf32>
    %779 = arith.negf %778 : vector<8x128xf32>
    %780 = math.exp %779 : vector<8x128xf32>
    %cst_260 = arith.constant 1.000000e+00 : f32
    %781 = vector.broadcast %cst_260 : f32 to vector<8x128xf32>
    %782 = arith.addf %781, %780 : vector<8x128xf32>
    %783 = arith.divf %781, %782 : vector<8x128xf32>
    %784 = vector.extract_strided_slice %777 {offsets = [0, 128], sizes = [8, 128], strides = [1, 1]} : vector<8x640xf32> to vector<8x128xf32>
    %785 = arith.negf %784 : vector<8x128xf32>
    %786 = math.exp %785 : vector<8x128xf32>
    %cst_261 = arith.constant 1.000000e+00 : f32
    %787 = vector.broadcast %cst_261 : f32 to vector<8x128xf32>
    %788 = arith.addf %787, %786 : vector<8x128xf32>
    %789 = arith.divf %787, %788 : vector<8x128xf32>
    %790 = vector.extract_strided_slice %777 {offsets = [0, 256], sizes = [8, 128], strides = [1, 1]} : vector<8x640xf32> to vector<8x128xf32>
    %791 = arith.negf %790 : vector<8x128xf32>
    %792 = math.exp %791 : vector<8x128xf32>
    %cst_262 = arith.constant 1.000000e+00 : f32
    %793 = vector.broadcast %cst_262 : f32 to vector<8x128xf32>
    %794 = arith.addf %793, %792 : vector<8x128xf32>
    %795 = arith.divf %793, %794 : vector<8x128xf32>
    %796 = vector.extract_strided_slice %777 {offsets = [0, 384], sizes = [8, 128], strides = [1, 1]} : vector<8x640xf32> to vector<8x128xf32>
    %797 = arith.negf %796 : vector<8x128xf32>
    %798 = math.exp %797 : vector<8x128xf32>
    %cst_263 = arith.constant 1.000000e+00 : f32
    %799 = vector.broadcast %cst_263 : f32 to vector<8x128xf32>
    %800 = arith.addf %799, %798 : vector<8x128xf32>
    %801 = arith.divf %799, %800 : vector<8x128xf32>
    %802 = vector.extract_strided_slice %777 {offsets = [0, 512], sizes = [8, 128], strides = [1, 1]} : vector<8x640xf32> to vector<8x128xf32>
    %803 = math.tanh %802 : vector<8x128xf32>
    %804 = arith.mulf %783, %803 : vector<8x128xf32>
    %805 = vector.extract_strided_slice %774 {offsets = [0, 128], sizes = [8, 128], strides = [1, 1]} : vector<8x512xf32> to vector<8x128xf32>
    %806 = arith.mulf %789, %805 : vector<8x128xf32>
    %807 = arith.addf %804, %806 : vector<8x128xf32>
    %808 = vector.extract_strided_slice %774 {offsets = [0, 384], sizes = [8, 128], strides = [1, 1]} : vector<8x512xf32> to vector<8x128xf32>
    %809 = arith.mulf %795, %808 : vector<8x128xf32>
    %810 = arith.addf %807, %809 : vector<8x128xf32>
    %811 = math.tanh %810 : vector<8x128xf32>
    %812 = arith.mulf %801, %811 : vector<8x128xf32>
    %c8_i32_264 = arith.constant 8 : i32
    %813 = arith.muli %c4_i32_214, %c8_i32_264 : i32
    %c16_i32_265 = arith.constant 16 : i32
    %814 = arith.addi %c16_i32_265, %813 : i32
    %815 = tpu.assume_multiple %814, 8 : i32
    %816 = tpu.concatenate %812, %810 in 1 : vector<8x128xf32>, vector<8x128xf32> -> vector<8x256xf32>
    %817 = arith.index_cast %815 : i32 to index
    %c0_266 = arith.constant 0 : index
    %818 = vector.load %arg8[%817, %c0_266] : memref<72x256xf32, #tpu.memory_space<vmem>>, vector<8x256xf32>
    tpu.vector_store %arg8[%817, %c0_266], %816 {strides = array<i32>} : memref<72x256xf32, #tpu.memory_space<vmem>>, vector<8x256xf32>,
    %c5_i32_267 = arith.constant 5 : i32
    %c8_i32_268 = arith.constant 8 : i32
    %819 = arith.muli %c5_i32_267, %c8_i32_268 : i32
    %c0_i32_269 = arith.constant 0 : i32
    %820 = arith.addi %819, %c0_i32_269 : i32
    %821 = arith.index_cast %820 : i32 to index
    %822 = memref.load %arg1[%821] : memref<56xi32, #tpu.memory_space<smem>>
    %823 = arith.addi %819, %c0_i32_269 : i32
    %824 = arith.index_cast %823 : i32 to index
    %825 = memref.load %arg2[%824] : memref<56xi32, #tpu.memory_space<smem>>
    %826 = arith.index_cast %822 : i32 to index
    %c0_270 = arith.constant 0 : index
    %827 = vector.load %arg8[%826, %c0_270] : memref<72x256xf32, #tpu.memory_space<vmem>>, vector<1x256xf32>
    %828 = arith.index_cast %c0_i32_269 : i32 to index
    %c0_271 = arith.constant 0 : index
    %829 = vector.load %arg9[%828, %c0_271] : memref<8x512xf32, #tpu.memory_space<vmem>>, vector<1x256xf32>
    tpu.vector_store %arg9[%828, %c0_271], %827 {strides = array<i32>} : memref<8x512xf32, #tpu.memory_space<vmem>>, vector<1x256xf32>,
    %830 = arith.index_cast %825 : i32 to index
    %c0_272 = arith.constant 0 : index
    %831 = vector.load %arg8[%830, %c0_272] : memref<72x256xf32, #tpu.memory_space<vmem>>, vector<1x256xf32>
    %832 = arith.index_cast %c0_i32_269 : i32 to index
    %c256_273 = arith.constant 256 : index
    %833 = vector.load %arg9[%832, %c256_273] : memref<8x512xf32, #tpu.memory_space<vmem>>, vector<1x256xf32>
    tpu.vector_store %arg9[%832, %c256_273], %831 {strides = array<i32>} : memref<8x512xf32, #tpu.memory_space<vmem>>, vector<1x256xf32>,
    %c1_i32_274 = arith.constant 1 : i32
    %834 = arith.addi %819, %c1_i32_274 : i32
    %835 = arith.index_cast %834 : i32 to index
    %836 = memref.load %arg1[%835] : memref<56xi32, #tpu.memory_space<smem>>
    %837 = arith.addi %819, %c1_i32_274 : i32
    %838 = arith.index_cast %837 : i32 to index
    %839 = memref.load %arg2[%838] : memref<56xi32, #tpu.memory_space<smem>>
    %840 = arith.index_cast %836 : i32 to index
    %c0_275 = arith.constant 0 : index
    %841 = vector.load %arg8[%840, %c0_275] : memref<72x256xf32, #tpu.memory_space<vmem>>, vector<1x256xf32>
    %842 = arith.index_cast %c1_i32_274 : i32 to index
    %c0_276 = arith.constant 0 : index
    %843 = vector.load %arg9[%842, %c0_276] : memref<8x512xf32, #tpu.memory_space<vmem>>, vector<1x256xf32>
    tpu.vector_store %arg9[%842, %c0_276], %841 {strides = array<i32>} : memref<8x512xf32, #tpu.memory_space<vmem>>, vector<1x256xf32>,
    %844 = arith.index_cast %839 : i32 to index
    %c0_277 = arith.constant 0 : index
    %845 = vector.load %arg8[%844, %c0_277] : memref<72x256xf32, #tpu.memory_space<vmem>>, vector<1x256xf32>
    %846 = arith.index_cast %c1_i32_274 : i32 to index
    %c256_278 = arith.constant 256 : index
    %847 = vector.load %arg9[%846, %c256_278] : memref<8x512xf32, #tpu.memory_space<vmem>>, vector<1x256xf32>
    tpu.vector_store %arg9[%846, %c256_278], %845 {strides = array<i32>} : memref<8x512xf32, #tpu.memory_space<vmem>>, vector<1x256xf32>,
    %c2_i32_279 = arith.constant 2 : i32
    %848 = arith.addi %819, %c2_i32_279 : i32
    %849 = arith.index_cast %848 : i32 to index
    %850 = memref.load %arg1[%849] : memref<56xi32, #tpu.memory_space<smem>>
    %851 = arith.addi %819, %c2_i32_279 : i32
    %852 = arith.index_cast %851 : i32 to index
    %853 = memref.load %arg2[%852] : memref<56xi32, #tpu.memory_space<smem>>
    %854 = arith.index_cast %850 : i32 to index
    %c0_280 = arith.constant 0 : index
    %855 = vector.load %arg8[%854, %c0_280] : memref<72x256xf32, #tpu.memory_space<vmem>>, vector<1x256xf32>
    %856 = arith.index_cast %c2_i32_279 : i32 to index
    %c0_281 = arith.constant 0 : index
    %857 = vector.load %arg9[%856, %c0_281] : memref<8x512xf32, #tpu.memory_space<vmem>>, vector<1x256xf32>
    tpu.vector_store %arg9[%856, %c0_281], %855 {strides = array<i32>} : memref<8x512xf32, #tpu.memory_space<vmem>>, vector<1x256xf32>,
    %858 = arith.index_cast %853 : i32 to index
    %c0_282 = arith.constant 0 : index
    %859 = vector.load %arg8[%858, %c0_282] : memref<72x256xf32, #tpu.memory_space<vmem>>, vector<1x256xf32>
    %860 = arith.index_cast %c2_i32_279 : i32 to index
    %c256_283 = arith.constant 256 : index
    %861 = vector.load %arg9[%860, %c256_283] : memref<8x512xf32, #tpu.memory_space<vmem>>, vector<1x256xf32>
    tpu.vector_store %arg9[%860, %c256_283], %859 {strides = array<i32>} : memref<8x512xf32, #tpu.memory_space<vmem>>, vector<1x256xf32>,
    %c3_i32_284 = arith.constant 3 : i32
    %862 = arith.addi %819, %c3_i32_284 : i32
    %863 = arith.index_cast %862 : i32 to index
    %864 = memref.load %arg1[%863] : memref<56xi32, #tpu.memory_space<smem>>
    %865 = arith.addi %819, %c3_i32_284 : i32
    %866 = arith.index_cast %865 : i32 to index
    %867 = memref.load %arg2[%866] : memref<56xi32, #tpu.memory_space<smem>>
    %868 = arith.index_cast %864 : i32 to index
    %c0_285 = arith.constant 0 : index
    %869 = vector.load %arg8[%868, %c0_285] : memref<72x256xf32, #tpu.memory_space<vmem>>, vector<1x256xf32>
    %870 = arith.index_cast %c3_i32_284 : i32 to index
    %c0_286 = arith.constant 0 : index
    %871 = vector.load %arg9[%870, %c0_286] : memref<8x512xf32, #tpu.memory_space<vmem>>, vector<1x256xf32>
    tpu.vector_store %arg9[%870, %c0_286], %869 {strides = array<i32>} : memref<8x512xf32, #tpu.memory_space<vmem>>, vector<1x256xf32>,
    %872 = arith.index_cast %867 : i32 to index
    %c0_287 = arith.constant 0 : index
    %873 = vector.load %arg8[%872, %c0_287] : memref<72x256xf32, #tpu.memory_space<vmem>>, vector<1x256xf32>
    %874 = arith.index_cast %c3_i32_284 : i32 to index
    %c256_288 = arith.constant 256 : index
    %875 = vector.load %arg9[%874, %c256_288] : memref<8x512xf32, #tpu.memory_space<vmem>>, vector<1x256xf32>
    tpu.vector_store %arg9[%874, %c256_288], %873 {strides = array<i32>} : memref<8x512xf32, #tpu.memory_space<vmem>>, vector<1x256xf32>,
    %c4_i32_289 = arith.constant 4 : i32
    %876 = arith.addi %819, %c4_i32_289 : i32
    %877 = arith.index_cast %876 : i32 to index
    %878 = memref.load %arg1[%877] : memref<56xi32, #tpu.memory_space<smem>>
    %879 = arith.addi %819, %c4_i32_289 : i32
    %880 = arith.index_cast %879 : i32 to index
    %881 = memref.load %arg2[%880] : memref<56xi32, #tpu.memory_space<smem>>
    %882 = arith.index_cast %878 : i32 to index
    %c0_290 = arith.constant 0 : index
    %883 = vector.load %arg8[%882, %c0_290] : memref<72x256xf32, #tpu.memory_space<vmem>>, vector<1x256xf32>
    %884 = arith.index_cast %c4_i32_289 : i32 to index
    %c0_291 = arith.constant 0 : index
    %885 = vector.load %arg9[%884, %c0_291] : memref<8x512xf32, #tpu.memory_space<vmem>>, vector<1x256xf32>
    tpu.vector_store %arg9[%884, %c0_291], %883 {strides = array<i32>} : memref<8x512xf32, #tpu.memory_space<vmem>>, vector<1x256xf32>,
    %886 = arith.index_cast %881 : i32 to index
    %c0_292 = arith.constant 0 : index
    %887 = vector.load %arg8[%886, %c0_292] : memref<72x256xf32, #tpu.memory_space<vmem>>, vector<1x256xf32>
    %888 = arith.index_cast %c4_i32_289 : i32 to index
    %c256_293 = arith.constant 256 : index
    %889 = vector.load %arg9[%888, %c256_293] : memref<8x512xf32, #tpu.memory_space<vmem>>, vector<1x256xf32>
    tpu.vector_store %arg9[%888, %c256_293], %887 {strides = array<i32>} : memref<8x512xf32, #tpu.memory_space<vmem>>, vector<1x256xf32>,
    %c5_i32_294 = arith.constant 5 : i32
    %890 = arith.addi %819, %c5_i32_294 : i32
    %891 = arith.index_cast %890 : i32 to index
    %892 = memref.load %arg1[%891] : memref<56xi32, #tpu.memory_space<smem>>
    %893 = arith.addi %819, %c5_i32_294 : i32
    %894 = arith.index_cast %893 : i32 to index
    %895 = memref.load %arg2[%894] : memref<56xi32, #tpu.memory_space<smem>>
    %896 = arith.index_cast %892 : i32 to index
    %c0_295 = arith.constant 0 : index
    %897 = vector.load %arg8[%896, %c0_295] : memref<72x256xf32, #tpu.memory_space<vmem>>, vector<1x256xf32>
    %898 = arith.index_cast %c5_i32_294 : i32 to index
    %c0_296 = arith.constant 0 : index
    %899 = vector.load %arg9[%898, %c0_296] : memref<8x512xf32, #tpu.memory_space<vmem>>, vector<1x256xf32>
    tpu.vector_store %arg9[%898, %c0_296], %897 {strides = array<i32>} : memref<8x512xf32, #tpu.memory_space<vmem>>, vector<1x256xf32>,
    %900 = arith.index_cast %895 : i32 to index
    %c0_297 = arith.constant 0 : index
    %901 = vector.load %arg8[%900, %c0_297] : memref<72x256xf32, #tpu.memory_space<vmem>>, vector<1x256xf32>
    %902 = arith.index_cast %c5_i32_294 : i32 to index
    %c256_298 = arith.constant 256 : index
    %903 = vector.load %arg9[%902, %c256_298] : memref<8x512xf32, #tpu.memory_space<vmem>>, vector<1x256xf32>
    tpu.vector_store %arg9[%902, %c256_298], %901 {strides = array<i32>} : memref<8x512xf32, #tpu.memory_space<vmem>>, vector<1x256xf32>,
    %c6_i32_299 = arith.constant 6 : i32
    %904 = arith.addi %819, %c6_i32_299 : i32
    %905 = arith.index_cast %904 : i32 to index
    %906 = memref.load %arg1[%905] : memref<56xi32, #tpu.memory_space<smem>>
    %907 = arith.addi %819, %c6_i32_299 : i32
    %908 = arith.index_cast %907 : i32 to index
    %909 = memref.load %arg2[%908] : memref<56xi32, #tpu.memory_space<smem>>
    %910 = arith.index_cast %906 : i32 to index
    %c0_300 = arith.constant 0 : index
    %911 = vector.load %arg8[%910, %c0_300] : memref<72x256xf32, #tpu.memory_space<vmem>>, vector<1x256xf32>
    %912 = arith.index_cast %c6_i32_299 : i32 to index
    %c0_301 = arith.constant 0 : index
    %913 = vector.load %arg9[%912, %c0_301] : memref<8x512xf32, #tpu.memory_space<vmem>>, vector<1x256xf32>
    tpu.vector_store %arg9[%912, %c0_301], %911 {strides = array<i32>} : memref<8x512xf32, #tpu.memory_space<vmem>>, vector<1x256xf32>,
    %914 = arith.index_cast %909 : i32 to index
    %c0_302 = arith.constant 0 : index
    %915 = vector.load %arg8[%914, %c0_302] : memref<72x256xf32, #tpu.memory_space<vmem>>, vector<1x256xf32>
    %916 = arith.index_cast %c6_i32_299 : i32 to index
    %c256_303 = arith.constant 256 : index
    %917 = vector.load %arg9[%916, %c256_303] : memref<8x512xf32, #tpu.memory_space<vmem>>, vector<1x256xf32>
    tpu.vector_store %arg9[%916, %c256_303], %915 {strides = array<i32>} : memref<8x512xf32, #tpu.memory_space<vmem>>, vector<1x256xf32>,
    %c7_i32_304 = arith.constant 7 : i32
    %918 = arith.addi %819, %c7_i32_304 : i32
    %919 = arith.index_cast %918 : i32 to index
    %920 = memref.load %arg1[%919] : memref<56xi32, #tpu.memory_space<smem>>
    %921 = arith.addi %819, %c7_i32_304 : i32
    %922 = arith.index_cast %921 : i32 to index
    %923 = memref.load %arg2[%922] : memref<56xi32, #tpu.memory_space<smem>>
    %924 = arith.index_cast %920 : i32 to index
    %c0_305 = arith.constant 0 : index
    %925 = vector.load %arg8[%924, %c0_305] : memref<72x256xf32, #tpu.memory_space<vmem>>, vector<1x256xf32>
    %926 = arith.index_cast %c7_i32_304 : i32 to index
    %c0_306 = arith.constant 0 : index
    %927 = vector.load %arg9[%926, %c0_306] : memref<8x512xf32, #tpu.memory_space<vmem>>, vector<1x256xf32>
    tpu.vector_store %arg9[%926, %c0_306], %925 {strides = array<i32>} : memref<8x512xf32, #tpu.memory_space<vmem>>, vector<1x256xf32>,
    %928 = arith.index_cast %923 : i32 to index
    %c0_307 = arith.constant 0 : index
    %929 = vector.load %arg8[%928, %c0_307] : memref<72x256xf32, #tpu.memory_space<vmem>>, vector<1x256xf32>
    %930 = arith.index_cast %c7_i32_304 : i32 to index
    %c256_308 = arith.constant 256 : index
    %931 = vector.load %arg9[%930, %c256_308] : memref<8x512xf32, #tpu.memory_space<vmem>>, vector<1x256xf32>
    tpu.vector_store %arg9[%930, %c256_308], %929 {strides = array<i32>} : memref<8x512xf32, #tpu.memory_space<vmem>>, vector<1x256xf32>,
    %c8_i32_309 = arith.constant 8 : i32
    %c0_310 = arith.constant 0 : index
    %c0_311 = arith.constant 0 : index
    %932 = vector.load %arg9[%c0_310, %c0_311] : memref<8x512xf32, #tpu.memory_space<vmem>>, vector<8x512xf32>
    %933 = arith.truncf %932 : vector<8x512xf32> to vector<8x512xbf16>
    %cst_312 = arith.constant dense<0.000000e+00> : vector<8x640xf32>
    %934 = tpu.matmul %933, %25, %cst_312 {dimension_numbers = #tpu.dot_dimension_numbers<[1], [0], [0], [1], [0, 0, 1, 1], [], []>} : vector<8x512xbf16>, vector<512x640xbf16>, vector<8x640xf32> -> vector<8x640xf32>
    %935 = arith.addf %934, %28 : vector<8x640xf32>
    %936 = vector.extract_strided_slice %935 {offsets = [0, 0], sizes = [8, 128], strides = [1, 1]} : vector<8x640xf32> to vector<8x128xf32>
    %937 = arith.negf %936 : vector<8x128xf32>
    %938 = math.exp %937 : vector<8x128xf32>
    %cst_313 = arith.constant 1.000000e+00 : f32
    %939 = vector.broadcast %cst_313 : f32 to vector<8x128xf32>
    %940 = arith.addf %939, %938 : vector<8x128xf32>
    %941 = arith.divf %939, %940 : vector<8x128xf32>
    %942 = vector.extract_strided_slice %935 {offsets = [0, 128], sizes = [8, 128], strides = [1, 1]} : vector<8x640xf32> to vector<8x128xf32>
    %943 = arith.negf %942 : vector<8x128xf32>
    %944 = math.exp %943 : vector<8x128xf32>
    %cst_314 = arith.constant 1.000000e+00 : f32
    %945 = vector.broadcast %cst_314 : f32 to vector<8x128xf32>
    %946 = arith.addf %945, %944 : vector<8x128xf32>
    %947 = arith.divf %945, %946 : vector<8x128xf32>
    %948 = vector.extract_strided_slice %935 {offsets = [0, 256], sizes = [8, 128], strides = [1, 1]} : vector<8x640xf32> to vector<8x128xf32>
    %949 = arith.negf %948 : vector<8x128xf32>
    %950 = math.exp %949 : vector<8x128xf32>
    %cst_315 = arith.constant 1.000000e+00 : f32
    %951 = vector.broadcast %cst_315 : f32 to vector<8x128xf32>
    %952 = arith.addf %951, %950 : vector<8x128xf32>
    %953 = arith.divf %951, %952 : vector<8x128xf32>
    %954 = vector.extract_strided_slice %935 {offsets = [0, 384], sizes = [8, 128], strides = [1, 1]} : vector<8x640xf32> to vector<8x128xf32>
    %955 = arith.negf %954 : vector<8x128xf32>
    %956 = math.exp %955 : vector<8x128xf32>
    %cst_316 = arith.constant 1.000000e+00 : f32
    %957 = vector.broadcast %cst_316 : f32 to vector<8x128xf32>
    %958 = arith.addf %957, %956 : vector<8x128xf32>
    %959 = arith.divf %957, %958 : vector<8x128xf32>
    %960 = vector.extract_strided_slice %935 {offsets = [0, 512], sizes = [8, 128], strides = [1, 1]} : vector<8x640xf32> to vector<8x128xf32>
    %961 = math.tanh %960 : vector<8x128xf32>
    %962 = arith.mulf %941, %961 : vector<8x128xf32>
    %963 = vector.extract_strided_slice %932 {offsets = [0, 128], sizes = [8, 128], strides = [1, 1]} : vector<8x512xf32> to vector<8x128xf32>
    %964 = arith.mulf %947, %963 : vector<8x128xf32>
    %965 = arith.addf %962, %964 : vector<8x128xf32>
    %966 = vector.extract_strided_slice %932 {offsets = [0, 384], sizes = [8, 128], strides = [1, 1]} : vector<8x512xf32> to vector<8x128xf32>
    %967 = arith.mulf %953, %966 : vector<8x128xf32>
    %968 = arith.addf %965, %967 : vector<8x128xf32>
    %969 = math.tanh %968 : vector<8x128xf32>
    %970 = arith.mulf %959, %969 : vector<8x128xf32>
    %c8_i32_317 = arith.constant 8 : i32
    %971 = arith.muli %c5_i32_267, %c8_i32_317 : i32
    %c16_i32_318 = arith.constant 16 : i32
    %972 = arith.addi %c16_i32_318, %971 : i32
    %973 = tpu.assume_multiple %972, 8 : i32
    %974 = tpu.concatenate %970, %968 in 1 : vector<8x128xf32>, vector<8x128xf32> -> vector<8x256xf32>
    %975 = arith.index_cast %973 : i32 to index
    %c0_319 = arith.constant 0 : index
    %976 = vector.load %arg8[%975, %c0_319] : memref<72x256xf32, #tpu.memory_space<vmem>>, vector<8x256xf32>
    tpu.vector_store %arg8[%975, %c0_319], %974 {strides = array<i32>} : memref<72x256xf32, #tpu.memory_space<vmem>>, vector<8x256xf32>,
    %c6_i32_320 = arith.constant 6 : i32
    %c8_i32_321 = arith.constant 8 : i32
    %977 = arith.muli %c6_i32_320, %c8_i32_321 : i32
    %c0_i32_322 = arith.constant 0 : i32
    %978 = arith.addi %977, %c0_i32_322 : i32
    %979 = arith.index_cast %978 : i32 to index
    %980 = memref.load %arg1[%979] : memref<56xi32, #tpu.memory_space<smem>>
    %981 = arith.addi %977, %c0_i32_322 : i32
    %982 = arith.index_cast %981 : i32 to index
    %983 = memref.load %arg2[%982] : memref<56xi32, #tpu.memory_space<smem>>
    %984 = arith.index_cast %980 : i32 to index
    %c0_323 = arith.constant 0 : index
    %985 = vector.load %arg8[%984, %c0_323] : memref<72x256xf32, #tpu.memory_space<vmem>>, vector<1x256xf32>
    %986 = arith.index_cast %c0_i32_322 : i32 to index
    %c0_324 = arith.constant 0 : index
    %987 = vector.load %arg9[%986, %c0_324] : memref<8x512xf32, #tpu.memory_space<vmem>>, vector<1x256xf32>
    tpu.vector_store %arg9[%986, %c0_324], %985 {strides = array<i32>} : memref<8x512xf32, #tpu.memory_space<vmem>>, vector<1x256xf32>,
    %988 = arith.index_cast %983 : i32 to index
    %c0_325 = arith.constant 0 : index
    %989 = vector.load %arg8[%988, %c0_325] : memref<72x256xf32, #tpu.memory_space<vmem>>, vector<1x256xf32>
    %990 = arith.index_cast %c0_i32_322 : i32 to index
    %c256_326 = arith.constant 256 : index
    %991 = vector.load %arg9[%990, %c256_326] : memref<8x512xf32, #tpu.memory_space<vmem>>, vector<1x256xf32>
    tpu.vector_store %arg9[%990, %c256_326], %989 {strides = array<i32>} : memref<8x512xf32, #tpu.memory_space<vmem>>, vector<1x256xf32>,
    %c1_i32_327 = arith.constant 1 : i32
    %992 = arith.addi %977, %c1_i32_327 : i32
    %993 = arith.index_cast %992 : i32 to index
    %994 = memref.load %arg1[%993] : memref<56xi32, #tpu.memory_space<smem>>
    %995 = arith.addi %977, %c1_i32_327 : i32
    %996 = arith.index_cast %995 : i32 to index
    %997 = memref.load %arg2[%996] : memref<56xi32, #tpu.memory_space<smem>>
    %998 = arith.index_cast %994 : i32 to index
    %c0_328 = arith.constant 0 : index
    %999 = vector.load %arg8[%998, %c0_328] : memref<72x256xf32, #tpu.memory_space<vmem>>, vector<1x256xf32>
    %1000 = arith.index_cast %c1_i32_327 : i32 to index
    %c0_329 = arith.constant 0 : index
    %1001 = vector.load %arg9[%1000, %c0_329] : memref<8x512xf32, #tpu.memory_space<vmem>>, vector<1x256xf32>
    tpu.vector_store %arg9[%1000, %c0_329], %999 {strides = array<i32>} : memref<8x512xf32, #tpu.memory_space<vmem>>, vector<1x256xf32>,
    %1002 = arith.index_cast %997 : i32 to index
    %c0_330 = arith.constant 0 : index
    %1003 = vector.load %arg8[%1002, %c0_330] : memref<72x256xf32, #tpu.memory_space<vmem>>, vector<1x256xf32>
    %1004 = arith.index_cast %c1_i32_327 : i32 to index
    %c256_331 = arith.constant 256 : index
    %1005 = vector.load %arg9[%1004, %c256_331] : memref<8x512xf32, #tpu.memory_space<vmem>>, vector<1x256xf32>
    tpu.vector_store %arg9[%1004, %c256_331], %1003 {strides = array<i32>} : memref<8x512xf32, #tpu.memory_space<vmem>>, vector<1x256xf32>,
    %c2_i32_332 = arith.constant 2 : i32
    %1006 = arith.addi %977, %c2_i32_332 : i32
    %1007 = arith.index_cast %1006 : i32 to index
    %1008 = memref.load %arg1[%1007] : memref<56xi32, #tpu.memory_space<smem>>
    %1009 = arith.addi %977, %c2_i32_332 : i32
    %1010 = arith.index_cast %1009 : i32 to index
    %1011 = memref.load %arg2[%1010] : memref<56xi32, #tpu.memory_space<smem>>
    %1012 = arith.index_cast %1008 : i32 to index
    %c0_333 = arith.constant 0 : index
    %1013 = vector.load %arg8[%1012, %c0_333] : memref<72x256xf32, #tpu.memory_space<vmem>>, vector<1x256xf32>
    %1014 = arith.index_cast %c2_i32_332 : i32 to index
    %c0_334 = arith.constant 0 : index
    %1015 = vector.load %arg9[%1014, %c0_334] : memref<8x512xf32, #tpu.memory_space<vmem>>, vector<1x256xf32>
    tpu.vector_store %arg9[%1014, %c0_334], %1013 {strides = array<i32>} : memref<8x512xf32, #tpu.memory_space<vmem>>, vector<1x256xf32>,
    %1016 = arith.index_cast %1011 : i32 to index
    %c0_335 = arith.constant 0 : index
    %1017 = vector.load %arg8[%1016, %c0_335] : memref<72x256xf32, #tpu.memory_space<vmem>>, vector<1x256xf32>
    %1018 = arith.index_cast %c2_i32_332 : i32 to index
    %c256_336 = arith.constant 256 : index
    %1019 = vector.load %arg9[%1018, %c256_336] : memref<8x512xf32, #tpu.memory_space<vmem>>, vector<1x256xf32>
    tpu.vector_store %arg9[%1018, %c256_336], %1017 {strides = array<i32>} : memref<8x512xf32, #tpu.memory_space<vmem>>, vector<1x256xf32>,
    %c3_i32_337 = arith.constant 3 : i32
    %1020 = arith.addi %977, %c3_i32_337 : i32
    %1021 = arith.index_cast %1020 : i32 to index
    %1022 = memref.load %arg1[%1021] : memref<56xi32, #tpu.memory_space<smem>>
    %1023 = arith.addi %977, %c3_i32_337 : i32
    %1024 = arith.index_cast %1023 : i32 to index
    %1025 = memref.load %arg2[%1024] : memref<56xi32, #tpu.memory_space<smem>>
    %1026 = arith.index_cast %1022 : i32 to index
    %c0_338 = arith.constant 0 : index
    %1027 = vector.load %arg8[%1026, %c0_338] : memref<72x256xf32, #tpu.memory_space<vmem>>, vector<1x256xf32>
    %1028 = arith.index_cast %c3_i32_337 : i32 to index
    %c0_339 = arith.constant 0 : index
    %1029 = vector.load %arg9[%1028, %c0_339] : memref<8x512xf32, #tpu.memory_space<vmem>>, vector<1x256xf32>
    tpu.vector_store %arg9[%1028, %c0_339], %1027 {strides = array<i32>} : memref<8x512xf32, #tpu.memory_space<vmem>>, vector<1x256xf32>,
    %1030 = arith.index_cast %1025 : i32 to index
    %c0_340 = arith.constant 0 : index
    %1031 = vector.load %arg8[%1030, %c0_340] : memref<72x256xf32, #tpu.memory_space<vmem>>, vector<1x256xf32>
    %1032 = arith.index_cast %c3_i32_337 : i32 to index
    %c256_341 = arith.constant 256 : index
    %1033 = vector.load %arg9[%1032, %c256_341] : memref<8x512xf32, #tpu.memory_space<vmem>>, vector<1x256xf32>
    tpu.vector_store %arg9[%1032, %c256_341], %1031 {strides = array<i32>} : memref<8x512xf32, #tpu.memory_space<vmem>>, vector<1x256xf32>,
    %c4_i32_342 = arith.constant 4 : i32
    %1034 = arith.addi %977, %c4_i32_342 : i32
    %1035 = arith.index_cast %1034 : i32 to index
    %1036 = memref.load %arg1[%1035] : memref<56xi32, #tpu.memory_space<smem>>
    %1037 = arith.addi %977, %c4_i32_342 : i32
    %1038 = arith.index_cast %1037 : i32 to index
    %1039 = memref.load %arg2[%1038] : memref<56xi32, #tpu.memory_space<smem>>
    %1040 = arith.index_cast %1036 : i32 to index
    %c0_343 = arith.constant 0 : index
    %1041 = vector.load %arg8[%1040, %c0_343] : memref<72x256xf32, #tpu.memory_space<vmem>>, vector<1x256xf32>
    %1042 = arith.index_cast %c4_i32_342 : i32 to index
    %c0_344 = arith.constant 0 : index
    %1043 = vector.load %arg9[%1042, %c0_344] : memref<8x512xf32, #tpu.memory_space<vmem>>, vector<1x256xf32>
    tpu.vector_store %arg9[%1042, %c0_344], %1041 {strides = array<i32>} : memref<8x512xf32, #tpu.memory_space<vmem>>, vector<1x256xf32>,
    %1044 = arith.index_cast %1039 : i32 to index
    %c0_345 = arith.constant 0 : index
    %1045 = vector.load %arg8[%1044, %c0_345] : memref<72x256xf32, #tpu.memory_space<vmem>>, vector<1x256xf32>
    %1046 = arith.index_cast %c4_i32_342 : i32 to index
    %c256_346 = arith.constant 256 : index
    %1047 = vector.load %arg9[%1046, %c256_346] : memref<8x512xf32, #tpu.memory_space<vmem>>, vector<1x256xf32>
    tpu.vector_store %arg9[%1046, %c256_346], %1045 {strides = array<i32>} : memref<8x512xf32, #tpu.memory_space<vmem>>, vector<1x256xf32>,
    %c5_i32_347 = arith.constant 5 : i32
    %1048 = arith.addi %977, %c5_i32_347 : i32
    %1049 = arith.index_cast %1048 : i32 to index
    %1050 = memref.load %arg1[%1049] : memref<56xi32, #tpu.memory_space<smem>>
    %1051 = arith.addi %977, %c5_i32_347 : i32
    %1052 = arith.index_cast %1051 : i32 to index
    %1053 = memref.load %arg2[%1052] : memref<56xi32, #tpu.memory_space<smem>>
    %1054 = arith.index_cast %1050 : i32 to index
    %c0_348 = arith.constant 0 : index
    %1055 = vector.load %arg8[%1054, %c0_348] : memref<72x256xf32, #tpu.memory_space<vmem>>, vector<1x256xf32>
    %1056 = arith.index_cast %c5_i32_347 : i32 to index
    %c0_349 = arith.constant 0 : index
    %1057 = vector.load %arg9[%1056, %c0_349] : memref<8x512xf32, #tpu.memory_space<vmem>>, vector<1x256xf32>
    tpu.vector_store %arg9[%1056, %c0_349], %1055 {strides = array<i32>} : memref<8x512xf32, #tpu.memory_space<vmem>>, vector<1x256xf32>,
    %1058 = arith.index_cast %1053 : i32 to index
    %c0_350 = arith.constant 0 : index
    %1059 = vector.load %arg8[%1058, %c0_350] : memref<72x256xf32, #tpu.memory_space<vmem>>, vector<1x256xf32>
    %1060 = arith.index_cast %c5_i32_347 : i32 to index
    %c256_351 = arith.constant 256 : index
    %1061 = vector.load %arg9[%1060, %c256_351] : memref<8x512xf32, #tpu.memory_space<vmem>>, vector<1x256xf32>
    tpu.vector_store %arg9[%1060, %c256_351], %1059 {strides = array<i32>} : memref<8x512xf32, #tpu.memory_space<vmem>>, vector<1x256xf32>,
    %c6_i32_352 = arith.constant 6 : i32
    %1062 = arith.addi %977, %c6_i32_352 : i32
    %1063 = arith.index_cast %1062 : i32 to index
    %1064 = memref.load %arg1[%1063] : memref<56xi32, #tpu.memory_space<smem>>
    %1065 = arith.addi %977, %c6_i32_352 : i32
    %1066 = arith.index_cast %1065 : i32 to index
    %1067 = memref.load %arg2[%1066] : memref<56xi32, #tpu.memory_space<smem>>
    %1068 = arith.index_cast %1064 : i32 to index
    %c0_353 = arith.constant 0 : index
    %1069 = vector.load %arg8[%1068, %c0_353] : memref<72x256xf32, #tpu.memory_space<vmem>>, vector<1x256xf32>
    %1070 = arith.index_cast %c6_i32_352 : i32 to index
    %c0_354 = arith.constant 0 : index
    %1071 = vector.load %arg9[%1070, %c0_354] : memref<8x512xf32, #tpu.memory_space<vmem>>, vector<1x256xf32>
    tpu.vector_store %arg9[%1070, %c0_354], %1069 {strides = array<i32>} : memref<8x512xf32, #tpu.memory_space<vmem>>, vector<1x256xf32>,
    %1072 = arith.index_cast %1067 : i32 to index
    %c0_355 = arith.constant 0 : index
    %1073 = vector.load %arg8[%1072, %c0_355] : memref<72x256xf32, #tpu.memory_space<vmem>>, vector<1x256xf32>
    %1074 = arith.index_cast %c6_i32_352 : i32 to index
    %c256_356 = arith.constant 256 : index
    %1075 = vector.load %arg9[%1074, %c256_356] : memref<8x512xf32, #tpu.memory_space<vmem>>, vector<1x256xf32>
    tpu.vector_store %arg9[%1074, %c256_356], %1073 {strides = array<i32>} : memref<8x512xf32, #tpu.memory_space<vmem>>, vector<1x256xf32>,
    %c7_i32_357 = arith.constant 7 : i32
    %1076 = arith.addi %977, %c7_i32_357 : i32
    %1077 = arith.index_cast %1076 : i32 to index
    %1078 = memref.load %arg1[%1077] : memref<56xi32, #tpu.memory_space<smem>>
    %1079 = arith.addi %977, %c7_i32_357 : i32
    %1080 = arith.index_cast %1079 : i32 to index
    %1081 = memref.load %arg2[%1080] : memref<56xi32, #tpu.memory_space<smem>>
    %1082 = arith.index_cast %1078 : i32 to index
    %c0_358 = arith.constant 0 : index
    %1083 = vector.load %arg8[%1082, %c0_358] : memref<72x256xf32, #tpu.memory_space<vmem>>, vector<1x256xf32>
    %1084 = arith.index_cast %c7_i32_357 : i32 to index
    %c0_359 = arith.constant 0 : index
    %1085 = vector.load %arg9[%1084, %c0_359] : memref<8x512xf32, #tpu.memory_space<vmem>>, vector<1x256xf32>
    tpu.vector_store %arg9[%1084, %c0_359], %1083 {strides = array<i32>} : memref<8x512xf32, #tpu.memory_space<vmem>>, vector<1x256xf32>,
    %1086 = arith.index_cast %1081 : i32 to index
    %c0_360 = arith.constant 0 : index
    %1087 = vector.load %arg8[%1086, %c0_360] : memref<72x256xf32, #tpu.memory_space<vmem>>, vector<1x256xf32>
    %1088 = arith.index_cast %c7_i32_357 : i32 to index
    %c256_361 = arith.constant 256 : index
    %1089 = vector.load %arg9[%1088, %c256_361] : memref<8x512xf32, #tpu.memory_space<vmem>>, vector<1x256xf32>
    tpu.vector_store %arg9[%1088, %c256_361], %1087 {strides = array<i32>} : memref<8x512xf32, #tpu.memory_space<vmem>>, vector<1x256xf32>,
    %c8_i32_362 = arith.constant 8 : i32
    %c0_363 = arith.constant 0 : index
    %c0_364 = arith.constant 0 : index
    %1090 = vector.load %arg9[%c0_363, %c0_364] : memref<8x512xf32, #tpu.memory_space<vmem>>, vector<8x512xf32>
    %1091 = arith.truncf %1090 : vector<8x512xf32> to vector<8x512xbf16>
    %cst_365 = arith.constant dense<0.000000e+00> : vector<8x640xf32>
    %1092 = tpu.matmul %1091, %25, %cst_365 {dimension_numbers = #tpu.dot_dimension_numbers<[1], [0], [0], [1], [0, 0, 1, 1], [], []>} : vector<8x512xbf16>, vector<512x640xbf16>, vector<8x640xf32> -> vector<8x640xf32>
    %1093 = arith.addf %1092, %28 : vector<8x640xf32>
    %1094 = vector.extract_strided_slice %1093 {offsets = [0, 0], sizes = [8, 128], strides = [1, 1]} : vector<8x640xf32> to vector<8x128xf32>
    %1095 = arith.negf %1094 : vector<8x128xf32>
    %1096 = math.exp %1095 : vector<8x128xf32>
    %cst_366 = arith.constant 1.000000e+00 : f32
    %1097 = vector.broadcast %cst_366 : f32 to vector<8x128xf32>
    %1098 = arith.addf %1097, %1096 : vector<8x128xf32>
    %1099 = arith.divf %1097, %1098 : vector<8x128xf32>
    %1100 = vector.extract_strided_slice %1093 {offsets = [0, 128], sizes = [8, 128], strides = [1, 1]} : vector<8x640xf32> to vector<8x128xf32>
    %1101 = arith.negf %1100 : vector<8x128xf32>
    %1102 = math.exp %1101 : vector<8x128xf32>
    %cst_367 = arith.constant 1.000000e+00 : f32
    %1103 = vector.broadcast %cst_367 : f32 to vector<8x128xf32>
    %1104 = arith.addf %1103, %1102 : vector<8x128xf32>
    %1105 = arith.divf %1103, %1104 : vector<8x128xf32>
    %1106 = vector.extract_strided_slice %1093 {offsets = [0, 256], sizes = [8, 128], strides = [1, 1]} : vector<8x640xf32> to vector<8x128xf32>
    %1107 = arith.negf %1106 : vector<8x128xf32>
    %1108 = math.exp %1107 : vector<8x128xf32>
    %cst_368 = arith.constant 1.000000e+00 : f32
    %1109 = vector.broadcast %cst_368 : f32 to vector<8x128xf32>
    %1110 = arith.addf %1109, %1108 : vector<8x128xf32>
    %1111 = arith.divf %1109, %1110 : vector<8x128xf32>
    %1112 = vector.extract_strided_slice %1093 {offsets = [0, 384], sizes = [8, 128], strides = [1, 1]} : vector<8x640xf32> to vector<8x128xf32>
    %1113 = arith.negf %1112 : vector<8x128xf32>
    %1114 = math.exp %1113 : vector<8x128xf32>
    %cst_369 = arith.constant 1.000000e+00 : f32
    %1115 = vector.broadcast %cst_369 : f32 to vector<8x128xf32>
    %1116 = arith.addf %1115, %1114 : vector<8x128xf32>
    %1117 = arith.divf %1115, %1116 : vector<8x128xf32>
    %1118 = vector.extract_strided_slice %1093 {offsets = [0, 512], sizes = [8, 128], strides = [1, 1]} : vector<8x640xf32> to vector<8x128xf32>
    %1119 = math.tanh %1118 : vector<8x128xf32>
    %1120 = arith.mulf %1099, %1119 : vector<8x128xf32>
    %1121 = vector.extract_strided_slice %1090 {offsets = [0, 128], sizes = [8, 128], strides = [1, 1]} : vector<8x512xf32> to vector<8x128xf32>
    %1122 = arith.mulf %1105, %1121 : vector<8x128xf32>
    %1123 = arith.addf %1120, %1122 : vector<8x128xf32>
    %1124 = vector.extract_strided_slice %1090 {offsets = [0, 384], sizes = [8, 128], strides = [1, 1]} : vector<8x512xf32> to vector<8x128xf32>
    %1125 = arith.mulf %1111, %1124 : vector<8x128xf32>
    %1126 = arith.addf %1123, %1125 : vector<8x128xf32>
    %1127 = math.tanh %1126 : vector<8x128xf32>
    %1128 = arith.mulf %1117, %1127 : vector<8x128xf32>
    %c8_i32_370 = arith.constant 8 : i32
    %1129 = arith.muli %c6_i32_320, %c8_i32_370 : i32
    %c16_i32_371 = arith.constant 16 : i32
    %1130 = arith.addi %c16_i32_371, %1129 : i32
    %1131 = tpu.assume_multiple %1130, 8 : i32
    %1132 = tpu.concatenate %1128, %1126 in 1 : vector<8x128xf32>, vector<8x128xf32> -> vector<8x256xf32>
    %1133 = arith.index_cast %1131 : i32 to index
    %c0_372 = arith.constant 0 : index
    %1134 = vector.load %arg8[%1133, %c0_372] : memref<72x256xf32, #tpu.memory_space<vmem>>, vector<8x256xf32>
    tpu.vector_store %arg8[%1133, %c0_372], %1132 {strides = array<i32>} : memref<72x256xf32, #tpu.memory_space<vmem>>, vector<8x256xf32>,
    %c7_i32_373 = arith.constant 7 : i32
    return
  }
  func.func @transform_0(%arg0: i32, %arg1: memref<56xi32, #tpu.memory_space<smem>>, %arg2: memref<56xi32, #tpu.memory_space<smem>>) -> (i32, i32) {
    %c0_i32 = arith.constant 0 : i32
    %c0_i32_0 = arith.constant 0 : i32
    %c0_i32_1 = arith.constant 0 : i32
    return %c0_i32, %c0_i32_0 : i32, i32
  }
  func.func @transform_1(%arg0: i32, %arg1: memref<56xi32, #tpu.memory_space<smem>>, %arg2: memref<56xi32, #tpu.memory_space<smem>>) -> (i32, i32) {
    %c0_i32 = arith.constant 0 : i32
    %c0_i32_0 = arith.constant 0 : i32
    %c0_i32_1 = arith.constant 0 : i32
    return %c0_i32, %c0_i32_0 : i32, i32
  }
  func.func @transform_2(%arg0: i32, %arg1: memref<56xi32, #tpu.memory_space<smem>>, %arg2: memref<56xi32, #tpu.memory_space<smem>>) -> (i32, i32) {
    %c0_i32 = arith.constant 0 : i32
    %c0_i32_0 = arith.constant 0 : i32
    %c0_i32_1 = arith.constant 0 : i32
    return %c0_i32, %c0_i32_0 : i32, i32
  }
  func.func @transform_3(%arg0: i32, %arg1: memref<56xi32, #tpu.memory_space<smem>>, %arg2: memref<56xi32, #tpu.memory_space<smem>>) -> (i32, i32) {
    %c0_i32 = arith.constant 0 : i32
    %c0_i32_0 = arith.constant 0 : i32
    %c0_i32_1 = arith.constant 0 : i32
    return %c0_i32, %c0_i32_0 : i32, i32
  }
  func.func @transform_4(%arg0: i32, %arg1: memref<56xi32, #tpu.memory_space<smem>>, %arg2: memref<56xi32, #tpu.memory_space<smem>>) -> (i32, i32) {
    %c0_i32 = arith.constant 0 : i32
    %c0_i32_0 = arith.constant 0 : i32
    %c0_i32_1 = arith.constant 0 : i32
    return %c0_i32, %c0_i32_0 : i32, i32
  }
  func.func @transform_5(%arg0: i32, %arg1: memref<56xi32, #tpu.memory_space<smem>>, %arg2: memref<56xi32, #tpu.memory_space<smem>>) -> (i32, i32) {
    %c0_i32 = arith.constant 0 : i32
    %c0_i32_0 = arith.constant 0 : i32
    %c0_i32_1 = arith.constant 0 : i32
    return %c0_i32, %c0_i32_0 : i32, i32
  }
}

</mosaic_0001>

<bundles_post_ra>
// kernel: _tree_lstm_jit.1
= control target key start
LH: loop header
LB: loop body
LE: loop exit
PB: predicated region body
PF: predicated region fallthrough
CT: control target
= control target key end

     0   :  { %s13137_s0 = inlined_call_operand.vmem [shape: s32[56], index: 0, kind: input, shape index: {}]   ;;  %s13138_s2 = inlined_call_operand.vmem [shape: bf16[16,128], index: 2, kind: input, shape index: {}]   ;;  %s13139_s3 = inlined_call_operand.vmem [shape: bf16[128,384], index: 3, kind: input, shape index: {}]   ;;  %s13140_s4 = inlined_call_operand.vmem [shape: bf16[512,640], index: 4, kind: input, shape index: {}]   ;;  %s13141_s5 = inlined_call_operand.vmem [shape: f32[1,384], index: 5, kind: input, shape index: {}]   ;;  %s13142_s6 = inlined_call_operand.vmem [shape: f32[1,640], index: 6, kind: input, shape index: {}]   ;;  %s13143_s7 = inlined_call_operand.vmem [shape: f32[72,256], index: 7, kind: output, shape index: {}]   ;;  %s13144_s1 = inlined_call_operand.vmem [shape: s32[56], index: 1, kind: input, shape index: {}]  }
   0x1   :  { %13492 = sst [smem:[#allocation115_spill]] %s13140_s4  ;;  %s12_s26 = sshll.u32 %s13137_s0, 4  ;;  %s13_s26 = int_to_ptr.vmem [resolvable:$true] %s12_s26 }
   0x2   :  { %13493 = sst [smem:[#allocation116_spill]] %s13142_s6  ;;  %s16_s29 = sshll.u32 %s13144_s1, 4  ;;  %s17_s29 = int_to_ptr.vmem [resolvable:$true] %s16_s29 }
   0x3   :  { %s7126_s30 = scalar_lea.vmem %s13_s26, 16  ;;  %p7131_p1 = scmp.lt.s32.totalorder %s13_s26, %s13_s26 }
   0x4   :  { %p7127_p0 = scmp.ne.s32.totalorder %s13_s26, %s7126_s30  ;;  %p7132_p2 = scmp.lt.s32.totalorder %s7126_s30, %s7126_s30 }
   0x6   :  { %p7133_p3 = por %p7132_p2, %p7131_p1 }
   0x8   :  { %p7134_p4 = pnand %p7133_p3, %p7127_p0 }
   0xa   :  { %7137 = shalt.err (!%p7134_p4)  }
   0xb   :  { %s7152_s8 = smov [#allocation4]   ;;  %s7138_s9 = scalar_lea.vmem %s17_s29, 16 }
   0xc   :  { %15 = dma.vmem_to_smem %s13_s26, 16, %s7152_s8, [#allocation3] }
   0xd   :  { %p7139_p5 = scmp.ne.s32.totalorder %s17_s29, %s7138_s9  ;;  %p7143_p6 = scmp.lt.s32.totalorder %s17_s29, %s17_s29 }
   0xe   :  { %p7144_p7 = scmp.lt.s32.totalorder %s7138_s9, %s7138_s9 }
  0x10   :  { %p7145_p8 = por %p7144_p7, %p7143_p6 }
  0x12   :  { %p7146_p9 = pnand %p7145_p8, %p7139_p5 }
  0x14   :  { %7149 = shalt.err (!%p7146_p9)  }
  0x15   :  { %s7153_s0 = smov [#allocation5]  }
  0x16   :  { %19 = dma.vmem_to_smem %s17_s29, 16, %s7153_s0, [#allocation3] }
  0x17   :  { %7150 = dma.done.wait [#allocation3], 32 }
  0x18   :  { %7151 = vsyncadd [#allocation3], 4294967264 }
  0x19   :  { %21 = sfence }
  0x1a   :  { %v6225_v0 = vld [vmem:[%s13139_s3 + $0x4] ss:$12 sps:$4 sm:$0xff]   ;;  %v6227_v1 = vld [vmem:[%s13139_s3] ss:$12 sps:$4 sm:$0xff]   ;;  %v7154_v2 = vmov 0.0   ;;  %v7155_v3 = vmov 0  }
  0x1b   :  { %6116 = vmatprep.subr.bf16.mxu1 %v7154_v2  ;;  %250 = vmatprep.mubr.bf16.mxu0 %v7155_v3  ;;  %v6228_v4 = vld [vmem:[%s13139_s3 + $0x1c] ss:$12 sps:$4 sm:$0xff]   ;;  %vm7156_vm0 = vmmov 0   ;;  %v6230_v5 = vld [vmem:[%s13139_s3 + $0x18] ss:$12 sps:$4 sm:$0xff]   ;;  %s7612_s0 = sld [smem:[#allocation4]] }
  0x1c   :  { %218 = vmatprep.subr.bf16.mxu0 %v6225_v0  ;;  %6132 = vmatprep.mubr.msk.bf16.mxu1 %vm7156_vm0, %v7154_v2  ;;  %v6231_v6 = vld [vmem:[%s13139_s3 + $0x34] ss:$12 sps:$4 sm:$0xff]   ;;  %v6233_v8 = vld [vmem:[%s13139_s3 + $0x30] ss:$12 sps:$4 sm:$0xff]   ;;  %v6234_v9 = vld [vmem:[%s13139_s3 + $0x4c] ss:$12 sps:$4 sm:$0xff]  }
  0x1d   :  { %219 = vmatpush1.bf16.msra.mxu0 %v6227_v1  ;;  %v6237_v7 = vld [vmem:[%s13139_s3 + $0x8] ss:$12 sps:$4 sm:$0xff]   ;;  %v6241_v10 = vld [vmem:[%s13139_s3 + $0x20] ss:$12 sps:$4 sm:$0xff]   ;;  %v6238_v12 = vld [vmem:[%s13139_s3 + $0x64] ss:$12 sps:$4 sm:$0xff]  }
  0x1e   :  { %220 = vmatprep.subr.bf16.mxu0 %v6228_v4  ;;  %6117 = vmatpush3.bf16.msra.mxu1 %v6237_v7  ;;  %v6236_v11 = vld [vmem:[%s13139_s3 + $0x48] ss:$12 sps:$4 sm:$0xff]   ;;  %v6245_v13 = vld [vmem:[%s13139_s3 + $0x38] ss:$12 sps:$4 sm:$0xff]   ;;  %v6240_v14 = vld [vmem:[%s13139_s3 + $0x60] ss:$12 sps:$4 sm:$0xff]  }
  0x1f   :  { %6118 = vmatprep.subr.bf16.mxu1 %v7154_v2  ;;  %v6242_v15 = vld [vmem:[%s13139_s3 + $0x7c] ss:$12 sps:$4 sm:$0xff]   ;;  %v6244_v17 = vld [vmem:[%s13139_s3 + $0x78] ss:$12 sps:$4 sm:$0xff]   ;;  %v6246_v18 = vld [vmem:[%s13139_s3 + $0x94] ss:$12 sps:$4 sm:$0xff]  }
  0x20   :  { %v6249_v16 = vld [vmem:[%s13139_s3 + $0x50] ss:$12 sps:$4 sm:$0xff]   ;;  %v6253_v19 = vld [vmem:[%s13139_s3 + $0x68] ss:$12 sps:$4 sm:$0xff]   ;;  %v6250_v21 = vld [vmem:[%s13139_s3 + $0xac] ss:$12 sps:$4 sm:$0xff]  }
  0x21   :  { %221 = vmatpush1.bf16.msra.mxu0 %v6230_v5  ;;  %v6248_v20 = vld [vmem:[%s13139_s3 + $0x90] ss:$12 sps:$4 sm:$0xff]   ;;  %v6255_v22 = vld [vmem:[%s13139_s3 + $0x80] ss:$12 sps:$4 sm:$0xff]   ;;  %v6252_v23 = vld [vmem:[%s13139_s3 + $0xa8] ss:$12 sps:$4 sm:$0xff]  }
  0x22   :  { %222 = vmatprep.subr.bf16.mxu0 %v6231_v6  ;;  %6119 = vmatpush3.bf16.msra.mxu1 %v6241_v10  ;;  %v6256_v24 = vld [vmem:[%s13139_s3 + $0x98] ss:$12 sps:$4 sm:$0xff]   ;;  %v6257_v26 = vld [vmem:[%s13139_s3 + $0xb0] ss:$12 sps:$4 sm:$0xff]   ;;  %v6260_v28 = vld [vmem:[%s13140_s4 + $0xc] ss:$20 sps:$4 sm:$0xff]  }
  0x23   :  { %6120 = vmatprep.subr.bf16.mxu1 %v7154_v2  ;;  %v6254_v25 = vld [vmem:[%s13138_s2] sm:$0xff]   ;;  %v6263_v30 = vld [vmem:[%s13140_s4 + $0x8] ss:$20 sps:$4 sm:$0xff]   ;;  %v6275_v38 = vld [vmem:[%s13140_s4 + $0x58] ss:$20 sps:$4 sm:$0xff]   ;;  %s7616_s1 = sld [smem:[#allocation4 + $0x1]] }
  0x24   :  { %v6258_v27 = vld [vmem:[%s13140_s4 + $0x4] ss:$20 sps:$4 sm:$0xff]   ;;  %v6262_v29 = vld [vmem:[%s13140_s4] ss:$20 sps:$4 sm:$0xff]   ;;  %v6268_v33 = vld [vmem:[%s13140_s4 + $0x28] ss:$20 sps:$4 sm:$0xff]  }
  0x25   :  { %223 = vmatpush1.bf16.msra.mxu0 %v6233_v8  ;;  %v6264_v31 = vld [vmem:[%s13140_s4 + $0x2c] ss:$20 sps:$4 sm:$0xff]   ;;  %v6266_v32 = vld [vmem:[%s13140_s4 + $0x34] ss:$20 sps:$4 sm:$0xff]   ;;  %v6269_v34 = vld [vmem:[%s13140_s4 + $0x30] ss:$20 sps:$4 sm:$0xff]  }
  0x26   :  { %224 = vmatprep.subr.bf16.mxu0 %v6234_v9  ;;  %6121 = vmatpush3.bf16.msra.mxu1 %v6245_v13  ;;  %v6270_v35 = vld [vmem:[%s13140_s4 + $0x54] ss:$20 sps:$4 sm:$0xff]   ;;  %v6272_v36 = vld [vmem:[%s13140_s4 + $0x5c] ss:$20 sps:$4 sm:$0xff]   ;;  %v6278_v40 = vld [vmem:[%s13140_s4 + $0x84] ss:$20 sps:$4 sm:$0xff]  }
  0x27   :  { %6122 = vmatprep.subr.bf16.mxu1 %v7154_v2  ;;  %v6274_v37 = vld [vmem:[%s13140_s4 + $0x50] ss:$20 sps:$4 sm:$0xff]   ;;  %v6280_v41 = vld [vmem:[%s13140_s4 + $0x78] ss:$20 sps:$4 sm:$0xff]   ;;  %v6281_v42 = vld [vmem:[%s13140_s4 + $0x80] ss:$20 sps:$4 sm:$0xff]  }
  0x28   :  { %v6276_v39 = vld [vmem:[%s13140_s4 + $0x7c] ss:$20 sps:$4 sm:$0xff]   ;;  %v6282_v43 = vld [vmem:[%s13140_s4 + $0xa4] ss:$20 sps:$4 sm:$0xff]   ;;  %v6284_v44 = vld [vmem:[%s13140_s4 + $0xac] ss:$20 sps:$4 sm:$0xff]  }
  0x29   :  { %225 = vmatpush1.bf16.msra.mxu0 %v6236_v11  ;;  %v6286_v45 = vld [vmem:[%s13140_s4 + $0xa0] ss:$20 sps:$4 sm:$0xff]   ;;  %v6287_v46 = vld [vmem:[%s13140_s4 + $0xa8] ss:$20 sps:$4 sm:$0xff]   ;;  %v6293_v50 = vld [vmem:[%s13140_s4 + $0xd0] ss:$20 sps:$4 sm:$0xff]  }
  0x2a   :  { %226 = vmatprep.subr.bf16.mxu0 %v6238_v12  ;;  %6123 = vmatpush3.bf16.msra.mxu1 %v6249_v16  ;;  %v6288_v47 = vld [vmem:[%s13140_s4 + $0xcc] ss:$20 sps:$4 sm:$0xff]   ;;  %v6290_v48 = vld [vmem:[%s13140_s4 + $0xd4] ss:$20 sps:$4 sm:$0xff]   ;;  %v7358_v52 = vld [vmem:[%s13140_s4 + $0xfc] ss:$20 sps:$4 sm:$0xff]  }
  0x2b   :  { %6124 = vmatprep.subr.bf16.mxu1 %v7154_v2  ;;  %v6292_v49 = vld [vmem:[%s13140_s4 + $0xc8] ss:$20 sps:$4 sm:$0xff]   ;;  %v7363_v53 = vld [vmem:[%s13140_s4 + $0xf0] ss:$20 sps:$4 sm:$0xff]   ;;  %v7368_v54 = vld [vmem:[%s13140_s4 + $0xf8] ss:$20 sps:$4 sm:$0xff]  }
  0x2c   :  { %v7353_v51 = vld [vmem:[%s13140_s4 + $0xf4] ss:$20 sps:$4 sm:$0xff]   ;;  %v7377_v55 = vld [vmem:[%s13140_s4 + $0x11c] ss:$20 sps:$4 sm:$0xff]   ;;  %v7382_v56 = vld [vmem:[%s13140_s4 + $0x124] ss:$20 sps:$4 sm:$0xff]  }
  0x2d   :  { %227 = vmatpush1.bf16.msra.mxu0 %v6240_v14  ;;  %v7387_v57 = vld [vmem:[%s13140_s4 + $0x118] ss:$20 sps:$4 sm:$0xff]   ;;  %v7392_v58 = vld [vmem:[%s13140_s4 + $0x120] ss:$20 sps:$4 sm:$0xff]   ;;  %v7416_v62 = vld [vmem:[%s13140_s4 + $0x148] ss:$20 sps:$4 sm:$0xff]  }
  0x2e   :  { %228 = vmatprep.subr.bf16.mxu0 %v6242_v15  ;;  %6125 = vmatpush3.bf16.msra.mxu1 %v6253_v19  ;;  %v7401_v59 = vld [vmem:[%s13140_s4 + $0x144] ss:$20 sps:$4 sm:$0xff]   ;;  %v7406_v60 = vld [vmem:[%s13140_s4 + $0x14c] ss:$20 sps:$4 sm:$0xff]   ;;  %v7430_v0 = vld [vmem:[%s13140_s4 + $0x174] ss:$20 sps:$4 sm:$0xff]  }
  0x2f   :  { %6126 = vmatprep.subr.bf16.mxu1 %v7154_v2  ;;  %v7411_v61 = vld [vmem:[%s13140_s4 + $0x140] ss:$20 sps:$4 sm:$0xff]   ;;  %v7435_v1 = vld [vmem:[%s13140_s4 + $0x168] ss:$20 sps:$4 sm:$0xff]   ;;  %v7459_v5 = vld [vmem:[%s13140_s4 + $0x190] ss:$20 sps:$4 sm:$0xff]  }
  0x30   :  { %v7425_v63 = vld [vmem:[%s13140_s4 + $0x16c] ss:$20 sps:$4 sm:$0xff]   ;;  %v7449_v3 = vld [vmem:[%s13140_s4 + $0x194] ss:$20 sps:$4 sm:$0xff]   ;;  %v7454_v4 = vld [vmem:[%s13140_s4 + $0x19c] ss:$20 sps:$4 sm:$0xff]  }
  0x31   :  { %229 = vmatpush1.bf16.msra.mxu0 %v6244_v17  ;;  %v7464_v6 = vld [vmem:[%s13140_s4 + $0x198] ss:$20 sps:$4 sm:$0xff]   ;;  %v7473_v7 = vld [vmem:[%s13140_s4 + $0x1bc] ss:$20 sps:$4 sm:$0xff]   ;;  %v7488_v10 = vld [vmem:[%s13140_s4 + $0x1c0] ss:$20 sps:$4 sm:$0xff]  }
  0x32   :  { %230 = vmatprep.subr.bf16.mxu0 %v6246_v18  ;;  %6127 = vmatpush3.bf16.msra.mxu1 %v6255_v22  ;;  %v7478_v8 = vld [vmem:[%s13140_s4 + $0x1c4] ss:$20 sps:$4 sm:$0xff]   ;;  %v7502_v12 = vld [vmem:[%s13140_s4 + $0x1ec] ss:$20 sps:$4 sm:$0xff]   ;;  %v7512_v14 = vld [vmem:[%s13140_s4 + $0x1e8] ss:$20 sps:$4 sm:$0xff]  }
  0x33   :  { %6128 = vmatprep.subr.bf16.mxu1 %v7154_v2  ;;  %v7483_v9 = vld [vmem:[%s13140_s4 + $0x1b8] ss:$20 sps:$4 sm:$0xff]   ;;  %v7507_v13 = vld [vmem:[%s13140_s4 + $0x1e0] ss:$20 sps:$4 sm:$0xff]   ;;  %v7531_v17 = vld [vmem:[%s13140_s4 + $0x208] ss:$20 sps:$4 sm:$0xff]  }
  0x34   :  { %v7497_v11 = vld [vmem:[%s13140_s4 + $0x1e4] ss:$20 sps:$4 sm:$0xff]   ;;  %v7517_v15 = vld [vmem:[%s13140_s4 + $0x20c] ss:$20 sps:$4 sm:$0xff]   ;;  %v7522_v16 = vld [vmem:[%s13140_s4 + $0x214] ss:$20 sps:$4 sm:$0xff]  }
  0x35   :  { %231 = vmatpush1.bf16.msra.mxu0 %v6248_v20  ;;  %v7536_v18 = vld [vmem:[%s13140_s4 + $0x210] ss:$20 sps:$4 sm:$0xff]   ;;  %v7543_v19 = vld [vmem:[%s13140_s4 + $0x234] ss:$20 sps:$4 sm:$0xff]   ;;  %v7560_v22 = vld [vmem:[%s13140_s4 + $0x238] ss:$20 sps:$4 sm:$0xff]  }
  0x36   :  { %232 = vmatprep.subr.bf16.mxu0 %v6250_v21  ;;  %6129 = vmatpush3.bf16.msra.mxu1 %v6256_v24  ;;  %v7548_v20 = vld [vmem:[%s13140_s4 + $0x23c] ss:$20 sps:$4 sm:$0xff]   ;;  %v7572_v24 = vld [vmem:[%s13140_s4 + $0x264] ss:$20 sps:$4 sm:$0xff]   ;;  %s588_s10 = sshra.s32 %s7616_s1, 3  ;;  %s7623_s11 = sld [smem:[#allocation4 + $0x2]] }
  0x37   :  { %6130 = vmatprep.subr.bf16.mxu1 %v7154_v2  ;;  %v7440_v2 = vld [vmem:[%s13140_s4 + $0x170] ss:$20 sps:$4 sm:$0xff]   ;;  %s7625_s12 = sld [smem:[#allocation4 + $0x3]]  ;;  %s7627_s2 = sld [smem:[#allocation4 + $0x4]] }
  0x38   :  { %v7555_v21 = vld [vmem:[%s13140_s4 + $0x230] ss:$20 sps:$4 sm:$0xff]   ;;  %s562_s13 = sand.u32 7, %s7612_s0  ;;  %s591_s3 = sand.u32 7, %s7616_s1 }
  0x39   :  { %233 = vmatpush1.bf16.msra.mxu0 %v6252_v23  ;;  %v7567_v23 = vld [vmem:[%s13140_s4 + $0x25c] ss:$20 sps:$4 sm:$0xff]   ;;  %s5689_s15 = sshll.u32 %s588_s10, 4  ;;  %s7635_s18 = sld [smem:[#allocation4 + $0x5]] }
  0x3a   :  { %6131 = vmatpush3.bf16.msra.mxu1 %v6257_v26  ;;  %1608 = vmatprep.subr.bf16.mxu0 %v6258_v27  ;;  %v7584_v26 = vld [vmem:[%s13140_s4 + $0x260] ss:$20 sps:$4 sm:$0xff]   ;;  %v7593_v27 = vld [vmem:[%s13140_s4 + $0x284] ss:$20 sps:$4 sm:$0xff]   ;;  %s7633_s17 = sadd.s32 %s5689_s15, %s591_s3  ;;  %s7650_s9 = sld [smem:[#allocation4 + $0x6]] }
  0x3b   :  { %1690 = vmatprep.subr.bf16.mxu1 %v6260_v28  ;;  %v7598_v28 = vld [vmem:[%s13140_s4 + $0x28c] ss:$20 sps:$4 sm:$0xff]   ;;  %s7655_s10 = sld [smem:[#allocation4 + $0x7]]  ;;  %s7668_s19 = sld [smem:[#allocation5 + $0x1]] }
  0x3c   :  { %251 = vmatmul.mubr.bf16.vlgmr.msra.gmra.mrb[0].mxu0 %v6254_v25  ;;  %s614_s22 = sshra.s32 %s7623_s11, 3  ;;  %s617_s27 = sand.u32 7, %s7623_s11 }
  0x3d   :  { %6133 = vmatmul.mubr.bf16.vlgmr.msra.gmra.mrb[0].mxu1 %v6254_v25  ;;  %1609 = vmatpush1.bf16.msra.mxu0 %v6262_v29  ;;  %v7579_v25 = vld [vmem:[%s13140_s4 + $0x258] ss:$20 sps:$4 sm:$0xff]   ;;  %v69_v29 = vlaneseq  ;;  %s640_s26 = sshra.s32 %s7625_s12, 3  ;;  %s666_s28 = sshra.s32 %s7627_s2, 3 }
  0x3e   :  { %1691 = vmatpush1.bf16.msra.mxu1 %v6263_v30  ;;  %1610 = vmatprep.subr.bf16.mxu0 %v6264_v31  ;;  %s5691_s29 = sshll.u32 %s614_s22, 4  ;;  %s643_s30 = sand.u32 7, %s7625_s12 }
  0x3f   :  { %1692 = vmatprep.subr.bf16.mxu1 %v6266_v32  ;;  %v7603_v30 = vshrl.u32 %v69_v29, 7  ;;  %v67_v32 = vld [vmem:[%s13141_s5] sm:$0x7]  ;;  %s559_s5 = sshra.s32 %s7612_s0, 3  ;;  %s5693_s8 = sshll.u32 %s640_s26, 4  ;;  %vm7753_vm1 = vcmp.lt.s32.totalorder %v69_v29, 256 }
  0x40   :  { %s5687_s14 = sshll.u32 %s559_s5, 4  ;;  %s669_s0 = sand.u32 7, %s7627_s2 }
  0x41   :  { %1611 = vmatpush1.bf16.msra.mxu0 %v6268_v33  ;;  %v13152_v31 = vsub.s32 0, %v7603_v30  ;;  %s7631_s16 = sadd.s32 %s5687_s14, %s562_s13  ;;  %s5695_s1 = sshll.u32 %s666_s28, 4 }
  0x42   :  { %1693 = vmatpush1.bf16.msra.mxu1 %v6269_v34  ;;  %1612 = vmatprep.subr.bf16.mxu0 %v6270_v35  ;;  %v13151_v34 = vsub.s32 1, %v7603_v30  ;;  %s7653_s5 = sadd.s32 %s5691_s29, %s617_s27  ;;  %s7657_s13 = sadd.s32 %s5693_s8, %s643_s30 }
  0x43   :  { %1694 = vmatprep.subr.bf16.mxu1 %v6272_v36  ;;  %v72_v33 = vrot.slane %v67_v32, %v13152_v31  ;;  %s692_s11 = sshra.s32 %s7635_s18, 3  ;;  %s7660_s14 = sadd.s32 %s5695_s1, %s669_s0 }
  0x44   :  { %s7662_s12 = sld [smem:[#allocation5]]  ;;  %s695_s20 = sand.u32 7, %s7635_s18 }
  0x45   :  { %1613 = vmatpush1.bf16.msra.mxu0 %v6274_v37  ;;  %v76_v37 = vrot.slane %v67_v32, %v13151_v34  ;;  %s5697_s22 = sshll.u32 %s692_s11, 4  ;;  %s718_s30 = sshra.s32 %s7650_s9, 3 }
  0x46   :  { %1695 = vmatpush1.bf16.msra.mxu1 %v6275_v38  ;;  %1614 = vmatprep.subr.bf16.mxu0 %v6276_v39  ;;  %s7680_s8 = sld [smem:[#allocation5 + $0x2]]  ;;  %s7682_s18 = sadd.s32 %s5697_s22, %s695_s20 }
  0x47   :  { %1696 = vmatprep.subr.bf16.mxu1 %v6278_v40  ;;  %s7684_s0 = sld [smem:[#allocation5 + $0x3]]  ;;  %s744_s2 = sshra.s32 %s7655_s10, 3 }
  0x48   :  { %s7690_s3 = sld [smem:[#allocation5 + $0x4]]  ;;  %s721_s23 = sand.u32 7, %s7650_s9 }
  0x49   :  { %1615 = vmatpush1.bf16.msra.mxu0 %v6280_v41  ;;  %s5699_s24 = sshll.u32 %s718_s30, 4  ;;  %s747_s11 = sand.u32 7, %s7655_s10 }
  0x4a   :  { %1697 = vmatpush1.bf16.msra.mxu1 %v6281_v42  ;;  %1616 = vmatprep.subr.bf16.mxu0 %v6282_v43  ;;  %v13150_v43 = vsub.s32 2, %v7603_v30  ;;  %s574_s1 = sshra.s32 %s7662_s12, 3  ;;  %s5701_s26 = sshll.u32 %s744_s2, 4 }
  0x4b   :  { %1698 = vmatprep.subr.bf16.mxu1 %v6284_v44  ;;  %s7702_s15 = sadd.s32 %s5699_s24, %s721_s23  ;;  %s600_s25 = sshra.s32 %s7668_s19, 3 }
  0x4c   :  { %13494 = sst [smem:[#allocation7_spill]] %s7702_s15  ;;  %s577_s21 = sand.u32 7, %s7662_s12 }
  0x4d   :  { %1617 = vmatpush1.bf16.msra.mxu0 %v6286_v45  ;;  %s5688_s9 = sshll.u32 %s574_s1, 4  ;;  %s7706_s30 = sadd.s32 %s5701_s26, %s747_s11 }
  0x4e   :  { %1699 = vmatpush1.bf16.msra.mxu1 %v6287_v46  ;;  %1618 = vmatprep.subr.bf16.mxu0 %v6288_v47  ;;  %13495 = sst [smem:[#allocation8_spill]] %s7706_s30  ;;  %s603_s6 = sand.u32 7, %s7668_s19 }
  0x4f   :  { %1700 = vmatprep.subr.bf16.mxu1 %v6290_v48  ;;  %s5690_s20 = sshll.u32 %s600_s25, 4  ;;  %s7709_s22 = sld [smem:[#allocation5 + $0x5]] }
  0x50   :  { %s7711_s27 = sadd.s32 %s5688_s9, %s577_s21  ;;  %s7713_s10 = sld [smem:[#allocation5 + $0x6]] }
  0x51   :  { %1619 = vmatpush1.bf16.msra.mxu0 %v6292_v49  ;;  %13496 = sst [smem:[#allocation9_spill]] %s7711_s27  ;;  %s7719_s26 = sld [smem:[#allocation5 + $0x7]] }
  0x52   :  { %1701 = vmatpush1.bf16.msra.mxu1 %v6293_v50  ;;  %1620 = vmatprep.subr.bf16.mxu0 %v7353_v51  ;;  %v80_v50 = vrot.slane %v67_v32, %v13150_v43  ;;  %s7721_s19 = sadd.s32 %s5690_s20, %s603_s6  ;;  %s626_s25 = sshra.s32 %s7680_s8, 3 }
  0x53   :  { %1702 = vmatprep.subr.bf16.mxu1 %v7358_v52  ;;  %s629_s6 = sand.u32 7, %s7680_s8  ;;  %s652_s20 = sshra.s32 %s7684_s0, 3 }
  0x54   :  { %s5692_s24 = sshll.u32 %s626_s25, 4  ;;  %s655_s28 = sand.u32 7, %s7684_s0 }
  0x55   :  { %1621 = vmatpush1.bf16.msra.mxu0 %v7363_v53  ;;  %s678_s1 = sshra.s32 %s7690_s3, 3  ;;  %s5694_s8 = sshll.u32 %s652_s20, 4 }
  0x56   :  { %1703 = vmatpush1.bf16.msra.mxu1 %v7368_v54  ;;  %1622 = vmatprep.subr.bf16.mxu0 %v7377_v55  ;;  %s704_s4 = sshra.s32 %s7709_s22, 3  ;;  %s681_s2 = sand.u32 7, %s7690_s3 }
  0x57   :  { %1704 = vmatprep.subr.bf16.mxu1 %v7382_v56  ;;  %s730_s23 = sshra.s32 %s7713_s10, 3  ;;  %s5696_s27 = sshll.u32 %s678_s1, 4 }
  0x58   :  { %s756_s30 = sshra.s32 %s7719_s26, 3  ;;  %s707_s15 = sand.u32 7, %s7709_s22 }
  0x59   :  { %1623 = vmatpush1.bf16.msra.mxu0 %v7387_v57  ;;  %s5698_s29 = sshll.u32 %s704_s4, 4  ;;  %s733_s12 = sand.u32 7, %s7713_s10 }
  0x5a   :  { %1705 = vmatpush1.bf16.msra.mxu1 %v7392_v58  ;;  %1624 = vmatprep.subr.bf16.mxu0 %v7401_v59  ;;  %s5700_s25 = sshll.u32 %s730_s23, 4  ;;  %s759_s0 = sand.u32 7, %s7719_s26 }
  0x5b   :  { %1706 = vmatprep.subr.bf16.mxu1 %v7406_v60  ;;  %s5702_s9 = sshll.u32 %s756_s30, 4  ;;  %s7758_s20 = sadd.s32 %s5692_s24, %s629_s6 }
  0x5c   :  { %s7760_s3 = sadd.s32 %s5694_s8, %s655_s28  ;;  %s13499_s4 = scalar_lea.vmem %s13143_s7, %s7631_s16 }
  0x5d   :  { %1625 = vmatpush1.bf16.msra.mxu0 %v7411_v61  ;;  %s13500_s23 = scalar_lea.vmem %s13143_s7, %s7633_s17  ;;  %s7772_s26 = sadd.s32 %s5696_s27, %s681_s2 }
  0x5e   :  { %1707 = vmatpush1.bf16.msra.mxu1 %v7416_v62  ;;  %1626 = vmatprep.subr.bf16.mxu0 %v7425_v63  ;;  %s13501_s30 = sld [smem:[#allocation7_spill]]  ;;  %s7774_s21 = sadd.s32 %s5698_s29, %s707_s15 }
  0x5f   :  { %1708 = vmatprep.subr.bf16.mxu1 %v7430_v0  ;;  %s13502_s28 = sld [smem:[#allocation8_spill]]  ;;  %s13503_s24 = scalar_lea.vmem %s13143_s7, %s7653_s5 }
  0x60   :  { %s13504_s8 = scalar_lea.vmem %s13143_s7, %s7657_s13  ;;  %s7790_s15 = sadd.s32 %s5700_s25, %s733_s12 }
  0x61   :  { %1627 = vmatpush1.bf16.msra.mxu0 %v7435_v1  ;;  %s13505_s2 = sld [smem:[#allocation9_spill]]  ;;  %s7792_s29 = sadd.s32 %s5702_s9, %s759_s0 }
  0x62   :  { %1709 = vmatpush1.bf16.msra.mxu1 %v7440_v2  ;;  %1628 = vmatprep.subr.bf16.mxu0 %v7449_v3  ;;  %s13506_s22 = scalar_lea.vmem %s13143_s7, %s7660_s14  ;;  %s13507_s25 = scalar_lea.vmem %s13143_s7, %s7682_s18 }
  0x63   :  { %1710 = vmatprep.subr.bf16.mxu1 %v7454_v4  ;;  %s711_s1 = scalar_lea.vmem %s13143_s7, %s7774_s21  ;;  %s737_s21 = scalar_lea.vmem %s13143_s7, %s7790_s15 }
  0x64   :  { %s13508_s6 = scalar_lea.vmem %s13143_s7, %s13501_s30  ;;  %s763_s11 = scalar_lea.vmem %s13143_s7, %s7792_s29 }
  0x65   :  { %1629 = vmatpush1.bf16.msra.mxu0 %v7459_v5  ;;  %s13509_s17 = scalar_lea.vmem %s13143_s7, %s13502_s28  ;;  %s13613_s16 = sld [smem:[#allocation116_spill]] }
  0x66   :  { %1711 = vmatpush1.bf16.msra.mxu1 %v7464_v6  ;;  %1630 = vmatprep.subr.bf16.mxu0 %v7473_v7  ;;  %s8681_s18 = sld [smem:[#allocation4 + $0x9]]  ;;  %s8689_s27 = sld [smem:[#allocation4 + $0xc]] }
  0x67   :  { %1712 = vmatprep.subr.bf16.mxu1 %v7478_v8  ;;  %s13510_s13 = scalar_lea.vmem %s13143_s7, %s13505_s2  ;;  %s13512_s2 = sld [smem:[#allocation115_spill]] }
  0x68   :  { %s8695_s5 = sld [smem:[#allocation4 + $0xf]]  ;;  %s8701_s28 = sld [smem:[#allocation5 + $0x9]] }
  0x69   :  { %1631 = vmatpush1.bf16.msra.mxu0 %v7483_v9  ;;  %s8708_s0 = sld [smem:[#allocation5 + $0xb]] }
  0x6a   :  { %1713 = vmatpush1.bf16.msra.mxu1 %v7488_v10  ;;  %1632 = vmatprep.subr.bf16.mxu0 %v7497_v11 }
  0x6b   :  { %1714 = vmatprep.subr.bf16.mxu1 %v7502_v12 }
  0x6c   :  { %s1987_s14 = sshra.s32 %s8689_s27, 3 }
  0x6d   :  { %1633 = vmatpush1.bf16.msra.mxu0 %v7507_v13  ;;  %v7969_v43 = vld [vmem:[%s13512_s2 + $0x2f8] ss:$20 sps:$4 sm:$0xff]   ;;  %v7974_v34 = vld [vmem:[%s13512_s2 + $0x300] ss:$20 sps:$4 sm:$0xff]  }
  0x6e   :  { %1715 = vmatpush1.bf16.msra.mxu1 %v7512_v14  ;;  %1634 = vmatprep.subr.bf16.mxu0 %v7517_v15  ;;  %13518 = vst [vmem:[#allocation15_spill] sm:$0xff] %v7969_v43  ;;  %13519 = vst [vmem:[#allocation16_spill] sm:$0xff] %v7974_v34  ;;  %v7981_v31 = vld [vmem:[%s13512_s2 + $0x324] ss:$20 sps:$4 sm:$0xff]  }
  0x6f   :  { %1716 = vmatprep.subr.bf16.mxu1 %v7522_v16  ;;  %13520 = vst [vmem:[#allocation17_spill] sm:$0xff] %v7981_v31 }
  0x71   :  { %1635 = vmatpush1.bf16.msra.mxu0 %v7531_v17 }
  0x72   :  { %1717 = vmatpush1.bf16.msra.mxu1 %v7536_v18  ;;  %1636 = vmatprep.subr.bf16.mxu0 %v7543_v19 }
  0x73   :  { %1718 = vmatprep.subr.bf16.mxu1 %v7548_v20 }
  0x75   :  { %1637 = vmatpush1.bf16.msra.mxu0 %v7555_v21 }
  0x76   :  { %1719 = vmatpush1.bf16.msra.mxu1 %v7560_v22  ;;  %1638 = vmatprep.subr.bf16.mxu0 %v7567_v23 }
  0x77   :  { %1720 = vmatprep.subr.bf16.mxu1 %v7572_v24 }
  0x79   :  { %1639 = vmatpush1.bf16.msra.mxu0 %v7579_v25 }
  0x7a   :  { %1721 = vmatpush1.bf16.msra.mxu1 %v7584_v26  ;;  %1649 = vmatprep.subr.bf16.mxu0 %v7593_v27 }
  0x7b   :  { %1731 = vmatprep.subr.bf16.mxu1 %v7598_v28 }
 0x10f   :  { %v252_v35 = vpop.f32.mrb[0].mxu0 }
 0x110   :  { %v253_v36 = vadd.f32 %v252_v35, %v72_v33  ;;  %v254_v38 = vpop.f32.mrb[1].mxu0  ;;  %v295_v46 = vpop.f32.mrb[0].mxu1 }
 0x111   :  { %v256_v39 = vpop.f32.mrb[2].mxu0  ;;  %v255_v44 = vadd.f32 %v254_v38, %v76_v37  ;;  %v6134_v47 = vpop.f32.mrb[1].mxu1  ;;  %v296_v38 = vadd.f32 %v295_v46, %v80_v50 }
 0x112   :  { %v5147_v40 = vmul.f32 -1.442695, %v253_v36  ;;  %v257_v41 = vadd.f32 %v256_v39, %v72_v33  ;;  %v258_v42 = vpop.f32.mrb[3].mxu0  ;;  %v298_v49 = vpop.f32.mrb[2].mxu1 }
 0x113   :  { %v259_v48 = vadd.f32 %v258_v42, %v76_v37  ;;  %v6135_v35 = vpop.f32.mrb[3].mxu1  ;;  %v5149_v36 = vmul.f32 -1.442695, %v255_v44  ;;  %v299_v37 = vadd.f32 %v298_v49, %v80_v50 }
 0x114   :  { %6482 = vpow2.f32 %v5147_v40  ;;  %v5148_v45 = vmul.f32 -1.442695, %v257_v41 }
 0x115   :  { %v5150_v33 = vmul.f32 -1.442695, %v259_v48 }
 0x116   :  { %6484 = vpow2.f32 %v5148_v45 }
 0x117   :  { %6486 = vpow2.f32 %v5149_v36 }
 0x118   :  { %6488 = vpow2.f32 %v5150_v33 }
 0x119   :  { %6490 = vtanh.f32 %v296_v38 }
 0x11e   :  { %v6483_v32 = vpop.eup %6482 }
 0x11f   :  { %v308_v39 = vadd.f32 1.0, %v6483_v32 }
 0x120   :  { %v6485_v40 = vpop.eup %6484 }
 0x121   :  { %6492 = vrcp.f32 %v308_v39  ;;  %v309_v41 = vadd.f32 1.0, %v6485_v40  ;;  %v6487_v42 = vpop.eup %6486 }
 0x122   :  { %6494 = vtanh.f32 %v299_v37  ;;  %v6489_v44 = vpop.eup %6488  ;;  %v320_v46 = vadd.f32 1.0, %v6487_v42 }
 0x123   :  { %6496 = vrcp.f32 %v309_v41  ;;  %v6491_v45 = vpop.eup %6490  ;;  %v321_v48 = vadd.f32 1.0, %v6489_v44 }
 0x124   :  { %6498 = vrcp.f32 %v320_v46 }
 0x12b   :  { %v6493_v47 = vpop.eup %6492 }
 0x12c   :  { %v6495_v49 = vpop.eup %6494  ;;  %v328_v50 = vmul.f32 %v6493_v47, %v6491_v45 }
 0x12d   :  { %v6497_v35 = vpop.eup %6496 }
 0x12e   :  { %6500 = vtanh.f32 %v328_v50  ;;  %335 = vst [vmem:[%s13143_s7 + $0x8] sm:$0xff] %v328_v50  ;;  %v329_v36 = vmul.f32 %v6497_v35, %v6495_v49  ;;  %v6499_v33 = vpop.eup %6498 }
 0x12f   :  { %6502 = vrcp.f32 %v321_v48 }
 0x130   :  { %6504 = vtanh.f32 %v329_v36  ;;  %337 = vst [vmem:[%s13143_s7 + $0x18] sm:$0xff] %v329_v36 }
 0x138   :  { %v6501_v38 = vpop.eup %6500 }
 0x139   :  { %v6503_v32 = vpop.eup %6502  ;;  %v332_v37 = vmul.f32 %v6501_v38, %v6499_v33 }
 0x13a   :  { %v6505_v39 = vpop.eup %6504 }
 0x13b   :  { %334 = vst [vmem:[%s13143_s7] sm:$0xff] %v332_v37  ;;  %v333_v40 = vmul.f32 %v6505_v39, %v6503_v32 }
 0x13d   :  { %336 = vst [vmem:[%s13143_s7 + $0x10] sm:$0xff] %v333_v40 }
 0x144   :  { %v567_v42 = vld [vmem:[%s13499_s4] ss:$8 sm:$0x3]  ;;  %s633_s4 = scalar_lea.vmem %s13143_s7, %s7758_s20 }
 0x145   :  { %v596_v29 = vld [vmem:[%s13500_s23] ss:$8 sm:$0x3]  ;;  %572 = vst.msk [vmem:[#allocation2] ss:$8 sm:$0x3] %vm7753_vm1, %v567_v42  ;;  %s659_s23 = scalar_lea.vmem %s13143_s7, %s7760_s3  ;;  %s685_s3 = scalar_lea.vmem %s13143_s7, %s7772_s26 }
 0x146   :  { %598 = vst.msk [vmem:[#allocation2 + $0x1] ss:$8 sm:$0x3] %vm7753_vm1, %v596_v29  ;;  %v622_v44 = vld [vmem:[%s13503_s24] ss:$8 sm:$0x3] }
 0x147   :  { %v648_v45 = vld [vmem:[%s13504_s8] ss:$8 sm:$0x3]  ;;  %624 = vst.msk [vmem:[#allocation2 + $0x2] ss:$8 sm:$0x3] %vm7753_vm1, %v622_v44 }
 0x148   :  { %650 = vst.msk [vmem:[#allocation2 + $0x3] ss:$8 sm:$0x3] %vm7753_vm1, %v648_v45  ;;  %v674_v46 = vld [vmem:[%s13506_s22] ss:$8 sm:$0x3] }
 0x149   :  { %v700_v47 = vld [vmem:[%s13507_s25] ss:$8 sm:$0x3]  ;;  %676 = vst.msk [vmem:[#allocation2 + $0x4] ss:$8 sm:$0x3] %vm7753_vm1, %v674_v46  ;;  %s13511_s25 = scalar_lea.vmem %s13143_s7, %s7721_s19 }
 0x14a   :  { %702 = vst.msk [vmem:[#allocation2 + $0x5] ss:$8 sm:$0x3] %vm7753_vm1, %v700_v47  ;;  %v726_v48 = vld [vmem:[%s13508_s6] ss:$8 sm:$0x3] }
 0x14b   :  { %v752_v49 = vld [vmem:[%s13509_s17] ss:$8 sm:$0x3]  ;;  %728 = vst.msk [vmem:[#allocation2 + $0x6] ss:$8 sm:$0x3] %vm7753_vm1, %v726_v48 }
 0x14c   :  { %754 = vst.msk [vmem:[#allocation2 + $0x7] ss:$8 sm:$0x3] %vm7753_vm1, %v752_v49  ;;  %v582_v50 = vld [vmem:[%s13510_s13] ss:$8 sm:$0x3] }
 0x14d   :  { %v608_v35 = vld [vmem:[%s13511_s25] ss:$8 sm:$0x3]  ;;  %584 = vst.msk [vmem:[#allocation2 + $0x10] ss:$8 sm:$0x3] %vm7753_vm1, %v582_v50 }
 0x14e   :  { %610 = vst.msk [vmem:[#allocation2 + $0x11] ss:$8 sm:$0x3] %vm7753_vm1, %v608_v35  ;;  %v634_v36 = vld [vmem:[%s633_s4] ss:$8 sm:$0x3] }
 0x14f   :  { %v660_v33 = vld [vmem:[%s659_s23] ss:$8 sm:$0x3]  ;;  %636 = vst.msk [vmem:[#allocation2 + $0x12] ss:$8 sm:$0x3] %vm7753_vm1, %v634_v36 }
 0x150   :  { %662 = vst.msk [vmem:[#allocation2 + $0x13] ss:$8 sm:$0x3] %vm7753_vm1, %v660_v33  ;;  %v686_v38 = vld [vmem:[%s685_s3] ss:$8 sm:$0x3] }
 0x151   :  { %v712_v32 = vld [vmem:[%s711_s1] ss:$8 sm:$0x3]  ;;  %688 = vst.msk [vmem:[#allocation2 + $0x14] ss:$8 sm:$0x3] %vm7753_vm1, %v686_v38 }
 0x152   :  { %714 = vst.msk [vmem:[#allocation2 + $0x15] ss:$8 sm:$0x3] %vm7753_vm1, %v712_v32  ;;  %v738_v37 = vld [vmem:[%s737_s21] ss:$8 sm:$0x3] }
 0x153   :  { %v764_v39 = vld [vmem:[%s763_s11] ss:$8 sm:$0x3]  ;;  %740 = vst.msk [vmem:[#allocation2 + $0x16] ss:$8 sm:$0x3] %vm7753_vm1, %v738_v37 }
 0x154   :  { %766 = vst.msk [vmem:[#allocation2 + $0x17] ss:$8 sm:$0x3] %vm7753_vm1, %v764_v39  ;;  %v7876_v40 = vld [vmem:[#allocation2 + $0x8] sm:$0xff]  ;;  %v768_v42 = vld [vmem:[#allocation2] sm:$0xff]  ;;  %s8677_s6 = sld [smem:[#allocation4 + $0x8]] }
 0x155   :  { %v7880_v29 = vpack.c.bf16 %v7876_v40, %v7876_v40  ;;  %v7882_v44 = vpack.c.bf16 %v768_v42, %v768_v42  ;;  %v7887_v45 = vld [vmem:[%s13512_s2 + $0x280] ss:$20 sps:$4 sm:$0xff]   ;;  %v7892_v46 = vld [vmem:[%s13512_s2 + $0x288] ss:$20 sps:$4 sm:$0xff]   ;;  %v7924_v36 = vld [vmem:[%s13512_s2 + $0x2b0] ss:$20 sps:$4 sm:$0xff]  }
 0x156   :  { %v7897_v47 = vld [vmem:[%s13512_s2 + $0x2ac] ss:$20 sps:$4 sm:$0xff]   ;;  %v7902_v48 = vld [vmem:[%s13512_s2 + $0x2b4] ss:$20 sps:$4 sm:$0xff]   ;;  %v7936_v38 = vld [vmem:[%s13512_s2 + $0x2dc] ss:$20 sps:$4 sm:$0xff]  }
 0x157   :  { %1640 = vmatprep.mubr.bf16.mxu0 %v7880_v29  ;;  %1722 = vmatprep.mubr.bf16.mxu1 %v7880_v29  ;;  %v7919_v35 = vld [vmem:[%s13512_s2 + $0x2a8] ss:$20 sps:$4 sm:$0xff]   ;;  %13513 = vst [vmem:[#allocation10_spill] sm:$0xff] %v7936_v38  ;;  %v7945_v32 = vld [vmem:[%s13512_s2 + $0x2d0] ss:$20 sps:$4 sm:$0xff]   ;;  %s8683_s24 = sld [smem:[#allocation4 + $0xa]] }
 0x158   :  { %1641 = vmatmul.mubr.bf16.vlgmr.msra.gmra.mrb[4].mxu0 %v7882_v44  ;;  %1723 = vmatmul.mubr.bf16.vlgmr.msra.gmra.mrb[4].mxu1 %v7882_v44  ;;  %v7931_v33 = vld [vmem:[%s13512_s2 + $0x2d4] ss:$20 sps:$4 sm:$0xff]   ;;  %13514 = vst [vmem:[#allocation11_spill] sm:$0xff] %v7945_v32  ;;  %v7950_v37 = vld [vmem:[%s13512_s2 + $0x2d8] ss:$20 sps:$4 sm:$0xff]   ;;  %s8685_s17 = sld [smem:[#allocation4 + $0xb]] }
 0x159   :  { %1650 = vmatpush1.bf16.msra.mxu0 %v7887_v45  ;;  %1732 = vmatpush1.bf16.msra.mxu1 %v7892_v46  ;;  %13515 = vst [vmem:[#allocation12_spill] sm:$0xff] %v7950_v37  ;;  %v7957_v39 = vld [vmem:[%s13512_s2 + $0x2fc] ss:$20 sps:$4 sm:$0xff]   ;;  %v7962_v42 = vld [vmem:[%s13512_s2 + $0x304] ss:$20 sps:$4 sm:$0xff]   ;;  %s8691_s3 = sld [smem:[#allocation4 + $0xd]] }
 0x15a   :  { %1651 = vmatprep.subr.bf16.mxu0 %v7897_v47  ;;  %1733 = vmatprep.subr.bf16.mxu1 %v7902_v48  ;;  %13516 = vst [vmem:[#allocation13_spill] sm:$0xff] %v7957_v39  ;;  %13517 = vst [vmem:[#allocation14_spill] sm:$0xff] %v7962_v42  ;;  %s1891_s20 = sshra.s32 %s8677_s6, 3  ;;  %s8693_s8 = sld [smem:[#allocation4 + $0xe]] }
 0x15b   :  { %v7908_v49 = vld [vmem:[#allocation2 + $0x18] sm:$0xff]  ;;  %s8697_s1 = sld [smem:[#allocation5 + $0x8]]  ;;  %s1894_s30 = sand.u32 7, %s8677_s6 }
 0x15c   :  { %v7914_v50 = vpack.c.bf16 %v7908_v49, %v7908_v49  ;;  %s5703_s22 = sshll.u32 %s1891_s20, 4  ;;  %s1915_s13 = sshra.s32 %s8681_s18, 3 }
 0x15d   :  { %1652 = vmatpush1.bf16.msra.mxu0 %v7919_v35  ;;  %1734 = vmatpush1.bf16.msra.mxu1 %v7924_v36  ;;  %s1939_s12 = sshra.s32 %s8683_s24, 3  ;;  %s8704_s25 = sld [smem:[#allocation5 + $0xa]] }
 0x15e   :  { %1681 = vmatprep.mubr.bf16.mxu0 %v7914_v50  ;;  %1763 = vmatprep.mubr.bf16.mxu1 %v7914_v50  ;;  %s8706_s26 = sadd.s32 %s5703_s22, %s1894_s30  ;;  %s1918_s21 = sand.u32 7, %s8681_s18 }
 0x15f   :  { %1653 = vmatprep.subr.bf16.mxu0 %v7931_v33  ;;  %1735 = vmatprep.subr.bf16.mxu1 %v7936_v38  ;;  %v8290_v38 = vld [vmem:[%s13512_s2 + $0x290] ss:$20 sps:$4 sm:$0xff]   ;;  %s5705_s9 = sshll.u32 %s1915_s13, 4  ;;  %s1942_s10 = sand.u32 7, %s8683_s24 }
 0x160   :  { %s5707_s11 = sshll.u32 %s1939_s12, 4  ;;  %s1963_s4 = sshra.s32 %s8685_s17, 3 }
 0x161   :  { %1654 = vmatpush1.bf16.msra.mxu0 %v7945_v32  ;;  %1736 = vmatpush1.bf16.msra.mxu1 %v7950_v37  ;;  %v7986_v37 = vld [vmem:[%s13512_s2 + $0x32c] ss:$20 sps:$4 sm:$0xff]   ;;  %v770_v32 = vld [vmem:[#allocation2 + $0x10] sm:$0xff]  ;;  %s8717_s23 = sadd.s32 %s5705_s9, %s1918_s21  ;;  %s2011_s6 = sshra.s32 %s8691_s3, 3 }
 0x162   :  { %1655 = vmatprep.subr.bf16.mxu0 %v7957_v39  ;;  %1737 = vmatprep.subr.bf16.mxu1 %v7962_v42  ;;  %13521 = vst [vmem:[#allocation18_spill] sm:$0xff] %v7986_v37  ;;  %v7993_v39 = vld [vmem:[%s13512_s2 + $0x320] ss:$20 sps:$4 sm:$0xff]   ;;  %v7998_v42 = vld [vmem:[%s13512_s2 + $0x328] ss:$20 sps:$4 sm:$0xff]   ;;  %s1966_s18 = sand.u32 7, %s8685_s17 }
 0x163   :  { %13522 = vst [vmem:[#allocation19_spill] sm:$0xff] %v7993_v39  ;;  %13523 = vst [vmem:[#allocation20_spill] sm:$0xff] %v7998_v42  ;;  %s5709_s24 = sshll.u32 %s1963_s4, 4  ;;  %s1990_s20 = sand.u32 7, %s8689_s27 }
 0x164   :  { %s5711_s30 = sshll.u32 %s1987_s14, 4  ;;  %s2014_s22 = sand.u32 7, %s8691_s3 }
 0x165   :  { %1656 = vmatpush1.bf16.msra.mxu0 %v7969_v43  ;;  %1738 = vmatpush1.bf16.msra.mxu1 %v7974_v34  ;;  %v8005_v43 = vld [vmem:[%s13512_s2 + $0x34c] ss:$20 sps:$4 sm:$0xff]   ;;  %v8010_v34 = vld [vmem:[%s13512_s2 + $0x354] ss:$20 sps:$4 sm:$0xff]   ;;  %s5713_s13 = sshll.u32 %s2011_s6, 4  ;;  %s8732_s17 = sadd.s32 %s5709_s24, %s1966_s18 }
 0x166   :  { %1657 = vmatprep.subr.bf16.mxu0 %v7981_v31  ;;  %1739 = vmatprep.subr.bf16.mxu1 %v7986_v37  ;;  %13524 = vst [vmem:[#allocation21_spill] sm:$0xff] %v8005_v43  ;;  %13525 = vst [vmem:[#allocation22_spill] sm:$0xff] %v8010_v34  ;;  %v8017_v31 = vld [vmem:[%s13512_s2 + $0x348] ss:$20 sps:$4 sm:$0xff]   ;;  %v8022_v37 = vld [vmem:[%s13512_s2 + $0x350] ss:$20 sps:$4 sm:$0xff]   ;;  %s8741_s15 = sadd.s32 %s5713_s13, %s2014_s22 }
 0x167   :  { %13526 = vst [vmem:[#allocation23_spill] sm:$0xff] %v8017_v31  ;;  %13527 = vst [vmem:[#allocation24_spill] sm:$0xff] %v8022_v37  ;;  %s2038_s4 = sand.u32 7, %s8693_s8  ;;  %s2059_s13 = sshra.s32 %s8695_s5, 3 }
 0x168   :  { %s1902_s6 = sshra.s32 %s8697_s1, 3  ;;  %s2062_s18 = sand.u32 7, %s8695_s5 }
 0x169   :  { %1658 = vmatpush1.bf16.msra.mxu0 %v7993_v39  ;;  %1740 = vmatpush1.bf16.msra.mxu1 %v7998_v42  ;;  %v8029_v39 = vld [vmem:[%s13512_s2 + $0x374] ss:$20 sps:$4 sm:$0xff]   ;;  %v8034_v42 = vld [vmem:[%s13512_s2 + $0x37c] ss:$20 sps:$4 sm:$0xff]   ;;  %s1926_s24 = sshra.s32 %s8701_s28, 3  ;;  %s5704_s12 = sshll.u32 %s1902_s6, 4 }
 0x16a   :  { %1659 = vmatprep.subr.bf16.mxu0 %v8005_v43  ;;  %1741 = vmatprep.subr.bf16.mxu1 %v8010_v34  ;;  %13528 = vst [vmem:[#allocation25_spill] sm:$0xff] %v8029_v39  ;;  %13529 = vst [vmem:[#allocation26_spill] sm:$0xff] %v8034_v42  ;;  %v8041_v43 = vld [vmem:[%s13512_s2 + $0x370] ss:$20 sps:$4 sm:$0xff]   ;;  %v8046_v34 = vld [vmem:[%s13512_s2 + $0x378] ss:$20 sps:$4 sm:$0xff]  }
 0x16b   :  { %13530 = vst [vmem:[#allocation27_spill] sm:$0xff] %v8041_v43  ;;  %13531 = vst [vmem:[#allocation28_spill] sm:$0xff] %v8046_v34  ;;  %s1929_s19 = sand.u32 7, %s8701_s28  ;;  %s5706_s21 = sshll.u32 %s1926_s24, 4 }
 0x16c   :  { %s8767_s27 = sld [smem:[#allocation5 + $0xc]]  ;;  %s8771_s3 = sld [smem:[#allocation5 + $0xd]] }
 0x16d   :  { %1660 = vmatpush1.bf16.msra.mxu0 %v8017_v31  ;;  %1742 = vmatpush1.bf16.msra.mxu1 %v8022_v37  ;;  %v8053_v31 = vld [vmem:[%s13512_s2 + $0x39c] ss:$20 sps:$4 sm:$0xff]   ;;  %v8058_v37 = vld [vmem:[%s13512_s2 + $0x3a4] ss:$20 sps:$4 sm:$0xff]   ;;  %s8775_s5 = sld [smem:[#allocation5 + $0xe]]  ;;  %s8779_s28 = sld [smem:[#allocation5 + $0xf]] }
 0x16e   :  { %1661 = vmatprep.subr.bf16.mxu0 %v8029_v39  ;;  %1743 = vmatprep.subr.bf16.mxu1 %v8034_v42  ;;  %13532 = vst [vmem:[#allocation29_spill] sm:$0xff] %v8053_v31  ;;  %13533 = vst [vmem:[#allocation30_spill] sm:$0xff] %v8058_v37  ;;  %v8065_v39 = vld [vmem:[%s13512_s2 + $0x398] ss:$20 sps:$4 sm:$0xff]   ;;  %v8070_v42 = vld [vmem:[%s13512_s2 + $0x3a0] ss:$20 sps:$4 sm:$0xff]  }
 0x16f   :  { %13534 = vst [vmem:[#allocation31_spill] sm:$0xff] %v8065_v39  ;;  %13535 = vst [vmem:[#allocation32_spill] sm:$0xff] %v8070_v42  ;;  %s1974_s24 = sshra.s32 %s8708_s0, 3 }
 0x171   :  { %1662 = vmatpush1.bf16.msra.mxu0 %v8041_v43  ;;  %1744 = vmatpush1.bf16.msra.mxu1 %v8046_v34  ;;  %v8077_v43 = vld [vmem:[%s13512_s2 + $0x3c4] ss:$20 sps:$4 sm:$0xff]   ;;  %v8082_v34 = vld [vmem:[%s13512_s2 + $0x3cc] ss:$20 sps:$4 sm:$0xff]  }
 0x172   :  { %1663 = vmatprep.subr.bf16.mxu0 %v8053_v31  ;;  %1745 = vmatprep.subr.bf16.mxu1 %v8058_v37  ;;  %13536 = vst [vmem:[#allocation33_spill] sm:$0xff] %v8077_v43  ;;  %13537 = vst [vmem:[#allocation34_spill] sm:$0xff] %v8082_v34  ;;  %v8089_v31 = vld [vmem:[%s13512_s2 + $0x3c0] ss:$20 sps:$4 sm:$0xff]   ;;  %v8094_v37 = vld [vmem:[%s13512_s2 + $0x3c8] ss:$20 sps:$4 sm:$0xff]  }
 0x173   :  { %13538 = vst [vmem:[#allocation35_spill] sm:$0xff] %v8089_v31  ;;  %13539 = vst [vmem:[#allocation36_spill] sm:$0xff] %v8094_v37 }
 0x175   :  { %1664 = vmatpush1.bf16.msra.mxu0 %v8065_v39  ;;  %1746 = vmatpush1.bf16.msra.mxu1 %v8070_v42  ;;  %v8101_v39 = vld [vmem:[%s13512_s2 + $0x3ec] ss:$20 sps:$4 sm:$0xff]   ;;  %v8106_v42 = vld [vmem:[%s13512_s2 + $0x3f4] ss:$20 sps:$4 sm:$0xff]  }
 0x176   :  { %1665 = vmatprep.subr.bf16.mxu0 %v8077_v43  ;;  %1747 = vmatprep.subr.bf16.mxu1 %v8082_v34  ;;  %13540 = vst [vmem:[#allocation37_spill] sm:$0xff] %v8101_v39  ;;  %13541 = vst [vmem:[#allocation38_spill] sm:$0xff] %v8106_v42  ;;  %v8113_v43 = vld [vmem:[%s13512_s2 + $0x3e8] ss:$20 sps:$4 sm:$0xff]   ;;  %v8118_v34 = vld [vmem:[%s13512_s2 + $0x3f0] ss:$20 sps:$4 sm:$0xff]  }
 0x177   :  { %13542 = vst [vmem:[#allocation39_spill] sm:$0xff] %v8113_v43  ;;  %13543 = vst [vmem:[#allocation40_spill] sm:$0xff] %v8118_v34 }
 0x179   :  { %1666 = vmatpush1.bf16.msra.mxu0 %v8089_v31  ;;  %1748 = vmatpush1.bf16.msra.mxu1 %v8094_v37  ;;  %v8125_v31 = vld [vmem:[%s13512_s2 + $0x414] ss:$20 sps:$4 sm:$0xff]   ;;  %v8130_v37 = vld [vmem:[%s13512_s2 + $0x41c] ss:$20 sps:$4 sm:$0xff]  }
 0x17a   :  { %1667 = vmatprep.subr.bf16.mxu0 %v8101_v39  ;;  %1749 = vmatprep.subr.bf16.mxu1 %v8106_v42  ;;  %13544 = vst [vmem:[#allocation41_spill] sm:$0xff] %v8125_v31  ;;  %13545 = vst [vmem:[#allocation42_spill] sm:$0xff] %v8130_v37  ;;  %v8137_v39 = vld [vmem:[%s13512_s2 + $0x410] ss:$20 sps:$4 sm:$0xff]   ;;  %v8142_v42 = vld [vmem:[%s13512_s2 + $0x418] ss:$20 sps:$4 sm:$0xff]  }
 0x17b   :  { %13546 = vst [vmem:[#allocation43_spill] sm:$0xff] %v8137_v39  ;;  %13547 = vst [vmem:[#allocation44_spill] sm:$0xff] %v8142_v42 }
 0x17d   :  { %1668 = vmatpush1.bf16.msra.mxu0 %v8113_v43  ;;  %1750 = vmatpush1.bf16.msra.mxu1 %v8118_v34  ;;  %v8149_v43 = vld [vmem:[%s13512_s2 + $0x43c] ss:$20 sps:$4 sm:$0xff]   ;;  %v8154_v34 = vld [vmem:[%s13512_s2 + $0x444] ss:$20 sps:$4 sm:$0xff]  }
 0x17e   :  { %1669 = vmatprep.subr.bf16.mxu0 %v8125_v31  ;;  %1751 = vmatprep.subr.bf16.mxu1 %v8130_v37  ;;  %13548 = vst [vmem:[#allocation45_spill] sm:$0xff] %v8149_v43  ;;  %13549 = vst [vmem:[#allocation46_spill] sm:$0xff] %v8154_v34  ;;  %v8161_v31 = vld [vmem:[%s13512_s2 + $0x438] ss:$20 sps:$4 sm:$0xff]   ;;  %v8166_v37 = vld [vmem:[%s13512_s2 + $0x440] ss:$20 sps:$4 sm:$0xff]  }
 0x17f   :  { %13550 = vst [vmem:[#allocation47_spill] sm:$0xff] %v8161_v31  ;;  %13551 = vst [vmem:[#allocation48_spill] sm:$0xff] %v8166_v37 }
 0x181   :  { %1670 = vmatpush1.bf16.msra.mxu0 %v8137_v39  ;;  %1752 = vmatpush1.bf16.msra.mxu1 %v8142_v42  ;;  %v8173_v39 = vld [vmem:[%s13512_s2 + $0x464] ss:$20 sps:$4 sm:$0xff]   ;;  %v8178_v42 = vld [vmem:[%s13512_s2 + $0x46c] ss:$20 sps:$4 sm:$0xff]  }
 0x182   :  { %1671 = vmatprep.subr.bf16.mxu0 %v8149_v43  ;;  %1753 = vmatprep.subr.bf16.mxu1 %v8154_v34  ;;  %13552 = vst [vmem:[#allocation49_spill] sm:$0xff] %v8173_v39  ;;  %13553 = vst [vmem:[#allocation50_spill] sm:$0xff] %v8178_v42  ;;  %v8185_v43 = vld [vmem:[%s13512_s2 + $0x460] ss:$20 sps:$4 sm:$0xff]   ;;  %v8190_v34 = vld [vmem:[%s13512_s2 + $0x468] ss:$20 sps:$4 sm:$0xff]  }
 0x183   :  { %13554 = vst [vmem:[#allocation51_spill] sm:$0xff] %v8185_v43  ;;  %13555 = vst [vmem:[#allocation52_spill] sm:$0xff] %v8190_v34 }
 0x185   :  { %1672 = vmatpush1.bf16.msra.mxu0 %v8161_v31  ;;  %1754 = vmatpush1.bf16.msra.mxu1 %v8166_v37  ;;  %v8197_v31 = vld [vmem:[%s13512_s2 + $0x48c] ss:$20 sps:$4 sm:$0xff]   ;;  %v8202_v37 = vld [vmem:[%s13512_s2 + $0x494] ss:$20 sps:$4 sm:$0xff]  }
 0x186   :  { %1673 = vmatprep.subr.bf16.mxu0 %v8173_v39  ;;  %1755 = vmatprep.subr.bf16.mxu1 %v8178_v42  ;;  %13556 = vst [vmem:[#allocation53_spill] sm:$0xff] %v8197_v31  ;;  %13557 = vst [vmem:[#allocation54_spill] sm:$0xff] %v8202_v37  ;;  %v8209_v39 = vld [vmem:[%s13512_s2 + $0x488] ss:$20 sps:$4 sm:$0xff]   ;;  %v8214_v42 = vld [vmem:[%s13512_s2 + $0x490] ss:$20 sps:$4 sm:$0xff]  }
 0x187   :  { %13558 = vst [vmem:[#allocation55_spill] sm:$0xff] %v8209_v39  ;;  %13559 = vst [vmem:[#allocation56_spill] sm:$0xff] %v8214_v42 }
 0x189   :  { %1674 = vmatpush1.bf16.msra.mxu0 %v8185_v43  ;;  %1756 = vmatpush1.bf16.msra.mxu1 %v8190_v34  ;;  %v8221_v43 = vld [vmem:[%s13512_s2 + $0x4b4] ss:$20 sps:$4 sm:$0xff]   ;;  %v8226_v34 = vld [vmem:[%s13512_s2 + $0x4bc] ss:$20 sps:$4 sm:$0xff]  }
 0x18a   :  { %1675 = vmatprep.subr.bf16.mxu0 %v8197_v31  ;;  %1757 = vmatprep.subr.bf16.mxu1 %v8202_v37  ;;  %13560 = vst [vmem:[#allocation57_spill] sm:$0xff] %v8221_v43  ;;  %13561 = vst [vmem:[#allocation58_spill] sm:$0xff] %v8226_v34  ;;  %v8233_v31 = vld [vmem:[%s13512_s2 + $0x4b0] ss:$20 sps:$4 sm:$0xff]   ;;  %v8238_v37 = vld [vmem:[%s13512_s2 + $0x4b8] ss:$20 sps:$4 sm:$0xff]  }
 0x18b   :  { %13562 = vst [vmem:[#allocation59_spill] sm:$0xff] %v8233_v31  ;;  %13563 = vst [vmem:[#allocation60_spill] sm:$0xff] %v8238_v37 }
 0x18d   :  { %1676 = vmatpush1.bf16.msra.mxu0 %v8209_v39  ;;  %1758 = vmatpush1.bf16.msra.mxu1 %v8214_v42  ;;  %v8245_v39 = vld [vmem:[%s13512_s2 + $0x4dc] ss:$20 sps:$4 sm:$0xff]   ;;  %v8250_v42 = vld [vmem:[%s13512_s2 + $0x4e4] ss:$20 sps:$4 sm:$0xff]  }
 0x18e   :  { %1677 = vmatprep.subr.bf16.mxu0 %v8221_v43  ;;  %1759 = vmatprep.subr.bf16.mxu1 %v8226_v34  ;;  %13564 = vst [vmem:[#allocation61_spill] sm:$0xff] %v8245_v39  ;;  %13565 = vst [vmem:[#allocation62_spill] sm:$0xff] %v8250_v42  ;;  %v8257_v43 = vld [vmem:[%s13512_s2 + $0x4d8] ss:$20 sps:$4 sm:$0xff]   ;;  %v8262_v34 = vld [vmem:[%s13512_s2 + $0x4e0] ss:$20 sps:$4 sm:$0xff]  }
 0x18f   :  { %13566 = vst [vmem:[#allocation63_spill] sm:$0xff] %v8257_v43  ;;  %13567 = vst [vmem:[#allocation64_spill] sm:$0xff] %v8262_v34 }
 0x191   :  { %1678 = vmatpush1.bf16.msra.mxu0 %v8233_v31  ;;  %1760 = vmatpush1.bf16.msra.mxu1 %v8238_v37  ;;  %v8269_v31 = vld [vmem:[%s13512_s2 + $0x150] ss:$20 sps:$4 sm:$0xff]  }
 0x192   :  { %1679 = vmatprep.subr.bf16.mxu0 %v8245_v39  ;;  %1761 = vmatprep.subr.bf16.mxu1 %v8250_v42  ;;  %v8274_v37 = vld [vmem:[%s13512_s2 + $0x3d0] ss:$20 sps:$4 sm:$0xff]   ;;  %v8283_v42 = vpack.c.bf16 %v770_v32, %v770_v32  ;;  %v8309_v32 = vld [vmem:[%s13512_s2 + $0x38] ss:$20 sps:$4 sm:$0xff]  }
 0x193   :  { %13568 = vst [vmem:[#allocation65_spill] sm:$0xff] %v8274_v37  ;;  %v8281_v39 = vld [vmem:[%s13512_s2 + $0x10] ss:$20 sps:$4 sm:$0xff]   ;;  %13572 = vst [vmem:[#allocation69_spill] sm:$0xff] %v8309_v32 }
 0x194   :  { %13569 = vst [vmem:[#allocation66_spill] sm:$0xff] %v8281_v39 }
 0x195   :  { %1680 = vmatpush1.bf16.msra.mxu0 %v8257_v43  ;;  %1762 = vmatpush1.bf16.msra.mxu1 %v8262_v34  ;;  %v8295_v34 = vld [vmem:[%s13512_s2 + $0x178] ss:$20 sps:$4 sm:$0xff]  }
 0x196   :  { %5808 = vmatprep.subr.bf16.mxu0 %v8269_v31  ;;  %5830 = vmatprep.subr.bf16.mxu1 %v8274_v37  ;;  %13570 = vst [vmem:[#allocation67_spill] sm:$0xff] %v8295_v34  ;;  %v8300_v43 = vld [vmem:[%s13512_s2 + $0x3f8] ss:$20 sps:$4 sm:$0xff]  }
 0x197   :  { %13571 = vst [vmem:[#allocation68_spill] sm:$0xff] %v8300_v43  ;;  %v8316_v37 = vld [vmem:[%s13512_s2 + $0x2b8] ss:$20 sps:$4 sm:$0xff]  }
 0x198   :  { %1682 = vmatmul.mubr.bf16.vlgmr.msra.gmra.mrb[4].mxu0 %v8283_v42  ;;  %1764 = vmatmul.mubr.bf16.vlgmr.msra.gmra.mrb[4].mxu1 %v8283_v42  ;;  %13573 = vst [vmem:[#allocation70_spill] sm:$0xff] %v8316_v37 }
 0x199   :  { %5809 = vmatpush3.bf16.msra.mxu0 %v8281_v39  ;;  %1804 = vmatprep.mubr.bf16.mxu0 %v7880_v29  ;;  %v8321_v39 = vld [vmem:[%s13512_s2 + $0x1a0] ss:$20 sps:$4 sm:$0xff]  }
 0x19a   :  { %5831 = vmatpush3.bf16.msra.mxu1 %v8290_v38  ;;  %1844 = vmatprep.mubr.bf16.mxu1 %v7914_v50  ;;  %13574 = vst [vmem:[#allocation71_spill] sm:$0xff] %v8321_v39  ;;  %v8328_v29 = vld [vmem:[%s13512_s2 + $0x420] ss:$20 sps:$4 sm:$0xff]  }
 0x19b   :  { %5810 = vmatprep.subr.bf16.mxu0 %v8295_v34  ;;  %5832 = vmatprep.subr.bf16.mxu1 %v8300_v43  ;;  %13575 = vst [vmem:[#allocation72_spill] sm:$0xff] %v8328_v29  ;;  %v8334_v50 = vld [vmem:[%s13512_s2 + $0x60] ss:$20 sps:$4 sm:$0xff]   ;;  %v8346_v34 = vld [vmem:[%s13512_s2 + $0x1c8] ss:$20 sps:$4 sm:$0xff]  }
 0x19c   :  { %13576 = vst [vmem:[#allocation73_spill] sm:$0xff] %v8334_v50  ;;  %v8341_v43 = vld [vmem:[%s13512_s2 + $0x2e0] ss:$20 sps:$4 sm:$0xff]   ;;  %13578 = vst [vmem:[#allocation75_spill] sm:$0xff] %v8346_v34 }
 0x19d   :  { %5811 = vmatpush3.bf16.msra.mxu0 %v8309_v32  ;;  %13577 = vst [vmem:[#allocation74_spill] sm:$0xff] %v8341_v43  ;;  %v8352_v32 = vld [vmem:[%s13512_s2 + $0x448] ss:$20 sps:$4 sm:$0xff]  }
 0x19e   :  { %5833 = vmatpush3.bf16.msra.mxu1 %v8316_v37  ;;  %5812 = vmatprep.subr.bf16.mxu0 %v8321_v39  ;;  %13579 = vst [vmem:[#allocation76_spill] sm:$0xff] %v8352_v32  ;;  %v8358_v39 = vld [vmem:[%s13512_s2 + $0x88] ss:$20 sps:$4 sm:$0xff]   ;;  %v8370_v37 = vld [vmem:[%s13512_s2 + $0x1f0] ss:$20 sps:$4 sm:$0xff]  }
 0x19f   :  { %5834 = vmatprep.subr.bf16.mxu1 %v8328_v29  ;;  %13580 = vst [vmem:[#allocation77_spill] sm:$0xff] %v8358_v39  ;;  %v8365_v29 = vld [vmem:[%s13512_s2 + $0x308] ss:$20 sps:$4 sm:$0xff]   ;;  %13582 = vst [vmem:[#allocation79_spill] sm:$0xff] %v8370_v37 }
 0x1a0   :  { %13581 = vst [vmem:[#allocation78_spill] sm:$0xff] %v8365_v29 }
 0x1a1   :  { %5813 = vmatpush3.bf16.msra.mxu0 %v8334_v50  ;;  %v8376_v50 = vld [vmem:[%s13512_s2 + $0x470] ss:$20 sps:$4 sm:$0xff]  }
 0x1a2   :  { %5835 = vmatpush3.bf16.msra.mxu1 %v8341_v43  ;;  %5814 = vmatprep.subr.bf16.mxu0 %v8346_v34  ;;  %13583 = vst [vmem:[#allocation80_spill] sm:$0xff] %v8376_v50  ;;  %v8382_v34 = vld [vmem:[%s13512_s2 + $0xb0] ss:$20 sps:$4 sm:$0xff]   ;;  %v8394_v43 = vld [vmem:[%s13512_s2 + $0x218] ss:$20 sps:$4 sm:$0xff]  }
 0x1a3   :  { %5836 = vmatprep.subr.bf16.mxu1 %v8352_v32  ;;  %13584 = vst [vmem:[#allocation81_spill] sm:$0xff] %v8382_v34  ;;  %v8389_v32 = vld [vmem:[%s13512_s2 + $0x330] ss:$20 sps:$4 sm:$0xff]   ;;  %13586 = vst [vmem:[#allocation83_spill] sm:$0xff] %v8394_v43 }
 0x1a4   :  { %13585 = vst [vmem:[#allocation82_spill] sm:$0xff] %v8389_v32 }
 0x1a5   :  { %5815 = vmatpush3.bf16.msra.mxu0 %v8358_v39  ;;  %v8400_v39 = vld [vmem:[%s13512_s2 + $0x498] ss:$20 sps:$4 sm:$0xff]  }
 0x1a6   :  { %5837 = vmatpush3.bf16.msra.mxu1 %v8365_v29  ;;  %5816 = vmatprep.subr.bf16.mxu0 %v8370_v37  ;;  %13587 = vst [vmem:[#allocation84_spill] sm:$0xff] %v8400_v39  ;;  %v8406_v37 = vld [vmem:[%s13512_s2 + $0xd8] ss:$20 sps:$4 sm:$0xff]   ;;  %v8418_v29 = vld [vmem:[%s13512_s2 + $0x240] ss:$20 sps:$4 sm:$0xff]  }
 0x1a7   :  { %5838 = vmatprep.subr.bf16.mxu1 %v8376_v50  ;;  %13588 = vst [vmem:[#allocation85_spill] sm:$0xff] %v8406_v37  ;;  %v8413_v50 = vld [vmem:[%s13512_s2 + $0x358] ss:$20 sps:$4 sm:$0xff]   ;;  %13589 = vst [vmem:[#allocation86_spill] sm:$0xff] %v8418_v29 }
 0x1a9   :  { %5817 = vmatpush3.bf16.msra.mxu0 %v8382_v34  ;;  %v8424_v34 = vld [vmem:[%s13512_s2 + $0x4c0] ss:$20 sps:$4 sm:$0xff]  }
 0x1aa   :  { %5839 = vmatpush3.bf16.msra.mxu1 %v8389_v32  ;;  %5818 = vmatprep.subr.bf16.mxu0 %v8394_v43  ;;  %13590 = vst [vmem:[#allocation87_spill] sm:$0xff] %v8424_v34  ;;  %v8430_v43 = vld [vmem:[%s13512_s2 + $0x100] ss:$20 sps:$4 sm:$0xff]   ;;  %v8442_v32 = vld [vmem:[%s13512_s2 + $0x268] ss:$20 sps:$4 sm:$0xff]  }
 0x1ab   :  { %5840 = vmatprep.subr.bf16.mxu1 %v8400_v39  ;;  %13591 = vst [vmem:[#allocation88_spill] sm:$0xff] %v8430_v43  ;;  %v8437_v39 = vld [vmem:[%s13512_s2 + $0x380] ss:$20 sps:$4 sm:$0xff]   ;;  %13592 = vst [vmem:[#allocation89_spill] sm:$0xff] %v8442_v32 }
 0x1ad   :  { %5819 = vmatpush3.bf16.msra.mxu0 %v8406_v37  ;;  %v8448_v37 = vld [vmem:[%s13512_s2 + $0x4e8] ss:$20 sps:$4 sm:$0xff]  }
 0x1ae   :  { %5841 = vmatpush3.bf16.msra.mxu1 %v8413_v50  ;;  %5820 = vmatprep.subr.bf16.mxu0 %v8418_v29  ;;  %v8454_v29 = vld [vmem:[%s13512_s2 + $0x128] ss:$20 sps:$4 sm:$0xff]  }
 0x1af   :  { %5842 = vmatprep.subr.bf16.mxu1 %v8424_v34  ;;  %v8461_v34 = vld [vmem:[%s13512_s2 + $0x3a8] ss:$20 sps:$4 sm:$0xff]  }
 0x1b0   :  { %13593 = vst [vmem:[#allocation90_spill] sm:$0xff] %v8461_v34 }
 0x1b1   :  { %5821 = vmatpush3.bf16.msra.mxu0 %v8430_v43  ;;  %v8469_v43 = vld [vmem:[%s13512_s2 + $0x4] ss:$20 sps:$4 sm:$0xff]  }
 0x1b2   :  { %5843 = vmatpush3.bf16.msra.mxu1 %v8437_v39  ;;  %5822 = vmatprep.subr.bf16.mxu0 %v8442_v32  ;;  %13594 = vst [vmem:[#allocation91_spill] sm:$0xff] %v8469_v43  ;;  %v8475_v32 = vld [vmem:[%s13512_s2 + $0xc] ss:$20 sps:$4 sm:$0xff]  }
 0x1b3   :  { %5844 = vmatprep.subr.bf16.mxu1 %v8448_v37 }
 0x1b5   :  { %5823 = vmatpush3.bf16.msra.mxu0 %v8454_v29 }
 0x1b6   :  { %5845 = vmatpush3.bf16.msra.mxu1 %v8461_v34  ;;  %2089 = vmatprep.subr.bf16.mxu0 %v8469_v43  ;;  %v8483_v34 = vld [vmem:[%s13512_s2] ss:$20 sps:$4 sm:$0xff]   ;;  %v8489_v43 = vld [vmem:[%s13512_s2 + $0x8] ss:$20 sps:$4 sm:$0xff]  }
 0x1b7   :  { %2171 = vmatprep.subr.bf16.mxu1 %v8475_v32  ;;  %13595 = vst [vmem:[#allocation92_spill] sm:$0xff] %v8483_v34  ;;  %13596 = vst [vmem:[#allocation93_spill] sm:$0xff] %v8489_v43 }
 0x1b8   :  { %1805 = vmatmul.mubr.bf16.vlgmr.msra.gmra.mrb[8].mxu0 %v7882_v44  ;;  %v8495_v44 = vld [vmem:[%s13512_s2 + $0x2c] ss:$20 sps:$4 sm:$0xff]  }
 0x1b9   :  { %1845 = vmatmul.mubr.bf16.vlgmr.msra.gmra.mrb[8].mxu1 %v8283_v42  ;;  %2090 = vmatpush1.bf16.msra.mxu0 %v8483_v34  ;;  %13597 = vst [vmem:[#allocation94_spill] sm:$0xff] %v8495_v44  ;;  %v8501_v42 = vld [vmem:[%s13512_s2 + $0x34] ss:$20 sps:$4 sm:$0xff]  }
 0x1ba   :  { %2172 = vmatpush1.bf16.msra.mxu1 %v8489_v43  ;;  %2091 = vmatprep.subr.bf16.mxu0 %v8495_v44  ;;  %13598 = vst [vmem:[#allocation95_spill] sm:$0xff] %v8501_v42  ;;  %v8507_v34 = vld [vmem:[%s13512_s2 + $0x28] ss:$20 sps:$4 sm:$0xff]   ;;  %v8513_v43 = vld [vmem:[%s13512_s2 + $0x30] ss:$20 sps:$4 sm:$0xff]  }
 0x1bb   :  { %2173 = vmatprep.subr.bf16.mxu1 %v8501_v42  ;;  %13599 = vst [vmem:[#allocation96_spill] sm:$0xff] %v8507_v34  ;;  %13600 = vst [vmem:[#allocation97_spill] sm:$0xff] %v8513_v43  ;;  %v8519_v44 = vld [vmem:[%s13512_s2 + $0x54] ss:$20 sps:$4 sm:$0xff]   ;;  %v8525_v42 = vld [vmem:[%s13512_s2 + $0x5c] ss:$20 sps:$4 sm:$0xff]  }
 0x1bc   :  { %13601 = vst [vmem:[#allocation98_spill] sm:$0xff] %v8519_v44  ;;  %13602 = vst [vmem:[#allocation99_spill] sm:$0xff] %v8525_v42 }
 0x1bd   :  { %2092 = vmatpush1.bf16.msra.mxu0 %v8507_v34  ;;  %v8531_v34 = vld [vmem:[%s13512_s2 + $0x50] ss:$20 sps:$4 sm:$0xff]  }
 0x1be   :  { %2174 = vmatpush1.bf16.msra.mxu1 %v8513_v43  ;;  %2093 = vmatprep.subr.bf16.mxu0 %v8519_v44  ;;  %13603 = vst [vmem:[#allocation100_spill] sm:$0xff] %v8531_v34  ;;  %v8537_v43 = vld [vmem:[%s13512_s2 + $0x58] ss:$20 sps:$4 sm:$0xff]   ;;  %v8543_v44 = vld [vmem:[%s13512_s2 + $0x7c] ss:$20 sps:$4 sm:$0xff]  }
 0x1bf   :  { %2175 = vmatprep.subr.bf16.mxu1 %v8525_v42  ;;  %13604 = vst [vmem:[#allocation101_spill] sm:$0xff] %v8537_v43  ;;  %13605 = vst [vmem:[#allocation102_spill] sm:$0xff] %v8543_v44  ;;  %v8549_v42 = vld [vmem:[%s13512_s2 + $0x84] ss:$20 sps:$4 sm:$0xff]  }
 0x1c0   :  { %13606 = vst [vmem:[#allocation103_spill] sm:$0xff] %v8549_v42 }
 0x1c1   :  { %2094 = vmatpush1.bf16.msra.mxu0 %v8531_v34  ;;  %v8555_v34 = vld [vmem:[%s13512_s2 + $0x78] ss:$20 sps:$4 sm:$0xff]  }
 0x1c2   :  { %2176 = vmatpush1.bf16.msra.mxu1 %v8537_v43  ;;  %2095 = vmatprep.subr.bf16.mxu0 %v8543_v44  ;;  %13607 = vst [vmem:[#allocation104_spill] sm:$0xff] %v8555_v34  ;;  %v8561_v43 = vld [vmem:[%s13512_s2 + $0x80] ss:$20 sps:$4 sm:$0xff]   ;;  %v8567_v44 = vld [vmem:[%s13512_s2 + $0xa4] ss:$20 sps:$4 sm:$0xff]  }
 0x1c3   :  { %2177 = vmatprep.subr.bf16.mxu1 %v8549_v42  ;;  %13608 = vst [vmem:[#allocation105_spill] sm:$0xff] %v8561_v43  ;;  %13609 = vst [vmem:[#allocation106_spill] sm:$0xff] %v8567_v44  ;;  %v8573_v42 = vld [vmem:[%s13512_s2 + $0xac] ss:$20 sps:$4 sm:$0xff]  }
 0x1c4   :  { %13610 = vst [vmem:[#allocation107_spill] sm:$0xff] %v8573_v42 }
 0x1c5   :  { %2096 = vmatpush1.bf16.msra.mxu0 %v8555_v34  ;;  %v8579_v34 = vld [vmem:[%s13512_s2 + $0xa0] ss:$20 sps:$4 sm:$0xff]  }
 0x1c6   :  { %2178 = vmatpush1.bf16.msra.mxu1 %v8561_v43  ;;  %2097 = vmatprep.subr.bf16.mxu0 %v8567_v44  ;;  %13611 = vst [vmem:[#allocation108_spill] sm:$0xff] %v8579_v34  ;;  %v8585_v43 = vld [vmem:[%s13512_s2 + $0xa8] ss:$20 sps:$4 sm:$0xff]   ;;  %v8591_v44 = vld [vmem:[%s13512_s2 + $0xcc] ss:$20 sps:$4 sm:$0xff]  }
 0x1c7   :  { %2179 = vmatprep.subr.bf16.mxu1 %v8573_v42  ;;  %13612 = vst [vmem:[#allocation109_spill] sm:$0xff] %v8585_v43  ;;  %v8597_v42 = vld [vmem:[%s13512_s2 + $0xd4] ss:$20 sps:$4 sm:$0xff]  }
 0x1c9   :  { %2098 = vmatpush1.bf16.msra.mxu0 %v8579_v34  ;;  %v8603_v34 = vld [vmem:[%s13512_s2 + $0xc8] ss:$20 sps:$4 sm:$0xff]  }
 0x1ca   :  { %2180 = vmatpush1.bf16.msra.mxu1 %v8585_v43  ;;  %2099 = vmatprep.subr.bf16.mxu0 %v8591_v44  ;;  %v8609_v43 = vld [vmem:[%s13512_s2 + $0xd0] ss:$20 sps:$4 sm:$0xff]   ;;  %s1977_s2 = sand.u32 7, %s8708_s0  ;;  %s2073_s0 = sand.u32 7, %s8779_s28 }
 0x1cb   :  { %2181 = vmatprep.subr.bf16.mxu1 %v8597_v42 }
 0x1cd   :  { %2100 = vmatpush1.bf16.msra.mxu0 %v8603_v34 }
 0x1ce   :  { %2182 = vmatpush1.bf16.msra.mxu1 %v8609_v43  ;;  %2101 = vmatprep.subr.bf16.mxu0 %v7353_v51 }
 0x1cf   :  { %2183 = vmatprep.subr.bf16.mxu1 %v7358_v52 }
 0x1d1   :  { %2102 = vmatpush1.bf16.msra.mxu0 %v7363_v53 }
 0x1d2   :  { %2184 = vmatpush1.bf16.msra.mxu1 %v7368_v54  ;;  %2103 = vmatprep.subr.bf16.mxu0 %v7377_v55 }
 0x1d3   :  { %2185 = vmatprep.subr.bf16.mxu1 %v7382_v56 }
 0x1d5   :  { %2104 = vmatpush1.bf16.msra.mxu0 %v7387_v57 }
 0x1d6   :  { %2186 = vmatpush1.bf16.msra.mxu1 %v7392_v58  ;;  %2105 = vmatprep.subr.bf16.mxu0 %v7401_v59  ;;  %v530_v59 = vld [vmem:[%s13613_s16] sm:$0x1f]  ;;  %s8720_s16 = sadd.s32 %s5707_s11, %s1942_s10  ;;  %s2035_s10 = sshra.s32 %s8693_s8, 3 }
 0x1d7   :  { %2187 = vmatprep.subr.bf16.mxu1 %v7406_v60  ;;  %v13614_v60 = vsub.s32 0, %v7603_v30  ;;  %s8734_s11 = sadd.s32 %s5711_s30, %s1990_s20  ;;  %s5715_s14 = sshll.u32 %s2035_s10, 4 }
 0x1d8   :  { %s8760_s10 = sadd.s32 %s5715_s14, %s2038_s4  ;;  %s5717_s20 = sshll.u32 %s2059_s13, 4 }
 0x1d9   :  { %2106 = vmatpush1.bf16.msra.mxu0 %v7411_v61  ;;  %v8659_v61 = vrot.slane %v530_v59, %v13614_v60  ;;  %13618 = sst [smem:[#allocation7_spill]] %s8760_s10  ;;  %s1905_s30 = sand.u32 7, %s8697_s1 }
 0x1da   :  { %2188 = vmatpush1.bf16.msra.mxu1 %v7416_v62  ;;  %2107 = vmatprep.subr.bf16.mxu0 %v7425_v63  ;;  %v13615_v62 = vsub.s32 1, %v7603_v30  ;;  %s8769_s22 = sadd.s32 %s5717_s20, %s2062_s18  ;;  %s8773_s4 = sadd.s32 %s5704_s12, %s1905_s30 }
 0x1db   :  { %2189 = vmatprep.subr.bf16.mxu1 %v7430_v0  ;;  %v13616_v0 = vsub.s32 2, %v7603_v30  ;;  %13619 = sst [smem:[#allocation8_spill]] %s8769_s22  ;;  %s8777_s1 = sadd.s32 %s5706_s21, %s1929_s19 }
 0x1dc   :  { %v8663_v63 = vrot.slane %v530_v59, %v13615_v62  ;;  %13620 = sst [smem:[#allocation9_spill]] %s8773_s4  ;;  %s1950_s8 = sshra.s32 %s8704_s25, 3 }
 0x1dd   :  { %2108 = vmatpush1.bf16.msra.mxu0 %v7435_v1  ;;  %v8667_v1 = vrot.slane %v530_v59, %v13616_v0  ;;  %13621 = sst [smem:[#allocation111_spill]] %s8777_s1  ;;  %s1953_s13 = sand.u32 7, %s8704_s25 }
 0x1de   :  { %2190 = vmatpush1.bf16.msra.mxu1 %v7440_v2  ;;  %2109 = vmatprep.subr.bf16.mxu0 %v7449_v3  ;;  %s5708_s29 = sshll.u32 %s1950_s8, 4  ;;  %s1998_s12 = sshra.s32 %s8767_s27, 3 }
 0x1df   :  { %2191 = vmatprep.subr.bf16.mxu1 %v7454_v4  ;;  %s5710_s20 = sshll.u32 %s1974_s24, 4  ;;  %s2022_s30 = sshra.s32 %s8771_s3, 3 }
 0x1e0   :  { %s2001_s19 = sand.u32 7, %s8767_s27  ;;  %s2046_s4 = sshra.s32 %s8775_s5, 3 }
 0x1e1   :  { %2110 = vmatpush1.bf16.msra.mxu0 %v7459_v5  ;;  %s5712_s9 = sshll.u32 %s1998_s12, 4  ;;  %s2070_s21 = sshra.s32 %s8779_s28, 3 }
 0x1e2   :  { %2192 = vmatpush1.bf16.msra.mxu1 %v7464_v6  ;;  %2111 = vmatprep.subr.bf16.mxu0 %v7473_v7  ;;  %s2025_s14 = sand.u32 7, %s8771_s3  ;;  %s5714_s1 = sshll.u32 %s2022_s30, 4 }
 0x1e3   :  { %2193 = vmatprep.subr.bf16.mxu1 %v7478_v8  ;;  %v546_v8 = vsub.s32 3, %v7603_v30  ;;  %s2049_s25 = sand.u32 7, %s8775_s5  ;;  %s5716_s8 = sshll.u32 %s2046_s4, 4 }
 0x1e4   :  { %s5718_s22 = sshll.u32 %s2070_s21, 4  ;;  %s8812_s18 = sadd.s32 %s5708_s29, %s1953_s13 }
 0x1e5   :  { %2112 = vmatpush1.bf16.msra.mxu0 %v7483_v9  ;;  %v8673_v9 = vrot.slane %v530_v59, %v546_v8  ;;  %s8814_s6 = sadd.s32 %s5710_s20, %s1977_s2  ;;  %s13622_s12 = scalar_lea.vmem %s13143_s7, %s8706_s26 }
 0x1e6   :  { %2194 = vmatpush1.bf16.msra.mxu1 %v7488_v10  ;;  %2113 = vmatprep.subr.bf16.mxu0 %v7497_v11  ;;  %v550_v10 = vsub.s32 4, %v7603_v30  ;;  %s13623_s5 = scalar_lea.vmem %s13143_s7, %s8717_s23  ;;  %s8826_s4 = sadd.s32 %s5712_s9, %s2001_s19 }
 0x1e7   :  { %2195 = vmatprep.subr.bf16.mxu1 %v7502_v12  ;;  %13617 = vst [vmem:[#allocation110_spill] sm:$0xff] %v8673_v9  ;;  %s13624_s28 = sld [smem:[#allocation7_spill]]  ;;  %s8828_s30 = sadd.s32 %s5714_s1, %s2025_s14 }
 0x1e8   :  { %s13625_s2 = sld [smem:[#allocation8_spill]]  ;;  %s13626_s13 = scalar_lea.vmem %s13143_s7, %s8720_s16 }
 0x1e9   :  { %2114 = vmatpush1.bf16.msra.mxu0 %v7507_v13  ;;  %s13627_s19 = scalar_lea.vmem %s13143_s7, %s8732_s17  ;;  %s8844_s1 = sadd.s32 %s5716_s8, %s2049_s25 }
 0x1ea   :  { %2196 = vmatpush1.bf16.msra.mxu1 %v7512_v14  ;;  %2115 = vmatprep.subr.bf16.mxu0 %v7517_v15  ;;  %v8679_v15 = vrot.slane %v530_v59, %v550_v10  ;;  %s13628_s14 = sld [smem:[#allocation9_spill]]  ;;  %s8846_s20 = sadd.s32 %s5718_s22, %s2073_s0 }
 0x1eb   :  { %2197 = vmatprep.subr.bf16.mxu1 %v7522_v16  ;;  %s13629_s9 = sld [smem:[#allocation111_spill]]  ;;  %s13630_s24 = scalar_lea.vmem %s13143_s7, %s8734_s11 }
 0x1ec   :  { %s13631_s8 = scalar_lea.vmem %s13143_s7, %s8741_s15  ;;  %s1957_s27 = scalar_lea.vmem %s13143_s7, %s8812_s18 }
 0x1ed   :  { %2116 = vmatpush1.bf16.msra.mxu0 %v7531_v17  ;;  %s13632_s29 = scalar_lea.vmem %s13143_s7, %s13624_s28  ;;  %s2029_s21 = scalar_lea.vmem %s13143_s7, %s8828_s30 }
 0x1ee   :  { %2198 = vmatpush1.bf16.msra.mxu1 %v7536_v18  ;;  %2117 = vmatprep.subr.bf16.mxu0 %v7543_v19  ;;  %s13633_s23 = scalar_lea.vmem %s13143_s7, %s13625_s2  ;;  %s2053_s30 = scalar_lea.vmem %s13143_s7, %s8844_s1 }
 0x1ef   :  { %2199 = vmatprep.subr.bf16.mxu1 %v7548_v20  ;;  %s2077_s3 = scalar_lea.vmem %s13143_s7, %s8846_s20  ;;  %s13736_s20 = sld [smem:[#allocation115_spill]] }
 0x1f0   :  { %s13634_s17 = scalar_lea.vmem %s13143_s7, %s13628_s14  ;;  %s9327_s0 = sld [smem:[#allocation4 + $0x10]] }
 0x1f1   :  { %2118 = vmatpush1.bf16.msra.mxu0 %v7555_v21  ;;  %s9333_s1 = sld [smem:[#allocation4 + $0x13]]  ;;  %s9343_s11 = sld [smem:[#allocation4 + $0x17]] }
 0x1f2   :  { %2200 = vmatpush1.bf16.msra.mxu1 %v7560_v22  ;;  %2119 = vmatprep.subr.bf16.mxu0 %v7567_v23  ;;  %s9345_s26 = sld [smem:[#allocation5 + $0x10]]  ;;  %s9352_s10 = sld [smem:[#allocation5 + $0x12]] }
 0x1f3   :  { %2201 = vmatprep.subr.bf16.mxu1 %v7572_v24 }
 0x1f5   :  { %2120 = vmatpush1.bf16.msra.mxu0 %v7579_v25 }
 0x1f6   :  { %2202 = vmatpush1.bf16.msra.mxu1 %v7584_v26  ;;  %2130 = vmatprep.subr.bf16.mxu0 %v7593_v27  ;;  %s2372_s14 = sshra.s32 %s9327_s0, 3 }
 0x1f7   :  { %2212 = vmatprep.subr.bf16.mxu1 %v7598_v28  ;;  %s5719_s15 = sshll.u32 %s2372_s14, 4 }
 0x26b   :  { %v1683_v51 = vpop.f32.mrb[4].mxu0  ;;  %v1765_v52 = vpop.f32.mrb[4].mxu1 }
 0x26c   :  { %v1685_v53 = vpop.f32.mrb[5].mxu0  ;;  %v1767_v54 = vpop.f32.mrb[5].mxu1  ;;  %v6136_v2 = vadd.f32 %v1683_v51, %v8659_v61  ;;  %v6138_v4 = vadd.f32 %v1765_v52, %v8667_v1 }
 0x26d   :  { %v1687_v55 = vpop.f32.mrb[6].mxu0  ;;  %v1769_v56 = vpop.f32.mrb[6].mxu1  ;;  %v6137_v3 = vadd.f32 %v1685_v53, %v8663_v63  ;;  %v6139_v11 = vadd.f32 %v1767_v54, %v8673_v9 }
 0x26e   :  { %v1688_v57 = vpop.f32.mrb[7].mxu0  ;;  %v1770_v58 = vpop.f32.mrb[7].mxu1  ;;  %v5357_v5 = vmul.f32 -1.442695, %v6136_v2  ;;  %v5359_v7 = vmul.f32 -1.442695, %v6138_v4 }
 0x26f   :  { %v5358_v6 = vmul.f32 -1.442695, %v6137_v3  ;;  %v5360_v16 = vmul.f32 -1.442695, %v6139_v11 }
 0x270   :  { %6506 = vpow2.f32 %v5357_v5 }
 0x271   :  { %6508 = vpow2.f32 %v5358_v6 }
 0x272   :  { %6510 = vpow2.f32 %v5359_v7 }
 0x273   :  { %6512 = vpow2.f32 %v5360_v16 }
 0x27a   :  { %v6507_v12 = vpop.eup %6506 }
 0x27b   :  { %v6509_v13 = vpop.eup %6508  ;;  %v1855_v18 = vadd.f32 1.0, %v6507_v12 }
 0x27c   :  { %v6511_v14 = vpop.eup %6510  ;;  %v1861_v21 = vadd.f32 1.0, %v6509_v13 }
 0x27d   :  { %v1867_v25 = vadd.f32 1.0, %v6511_v14  ;;  %6514 = vrcp.f32 %v1855_v18  ;;  %v6513_v53 = vpop.eup %6512 }
 0x27e   :  { %6516 = vrcp.f32 %v1861_v21  ;;  %v1873_v60 = vadd.f32 1.0, %v6513_v53  ;;  %v13647_v53 = vld [vmem:[#allocation21_spill] sm:$0xff] }
 0x27f   :  { %6518 = vrcp.f32 %v1867_v25 }
 0x287   :  { %v6515_v54 = vpop.eup %6514 }
 0x288   :  { %v6517_v55 = vpop.eup %6516 }
 0x289   :  { %v6519_v56 = vpop.eup %6518  ;;  %v1878_v58 = vmul.f32 %v6517_v55, %v7876_v40  ;;  %v13649_v55 = vld [vmem:[#allocation23_spill] sm:$0xff] }
 0x28a   :  { %v1880_v62 = vmul.f32 %v6519_v56, %v7908_v49  ;;  %v13650_v56 = vld [vmem:[#allocation24_spill] sm:$0xff] }
 0x28b   :  { %v5824_v17 = vpop.f32.mrb[8].mxu0 }
 0x28c   :  { %v5846_v19 = vpop.f32.mrb[8].mxu1  ;;  %v5825_v20 = vpop.f32.mrb[9].mxu0 }
 0x28d   :  { %v5826_v22 = vadd.f32 %v5825_v20, %v5824_v17  ;;  %v5847_v23 = vpop.f32.mrb[9].mxu1  ;;  %v5827_v24 = vpop.f32.mrb[10].mxu0 }
 0x28e   :  { %v5848_v26 = vadd.f32 %v5847_v23, %v5846_v19  ;;  %v5849_v27 = vpop.f32.mrb[10].mxu1  ;;  %v5828_v28 = vpop.f32.mrb[11].mxu0 }
 0x28f   :  { %v1807_v30 = vadd.f32 %v5826_v22, %v8679_v15  ;;  %v5850_v51 = vpop.f32.mrb[11].mxu1  ;;  %v13638_v28 = vld [vmem:[#allocation12_spill] sm:$0xff] }
 0x290   :  { %v13642_v51 = vld [vmem:[#allocation16_spill] sm:$0xff] }
 0x291   :  { %v1847_v52 = vadd.f32 %v5848_v26, %v1807_v30  ;;  %v13639_v30 = vld [vmem:[#allocation13_spill] sm:$0xff] }
 0x293   :  { %6520 = vtanh.f32 %v1847_v52  ;;  %v13643_v52 = vld [vmem:[#allocation17_spill] sm:$0xff] }
 0x294   :  { %6522 = vrcp.f32 %v1873_v60  ;;  %v13654_v60 = vld [vmem:[#allocation28_spill] sm:$0xff] }
 0x29d   :  { %v6521_v57 = vpop.eup %6520 }
 0x29e   :  { %v1877_v59 = vmul.f32 %v6521_v57, %v6515_v54  ;;  %v6523_v49 = vpop.eup %6522  ;;  %v13648_v54 = vld [vmem:[#allocation22_spill] sm:$0xff]  ;;  %v13651_v57 = vld [vmem:[#allocation25_spill] sm:$0xff] }
 0x2a0   :  { %v1879_v0 = vadd.f32 %v1878_v58, %v1877_v59  ;;  %v13652_v58 = vld [vmem:[#allocation26_spill] sm:$0xff]  ;;  %v13653_v59 = vld [vmem:[#allocation27_spill] sm:$0xff] }
 0x2a2   :  { %v1881_v40 = vadd.f32 %v1880_v62, %v1879_v0  ;;  %v13655_v62 = vld [vmem:[#allocation29_spill] sm:$0xff]  ;;  %v13656_v0 = vld [vmem:[#allocation30_spill] sm:$0xff] }
 0x2a4   :  { %6524 = vtanh.f32 %v1881_v40  ;;  %5362 = vst [vmem:[%s13143_s7 + $0x28] sm:$0xff] %v1881_v40  ;;  %v13657_v40 = vld [vmem:[#allocation31_spill] sm:$0xff] }
 0x2ae   :  { %v6525_v2 = vpop.eup %6524 }
 0x2af   :  { %v1883_v3 = vmul.f32 %v6525_v2, %v6523_v49  ;;  %v13658_v49 = vld [vmem:[#allocation32_spill] sm:$0xff]  ;;  %v13659_v2 = vld [vmem:[#allocation33_spill] sm:$0xff] }
 0x2b1   :  { %5361 = vst [vmem:[%s13143_s7 + $0x20] sm:$0xff] %v1883_v3  ;;  %v13660_v3 = vld [vmem:[#allocation34_spill] sm:$0xff] }
 0x2b8   :  { %v1899_v4 = vld [vmem:[%s13622_s12] ss:$8 sm:$0x3]  ;;  %s9329_s12 = sld [smem:[#allocation4 + $0x11]] }
 0x2b9   :  { %v1923_v5 = vld [vmem:[%s13623_s5] ss:$8 sm:$0x3]  ;;  %1900 = vst.msk [vmem:[#allocation2] ss:$8 sm:$0x3] %vm7753_vm1, %v1899_v4  ;;  %s1981_s5 = scalar_lea.vmem %s13143_s7, %s8814_s6  ;;  %s2005_s6 = scalar_lea.vmem %s13143_s7, %s8826_s4 }
 0x2ba   :  { %1924 = vst.msk [vmem:[#allocation2 + $0x1] ss:$8 sm:$0x3] %vm7753_vm1, %v1923_v5  ;;  %v1947_v6 = vld [vmem:[%s13626_s13] ss:$8 sm:$0x3] }
 0x2bb   :  { %v1971_v7 = vld [vmem:[%s13627_s19] ss:$8 sm:$0x3]  ;;  %1948 = vst.msk [vmem:[#allocation2 + $0x2] ss:$8 sm:$0x3] %vm7753_vm1, %v1947_v6 }
 0x2bc   :  { %1972 = vst.msk [vmem:[#allocation2 + $0x3] ss:$8 sm:$0x3] %vm7753_vm1, %v1971_v7  ;;  %v1995_v8 = vld [vmem:[%s13630_s24] ss:$8 sm:$0x3] }
 0x2bd   :  { %v2019_v10 = vld [vmem:[%s13631_s8] ss:$8 sm:$0x3]  ;;  %1996 = vst.msk [vmem:[#allocation2 + $0x4] ss:$8 sm:$0x3] %vm7753_vm1, %v1995_v8  ;;  %s13635_s8 = scalar_lea.vmem %s13143_s7, %s13629_s9 }
 0x2be   :  { %2020 = vst.msk [vmem:[#allocation2 + $0x5] ss:$8 sm:$0x3] %vm7753_vm1, %v2019_v10  ;;  %v2043_v11 = vld [vmem:[%s13632_s29] ss:$8 sm:$0x3] }
 0x2bf   :  { %v2067_v12 = vld [vmem:[%s13633_s23] ss:$8 sm:$0x3]  ;;  %2044 = vst.msk [vmem:[#allocation2 + $0x6] ss:$8 sm:$0x3] %vm7753_vm1, %v2043_v11 }
 0x2c0   :  { %2068 = vst.msk [vmem:[#allocation2 + $0x7] ss:$8 sm:$0x3] %vm7753_vm1, %v2067_v12  ;;  %v1910_v13 = vld [vmem:[%s13634_s17] ss:$8 sm:$0x3] }
 0x2c1   :  { %v1934_v14 = vld [vmem:[%s13635_s8] ss:$8 sm:$0x3]  ;;  %1911 = vst.msk [vmem:[#allocation2 + $0x10] ss:$8 sm:$0x3] %vm7753_vm1, %v1910_v13 }
 0x2c2   :  { %1935 = vst.msk [vmem:[#allocation2 + $0x11] ss:$8 sm:$0x3] %vm7753_vm1, %v1934_v14  ;;  %v1958_v16 = vld [vmem:[%s1957_s27] ss:$8 sm:$0x3] }
 0x2c3   :  { %v1982_v17 = vld [vmem:[%s1981_s5] ss:$8 sm:$0x3]  ;;  %1959 = vst.msk [vmem:[#allocation2 + $0x12] ss:$8 sm:$0x3] %vm7753_vm1, %v1958_v16 }
 0x2c4   :  { %1983 = vst.msk [vmem:[#allocation2 + $0x13] ss:$8 sm:$0x3] %vm7753_vm1, %v1982_v17  ;;  %v2006_v18 = vld [vmem:[%s2005_s6] ss:$8 sm:$0x3] }
 0x2c5   :  { %v2030_v19 = vld [vmem:[%s2029_s21] ss:$8 sm:$0x3]  ;;  %2007 = vst.msk [vmem:[#allocation2 + $0x14] ss:$8 sm:$0x3] %vm7753_vm1, %v2006_v18 }
 0x2c6   :  { %2031 = vst.msk [vmem:[#allocation2 + $0x15] ss:$8 sm:$0x3] %vm7753_vm1, %v2030_v19  ;;  %v2054_v20 = vld [vmem:[%s2053_s30] ss:$8 sm:$0x3] }
 0x2c7   :  { %v2078_v21 = vld [vmem:[%s2077_s3] ss:$8 sm:$0x3]  ;;  %2055 = vst.msk [vmem:[#allocation2 + $0x16] ss:$8 sm:$0x3] %vm7753_vm1, %v2054_v20 }
 0x2c8   :  { %2079 = vst.msk [vmem:[#allocation2 + $0x17] ss:$8 sm:$0x3] %vm7753_vm1, %v2078_v21  ;;  %v8930_v22 = vld [vmem:[#allocation2 + $0x8] sm:$0xff]  ;;  %v2081_v23 = vld [vmem:[#allocation2] sm:$0xff]  ;;  %v13662_v5 = vld [vmem:[#allocation36_spill] sm:$0xff] }
 0x2c9   :  { %v8934_v24 = vpack.c.bf16 %v8930_v22, %v8930_v22  ;;  %v8936_v25 = vpack.c.bf16 %v2081_v23, %v2081_v23  ;;  %v13661_v4 = vld [vmem:[#allocation35_spill] sm:$0xff]  ;;  %v13663_v6 = vld [vmem:[#allocation37_spill] sm:$0xff]  ;;  %v13664_v7 = vld [vmem:[#allocation38_spill] sm:$0xff]  ;;  %s9331_s3 = sld [smem:[#allocation4 + $0x12]]  ;;  %s9337_s9 = sld [smem:[#allocation4 + $0x14]] }
 0x2ca   :  { %v13665_v8 = vld [vmem:[#allocation39_spill] sm:$0xff]  ;;  %v13666_v10 = vld [vmem:[#allocation40_spill] sm:$0xff]  ;;  %v13667_v11 = vld [vmem:[#allocation41_spill] sm:$0xff]  ;;  %s9339_s27 = sld [smem:[#allocation4 + $0x15]]  ;;  %s9341_s5 = sld [smem:[#allocation4 + $0x16]] }
 0x2cb   :  { %2121 = vmatprep.mubr.bf16.mxu0 %v8934_v24  ;;  %2203 = vmatprep.mubr.bf16.mxu1 %v8934_v24  ;;  %v13668_v12 = vld [vmem:[#allocation42_spill] sm:$0xff]  ;;  %v13669_v13 = vld [vmem:[#allocation43_spill] sm:$0xff]  ;;  %v13670_v14 = vld [vmem:[#allocation44_spill] sm:$0xff]  ;;  %s2375_s29 = sand.u32 7, %s9327_s0  ;;  %s2396_s13 = sshra.s32 %s9329_s12, 3 }
 0x2cc   :  { %2122 = vmatmul.mubr.bf16.vlgmr.msra.gmra.mrb[12].mxu0 %v8936_v25  ;;  %2204 = vmatmul.mubr.bf16.vlgmr.msra.gmra.mrb[12].mxu1 %v8936_v25  ;;  %v13671_v16 = vld [vmem:[#allocation45_spill] sm:$0xff]  ;;  %v13672_v17 = vld [vmem:[#allocation46_spill] sm:$0xff]  ;;  %v13673_v18 = vld [vmem:[#allocation47_spill] sm:$0xff]  ;;  %s9349_s23 = sld [smem:[#allocation5 + $0x11]]  ;;  %s9354_s6 = sadd.s32 %s5719_s15, %s2375_s29 }
 0x2cd   :  { %2131 = vmatpush1.bf16.msra.mxu0 %v7887_v45  ;;  %2213 = vmatpush1.bf16.msra.mxu1 %v7892_v46  ;;  %v13636_v45 = vld [vmem:[#allocation10_spill] sm:$0xff]  ;;  %v13637_v46 = vld [vmem:[#allocation11_spill] sm:$0xff]  ;;  %v13674_v19 = vld [vmem:[#allocation48_spill] sm:$0xff]  ;;  %s9356_s19 = sld [smem:[#allocation5 + $0x13]]  ;;  %s2399_s16 = sand.u32 7, %s9329_s12 }
 0x2ce   :  { %2132 = vmatprep.subr.bf16.mxu0 %v7897_v47  ;;  %2214 = vmatprep.subr.bf16.mxu1 %v7902_v48  ;;  %v13640_v47 = vld [vmem:[#allocation14_spill] sm:$0xff]  ;;  %v13641_v48 = vld [vmem:[#allocation15_spill] sm:$0xff]  ;;  %v13675_v20 = vld [vmem:[#allocation49_spill] sm:$0xff]  ;;  %s5721_s21 = sshll.u32 %s2396_s13, 4  ;;  %s2444_s8 = sshra.s32 %s9333_s1, 3 }
 0x2cf   :  { %v8942_v26 = vld [vmem:[#allocation2 + $0x18] sm:$0xff]  ;;  %v13676_v21 = vld [vmem:[#allocation50_spill] sm:$0xff]  ;;  %v13677_v23 = vld [vmem:[#allocation51_spill] sm:$0xff]  ;;  %s2420_s18 = sshra.s32 %s9331_s3, 3  ;;  %s2423_s28 = sand.u32 7, %s9331_s3 }
 0x2d0   :  { %v8948_v27 = vpack.c.bf16 %v8942_v26, %v8942_v26  ;;  %s5723_s24 = sshll.u32 %s2420_s18, 4  ;;  %s9365_s4 = sadd.s32 %s5721_s21, %s2399_s16 }
 0x2d1   :  { %2133 = vmatpush1.bf16.msra.mxu0 %v7919_v35  ;;  %2215 = vmatpush1.bf16.msra.mxu1 %v7924_v36  ;;  %v13644_v35 = vld [vmem:[#allocation18_spill] sm:$0xff]  ;;  %v13645_v36 = vld [vmem:[#allocation19_spill] sm:$0xff]  ;;  %s2468_s22 = sshra.s32 %s9337_s9, 3  ;;  %s9368_s30 = sadd.s32 %s5723_s24, %s2423_s28 }
 0x2d2   :  { %2162 = vmatprep.mubr.bf16.mxu0 %v8948_v27  ;;  %2244 = vmatprep.mubr.bf16.mxu1 %v8948_v27  ;;  %s2492_s0 = sshra.s32 %s9339_s27, 3  ;;  %s2447_s12 = sand.u32 7, %s9333_s1 }
 0x2d3   :  { %2134 = vmatprep.subr.bf16.mxu0 %v7931_v33  ;;  %2216 = vmatprep.subr.bf16.mxu1 %v13636_v45  ;;  %v13646_v33 = vld [vmem:[#allocation20_spill] sm:$0xff]  ;;  %s5725_s3 = sshll.u32 %s2444_s8, 4  ;;  %s2471_s14 = sand.u32 7, %s9337_s9 }
 0x2d4   :  { %v13678_v45 = vld [vmem:[#allocation52_spill] sm:$0xff]  ;;  %s5727_s29 = sshll.u32 %s2468_s22, 4  ;;  %s2495_s15 = sand.u32 7, %s9339_s27 }
 0x2d5   :  { %2135 = vmatpush1.bf16.msra.mxu0 %v13637_v46  ;;  %2217 = vmatpush1.bf16.msra.mxu1 %v13638_v28  ;;  %v13679_v46 = vld [vmem:[#allocation53_spill] sm:$0xff]  ;;  %v13680_v28 = vld [vmem:[#allocation54_spill] sm:$0xff]  ;;  %s5729_s13 = sshll.u32 %s2492_s0, 4  ;;  %s2516_s28 = sshra.s32 %s9341_s5, 3 }
 0x2d6   :  { %2136 = vmatprep.subr.bf16.mxu0 %v13639_v30  ;;  %2218 = vmatprep.subr.bf16.mxu1 %v13640_v47  ;;  %v13681_v30 = vld [vmem:[#allocation55_spill] sm:$0xff]  ;;  %v13682_v47 = vld [vmem:[#allocation56_spill] sm:$0xff]  ;;  %s9380_s1 = sadd.s32 %s5725_s3, %s2447_s12  ;;  %s9382_s24 = sadd.s32 %s5727_s29, %s2471_s14 }
 0x2d7   :  { %s9389_s2 = sadd.s32 %s5729_s13, %s2495_s15  ;;  %s2519_s8 = sand.u32 7, %s9341_s5 }
 0x2d8   :  { %s5731_s22 = sshll.u32 %s2516_s28, 4  ;;  %s2540_s13 = sshra.s32 %s9343_s11, 3 }
 0x2d9   :  { %2137 = vmatpush1.bf16.msra.mxu0 %v13641_v48  ;;  %2219 = vmatpush1.bf16.msra.mxu1 %v13642_v51  ;;  %v13683_v48 = vld [vmem:[#allocation57_spill] sm:$0xff]  ;;  %v13684_v51 = vld [vmem:[#allocation58_spill] sm:$0xff]  ;;  %s9408_s28 = sadd.s32 %s5731_s22, %s2519_s8  ;;  %s2383_s0 = sshra.s32 %s9345_s26, 3 }
 0x2da   :  { %2138 = vmatprep.subr.bf16.mxu0 %v13643_v52  ;;  %2220 = vmatprep.subr.bf16.mxu1 %v13644_v35  ;;  %v13685_v52 = vld [vmem:[#allocation59_spill] sm:$0xff]  ;;  %v13686_v35 = vld [vmem:[#allocation60_spill] sm:$0xff]  ;;  %13739 = sst [smem:[#allocation7_spill]] %s9408_s28  ;;  %s2543_s12 = sand.u32 7, %s9343_s11 }
 0x2db   :  { %s2407_s3 = sshra.s32 %s9349_s23, 3  ;;  %s5733_s14 = sshll.u32 %s2540_s13, 4 }
 0x2dc   :  { %s2386_s29 = sand.u32 7, %s9345_s26  ;;  %s5720_s18 = sshll.u32 %s2383_s0, 4 }
 0x2dd   :  { %2139 = vmatpush1.bf16.msra.mxu0 %v13645_v36  ;;  %2221 = vmatpush1.bf16.msra.mxu1 %v13646_v33  ;;  %v13687_v36 = vld [vmem:[#allocation61_spill] sm:$0xff]  ;;  %v13688_v33 = vld [vmem:[#allocation62_spill] sm:$0xff]  ;;  %s2410_s17 = sand.u32 7, %s9349_s23  ;;  %s5722_s16 = sshll.u32 %s2407_s3, 4 }
 0x2de   :  { %2140 = vmatprep.subr.bf16.mxu0 %v13647_v53  ;;  %2222 = vmatprep.subr.bf16.mxu1 %v13648_v54  ;;  %v2083_v53 = vld [vmem:[#allocation2 + $0x10] sm:$0xff]  ;;  %v13689_v54 = vld [vmem:[#allocation63_spill] sm:$0xff]  ;;  %s9415_s9 = sld [smem:[#allocation5 + $0x14]]  ;;  %s9417_s15 = sadd.s32 %s5733_s14, %s2543_s12 }
 0x2df   :  { %13740 = sst [smem:[#allocation8_spill]] %s9417_s15  ;;  %s9419_s27 = sld [smem:[#allocation5 + $0x15]] }
 0x2e0   :  { %s9421_s8 = sadd.s32 %s5720_s18, %s2386_s29  ;;  %s9423_s11 = sld [smem:[#allocation5 + $0x16]] }
 0x2e1   :  { %2141 = vmatpush1.bf16.msra.mxu0 %v13649_v55  ;;  %2223 = vmatpush1.bf16.msra.mxu1 %v13650_v56  ;;  %v13690_v55 = vld [vmem:[#allocation64_spill] sm:$0xff]  ;;  %v2087_v56 = vpack.c.bf16 %v2083_v53, %v2083_v53  ;;  %13741 = sst [smem:[#allocation9_spill]] %s9421_s8  ;;  %s9425_s26 = sadd.s32 %s5722_s16, %s2410_s17 }
 0x2e2   :  { %2142 = vmatprep.subr.bf16.mxu0 %v13651_v57  ;;  %2224 = vmatprep.subr.bf16.mxu1 %v13652_v58  ;;  %v13691_v57 = vld [vmem:[#allocation65_spill] sm:$0xff]  ;;  %v13692_v58 = vld [vmem:[#allocation66_spill] sm:$0xff]  ;;  %13742 = sst [smem:[#allocation111_spill]] %s9425_s26  ;;  %s9427_s23 = sld [smem:[#allocation5 + $0x17]] }
 0x2e3   :  { %v9116_v53 = vld [vmem:[%s13736_s20 + $0x120] ss:$20 sps:$4 sm:$0xff]   ;;  %s2431_s5 = sshra.s32 %s9352_s10, 3  ;;  %s2455_s3 = sshra.s32 %s9356_s19, 3 }
 0x2e4   :  { %s2434_s13 = sand.u32 7, %s9352_s10  ;;  %s5724_s25 = sshll.u32 %s2431_s5, 4 }
 0x2e5   :  { %2143 = vmatpush1.bf16.msra.mxu0 %v13653_v59  ;;  %2225 = vmatpush1.bf16.msra.mxu1 %v13654_v60  ;;  %v13693_v59 = vld [vmem:[#allocation67_spill] sm:$0xff]  ;;  %v13694_v60 = vld [vmem:[#allocation68_spill] sm:$0xff]  ;;  %s2479_s18 = sshra.s32 %s9415_s9, 3  ;;  %s5726_s14 = sshll.u32 %s2455_s3, 4 }
 0x2e6   :  { %2144 = vmatprep.subr.bf16.mxu0 %v13655_v62  ;;  %2226 = vmatprep.subr.bf16.mxu1 %v13656_v0  ;;  %v13695_v62 = vld [vmem:[#allocation69_spill] sm:$0xff]  ;;  %v13696_v0 = vld [vmem:[#allocation70_spill] sm:$0xff]  ;;  %s2503_s29 = sshra.s32 %s9419_s27, 3  ;;  %s2482_s17 = sand.u32 7, %s9415_s9 }
 0x2e7   :  { %s2527_s8 = sshra.s32 %s9423_s11, 3  ;;  %s5728_s21 = sshll.u32 %s2479_s18, 4 }
 0x2e8   :  { %s2551_s16 = sshra.s32 %s9427_s23, 3  ;;  %s2506_s22 = sand.u32 7, %s9419_s27 }
 0x2e9   :  { %2145 = vmatpush1.bf16.msra.mxu0 %v13657_v40  ;;  %2227 = vmatpush1.bf16.msra.mxu1 %v13658_v49  ;;  %v13698_v40 = vld [vmem:[#allocation72_spill] sm:$0xff]  ;;  %v13699_v49 = vld [vmem:[#allocation73_spill] sm:$0xff]  ;;  %s5730_s26 = sshll.u32 %s2503_s29, 4  ;;  %s2530_s10 = sand.u32 7, %s9423_s11 }
 0x2ea   :  { %2146 = vmatprep.subr.bf16.mxu0 %v13659_v2  ;;  %2228 = vmatprep.subr.bf16.mxu1 %v13660_v3  ;;  %v13700_v2 = vld [vmem:[#allocation74_spill] sm:$0xff]  ;;  %s5732_s5 = sshll.u32 %s2527_s8, 4  ;;  %s5734_s15 = sshll.u32 %s2551_s16, 4 }
 0x2eb   :  { %v13704_v3 = vld [vmem:[#allocation78_spill] sm:$0xff]  ;;  %s9460_s12 = sadd.s32 %s5724_s25, %s2434_s13  ;;  %s13743_s18 = scalar_lea.vmem %s13143_s7, %s9354_s6 }
 0x2ec   :  { %s13744_s11 = scalar_lea.vmem %s13143_s7, %s9365_s4  ;;  %s9474_s8 = sadd.s32 %s5728_s21, %s2482_s17 }
 0x2ed   :  { %2147 = vmatpush1.bf16.msra.mxu0 %v13661_v4  ;;  %2229 = vmatpush1.bf16.msra.mxu1 %v13662_v5  ;;  %v13705_v4 = vld [vmem:[#allocation79_spill] sm:$0xff]  ;;  %v13706_v5 = vld [vmem:[#allocation80_spill] sm:$0xff]  ;;  %s9476_s29 = sadd.s32 %s5730_s26, %s2506_s22  ;;  %s13747_s13 = scalar_lea.vmem %s13143_s7, %s9368_s30 }
 0x2ee   :  { %2148 = vmatprep.subr.bf16.mxu0 %v13663_v6  ;;  %2230 = vmatprep.subr.bf16.mxu1 %v13664_v7  ;;  %v13707_v6 = vld [vmem:[#allocation81_spill] sm:$0xff]  ;;  %v13708_v7 = vld [vmem:[#allocation82_spill] sm:$0xff]  ;;  %s13748_s17 = scalar_lea.vmem %s13143_s7, %s9380_s1  ;;  %s9492_s26 = sadd.s32 %s5732_s5, %s2530_s10 }
 0x2ef   :  { %s13749_s22 = sld [smem:[#allocation9_spill]]  ;;  %s13750_s21 = sld [smem:[#allocation111_spill]] }
 0x2f0   :  { %s13751_s3 = scalar_lea.vmem %s13143_s7, %s9382_s24  ;;  %s13752_s5 = scalar_lea.vmem %s13143_s7, %s9389_s2 }
 0x2f1   :  { %2149 = vmatpush1.bf16.msra.mxu0 %v13665_v8  ;;  %2231 = vmatpush1.bf16.msra.mxu1 %v13666_v10  ;;  %v13709_v8 = vld [vmem:[#allocation83_spill] sm:$0xff]  ;;  %v13710_v10 = vld [vmem:[#allocation84_spill] sm:$0xff]  ;;  %s2438_s9 = scalar_lea.vmem %s13143_s7, %s9460_s12  ;;  %s2510_s16 = scalar_lea.vmem %s13143_s7, %s9476_s29 }
 0x2f2   :  { %2150 = vmatprep.subr.bf16.mxu0 %v13667_v11  ;;  %2232 = vmatprep.subr.bf16.mxu1 %v13668_v12  ;;  %v13711_v11 = vld [vmem:[#allocation85_spill] sm:$0xff]  ;;  %v13712_v12 = vld [vmem:[#allocation86_spill] sm:$0xff]  ;;  %s2534_s29 = scalar_lea.vmem %s13143_s7, %s9492_s26  ;;  %s10362_s24 = sld [smem:[#allocation4 + $0x19]] }
 0x2f3   :  { %s10364_s6 = sld [smem:[#allocation4 + $0x1a]]  ;;  %s10374_s12 = sld [smem:[#allocation4 + $0x1e]] }
 0x2f4   :  { %s10376_s28 = sld [smem:[#allocation4 + $0x1f]]  ;;  %s10389_s10 = sld [smem:[#allocation5 + $0x1b]] }
 0x2f5   :  { %2151 = vmatpush1.bf16.msra.mxu0 %v13669_v13  ;;  %2233 = vmatpush1.bf16.msra.mxu1 %v13670_v14  ;;  %v13713_v13 = vld [vmem:[#allocation87_spill] sm:$0xff]  ;;  %v13714_v14 = vld [vmem:[#allocation88_spill] sm:$0xff]  ;;  %s13755_s1 = scalar_lea.vmem %s13143_s7, %s13749_s22 }
 0x2f6   :  { %2152 = vmatprep.subr.bf16.mxu0 %v13671_v16  ;;  %2234 = vmatprep.subr.bf16.mxu1 %v13672_v17  ;;  %v13715_v16 = vld [vmem:[#allocation89_spill] sm:$0xff]  ;;  %v13716_v17 = vld [vmem:[#allocation90_spill] sm:$0xff] }
 0x2f9   :  { %2153 = vmatpush1.bf16.msra.mxu0 %v13673_v18  ;;  %2235 = vmatpush1.bf16.msra.mxu1 %v13674_v19  ;;  %v13717_v18 = vld [vmem:[#allocation91_spill] sm:$0xff]  ;;  %v13719_v19 = vld [vmem:[#allocation93_spill] sm:$0xff] }
 0x2fa   :  { %2154 = vmatprep.subr.bf16.mxu0 %v13675_v20  ;;  %2236 = vmatprep.subr.bf16.mxu1 %v13676_v21  ;;  %v13721_v20 = vld [vmem:[#allocation95_spill] sm:$0xff]  ;;  %v13724_v21 = vld [vmem:[#allocation98_spill] sm:$0xff] }
 0x2fd   :  { %2155 = vmatpush1.bf16.msra.mxu0 %v13677_v23  ;;  %2237 = vmatpush1.bf16.msra.mxu1 %v13678_v45  ;;  %v13725_v23 = vld [vmem:[#allocation99_spill] sm:$0xff]  ;;  %v13728_v45 = vld [vmem:[#allocation102_spill] sm:$0xff] }
 0x2fe   :  { %2156 = vmatprep.subr.bf16.mxu0 %v13679_v46  ;;  %2238 = vmatprep.subr.bf16.mxu1 %v13680_v28  ;;  %v13729_v46 = vld [vmem:[#allocation103_spill] sm:$0xff]  ;;  %v13730_v28 = vld [vmem:[#allocation104_spill] sm:$0xff] }
 0x301   :  { %2157 = vmatpush1.bf16.msra.mxu0 %v13681_v30  ;;  %2239 = vmatpush1.bf16.msra.mxu1 %v13682_v47  ;;  %v13731_v30 = vld [vmem:[#allocation105_spill] sm:$0xff]  ;;  %v13732_v47 = vld [vmem:[#allocation106_spill] sm:$0xff] }
 0x302   :  { %2158 = vmatprep.subr.bf16.mxu0 %v13683_v48  ;;  %2240 = vmatprep.subr.bf16.mxu1 %v13684_v51  ;;  %v13733_v48 = vld [vmem:[#allocation107_spill] sm:$0xff]  ;;  %v13734_v51 = vld [vmem:[#allocation108_spill] sm:$0xff] }
 0x305   :  { %2159 = vmatpush1.bf16.msra.mxu0 %v13685_v52  ;;  %2241 = vmatpush1.bf16.msra.mxu1 %v13686_v35  ;;  %v13735_v52 = vld [vmem:[#allocation109_spill] sm:$0xff]  ;;  %v9074_v35 = vld [vmem:[%s13736_s20 + $0xf4] ss:$20 sps:$4 sm:$0xff]  }
 0x306   :  { %2160 = vmatprep.subr.bf16.mxu0 %v13687_v36  ;;  %2242 = vmatprep.subr.bf16.mxu1 %v13688_v33  ;;  %v9080_v36 = vld [vmem:[%s13736_s20 + $0xfc] ss:$20 sps:$4 sm:$0xff]   ;;  %v9110_v33 = vld [vmem:[%s13736_s20 + $0x118] ss:$20 sps:$4 sm:$0xff]  }
 0x309   :  { %2161 = vmatpush1.bf16.msra.mxu0 %v13689_v54  ;;  %2243 = vmatpush1.bf16.msra.mxu1 %v13690_v55  ;;  %v9122_v54 = vld [vmem:[%s13736_s20 + $0x144] ss:$20 sps:$4 sm:$0xff]   ;;  %v9128_v55 = vld [vmem:[%s13736_s20 + $0x14c] ss:$20 sps:$4 sm:$0xff]  }
 0x30a   :  { %5852 = vmatprep.subr.bf16.mxu0 %v8269_v31  ;;  %5874 = vmatprep.subr.bf16.mxu1 %v13691_v57  ;;  %v13697_v31 = vld [vmem:[#allocation71_spill] sm:$0xff] }
 0x30b   :  { %v9140_v57 = vld [vmem:[%s13736_s20 + $0x148] ss:$20 sps:$4 sm:$0xff]  }
 0x30c   :  { %2163 = vmatmul.mubr.bf16.vlgmr.msra.gmra.mrb[12].mxu0 %v2087_v56  ;;  %2245 = vmatmul.mubr.bf16.vlgmr.msra.gmra.mrb[12].mxu1 %v2087_v56 }
 0x30d   :  { %5853 = vmatpush3.bf16.msra.mxu0 %v13692_v58  ;;  %2285 = vmatprep.mubr.bf16.mxu0 %v8934_v24  ;;  %v13701_v24 = vld [vmem:[#allocation75_spill] sm:$0xff] }
 0x30e   :  { %5875 = vmatpush3.bf16.msra.mxu1 %v8290_v38  ;;  %2325 = vmatprep.mubr.bf16.mxu1 %v8948_v27  ;;  %v13702_v38 = vld [vmem:[#allocation76_spill] sm:$0xff]  ;;  %v13703_v27 = vld [vmem:[#allocation77_spill] sm:$0xff]  ;;  %v9146_v58 = vld [vmem:[%s13736_s20 + $0x16c] ss:$20 sps:$4 sm:$0xff]  }
 0x30f   :  { %5854 = vmatprep.subr.bf16.mxu0 %v13693_v59  ;;  %5876 = vmatprep.subr.bf16.mxu1 %v13694_v60  ;;  %v9152_v59 = vld [vmem:[%s13736_s20 + $0x174] ss:$20 sps:$4 sm:$0xff]  }
 0x310   :  { %v9158_v60 = vld [vmem:[%s13736_s20 + $0x168] ss:$20 sps:$4 sm:$0xff]  }
 0x311   :  { %5855 = vmatpush3.bf16.msra.mxu0 %v13695_v62  ;;  %v9164_v62 = vld [vmem:[%s13736_s20 + $0x170] ss:$20 sps:$4 sm:$0xff]  }
 0x312   :  { %5877 = vmatpush3.bf16.msra.mxu1 %v13696_v0  ;;  %5856 = vmatprep.subr.bf16.mxu0 %v13697_v31  ;;  %v9170_v0 = vld [vmem:[%s13736_s20 + $0x194] ss:$20 sps:$4 sm:$0xff]   ;;  %v9176_v31 = vld [vmem:[%s13736_s20 + $0x19c] ss:$20 sps:$4 sm:$0xff]  }
 0x313   :  { %5878 = vmatprep.subr.bf16.mxu1 %v13698_v40  ;;  %v9182_v40 = vld [vmem:[%s13736_s20 + $0x190] ss:$20 sps:$4 sm:$0xff]  }
 0x315   :  { %5857 = vmatpush3.bf16.msra.mxu0 %v13699_v49  ;;  %v9188_v49 = vld [vmem:[%s13736_s20 + $0x198] ss:$20 sps:$4 sm:$0xff]  }
 0x316   :  { %5879 = vmatpush3.bf16.msra.mxu1 %v13700_v2  ;;  %5858 = vmatprep.subr.bf16.mxu0 %v13701_v24  ;;  %v9194_v2 = vld [vmem:[%s13736_s20 + $0x1bc] ss:$20 sps:$4 sm:$0xff]   ;;  %v9200_v24 = vld [vmem:[%s13736_s20 + $0x1c4] ss:$20 sps:$4 sm:$0xff]  }
 0x317   :  { %5880 = vmatprep.subr.bf16.mxu1 %v13702_v38  ;;  %v9206_v38 = vld [vmem:[%s13736_s20 + $0x1b8] ss:$20 sps:$4 sm:$0xff]  }
 0x319   :  { %5859 = vmatpush3.bf16.msra.mxu0 %v13703_v27  ;;  %v9212_v27 = vld [vmem:[%s13736_s20 + $0x1c0] ss:$20 sps:$4 sm:$0xff]  }
 0x31a   :  { %5881 = vmatpush3.bf16.msra.mxu1 %v13704_v3  ;;  %5860 = vmatprep.subr.bf16.mxu0 %v13705_v4  ;;  %v9218_v3 = vld [vmem:[%s13736_s20 + $0x1e4] ss:$20 sps:$4 sm:$0xff]   ;;  %v9224_v4 = vld [vmem:[%s13736_s20 + $0x1ec] ss:$20 sps:$4 sm:$0xff]  }
 0x31b   :  { %5882 = vmatprep.subr.bf16.mxu1 %v13706_v5  ;;  %v9230_v5 = vld [vmem:[%s13736_s20 + $0x1e0] ss:$20 sps:$4 sm:$0xff]  }
 0x31d   :  { %5861 = vmatpush3.bf16.msra.mxu0 %v13707_v6  ;;  %v9236_v6 = vld [vmem:[%s13736_s20 + $0x1e8] ss:$20 sps:$4 sm:$0xff]  }
 0x31e   :  { %5883 = vmatpush3.bf16.msra.mxu1 %v13708_v7  ;;  %5862 = vmatprep.subr.bf16.mxu0 %v13709_v8  ;;  %v9242_v7 = vld [vmem:[%s13736_s20 + $0x20c] ss:$20 sps:$4 sm:$0xff]   ;;  %v9248_v8 = vld [vmem:[%s13736_s20 + $0x214] ss:$20 sps:$4 sm:$0xff]  }
 0x31f   :  { %5884 = vmatprep.subr.bf16.mxu1 %v13710_v10  ;;  %v9254_v10 = vld [vmem:[%s13736_s20 + $0x208] ss:$20 sps:$4 sm:$0xff]  }
 0x321   :  { %5863 = vmatpush3.bf16.msra.mxu0 %v13711_v11  ;;  %v9260_v11 = vld [vmem:[%s13736_s20 + $0x210] ss:$20 sps:$4 sm:$0xff]  }
 0x322   :  { %5885 = vmatpush3.bf16.msra.mxu1 %v8413_v50  ;;  %5864 = vmatprep.subr.bf16.mxu0 %v13712_v12  ;;  %v13718_v50 = vld [vmem:[#allocation92_spill] sm:$0xff] }
 0x323   :  { %5886 = vmatprep.subr.bf16.mxu1 %v13713_v13  ;;  %v9266_v12 = vld [vmem:[%s13736_s20 + $0x234] ss:$20 sps:$4 sm:$0xff]   ;;  %v9272_v13 = vld [vmem:[%s13736_s20 + $0x23c] ss:$20 sps:$4 sm:$0xff]  }
 0x325   :  { %5865 = vmatpush3.bf16.msra.mxu0 %v13714_v14  ;;  %v9278_v14 = vld [vmem:[%s13736_s20 + $0x230] ss:$20 sps:$4 sm:$0xff]  }
 0x326   :  { %5887 = vmatpush3.bf16.msra.mxu1 %v8437_v39  ;;  %5866 = vmatprep.subr.bf16.mxu0 %v13715_v16  ;;  %v13720_v39 = vld [vmem:[#allocation94_spill] sm:$0xff]  ;;  %v9284_v16 = vld [vmem:[%s13736_s20 + $0x238] ss:$20 sps:$4 sm:$0xff]  }
 0x327   :  { %5888 = vmatprep.subr.bf16.mxu1 %v8448_v37  ;;  %v13722_v37 = vld [vmem:[#allocation96_spill] sm:$0xff] }
 0x329   :  { %5867 = vmatpush3.bf16.msra.mxu0 %v8454_v29  ;;  %v13723_v29 = vld [vmem:[#allocation97_spill] sm:$0xff] }
 0x32a   :  { %5889 = vmatpush3.bf16.msra.mxu1 %v13716_v17  ;;  %2570 = vmatprep.subr.bf16.mxu0 %v13717_v18  ;;  %v9290_v17 = vld [vmem:[%s13736_s20 + $0x25c] ss:$20 sps:$4 sm:$0xff]   ;;  %v9296_v18 = vld [vmem:[%s13736_s20 + $0x264] ss:$20 sps:$4 sm:$0xff]  }
 0x32b   :  { %2652 = vmatprep.subr.bf16.mxu1 %v8475_v32  ;;  %v13726_v32 = vld [vmem:[#allocation100_spill] sm:$0xff] }
 0x32c   :  { %2286 = vmatmul.mubr.bf16.vlgmr.msra.gmra.mrb[16].mxu0 %v8936_v25  ;;  %v13727_v25 = vld [vmem:[#allocation101_spill] sm:$0xff] }
 0x32d   :  { %2326 = vmatmul.mubr.bf16.vlgmr.msra.gmra.mrb[16].mxu1 %v2087_v56  ;;  %2571 = vmatpush1.bf16.msra.mxu0 %v13718_v50  ;;  %v9134_v56 = vld [vmem:[%s13736_s20 + $0x140] ss:$20 sps:$4 sm:$0xff]   ;;  %v9302_v50 = vld [vmem:[%s13736_s20 + $0x258] ss:$20 sps:$4 sm:$0xff]  }
 0x32e   :  { %2653 = vmatpush1.bf16.msra.mxu1 %v13719_v19  ;;  %2572 = vmatprep.subr.bf16.mxu0 %v13720_v39  ;;  %v9308_v19 = vld [vmem:[%s13736_s20 + $0x260] ss:$20 sps:$4 sm:$0xff]   ;;  %v9314_v39 = vld [vmem:[%s13736_s20 + $0x284] ss:$20 sps:$4 sm:$0xff]  }
 0x32f   :  { %2654 = vmatprep.subr.bf16.mxu1 %v13721_v20  ;;  %13737 = vst [vmem:[#allocation10_spill] sm:$0xff] %v9314_v39  ;;  %v9320_v20 = vld [vmem:[%s13736_s20 + $0x28c] ss:$20 sps:$4 sm:$0xff]  }
 0x330   :  { %13738 = vst [vmem:[#allocation11_spill] sm:$0xff] %v9320_v20 }
 0x331   :  { %2573 = vmatpush1.bf16.msra.mxu0 %v13722_v37 }
 0x332   :  { %2655 = vmatpush1.bf16.msra.mxu1 %v13723_v29  ;;  %2574 = vmatprep.subr.bf16.mxu0 %v13724_v21 }
 0x333   :  { %2656 = vmatprep.subr.bf16.mxu1 %v13725_v23 }
 0x335   :  { %2575 = vmatpush1.bf16.msra.mxu0 %v13726_v32 }
 0x336   :  { %2657 = vmatpush1.bf16.msra.mxu1 %v13727_v25  ;;  %2576 = vmatprep.subr.bf16.mxu0 %v13728_v45 }
 0x337   :  { %2658 = vmatprep.subr.bf16.mxu1 %v13729_v46 }
 0x339   :  { %2577 = vmatpush1.bf16.msra.mxu0 %v13730_v28 }
 0x33a   :  { %2659 = vmatpush1.bf16.msra.mxu1 %v13731_v30  ;;  %2578 = vmatprep.subr.bf16.mxu0 %v13732_v47 }
 0x33b   :  { %2660 = vmatprep.subr.bf16.mxu1 %v13733_v48 }
 0x33d   :  { %2579 = vmatpush1.bf16.msra.mxu0 %v13734_v51 }
 0x33e   :  { %2661 = vmatpush1.bf16.msra.mxu1 %v13735_v52  ;;  %2580 = vmatprep.subr.bf16.mxu0 %v8591_v44  ;;  %v9098_v44 = vld [vmem:[%s13736_s20 + $0x11c] ss:$20 sps:$4 sm:$0xff]  }
 0x33f   :  { %2662 = vmatprep.subr.bf16.mxu1 %v8597_v42  ;;  %v9104_v42 = vld [vmem:[%s13736_s20 + $0x124] ss:$20 sps:$4 sm:$0xff]  }
 0x341   :  { %2581 = vmatpush1.bf16.msra.mxu0 %v8603_v34  ;;  %v9086_v34 = vld [vmem:[%s13736_s20 + $0xf0] ss:$20 sps:$4 sm:$0xff]  }
 0x342   :  { %2663 = vmatpush1.bf16.msra.mxu1 %v8609_v43  ;;  %2582 = vmatprep.subr.bf16.mxu0 %v9074_v35  ;;  %v9092_v43 = vld [vmem:[%s13736_s20 + $0xf8] ss:$20 sps:$4 sm:$0xff]   ;;  %s2458_s20 = sand.u32 7, %s9356_s19  ;;  %s2554_s19 = sand.u32 7, %s9427_s23 }
 0x343   :  { %2664 = vmatprep.subr.bf16.mxu1 %v9080_v36  ;;  %s9462_s0 = sadd.s32 %s5726_s14, %s2458_s20  ;;  %s13745_s23 = sld [smem:[#allocation7_spill]] }
 0x344   :  { %s13746_s20 = sld [smem:[#allocation8_spill]]  ;;  %s9494_s14 = sadd.s32 %s5734_s15, %s2554_s19 }
 0x345   :  { %2583 = vmatpush1.bf16.msra.mxu0 %v9086_v34  ;;  %s2558_s27 = scalar_lea.vmem %s13143_s7, %s9494_s14  ;;  %s13757_s14 = sld [smem:[#allocation115_spill]] }
 0x346   :  { %2665 = vmatpush1.bf16.msra.mxu1 %v9092_v43  ;;  %2584 = vmatprep.subr.bf16.mxu0 %v9098_v44  ;;  %s2904_s15 = sand.u32 7, %s10364_s6 }
 0x347   :  { %2666 = vmatprep.subr.bf16.mxu1 %v9104_v42 }
 0x349   :  { %2585 = vmatpush1.bf16.msra.mxu0 %v9110_v33  ;;  %s13753_s25 = scalar_lea.vmem %s13143_s7, %s13745_s23  ;;  %s10382_s23 = sld [smem:[#allocation5 + $0x19]] }
 0x34a   :  { %2667 = vmatpush1.bf16.msra.mxu1 %v9116_v53  ;;  %2586 = vmatprep.subr.bf16.mxu0 %v9122_v54  ;;  %s13754_s4 = scalar_lea.vmem %s13143_s7, %s13746_s20 }
 0x34b   :  { %2668 = vmatprep.subr.bf16.mxu1 %v9128_v55 }
 0x34d   :  { %2587 = vmatpush1.bf16.msra.mxu0 %v9134_v56 }
 0x34e   :  { %2669 = vmatpush1.bf16.msra.mxu1 %v9140_v57  ;;  %2588 = vmatprep.subr.bf16.mxu0 %v9146_v58 }
 0x34f   :  { %2670 = vmatprep.subr.bf16.mxu1 %v9152_v59  ;;  %s2891_s19 = sand.u32 7, %s10382_s23 }
 0x351   :  { %2589 = vmatpush1.bf16.msra.mxu0 %v9158_v60 }
 0x352   :  { %2671 = vmatpush1.bf16.msra.mxu1 %v9164_v62  ;;  %2590 = vmatprep.subr.bf16.mxu0 %v9170_v0 }
 0x353   :  { %2672 = vmatprep.subr.bf16.mxu1 %v9176_v31 }
 0x355   :  { %2591 = vmatpush1.bf16.msra.mxu0 %v9182_v40 }
 0x356   :  { %2673 = vmatpush1.bf16.msra.mxu1 %v9188_v49  ;;  %2592 = vmatprep.subr.bf16.mxu0 %v9194_v2 }
 0x357   :  { %2674 = vmatprep.subr.bf16.mxu1 %v9200_v24 }
 0x359   :  { %2593 = vmatpush1.bf16.msra.mxu0 %v9206_v38 }
 0x35a   :  { %2675 = vmatpush1.bf16.msra.mxu1 %v9212_v27  ;;  %2594 = vmatprep.subr.bf16.mxu0 %v9218_v3 }
 0x35b   :  { %2676 = vmatprep.subr.bf16.mxu1 %v9224_v4 }
 0x35d   :  { %2595 = vmatpush1.bf16.msra.mxu0 %v9230_v5 }
 0x35e   :  { %2677 = vmatpush1.bf16.msra.mxu1 %v9236_v6  ;;  %2596 = vmatprep.subr.bf16.mxu0 %v9242_v7 }
 0x35f   :  { %2678 = vmatprep.subr.bf16.mxu1 %v9248_v8 }
 0x361   :  { %2597 = vmatpush1.bf16.msra.mxu0 %v9254_v10 }
 0x362   :  { %2679 = vmatpush1.bf16.msra.mxu1 %v9260_v11  ;;  %2598 = vmatprep.subr.bf16.mxu0 %v9266_v12 }
 0x363   :  { %2680 = vmatprep.subr.bf16.mxu1 %v9272_v13 }
 0x365   :  { %2599 = vmatpush1.bf16.msra.mxu0 %v9278_v14 }
 0x366   :  { %2681 = vmatpush1.bf16.msra.mxu1 %v9284_v16  ;;  %2600 = vmatprep.subr.bf16.mxu0 %v9290_v17 }
 0x367   :  { %2682 = vmatprep.subr.bf16.mxu1 %v9296_v18 }
 0x369   :  { %2601 = vmatpush1.bf16.msra.mxu0 %v9302_v50 }
 0x36a   :  { %2683 = vmatpush1.bf16.msra.mxu1 %v9308_v19  ;;  %2611 = vmatprep.subr.bf16.mxu0 %v9314_v39 }
 0x36b   :  { %2693 = vmatprep.subr.bf16.mxu1 %v9320_v20 }
 0x3df   :  { %v2164_v37 = vpop.f32.mrb[12].mxu0  ;;  %v2246_v29 = vpop.f32.mrb[12].mxu1 }
 0x3e0   :  { %v2166_v21 = vpop.f32.mrb[13].mxu0  ;;  %v2248_v23 = vpop.f32.mrb[13].mxu1  ;;  %v6140_v28 = vadd.f32 %v2164_v37, %v8659_v61  ;;  %v6142_v47 = vadd.f32 %v2246_v29, %v8667_v1 }
 0x3e1   :  { %v2168_v32 = vpop.f32.mrb[14].mxu0  ;;  %v2250_v25 = vpop.f32.mrb[14].mxu1  ;;  %v6141_v30 = vadd.f32 %v2166_v21, %v8663_v63  ;;  %v6143_v20 = vadd.f32 %v2248_v23, %v8673_v9 }
 0x3e2   :  { %v2169_v45 = vpop.f32.mrb[15].mxu0  ;;  %v2251_v46 = vpop.f32.mrb[15].mxu1  ;;  %v5411_v48 = vmul.f32 -1.442695, %v6140_v28  ;;  %v5413_v52 = vmul.f32 -1.442695, %v6142_v47 }
 0x3e3   :  { %v5412_v51 = vmul.f32 -1.442695, %v6141_v30  ;;  %v5414_v46 = vmul.f32 -1.442695, %v6143_v20 }
 0x3e4   :  { %6526 = vpow2.f32 %v5411_v48 }
 0x3e5   :  { %6528 = vpow2.f32 %v5412_v51 }
 0x3e6   :  { %6530 = vpow2.f32 %v5413_v52 }
 0x3e7   :  { %6532 = vpow2.f32 %v5414_v46 }
 0x3ee   :  { %v6527_v32 = vpop.eup %6526 }
 0x3ef   :  { %v6529_v25 = vpop.eup %6528  ;;  %v2336_v37 = vadd.f32 1.0, %v6527_v32 }
 0x3f0   :  { %v6531_v45 = vpop.eup %6530  ;;  %v2342_v28 = vadd.f32 1.0, %v6529_v25 }
 0x3f1   :  { %v2348_v23 = vadd.f32 1.0, %v6531_v45  ;;  %6534 = vrcp.f32 %v2336_v37 }
 0x3f2   :  { %6536 = vrcp.f32 %v2342_v28 }
 0x3f3   :  { %6538 = vrcp.f32 %v2348_v23 }
 0x3ff   :  { %v5868_v39 = vpop.f32.mrb[16].mxu0 }
 0x400   :  { %v5890_v29 = vpop.f32.mrb[16].mxu1  ;;  %v5869_v21 = vpop.f32.mrb[17].mxu0 }
 0x401   :  { %v5870_v30 = vadd.f32 %v5869_v21, %v5868_v39  ;;  %v5891_v47 = vpop.f32.mrb[17].mxu1  ;;  %v5871_v48 = vpop.f32.mrb[18].mxu0 }
 0x402   :  { %v5892_v51 = vadd.f32 %v5891_v47, %v5890_v29  ;;  %v5893_v52 = vpop.f32.mrb[18].mxu1  ;;  %v5872_v9 = vpop.f32.mrb[19].mxu0 }
 0x403   :  { %v2288_v20 = vadd.f32 %v5870_v30, %v8679_v15  ;;  %v5894_v32 = vpop.f32.mrb[19].mxu1  ;;  %v6533_v39 = vpop.eup %6532 }
 0x404   :  { %v6535_v25 = vpop.eup %6534  ;;  %v2354_v28 = vadd.f32 1.0, %v6533_v39 }
 0x405   :  { %v2328_v9 = vadd.f32 %v5892_v51, %v2288_v20  ;;  %v6537_v45 = vpop.eup %6536 }
 0x406   :  { %v6539_v46 = vpop.eup %6538  ;;  %v2359_v29 = vmul.f32 %v6537_v45, %v8930_v22 }
 0x407   :  { %6540 = vtanh.f32 %v2328_v9  ;;  %v2361_v30 = vmul.f32 %v6539_v46, %v8942_v26 }
 0x408   :  { %6542 = vrcp.f32 %v2354_v28 }
 0x411   :  { %v6541_v37 = vpop.eup %6540 }
 0x412   :  { %v2358_v21 = vmul.f32 %v6541_v37, %v6535_v25  ;;  %v6543_v26 = vpop.eup %6542 }
 0x414   :  { %v2360_v47 = vadd.f32 %v2359_v29, %v2358_v21 }
 0x416   :  { %v2362_v22 = vadd.f32 %v2361_v30, %v2360_v47 }
 0x418   :  { %6544 = vtanh.f32 %v2362_v22  ;;  %5416 = vst [vmem:[%s13143_s7 + $0x38] sm:$0xff] %v2362_v22 }
 0x422   :  { %v6545_v48 = vpop.eup %6544 }
 0x423   :  { %v2364_v23 = vmul.f32 %v6545_v48, %v6543_v26 }
 0x425   :  { %5415 = vst [vmem:[%s13143_s7 + $0x30] sm:$0xff] %v2364_v23 }
 0x42c   :  { %v2380_v51 = vld [vmem:[%s13743_s18] ss:$8 sm:$0x3] }
 0x42d   :  { %v2404_v52 = vld [vmem:[%s13744_s11] ss:$8 sm:$0x3]  ;;  %2381 = vst.msk [vmem:[#allocation2] ss:$8 sm:$0x3] %vm7753_vm1, %v2380_v51  ;;  %s2462_s11 = scalar_lea.vmem %s13143_s7, %s9462_s0  ;;  %s2486_s0 = scalar_lea.vmem %s13143_s7, %s9474_s8 }
 0x42e   :  { %2405 = vst.msk [vmem:[#allocation2 + $0x1] ss:$8 sm:$0x3] %vm7753_vm1, %v2404_v52  ;;  %v2428_v20 = vld [vmem:[%s13747_s13] ss:$8 sm:$0x3] }
 0x42f   :  { %v2452_v32 = vld [vmem:[%s13748_s17] ss:$8 sm:$0x3]  ;;  %2429 = vst.msk [vmem:[#allocation2 + $0x2] ss:$8 sm:$0x3] %vm7753_vm1, %v2428_v20 }
 0x430   :  { %2453 = vst.msk [vmem:[#allocation2 + $0x3] ss:$8 sm:$0x3] %vm7753_vm1, %v2452_v32  ;;  %v2476_v9 = vld [vmem:[%s13751_s3] ss:$8 sm:$0x3] }
 0x431   :  { %v2500_v39 = vld [vmem:[%s13752_s5] ss:$8 sm:$0x3]  ;;  %2477 = vst.msk [vmem:[#allocation2 + $0x4] ss:$8 sm:$0x3] %vm7753_vm1, %v2476_v9  ;;  %s13756_s5 = scalar_lea.vmem %s13143_s7, %s13750_s21 }
 0x432   :  { %2501 = vst.msk [vmem:[#allocation2 + $0x5] ss:$8 sm:$0x3] %vm7753_vm1, %v2500_v39  ;;  %v2524_v25 = vld [vmem:[%s13753_s25] ss:$8 sm:$0x3] }
 0x433   :  { %v2548_v45 = vld [vmem:[%s13754_s4] ss:$8 sm:$0x3]  ;;  %2525 = vst.msk [vmem:[#allocation2 + $0x6] ss:$8 sm:$0x3] %vm7753_vm1, %v2524_v25 }
 0x434   :  { %2549 = vst.msk [vmem:[#allocation2 + $0x7] ss:$8 sm:$0x3] %vm7753_vm1, %v2548_v45  ;;  %v2391_v46 = vld [vmem:[%s13755_s1] ss:$8 sm:$0x3] }
 0x435   :  { %v2415_v37 = vld [vmem:[%s13756_s5] ss:$8 sm:$0x3]  ;;  %2392 = vst.msk [vmem:[#allocation2 + $0x10] ss:$8 sm:$0x3] %vm7753_vm1, %v2391_v46 }
 0x436   :  { %2416 = vst.msk [vmem:[#allocation2 + $0x11] ss:$8 sm:$0x3] %vm7753_vm1, %v2415_v37  ;;  %v2439_v29 = vld [vmem:[%s2438_s9] ss:$8 sm:$0x3] }
 0x437   :  { %v2463_v21 = vld [vmem:[%s2462_s11] ss:$8 sm:$0x3]  ;;  %2440 = vst.msk [vmem:[#allocation2 + $0x12] ss:$8 sm:$0x3] %vm7753_vm1, %v2439_v29 }
 0x438   :  { %2464 = vst.msk [vmem:[#allocation2 + $0x13] ss:$8 sm:$0x3] %vm7753_vm1, %v2463_v21  ;;  %v2487_v28 = vld [vmem:[%s2486_s0] ss:$8 sm:$0x3] }
 0x439   :  { %v2511_v30 = vld [vmem:[%s2510_s16] ss:$8 sm:$0x3]  ;;  %2488 = vst.msk [vmem:[#allocation2 + $0x14] ss:$8 sm:$0x3] %vm7753_vm1, %v2487_v28 }
 0x43a   :  { %2512 = vst.msk [vmem:[#allocation2 + $0x15] ss:$8 sm:$0x3] %vm7753_vm1, %v2511_v30  ;;  %v2535_v47 = vld [vmem:[%s2534_s29] ss:$8 sm:$0x3] }
 0x43b   :  { %v2559_v22 = vld [vmem:[%s2558_s27] ss:$8 sm:$0x3]  ;;  %2536 = vst.msk [vmem:[#allocation2 + $0x16] ss:$8 sm:$0x3] %vm7753_vm1, %v2535_v47 }
 0x43c   :  { %2560 = vst.msk [vmem:[#allocation2 + $0x17] ss:$8 sm:$0x3] %vm7753_vm1, %v2559_v22  ;;  %v9578_v26 = vld [vmem:[#allocation2 + $0x8] sm:$0xff]  ;;  %v2562_v48 = vld [vmem:[#allocation2] sm:$0xff]  ;;  %s10360_s11 = sld [smem:[#allocation4 + $0x18]] }
 0x43d   :  { %v9582_v23 = vpack.c.bf16 %v9578_v26, %v9578_v26  ;;  %v9584_v51 = vpack.c.bf16 %v2562_v48, %v2562_v48  ;;  %v9595_v20 = vld [vmem:[%s13757_s14 + $0x280] ss:$20 sps:$4 sm:$0xff]   ;;  %v9601_v32 = vld [vmem:[%s13757_s14 + $0x288] ss:$20 sps:$4 sm:$0xff]   ;;  %v9631_v46 = vld [vmem:[%s13757_s14 + $0x2b0] ss:$20 sps:$4 sm:$0xff]  }
 0x43e   :  { %v9611_v39 = vld [vmem:[%s13757_s14 + $0x2ac] ss:$20 sps:$4 sm:$0xff]   ;;  %v9617_v25 = vld [vmem:[%s13757_s14 + $0x2b4] ss:$20 sps:$4 sm:$0xff]   ;;  %v9643_v29 = vld [vmem:[%s13757_s14 + $0x2dc] ss:$20 sps:$4 sm:$0xff]  }
 0x43f   :  { %2602 = vmatprep.mubr.bf16.mxu0 %v9582_v23  ;;  %2684 = vmatprep.mubr.bf16.mxu1 %v9582_v23  ;;  %v9625_v45 = vld [vmem:[%s13757_s14 + $0x2a8] ss:$20 sps:$4 sm:$0xff]   ;;  %v9649_v21 = vld [vmem:[%s13757_s14 + $0x2d0] ss:$20 sps:$4 sm:$0xff]   ;;  %v9655_v28 = vld [vmem:[%s13757_s14 + $0x2d8] ss:$20 sps:$4 sm:$0xff]  }
 0x440   :  { %2603 = vmatmul.mubr.bf16.vlgmr.msra.gmra.mrb[20].mxu0 %v9584_v51  ;;  %2685 = vmatmul.mubr.bf16.vlgmr.msra.gmra.mrb[20].mxu1 %v9584_v51  ;;  %v9637_v37 = vld [vmem:[%s13757_s14 + $0x2d4] ss:$20 sps:$4 sm:$0xff]   ;;  %13758 = vst [vmem:[#allocation12_spill] sm:$0xff] %v9655_v28  ;;  %v9661_v30 = vld [vmem:[%s13757_s14 + $0x2fc] ss:$20 sps:$4 sm:$0xff]   ;;  %s10366_s25 = sld [smem:[#allocation4 + $0x1b]] }
 0x441   :  { %2612 = vmatpush1.bf16.msra.mxu0 %v9595_v20  ;;  %2694 = vmatpush1.bf16.msra.mxu1 %v9601_v32  ;;  %13759 = vst [vmem:[#allocation13_spill] sm:$0xff] %v9661_v30  ;;  %v9667_v47 = vld [vmem:[%s13757_s14 + $0x304] ss:$20 sps:$4 sm:$0xff]   ;;  %v9679_v48 = vld [vmem:[%s13757_s14 + $0x300] ss:$20 sps:$4 sm:$0xff]   ;;  %s10370_s13 = sld [smem:[#allocation4 + $0x1c]] }
 0x442   :  { %2613 = vmatprep.subr.bf16.mxu0 %v9611_v39  ;;  %2695 = vmatprep.subr.bf16.mxu1 %v9617_v25  ;;  %13760 = vst [vmem:[#allocation14_spill] sm:$0xff] %v9667_v47  ;;  %v9673_v22 = vld [vmem:[%s13757_s14 + $0x2f8] ss:$20 sps:$4 sm:$0xff]   ;;  %13762 = vst [vmem:[#allocation16_spill] sm:$0xff] %v9679_v48  ;;  %s2853_s2 = sshra.s32 %s10360_s11, 3  ;;  %s10372_s4 = sld [smem:[#allocation4 + $0x1d]] }
 0x443   :  { %v9590_v52 = vld [vmem:[#allocation2 + $0x18] sm:$0xff]  ;;  %13761 = vst [vmem:[#allocation15_spill] sm:$0xff] %v9673_v22  ;;  %s10378_s0 = sld [smem:[#allocation5 + $0x18]]  ;;  %s2856_s17 = sand.u32 7, %s10360_s11 }
 0x444   :  { %v9606_v9 = vpack.c.bf16 %v9590_v52, %v9590_v52  ;;  %s5735_s30 = sshll.u32 %s2853_s2, 4  ;;  %s2877_s16 = sshra.s32 %s10362_s24, 3 }
 0x445   :  { %2614 = vmatpush1.bf16.msra.mxu0 %v9625_v45  ;;  %2696 = vmatpush1.bf16.msra.mxu1 %v9631_v46  ;;  %s2901_s3 = sshra.s32 %s10364_s6, 3  ;;  %s10385_s1 = sld [smem:[#allocation5 + $0x1a]] }
 0x446   :  { %2643 = vmatprep.mubr.bf16.mxu0 %v9606_v9  ;;  %2725 = vmatprep.mubr.bf16.mxu1 %v9606_v9  ;;  %s10387_s20 = sadd.s32 %s5735_s30, %s2856_s17  ;;  %s2880_s5 = sand.u32 7, %s10362_s24 }
 0x447   :  { %2615 = vmatprep.subr.bf16.mxu0 %v9637_v37  ;;  %2697 = vmatprep.subr.bf16.mxu1 %v9643_v29  ;;  %s5737_s8 = sshll.u32 %s2877_s16, 4  ;;  %s5739_s29 = sshll.u32 %s2901_s3, 4 }
 0x448   :  { %s2925_s26 = sshra.s32 %s10366_s25, 3  ;;  %s10398_s22 = sadd.s32 %s5737_s8, %s2880_s5 }
 0x449   :  { %2616 = vmatpush1.bf16.msra.mxu0 %v9649_v21  ;;  %2698 = vmatpush1.bf16.msra.mxu1 %v9655_v28  ;;  %v9961_v28 = vld [vmem:[%s13757_s14 + $0x4d8] ss:$20 sps:$4 sm:$0xff]   ;;  %s2949_s21 = sshra.s32 %s10370_s13, 3  ;;  %s10401_s9 = sadd.s32 %s5739_s29, %s2904_s15 }
 0x44a   :  { %2617 = vmatprep.subr.bf16.mxu0 %v9661_v30  ;;  %2699 = vmatprep.subr.bf16.mxu1 %v9667_v47  ;;  %v9685_v30 = vld [vmem:[%s13757_s14 + $0x324] ss:$20 sps:$4 sm:$0xff]   ;;  %v9691_v47 = vld [vmem:[%s13757_s14 + $0x32c] ss:$20 sps:$4 sm:$0xff]   ;;  %13809 = vst [vmem:[#allocation63_spill] sm:$0xff] %v9961_v28  ;;  %s2973_s11 = sshra.s32 %s10372_s4, 3 }
 0x44b   :  { %13763 = vst [vmem:[#allocation17_spill] sm:$0xff] %v9685_v30  ;;  %13764 = vst [vmem:[#allocation18_spill] sm:$0xff] %v9691_v47  ;;  %s2928_s24 = sand.u32 7, %s10366_s25  ;;  %s5741_s6 = sshll.u32 %s2925_s26, 4 }
 0x44c   :  { %s2952_s2 = sand.u32 7, %s10370_s13  ;;  %s5743_s17 = sshll.u32 %s2949_s21, 4 }
 0x44d   :  { %2618 = vmatpush1.bf16.msra.mxu0 %v9673_v22  ;;  %2700 = vmatpush1.bf16.msra.mxu1 %v9679_v48  ;;  %v9697_v22 = vld [vmem:[%s13757_s14 + $0x320] ss:$20 sps:$4 sm:$0xff]   ;;  %v9703_v48 = vld [vmem:[%s13757_s14 + $0x328] ss:$20 sps:$4 sm:$0xff]   ;;  %s2976_s30 = sand.u32 7, %s10372_s4  ;;  %s5745_s16 = sshll.u32 %s2973_s11, 4 }
 0x44e   :  { %2619 = vmatprep.subr.bf16.mxu0 %v9685_v30  ;;  %2701 = vmatprep.subr.bf16.mxu1 %v9691_v47  ;;  %13765 = vst [vmem:[#allocation19_spill] sm:$0xff] %v9697_v22  ;;  %13766 = vst [vmem:[#allocation20_spill] sm:$0xff] %v9703_v48  ;;  %v9709_v30 = vld [vmem:[%s13757_s14 + $0x34c] ss:$20 sps:$4 sm:$0xff]   ;;  %v9715_v47 = vld [vmem:[%s13757_s14 + $0x354] ss:$20 sps:$4 sm:$0xff]   ;;  %s10413_s25 = sadd.s32 %s5741_s6, %s2928_s24  ;;  %s10415_s29 = sadd.s32 %s5743_s17, %s2952_s2 }
 0x44f   :  { %13767 = vst [vmem:[#allocation21_spill] sm:$0xff] %v9709_v30  ;;  %13768 = vst [vmem:[#allocation22_spill] sm:$0xff] %v9715_v47  ;;  %s2997_s15 = sshra.s32 %s10374_s12, 3  ;;  %s10422_s18 = sadd.s32 %s5745_s16, %s2976_s30 }
 0x450   :  { %s3000_s26 = sand.u32 7, %s10374_s12  ;;  %s5747_s21 = sshll.u32 %s2997_s15, 4 }
 0x451   :  { %2620 = vmatpush1.bf16.msra.mxu0 %v9697_v22  ;;  %2702 = vmatpush1.bf16.msra.mxu1 %v9703_v48  ;;  %v9721_v22 = vld [vmem:[%s13757_s14 + $0x348] ss:$20 sps:$4 sm:$0xff]   ;;  %v9727_v48 = vld [vmem:[%s13757_s14 + $0x350] ss:$20 sps:$4 sm:$0xff]   ;;  %s3021_s16 = sshra.s32 %s10376_s28, 3  ;;  %s10441_s15 = sadd.s32 %s5747_s21, %s3000_s26 }
 0x452   :  { %2621 = vmatprep.subr.bf16.mxu0 %v9709_v30  ;;  %2703 = vmatprep.subr.bf16.mxu1 %v9715_v47  ;;  %13769 = vst [vmem:[#allocation23_spill] sm:$0xff] %v9721_v22  ;;  %13770 = vst [vmem:[#allocation24_spill] sm:$0xff] %v9727_v48  ;;  %v9733_v30 = vld [vmem:[%s13757_s14 + $0x374] ss:$20 sps:$4 sm:$0xff]   ;;  %v9739_v47 = vld [vmem:[%s13757_s14 + $0x37c] ss:$20 sps:$4 sm:$0xff]  }
 0x453   :  { %13771 = vst [vmem:[#allocation25_spill] sm:$0xff] %v9733_v30  ;;  %13772 = vst [vmem:[#allocation26_spill] sm:$0xff] %v9739_v47  ;;  %13862 = sst [smem:[#allocation7_spill]] %s10441_s15  ;;  %s2864_s11 = sshra.s32 %s10378_s0, 3 }
 0x454   :  { %s3024_s24 = sand.u32 7, %s10376_s28  ;;  %s2888_s6 = sshra.s32 %s10382_s23, 3 }
 0x455   :  { %2622 = vmatpush1.bf16.msra.mxu0 %v9721_v22  ;;  %2704 = vmatpush1.bf16.msra.mxu1 %v9727_v48  ;;  %v9745_v22 = vld [vmem:[%s13757_s14 + $0x370] ss:$20 sps:$4 sm:$0xff]   ;;  %v9751_v48 = vld [vmem:[%s13757_s14 + $0x378] ss:$20 sps:$4 sm:$0xff]   ;;  %s5749_s2 = sshll.u32 %s3021_s16, 4  ;;  %s2867_s17 = sand.u32 7, %s10378_s0 }
 0x456   :  { %2623 = vmatprep.subr.bf16.mxu0 %v9733_v30  ;;  %2705 = vmatprep.subr.bf16.mxu1 %v9739_v47  ;;  %13773 = vst [vmem:[#allocation27_spill] sm:$0xff] %v9745_v22  ;;  %13774 = vst [vmem:[#allocation28_spill] sm:$0xff] %v9751_v48  ;;  %v9757_v30 = vld [vmem:[%s13757_s14 + $0x39c] ss:$20 sps:$4 sm:$0xff]   ;;  %v9763_v47 = vld [vmem:[%s13757_s14 + $0x3a4] ss:$20 sps:$4 sm:$0xff]   ;;  %s10450_s30 = sadd.s32 %s5749_s2, %s3024_s24 }
 0x457   :  { %13775 = vst [vmem:[#allocation29_spill] sm:$0xff] %v9757_v30  ;;  %13776 = vst [vmem:[#allocation30_spill] sm:$0xff] %v9763_v47  ;;  %s5736_s3 = sshll.u32 %s2864_s11, 4  ;;  %s5738_s5 = sshll.u32 %s2888_s6, 4 }
 0x458   :  { %s10448_s13 = sld [smem:[#allocation5 + $0x1c]]  ;;  %13863 = sst [smem:[#allocation8_spill]] %s10450_s30 }
 0x459   :  { %2624 = vmatpush1.bf16.msra.mxu0 %v9745_v22  ;;  %2706 = vmatpush1.bf16.msra.mxu1 %v9751_v48  ;;  %v9769_v22 = vld [vmem:[%s13757_s14 + $0x398] ss:$20 sps:$4 sm:$0xff]   ;;  %v9775_v48 = vld [vmem:[%s13757_s14 + $0x3a0] ss:$20 sps:$4 sm:$0xff]   ;;  %s10452_s4 = sld [smem:[#allocation5 + $0x1d]]  ;;  %s10454_s26 = sadd.s32 %s5736_s3, %s2867_s17 }
 0x45a   :  { %2625 = vmatprep.subr.bf16.mxu0 %v9757_v30  ;;  %2707 = vmatprep.subr.bf16.mxu1 %v9763_v47  ;;  %13777 = vst [vmem:[#allocation31_spill] sm:$0xff] %v9769_v22  ;;  %13778 = vst [vmem:[#allocation32_spill] sm:$0xff] %v9775_v48  ;;  %v9781_v30 = vld [vmem:[%s13757_s14 + $0x3c4] ss:$20 sps:$4 sm:$0xff]   ;;  %v9787_v47 = vld [vmem:[%s13757_s14 + $0x3cc] ss:$20 sps:$4 sm:$0xff]   ;;  %s10458_s0 = sadd.s32 %s5738_s5, %s2891_s19 }
 0x45b   :  { %13779 = vst [vmem:[#allocation33_spill] sm:$0xff] %v9781_v30  ;;  %13780 = vst [vmem:[#allocation34_spill] sm:$0xff] %v9787_v47  ;;  %13864 = sst [smem:[#allocation9_spill]] %s10454_s26  ;;  %s10456_s28 = sld [smem:[#allocation5 + $0x1e]] }
 0x45c   :  { %13865 = sst [smem:[#allocation111_spill]] %s10458_s0  ;;  %s10460_s23 = sld [smem:[#allocation5 + $0x1f]] }
 0x45d   :  { %2626 = vmatpush1.bf16.msra.mxu0 %v9769_v22  ;;  %2708 = vmatpush1.bf16.msra.mxu1 %v9775_v48  ;;  %v9793_v22 = vld [vmem:[%s13757_s14 + $0x3c0] ss:$20 sps:$4 sm:$0xff]   ;;  %v9799_v48 = vld [vmem:[%s13757_s14 + $0x3c8] ss:$20 sps:$4 sm:$0xff]   ;;  %s2912_s12 = sshra.s32 %s10385_s1, 3  ;;  %s2936_s6 = sshra.s32 %s10389_s10, 3 }
 0x45e   :  { %2627 = vmatprep.subr.bf16.mxu0 %v9781_v30  ;;  %2709 = vmatprep.subr.bf16.mxu1 %v9787_v47  ;;  %13781 = vst [vmem:[#allocation35_spill] sm:$0xff] %v9793_v22  ;;  %13782 = vst [vmem:[#allocation36_spill] sm:$0xff] %v9799_v48  ;;  %v9805_v30 = vld [vmem:[%s13757_s14 + $0x3ec] ss:$20 sps:$4 sm:$0xff]   ;;  %v9811_v47 = vld [vmem:[%s13757_s14 + $0x3f4] ss:$20 sps:$4 sm:$0xff]  }
 0x45f   :  { %13783 = vst [vmem:[#allocation37_spill] sm:$0xff] %v9805_v30  ;;  %13784 = vst [vmem:[#allocation38_spill] sm:$0xff] %v9811_v47  ;;  %s2915_s16 = sand.u32 7, %s10385_s1  ;;  %s5740_s27 = sshll.u32 %s2912_s12, 4 }
 0x460   :  { %s2960_s3 = sshra.s32 %s10448_s13, 3  ;;  %s5742_s2 = sshll.u32 %s2936_s6, 4 }
 0x461   :  { %2628 = vmatpush1.bf16.msra.mxu0 %v9793_v22  ;;  %2710 = vmatpush1.bf16.msra.mxu1 %v9799_v48  ;;  %v9817_v22 = vld [vmem:[%s13757_s14 + $0x3e8] ss:$20 sps:$4 sm:$0xff]   ;;  %v9823_v48 = vld [vmem:[%s13757_s14 + $0x3f0] ss:$20 sps:$4 sm:$0xff]   ;;  %s2984_s17 = sshra.s32 %s10452_s4, 3  ;;  %s2963_s19 = sand.u32 7, %s10448_s13 }
 0x462   :  { %2629 = vmatprep.subr.bf16.mxu0 %v9805_v30  ;;  %2711 = vmatprep.subr.bf16.mxu1 %v9811_v47  ;;  %13785 = vst [vmem:[#allocation39_spill] sm:$0xff] %v9817_v22  ;;  %13786 = vst [vmem:[#allocation40_spill] sm:$0xff] %v9823_v48  ;;  %v9829_v30 = vld [vmem:[%s13757_s14 + $0x414] ss:$20 sps:$4 sm:$0xff]   ;;  %v9835_v47 = vld [vmem:[%s13757_s14 + $0x41c] ss:$20 sps:$4 sm:$0xff]   ;;  %s10493_s24 = sadd.s32 %s5740_s27, %s2915_s16  ;;  %s13870_s16 = scalar_lea.vmem %s13143_s7, %s10401_s9 }
 0x463   :  { %13787 = vst [vmem:[#allocation41_spill] sm:$0xff] %v9829_v30  ;;  %13788 = vst [vmem:[#allocation42_spill] sm:$0xff] %v9835_v47  ;;  %s3008_s26 = sshra.s32 %s10456_s28, 3  ;;  %s5744_s8 = sshll.u32 %s2960_s3, 4 }
 0x464   :  { %s3032_s5 = sshra.s32 %s10460_s23, 3  ;;  %s2987_s21 = sand.u32 7, %s10452_s4 }
 0x465   :  { %2630 = vmatpush1.bf16.msra.mxu0 %v9817_v22  ;;  %2712 = vmatpush1.bf16.msra.mxu1 %v9823_v48  ;;  %v9841_v22 = vld [vmem:[%s13757_s14 + $0x410] ss:$20 sps:$4 sm:$0xff]   ;;  %v9847_v48 = vld [vmem:[%s13757_s14 + $0x418] ss:$20 sps:$4 sm:$0xff]   ;;  %s5746_s0 = sshll.u32 %s2984_s17, 4  ;;  %s3011_s1 = sand.u32 7, %s10456_s28 }
 0x466   :  { %2631 = vmatprep.subr.bf16.mxu0 %v9829_v30  ;;  %2713 = vmatprep.subr.bf16.mxu1 %v9835_v47  ;;  %13789 = vst [vmem:[#allocation43_spill] sm:$0xff] %v9841_v22  ;;  %13790 = vst [vmem:[#allocation44_spill] sm:$0xff] %v9847_v48  ;;  %v9853_v30 = vld [vmem:[%s13757_s14 + $0x43c] ss:$20 sps:$4 sm:$0xff]   ;;  %v9859_v47 = vld [vmem:[%s13757_s14 + $0x444] ss:$20 sps:$4 sm:$0xff]   ;;  %s13866_s3 = scalar_lea.vmem %s13143_s7, %s10387_s20  ;;  %s13867_s28 = scalar_lea.vmem %s13143_s7, %s10398_s22 }
 0x467   :  { %13791 = vst [vmem:[#allocation45_spill] sm:$0xff] %v9853_v30  ;;  %13792 = vst [vmem:[#allocation46_spill] sm:$0xff] %v9859_v47  ;;  %s5748_s12 = sshll.u32 %s3008_s26, 4  ;;  %s5750_s30 = sshll.u32 %s3032_s5, 4 }
 0x468   :  { %s10507_s26 = sadd.s32 %s5744_s8, %s2963_s19  ;;  %s10509_s17 = sadd.s32 %s5746_s0, %s2987_s21 }
 0x469   :  { %2632 = vmatpush1.bf16.msra.mxu0 %v9841_v22  ;;  %2714 = vmatpush1.bf16.msra.mxu1 %v9847_v48  ;;  %v9865_v22 = vld [vmem:[%s13757_s14 + $0x438] ss:$20 sps:$4 sm:$0xff]   ;;  %v9871_v48 = vld [vmem:[%s13757_s14 + $0x440] ss:$20 sps:$4 sm:$0xff]   ;;  %s13871_s19 = scalar_lea.vmem %s13143_s7, %s10413_s25  ;;  %s10525_s0 = sadd.s32 %s5748_s12, %s3011_s1 }
 0x46a   :  { %2633 = vmatprep.subr.bf16.mxu0 %v9853_v30  ;;  %2715 = vmatprep.subr.bf16.mxu1 %v9859_v47  ;;  %13793 = vst [vmem:[#allocation47_spill] sm:$0xff] %v9865_v22  ;;  %13794 = vst [vmem:[#allocation48_spill] sm:$0xff] %v9871_v48  ;;  %v9877_v30 = vld [vmem:[%s13757_s14 + $0x464] ss:$20 sps:$4 sm:$0xff]   ;;  %v9883_v47 = vld [vmem:[%s13757_s14 + $0x46c] ss:$20 sps:$4 sm:$0xff]   ;;  %s13874_s6 = scalar_lea.vmem %s13143_s7, %s10415_s29  ;;  %s13875_s12 = scalar_lea.vmem %s13143_s7, %s10422_s18 }
 0x46b   :  { %13795 = vst [vmem:[#allocation49_spill] sm:$0xff] %v9877_v30  ;;  %13796 = vst [vmem:[#allocation50_spill] sm:$0xff] %v9883_v47  ;;  %s13872_s21 = sld [smem:[#allocation9_spill]]  ;;  %s13873_s8 = sld [smem:[#allocation111_spill]] }
 0x46c   :  { %s2919_s13 = scalar_lea.vmem %s13143_s7, %s10493_s24  ;;  %s2991_s5 = scalar_lea.vmem %s13143_s7, %s10509_s17 }
 0x46d   :  { %2634 = vmatpush1.bf16.msra.mxu0 %v9865_v22  ;;  %2716 = vmatpush1.bf16.msra.mxu1 %v9871_v48  ;;  %v9889_v22 = vld [vmem:[%s13757_s14 + $0x460] ss:$20 sps:$4 sm:$0xff]   ;;  %v9895_v48 = vld [vmem:[%s13757_s14 + $0x468] ss:$20 sps:$4 sm:$0xff]   ;;  %s3015_s17 = scalar_lea.vmem %s13143_s7, %s10525_s0  ;;  %s11014_s0 = sld [smem:[#allocation4 + $0x23]] }
 0x46e   :  { %2635 = vmatprep.subr.bf16.mxu0 %v9877_v30  ;;  %2717 = vmatprep.subr.bf16.mxu1 %v9883_v47  ;;  %13797 = vst [vmem:[#allocation51_spill] sm:$0xff] %v9889_v22  ;;  %13798 = vst [vmem:[#allocation52_spill] sm:$0xff] %v9895_v48  ;;  %v9901_v30 = vld [vmem:[%s13757_s14 + $0x48c] ss:$20 sps:$4 sm:$0xff]   ;;  %v9907_v47 = vld [vmem:[%s13757_s14 + $0x494] ss:$20 sps:$4 sm:$0xff]  }
 0x46f   :  { %13799 = vst [vmem:[#allocation53_spill] sm:$0xff] %v9901_v30  ;;  %13800 = vst [vmem:[#allocation54_spill] sm:$0xff] %v9907_v47  ;;  %s11024_s29 = sld [smem:[#allocation4 + $0x27]]  ;;  %s11026_s20 = sld [smem:[#allocation5 + $0x20]] }
 0x470   :  { %s11033_s15 = sld [smem:[#allocation5 + $0x22]] }
 0x471   :  { %2636 = vmatpush1.bf16.msra.mxu0 %v9889_v22  ;;  %2718 = vmatpush1.bf16.msra.mxu1 %v9895_v48  ;;  %v9913_v22 = vld [vmem:[%s13757_s14 + $0x488] ss:$20 sps:$4 sm:$0xff]   ;;  %v9919_v48 = vld [vmem:[%s13757_s14 + $0x490] ss:$20 sps:$4 sm:$0xff]   ;;  %s13878_s25 = scalar_lea.vmem %s13143_s7, %s13872_s21 }
 0x472   :  { %2637 = vmatprep.subr.bf16.mxu0 %v9901_v30  ;;  %2719 = vmatprep.subr.bf16.mxu1 %v9907_v47  ;;  %13801 = vst [vmem:[#allocation55_spill] sm:$0xff] %v9913_v22  ;;  %13802 = vst [vmem:[#allocation56_spill] sm:$0xff] %v9919_v48  ;;  %v9925_v30 = vld [vmem:[%s13757_s14 + $0x4b4] ss:$20 sps:$4 sm:$0xff]   ;;  %v9931_v47 = vld [vmem:[%s13757_s14 + $0x4bc] ss:$20 sps:$4 sm:$0xff]  }
 0x473   :  { %13803 = vst [vmem:[#allocation57_spill] sm:$0xff] %v9925_v30  ;;  %13804 = vst [vmem:[#allocation58_spill] sm:$0xff] %v9931_v47 }
 0x475   :  { %2638 = vmatpush1.bf16.msra.mxu0 %v9913_v22  ;;  %2720 = vmatpush1.bf16.msra.mxu1 %v9919_v48  ;;  %v9937_v22 = vld [vmem:[%s13757_s14 + $0x4b0] ss:$20 sps:$4 sm:$0xff]   ;;  %v9943_v48 = vld [vmem:[%s13757_s14 + $0x4b8] ss:$20 sps:$4 sm:$0xff]  }
 0x476   :  { %2639 = vmatprep.subr.bf16.mxu0 %v9925_v30  ;;  %2721 = vmatprep.subr.bf16.mxu1 %v9931_v47  ;;  %13805 = vst [vmem:[#allocation59_spill] sm:$0xff] %v9937_v22  ;;  %13806 = vst [vmem:[#allocation60_spill] sm:$0xff] %v9943_v48  ;;  %v9949_v30 = vld [vmem:[%s13757_s14 + $0x4dc] ss:$20 sps:$4 sm:$0xff]   ;;  %v9955_v47 = vld [vmem:[%s13757_s14 + $0x4e4] ss:$20 sps:$4 sm:$0xff]  }
 0x477   :  { %13807 = vst [vmem:[#allocation61_spill] sm:$0xff] %v9949_v30  ;;  %13808 = vst [vmem:[#allocation62_spill] sm:$0xff] %v9955_v47 }
 0x479   :  { %2640 = vmatpush1.bf16.msra.mxu0 %v9937_v22  ;;  %2722 = vmatpush1.bf16.msra.mxu1 %v9943_v48  ;;  %v2564_v22 = vld [vmem:[#allocation2 + $0x10] sm:$0xff] }
 0x47a   :  { %2641 = vmatprep.subr.bf16.mxu0 %v9949_v30  ;;  %2723 = vmatprep.subr.bf16.mxu1 %v9955_v47  ;;  %v9967_v48 = vld [vmem:[%s13757_s14 + $0x4e0] ss:$20 sps:$4 sm:$0xff]   ;;  %v9970_v30 = vpack.c.bf16 %v2564_v22, %v2564_v22  ;;  %v9975_v47 = vld [vmem:[%s13757_s14 + $0x150] ss:$20 sps:$4 sm:$0xff]  }
 0x47b   :  { %13810 = vst [vmem:[#allocation64_spill] sm:$0xff] %v9975_v47  ;;  %v9989_v22 = vld [vmem:[%s13757_s14 + $0x10] ss:$20 sps:$4 sm:$0xff]  }
 0x47d   :  { %2642 = vmatpush1.bf16.msra.mxu0 %v9961_v28  ;;  %2724 = vmatpush1.bf16.msra.mxu1 %v9967_v48  ;;  %v9981_v28 = vld [vmem:[%s13757_s14 + $0x3d0] ss:$20 sps:$4 sm:$0xff]  }
 0x47e   :  { %5896 = vmatprep.subr.bf16.mxu0 %v9975_v47  ;;  %13811 = vst [vmem:[#allocation65_spill] sm:$0xff] %v9981_v28  ;;  %5918 = vmatprep.subr.bf16.mxu1 %v9981_v28  ;;  %v9996_v47 = vld [vmem:[%s13757_s14 + $0x290] ss:$20 sps:$4 sm:$0xff]   ;;  %v10003_v28 = vld [vmem:[%s13757_s14 + $0x178] ss:$20 sps:$4 sm:$0xff]  }
 0x47f   :  { %13812 = vst [vmem:[#allocation66_spill] sm:$0xff] %v9996_v47  ;;  %13813 = vst [vmem:[#allocation67_spill] sm:$0xff] %v10003_v28 }
 0x480   :  { %2644 = vmatmul.mubr.bf16.vlgmr.msra.gmra.mrb[20].mxu0 %v9970_v30  ;;  %2726 = vmatmul.mubr.bf16.vlgmr.msra.gmra.mrb[20].mxu1 %v9970_v30 }
 0x481   :  { %5897 = vmatpush3.bf16.msra.mxu0 %v9989_v22  ;;  %2766 = vmatprep.mubr.bf16.mxu0 %v9582_v23  ;;  %v10009_v23 = vld [vmem:[%s13757_s14 + $0x3f8] ss:$20 sps:$4 sm:$0xff]  }
 0x482   :  { %5919 = vmatpush3.bf16.msra.mxu1 %v9996_v47  ;;  %2806 = vmatprep.mubr.bf16.mxu1 %v9606_v9  ;;  %13814 = vst [vmem:[#allocation68_spill] sm:$0xff] %v10009_v23  ;;  %v10015_v47 = vld [vmem:[%s13757_s14 + $0x38] ss:$20 sps:$4 sm:$0xff]  }
 0x483   :  { %5898 = vmatprep.subr.bf16.mxu0 %v10003_v28  ;;  %5920 = vmatprep.subr.bf16.mxu1 %v10009_v23  ;;  %13815 = vst [vmem:[#allocation69_spill] sm:$0xff] %v10015_v47  ;;  %v10021_v9 = vld [vmem:[%s13757_s14 + $0x2b8] ss:$20 sps:$4 sm:$0xff]   ;;  %v10027_v28 = vld [vmem:[%s13757_s14 + $0x1a0] ss:$20 sps:$4 sm:$0xff]  }
 0x484   :  { %13816 = vst [vmem:[#allocation70_spill] sm:$0xff] %v10021_v9  ;;  %13817 = vst [vmem:[#allocation71_spill] sm:$0xff] %v10027_v28  ;;  %v10033_v23 = vld [vmem:[%s13757_s14 + $0x420] ss:$20 sps:$4 sm:$0xff]  }
 0x485   :  { %5899 = vmatpush3.bf16.msra.mxu0 %v10015_v47  ;;  %13818 = vst [vmem:[#allocation72_spill] sm:$0xff] %v10033_v23  ;;  %v10039_v47 = vld [vmem:[%s13757_s14 + $0x60] ss:$20 sps:$4 sm:$0xff]  }
 0x486   :  { %5921 = vmatpush3.bf16.msra.mxu1 %v10021_v9  ;;  %5900 = vmatprep.subr.bf16.mxu0 %v10027_v28  ;;  %13819 = vst [vmem:[#allocation73_spill] sm:$0xff] %v10039_v47  ;;  %v10045_v9 = vld [vmem:[%s13757_s14 + $0x2e0] ss:$20 sps:$4 sm:$0xff]   ;;  %v10051_v28 = vld [vmem:[%s13757_s14 + $0x1c8] ss:$20 sps:$4 sm:$0xff]  }
 0x487   :  { %5922 = vmatprep.subr.bf16.mxu1 %v10033_v23  ;;  %13820 = vst [vmem:[#allocation74_spill] sm:$0xff] %v10045_v9  ;;  %13821 = vst [vmem:[#allocation75_spill] sm:$0xff] %v10051_v28  ;;  %v10057_v23 = vld [vmem:[%s13757_s14 + $0x448] ss:$20 sps:$4 sm:$0xff]  }
 0x488   :  { %13822 = vst [vmem:[#allocation76_spill] sm:$0xff] %v10057_v23 }
 0x489   :  { %5901 = vmatpush3.bf16.msra.mxu0 %v10039_v47  ;;  %v10063_v47 = vld [vmem:[%s13757_s14 + $0x88] ss:$20 sps:$4 sm:$0xff]  }
 0x48a   :  { %5923 = vmatpush3.bf16.msra.mxu1 %v10045_v9  ;;  %5902 = vmatprep.subr.bf16.mxu0 %v10051_v28  ;;  %13823 = vst [vmem:[#allocation77_spill] sm:$0xff] %v10063_v47  ;;  %v10069_v9 = vld [vmem:[%s13757_s14 + $0x308] ss:$20 sps:$4 sm:$0xff]   ;;  %v10075_v28 = vld [vmem:[%s13757_s14 + $0x1f0] ss:$20 sps:$4 sm:$0xff]  }
 0x48b   :  { %5924 = vmatprep.subr.bf16.mxu1 %v10057_v23  ;;  %13824 = vst [vmem:[#allocation78_spill] sm:$0xff] %v10069_v9  ;;  %13825 = vst [vmem:[#allocation79_spill] sm:$0xff] %v10075_v28  ;;  %v10081_v23 = vld [vmem:[%s13757_s14 + $0x470] ss:$20 sps:$4 sm:$0xff]  }
 0x48c   :  { %13826 = vst [vmem:[#allocation80_spill] sm:$0xff] %v10081_v23 }
 0x48d   :  { %5903 = vmatpush3.bf16.msra.mxu0 %v10063_v47  ;;  %v10087_v47 = vld [vmem:[%s13757_s14 + $0xb0] ss:$20 sps:$4 sm:$0xff]  }
 0x48e   :  { %5925 = vmatpush3.bf16.msra.mxu1 %v10069_v9  ;;  %5904 = vmatprep.subr.bf16.mxu0 %v10075_v28  ;;  %13827 = vst [vmem:[#allocation81_spill] sm:$0xff] %v10087_v47  ;;  %v10093_v9 = vld [vmem:[%s13757_s14 + $0x330] ss:$20 sps:$4 sm:$0xff]   ;;  %v10099_v28 = vld [vmem:[%s13757_s14 + $0x218] ss:$20 sps:$4 sm:$0xff]  }
 0x48f   :  { %5926 = vmatprep.subr.bf16.mxu1 %v10081_v23  ;;  %13828 = vst [vmem:[#allocation82_spill] sm:$0xff] %v10093_v9  ;;  %13829 = vst [vmem:[#allocation83_spill] sm:$0xff] %v10099_v28  ;;  %v10105_v23 = vld [vmem:[%s13757_s14 + $0x498] ss:$20 sps:$4 sm:$0xff]  }
 0x490   :  { %13830 = vst [vmem:[#allocation84_spill] sm:$0xff] %v10105_v23 }
 0x491   :  { %5905 = vmatpush3.bf16.msra.mxu0 %v10087_v47  ;;  %v10111_v47 = vld [vmem:[%s13757_s14 + $0xd8] ss:$20 sps:$4 sm:$0xff]  }
 0x492   :  { %5927 = vmatpush3.bf16.msra.mxu1 %v10093_v9  ;;  %5906 = vmatprep.subr.bf16.mxu0 %v10099_v28  ;;  %13831 = vst [vmem:[#allocation85_spill] sm:$0xff] %v10111_v47  ;;  %v10117_v9 = vld [vmem:[%s13757_s14 + $0x358] ss:$20 sps:$4 sm:$0xff]   ;;  %v10123_v28 = vld [vmem:[%s13757_s14 + $0x240] ss:$20 sps:$4 sm:$0xff]  }
 0x493   :  { %5928 = vmatprep.subr.bf16.mxu1 %v10105_v23  ;;  %13832 = vst [vmem:[#allocation86_spill] sm:$0xff] %v10117_v9  ;;  %13833 = vst [vmem:[#allocation87_spill] sm:$0xff] %v10123_v28  ;;  %v10129_v23 = vld [vmem:[%s13757_s14 + $0x4c0] ss:$20 sps:$4 sm:$0xff]  }
 0x494   :  { %13834 = vst [vmem:[#allocation88_spill] sm:$0xff] %v10129_v23 }
 0x495   :  { %5907 = vmatpush3.bf16.msra.mxu0 %v10111_v47  ;;  %v10135_v47 = vld [vmem:[%s13757_s14 + $0x100] ss:$20 sps:$4 sm:$0xff]  }
 0x496   :  { %5929 = vmatpush3.bf16.msra.mxu1 %v10117_v9  ;;  %5908 = vmatprep.subr.bf16.mxu0 %v10123_v28  ;;  %13835 = vst [vmem:[#allocation89_spill] sm:$0xff] %v10135_v47  ;;  %v10141_v9 = vld [vmem:[%s13757_s14 + $0x380] ss:$20 sps:$4 sm:$0xff]   ;;  %v10147_v28 = vld [vmem:[%s13757_s14 + $0x268] ss:$20 sps:$4 sm:$0xff]  }
 0x497   :  { %5930 = vmatprep.subr.bf16.mxu1 %v10129_v23  ;;  %13836 = vst [vmem:[#allocation90_spill] sm:$0xff] %v10141_v9  ;;  %13837 = vst [vmem:[#allocation91_spill] sm:$0xff] %v10147_v28  ;;  %v10153_v23 = vld [vmem:[%s13757_s14 + $0x4e8] ss:$20 sps:$4 sm:$0xff]  }
 0x498   :  { %13838 = vst [vmem:[#allocation92_spill] sm:$0xff] %v10153_v23 }
 0x499   :  { %5909 = vmatpush3.bf16.msra.mxu0 %v10135_v47  ;;  %v10159_v47 = vld [vmem:[%s13757_s14 + $0x128] ss:$20 sps:$4 sm:$0xff]  }
 0x49a   :  { %5931 = vmatpush3.bf16.msra.mxu1 %v10141_v9  ;;  %5910 = vmatprep.subr.bf16.mxu0 %v10147_v28  ;;  %v10165_v9 = vld [vmem:[%s13757_s14 + $0x3a8] ss:$20 sps:$4 sm:$0xff]   ;;  %v10171_v28 = vld [vmem:[%s13757_s14 + $0x4] ss:$20 sps:$4 sm:$0xff]  }
 0x49b   :  { %5932 = vmatprep.subr.bf16.mxu1 %v10153_v23  ;;  %13839 = vst [vmem:[#allocation93_spill] sm:$0xff] %v10165_v9  ;;  %13840 = vst [vmem:[#allocation94_spill] sm:$0xff] %v10171_v28  ;;  %v10177_v23 = vld [vmem:[%s13757_s14 + $0xc] ss:$20 sps:$4 sm:$0xff]  }
 0x49d   :  { %5911 = vmatpush3.bf16.msra.mxu0 %v10159_v47 }
 0x49e   :  { %5933 = vmatpush3.bf16.msra.mxu1 %v10165_v9  ;;  %3051 = vmatprep.subr.bf16.mxu0 %v10171_v28  ;;  %v10185_v9 = vld [vmem:[%s13757_s14] ss:$20 sps:$4 sm:$0xff]   ;;  %v10191_v28 = vld [vmem:[%s13757_s14 + $0x8] ss:$20 sps:$4 sm:$0xff]  }
 0x49f   :  { %3133 = vmatprep.subr.bf16.mxu1 %v10177_v23  ;;  %13841 = vst [vmem:[#allocation95_spill] sm:$0xff] %v10185_v9  ;;  %13842 = vst [vmem:[#allocation96_spill] sm:$0xff] %v10191_v28 }
 0x4a0   :  { %2767 = vmatmul.mubr.bf16.vlgmr.msra.gmra.mrb[24].mxu0 %v9584_v51  ;;  %v10197_v51 = vld [vmem:[%s13757_s14 + $0x2c] ss:$20 sps:$4 sm:$0xff]  }
 0x4a1   :  { %2807 = vmatmul.mubr.bf16.vlgmr.msra.gmra.mrb[24].mxu1 %v9970_v30  ;;  %3052 = vmatpush1.bf16.msra.mxu0 %v10185_v9  ;;  %13843 = vst [vmem:[#allocation97_spill] sm:$0xff] %v10197_v51  ;;  %v10203_v30 = vld [vmem:[%s13757_s14 + $0x34] ss:$20 sps:$4 sm:$0xff]  }
 0x4a2   :  { %3134 = vmatpush1.bf16.msra.mxu1 %v10191_v28  ;;  %3053 = vmatprep.subr.bf16.mxu0 %v10197_v51  ;;  %13844 = vst [vmem:[#allocation98_spill] sm:$0xff] %v10203_v30  ;;  %v10209_v9 = vld [vmem:[%s13757_s14 + $0x28] ss:$20 sps:$4 sm:$0xff]   ;;  %v10215_v28 = vld [vmem:[%s13757_s14 + $0x30] ss:$20 sps:$4 sm:$0xff]  }
 0x4a3   :  { %3135 = vmatprep.subr.bf16.mxu1 %v10203_v30  ;;  %13845 = vst [vmem:[#allocation99_spill] sm:$0xff] %v10209_v9  ;;  %13846 = vst [vmem:[#allocation100_spill] sm:$0xff] %v10215_v28  ;;  %v10221_v51 = vld [vmem:[%s13757_s14 + $0x54] ss:$20 sps:$4 sm:$0xff]   ;;  %v10227_v30 = vld [vmem:[%s13757_s14 + $0x5c] ss:$20 sps:$4 sm:$0xff]  }
 0x4a4   :  { %13847 = vst [vmem:[#allocation101_spill] sm:$0xff] %v10221_v51  ;;  %13848 = vst [vmem:[#allocation102_spill] sm:$0xff] %v10227_v30 }
 0x4a5   :  { %3054 = vmatpush1.bf16.msra.mxu0 %v10209_v9  ;;  %v10233_v9 = vld [vmem:[%s13757_s14 + $0x50] ss:$20 sps:$4 sm:$0xff]  }
 0x4a6   :  { %3136 = vmatpush1.bf16.msra.mxu1 %v10215_v28  ;;  %3055 = vmatprep.subr.bf16.mxu0 %v10221_v51  ;;  %13849 = vst [vmem:[#allocation103_spill] sm:$0xff] %v10233_v9  ;;  %v10239_v28 = vld [vmem:[%s13757_s14 + $0x58] ss:$20 sps:$4 sm:$0xff]   ;;  %v10245_v51 = vld [vmem:[%s13757_s14 + $0x7c] ss:$20 sps:$4 sm:$0xff]  }
 0x4a7   :  { %3137 = vmatprep.subr.bf16.mxu1 %v10227_v30  ;;  %13850 = vst [vmem:[#allocation104_spill] sm:$0xff] %v10239_v28  ;;  %13851 = vst [vmem:[#allocation105_spill] sm:$0xff] %v10245_v51  ;;  %v10251_v30 = vld [vmem:[%s13757_s14 + $0x84] ss:$20 sps:$4 sm:$0xff]  }
 0x4a8   :  { %13852 = vst [vmem:[#allocation106_spill] sm:$0xff] %v10251_v30 }
 0x4a9   :  { %3056 = vmatpush1.bf16.msra.mxu0 %v10233_v9  ;;  %v10257_v9 = vld [vmem:[%s13757_s14 + $0x78] ss:$20 sps:$4 sm:$0xff]  }
 0x4aa   :  { %3138 = vmatpush1.bf16.msra.mxu1 %v10239_v28  ;;  %3057 = vmatprep.subr.bf16.mxu0 %v10245_v51  ;;  %13853 = vst [vmem:[#allocation107_spill] sm:$0xff] %v10257_v9  ;;  %v10263_v28 = vld [vmem:[%s13757_s14 + $0x80] ss:$20 sps:$4 sm:$0xff]   ;;  %v10269_v51 = vld [vmem:[%s13757_s14 + $0xa4] ss:$20 sps:$4 sm:$0xff]  }
 0x4ab   :  { %3139 = vmatprep.subr.bf16.mxu1 %v10251_v30  ;;  %13854 = vst [vmem:[#allocation108_spill] sm:$0xff] %v10263_v28  ;;  %13855 = vst [vmem:[#allocation109_spill] sm:$0xff] %v10269_v51  ;;  %v10275_v30 = vld [vmem:[%s13757_s14 + $0xac] ss:$20 sps:$4 sm:$0xff]  }
 0x4ac   :  { %13856 = vst [vmem:[#allocation112_spill] sm:$0xff] %v10275_v30 }
 0x4ad   :  { %3058 = vmatpush1.bf16.msra.mxu0 %v10257_v9  ;;  %v10281_v9 = vld [vmem:[%s13757_s14 + $0xa0] ss:$20 sps:$4 sm:$0xff]  }
 0x4ae   :  { %3140 = vmatpush1.bf16.msra.mxu1 %v10263_v28  ;;  %3059 = vmatprep.subr.bf16.mxu0 %v10269_v51  ;;  %13857 = vst [vmem:[#allocation113_spill] sm:$0xff] %v10281_v9  ;;  %v10287_v28 = vld [vmem:[%s13757_s14 + $0xa8] ss:$20 sps:$4 sm:$0xff]   ;;  %v10293_v51 = vld [vmem:[%s13757_s14 + $0xcc] ss:$20 sps:$4 sm:$0xff]  }
 0x4af   :  { %3141 = vmatprep.subr.bf16.mxu1 %v10275_v30  ;;  %13858 = vst [vmem:[#allocation114_spill] sm:$0xff] %v10287_v28  ;;  %v10299_v30 = vld [vmem:[%s13757_s14 + $0xd4] ss:$20 sps:$4 sm:$0xff]  }
 0x4b1   :  { %3060 = vmatpush1.bf16.msra.mxu0 %v10281_v9  ;;  %v10305_v9 = vld [vmem:[%s13757_s14 + $0xc8] ss:$20 sps:$4 sm:$0xff]  }
 0x4b2   :  { %3142 = vmatpush1.bf16.msra.mxu1 %v10287_v28  ;;  %3061 = vmatprep.subr.bf16.mxu0 %v10293_v51  ;;  %v10311_v28 = vld [vmem:[%s13757_s14 + $0xd0] ss:$20 sps:$4 sm:$0xff]   ;;  %s2939_s14 = sand.u32 7, %s10389_s10  ;;  %s3035_s10 = sand.u32 7, %s10460_s23 }
 0x4b3   :  { %3143 = vmatprep.subr.bf16.mxu1 %v10299_v30  ;;  %s10495_s11 = sadd.s32 %s5742_s2, %s2939_s14  ;;  %s13868_s23 = sld [smem:[#allocation7_spill]] }
 0x4b4   :  { %s13869_s14 = sld [smem:[#allocation8_spill]]  ;;  %s10527_s2 = sadd.s32 %s5750_s30, %s3035_s10 }
 0x4b5   :  { %3062 = vmatpush1.bf16.msra.mxu0 %v10305_v9  ;;  %s3039_s4 = scalar_lea.vmem %s13143_s7, %s10527_s2  ;;  %s13981_s2 = sld [smem:[#allocation115_spill]] }
 0x4b6   :  { %3144 = vmatpush1.bf16.msra.mxu1 %v10311_v28  ;;  %3063 = vmatprep.subr.bf16.mxu0 %v9074_v35  ;;  %v13859_v35 = vld [vmem:[#allocation10_spill] sm:$0xff]  ;;  %s11008_s10 = sld [smem:[#allocation4 + $0x20]] }
 0x4b7   :  { %3145 = vmatprep.subr.bf16.mxu1 %v9080_v36  ;;  %v13860_v36 = vld [vmem:[#allocation11_spill] sm:$0xff] }
 0x4b9   :  { %3064 = vmatpush1.bf16.msra.mxu0 %v9086_v34  ;;  %s13876_s27 = scalar_lea.vmem %s13143_s7, %s13868_s23 }
 0x4ba   :  { %3146 = vmatpush1.bf16.msra.mxu1 %v9092_v43  ;;  %3065 = vmatprep.subr.bf16.mxu0 %v9098_v44  ;;  %s13877_s22 = scalar_lea.vmem %s13143_s7, %s13869_s14 }
 0x4bb   :  { %3147 = vmatprep.subr.bf16.mxu1 %v9104_v42 }
 0x4bc   :  { %s3334_s21 = sshra.s32 %s11008_s10, 3 }
 0x4bd   :  { %3066 = vmatpush1.bf16.msra.mxu0 %v9110_v33  ;;  %s5751_s18 = sshll.u32 %s3334_s21, 4 }
 0x4be   :  { %3148 = vmatpush1.bf16.msra.mxu1 %v9116_v53  ;;  %3067 = vmatprep.subr.bf16.mxu0 %v9122_v54 }
 0x4bf   :  { %3149 = vmatprep.subr.bf16.mxu1 %v9128_v55 }
 0x4c1   :  { %3068 = vmatpush1.bf16.msra.mxu0 %v9134_v56 }
 0x4c2   :  { %3150 = vmatpush1.bf16.msra.mxu1 %v9140_v57  ;;  %3069 = vmatprep.subr.bf16.mxu0 %v9146_v58 }
 0x4c3   :  { %3151 = vmatprep.subr.bf16.mxu1 %v9152_v59 }
 0x4c5   :  { %3070 = vmatpush1.bf16.msra.mxu0 %v9158_v60 }
 0x4c6   :  { %3152 = vmatpush1.bf16.msra.mxu1 %v9164_v62  ;;  %3071 = vmatprep.subr.bf16.mxu0 %v9170_v0  ;;  %v13861_v0 = vld [vmem:[#allocation110_spill] sm:$0xff] }
 0x4c7   :  { %3153 = vmatprep.subr.bf16.mxu1 %v9176_v31 }
 0x4c9   :  { %3072 = vmatpush1.bf16.msra.mxu0 %v9182_v40 }
 0x4ca   :  { %3154 = vmatpush1.bf16.msra.mxu1 %v9188_v49  ;;  %3073 = vmatprep.subr.bf16.mxu0 %v9194_v2 }
 0x4cb   :  { %3155 = vmatprep.subr.bf16.mxu1 %v9200_v24 }
 0x4cd   :  { %3074 = vmatpush1.bf16.msra.mxu0 %v9206_v38 }
 0x4ce   :  { %3156 = vmatpush1.bf16.msra.mxu1 %v9212_v27  ;;  %3075 = vmatprep.subr.bf16.mxu0 %v9218_v3 }
 0x4cf   :  { %3157 = vmatprep.subr.bf16.mxu1 %v9224_v4 }
 0x4d1   :  { %3076 = vmatpush1.bf16.msra.mxu0 %v9230_v5 }
 0x4d2   :  { %3158 = vmatpush1.bf16.msra.mxu1 %v9236_v6  ;;  %3077 = vmatprep.subr.bf16.mxu0 %v9242_v7 }
 0x4d3   :  { %3159 = vmatprep.subr.bf16.mxu1 %v9248_v8 }
 0x4d5   :  { %3078 = vmatpush1.bf16.msra.mxu0 %v9254_v10 }
 0x4d6   :  { %3160 = vmatpush1.bf16.msra.mxu1 %v9260_v11  ;;  %3079 = vmatprep.subr.bf16.mxu0 %v9266_v12 }
 0x4d7   :  { %3161 = vmatprep.subr.bf16.mxu1 %v9272_v13 }
 0x4d9   :  { %3080 = vmatpush1.bf16.msra.mxu0 %v9278_v14 }
 0x4da   :  { %3162 = vmatpush1.bf16.msra.mxu1 %v9284_v16  ;;  %3081 = vmatprep.subr.bf16.mxu0 %v9290_v17 }
 0x4db   :  { %3163 = vmatprep.subr.bf16.mxu1 %v9296_v18 }
 0x4dd   :  { %3082 = vmatpush1.bf16.msra.mxu0 %v9302_v50 }
 0x4de   :  { %3164 = vmatpush1.bf16.msra.mxu1 %v9308_v19  ;;  %3092 = vmatprep.subr.bf16.mxu0 %v13859_v35 }
 0x4df   :  { %3174 = vmatprep.subr.bf16.mxu1 %v13860_v36 }
 0x553   :  { %v2645_v34 = vpop.f32.mrb[20].mxu0  ;;  %v2727_v43 = vpop.f32.mrb[20].mxu1 }
 0x554   :  { %v2647_v44 = vpop.f32.mrb[21].mxu0  ;;  %v2729_v42 = vpop.f32.mrb[21].mxu1  ;;  %v6144_v56 = vadd.f32 %v2645_v34, %v8659_v61  ;;  %v6146_v58 = vadd.f32 %v2727_v43, %v8667_v1 }
 0x555   :  { %v2649_v33 = vpop.f32.mrb[22].mxu0  ;;  %v2731_v53 = vpop.f32.mrb[22].mxu1  ;;  %v6145_v57 = vadd.f32 %v2647_v44, %v8663_v63  ;;  %v6147_v31 = vadd.f32 %v2729_v42, %v13861_v0 }
 0x556   :  { %v2650_v54 = vpop.f32.mrb[23].mxu0  ;;  %v2732_v55 = vpop.f32.mrb[23].mxu1  ;;  %v5465_v59 = vmul.f32 -1.442695, %v6144_v56  ;;  %v5467_v62 = vmul.f32 -1.442695, %v6146_v58 }
 0x557   :  { %v5466_v60 = vmul.f32 -1.442695, %v6145_v57  ;;  %v5468_v24 = vmul.f32 -1.442695, %v6147_v31 }
 0x558   :  { %6546 = vpow2.f32 %v5465_v59 }
 0x559   :  { %6548 = vpow2.f32 %v5466_v60 }
 0x55a   :  { %6550 = vpow2.f32 %v5467_v62 }
 0x55b   :  { %6552 = vpow2.f32 %v5468_v24 }
 0x562   :  { %v6547_v40 = vpop.eup %6546 }
 0x563   :  { %v6549_v49 = vpop.eup %6548  ;;  %v2817_v27 = vadd.f32 1.0, %v6547_v40 }
 0x564   :  { %v6551_v2 = vpop.eup %6550  ;;  %v2823_v5 = vadd.f32 1.0, %v6549_v49 }
 0x565   :  { %v2829_v10 = vadd.f32 1.0, %v6551_v2  ;;  %6554 = vrcp.f32 %v2817_v27  ;;  %v6553_v18 = vpop.eup %6552 }
 0x566   :  { %6556 = vrcp.f32 %v2823_v5  ;;  %v2835_v44 = vadd.f32 1.0, %v6553_v18  ;;  %v13894_v18 = vld [vmem:[#allocation26_spill] sm:$0xff] }
 0x567   :  { %6558 = vrcp.f32 %v2829_v10 }
 0x56f   :  { %v6555_v50 = vpop.eup %6554 }
 0x570   :  { %v6557_v19 = vpop.eup %6556 }
 0x571   :  { %v6559_v35 = vpop.eup %6558  ;;  %v2840_v34 = vmul.f32 %v6557_v19, %v9578_v26  ;;  %v13896_v19 = vld [vmem:[#allocation28_spill] sm:$0xff] }
 0x572   :  { %v2842_v42 = vmul.f32 %v6559_v35, %v9590_v52  ;;  %v13897_v35 = vld [vmem:[#allocation29_spill] sm:$0xff] }
 0x573   :  { %v5912_v38 = vpop.f32.mrb[24].mxu0 }
 0x574   :  { %v5934_v3 = vpop.f32.mrb[24].mxu1  ;;  %v5913_v4 = vpop.f32.mrb[25].mxu0 }
 0x575   :  { %v5914_v6 = vadd.f32 %v5913_v4, %v5912_v38  ;;  %v5935_v7 = vpop.f32.mrb[25].mxu1  ;;  %v5915_v8 = vpop.f32.mrb[26].mxu0 }
 0x576   :  { %v5936_v11 = vadd.f32 %v5935_v7, %v5934_v3  ;;  %v5937_v12 = vpop.f32.mrb[26].mxu1  ;;  %v5916_v13 = vpop.f32.mrb[27].mxu0 }
 0x577   :  { %v2769_v14 = vadd.f32 %v5914_v6, %v8679_v15  ;;  %v5938_v16 = vpop.f32.mrb[27].mxu1  ;;  %v13884_v12 = vld [vmem:[#allocation16_spill] sm:$0xff]  ;;  %v13885_v13 = vld [vmem:[#allocation17_spill] sm:$0xff] }
 0x578   :  { %v13892_v16 = vld [vmem:[#allocation24_spill] sm:$0xff] }
 0x579   :  { %v2809_v17 = vadd.f32 %v5936_v11, %v2769_v14  ;;  %v13891_v14 = vld [vmem:[#allocation23_spill] sm:$0xff] }
 0x57b   :  { %6560 = vtanh.f32 %v2809_v17  ;;  %v13893_v17 = vld [vmem:[#allocation25_spill] sm:$0xff] }
 0x57c   :  { %6562 = vrcp.f32 %v2835_v44  ;;  %v13901_v44 = vld [vmem:[#allocation33_spill] sm:$0xff] }
 0x585   :  { %v6561_v36 = vpop.eup %6560 }
 0x586   :  { %v2839_v43 = vmul.f32 %v6561_v36, %v6555_v50  ;;  %v6563_v52 = vpop.eup %6562  ;;  %v13895_v50 = vld [vmem:[#allocation27_spill] sm:$0xff]  ;;  %v13898_v36 = vld [vmem:[#allocation30_spill] sm:$0xff] }
 0x588   :  { %v2841_v33 = vadd.f32 %v2840_v34, %v2839_v43  ;;  %v13899_v34 = vld [vmem:[#allocation31_spill] sm:$0xff]  ;;  %v13900_v43 = vld [vmem:[#allocation32_spill] sm:$0xff] }
 0x58a   :  { %v2843_v26 = vadd.f32 %v2842_v42, %v2841_v33  ;;  %v13902_v42 = vld [vmem:[#allocation34_spill] sm:$0xff]  ;;  %v13903_v33 = vld [vmem:[#allocation35_spill] sm:$0xff] }
 0x58c   :  { %6564 = vtanh.f32 %v2843_v26  ;;  %5470 = vst [vmem:[%s13143_s7 + $0x48] sm:$0xff] %v2843_v26  ;;  %v13904_v26 = vld [vmem:[#allocation36_spill] sm:$0xff] }
 0x596   :  { %v6565_v53 = vpop.eup %6564 }
 0x597   :  { %v2845_v54 = vmul.f32 %v6565_v53, %v6563_v52  ;;  %v13905_v52 = vld [vmem:[#allocation37_spill] sm:$0xff]  ;;  %v13906_v53 = vld [vmem:[#allocation38_spill] sm:$0xff] }
 0x599   :  { %5469 = vst [vmem:[%s13143_s7 + $0x40] sm:$0xff] %v2845_v54  ;;  %v13907_v54 = vld [vmem:[#allocation39_spill] sm:$0xff] }
 0x5a0   :  { %v2861_v55 = vld [vmem:[%s13866_s3] ss:$8 sm:$0x3]  ;;  %s11010_s3 = sld [smem:[#allocation4 + $0x21]] }
 0x5a1   :  { %v2885_v56 = vld [vmem:[%s13867_s28] ss:$8 sm:$0x3]  ;;  %2862 = vst.msk [vmem:[#allocation2] ss:$8 sm:$0x3] %vm7753_vm1, %v2861_v55  ;;  %s2943_s28 = scalar_lea.vmem %s13143_s7, %s10495_s11  ;;  %s2967_s11 = scalar_lea.vmem %s13143_s7, %s10507_s26 }
 0x5a2   :  { %2886 = vst.msk [vmem:[#allocation2 + $0x1] ss:$8 sm:$0x3] %vm7753_vm1, %v2885_v56  ;;  %v2909_v57 = vld [vmem:[%s13870_s16] ss:$8 sm:$0x3] }
 0x5a3   :  { %v2933_v58 = vld [vmem:[%s13871_s19] ss:$8 sm:$0x3]  ;;  %2910 = vst.msk [vmem:[#allocation2 + $0x2] ss:$8 sm:$0x3] %vm7753_vm1, %v2909_v57 }
 0x5a4   :  { %2934 = vst.msk [vmem:[#allocation2 + $0x3] ss:$8 sm:$0x3] %vm7753_vm1, %v2933_v58  ;;  %v2957_v59 = vld [vmem:[%s13874_s6] ss:$8 sm:$0x3] }
 0x5a5   :  { %v2981_v60 = vld [vmem:[%s13875_s12] ss:$8 sm:$0x3]  ;;  %2958 = vst.msk [vmem:[#allocation2 + $0x4] ss:$8 sm:$0x3] %vm7753_vm1, %v2957_v59  ;;  %s13879_s12 = scalar_lea.vmem %s13143_s7, %s13873_s8 }
 0x5a6   :  { %2982 = vst.msk [vmem:[#allocation2 + $0x5] ss:$8 sm:$0x3] %vm7753_vm1, %v2981_v60  ;;  %v3005_v62 = vld [vmem:[%s13876_s27] ss:$8 sm:$0x3] }
 0x5a7   :  { %v3029_v31 = vld [vmem:[%s13877_s22] ss:$8 sm:$0x3]  ;;  %3006 = vst.msk [vmem:[#allocation2 + $0x6] ss:$8 sm:$0x3] %vm7753_vm1, %v3005_v62 }
 0x5a8   :  { %3030 = vst.msk [vmem:[#allocation2 + $0x7] ss:$8 sm:$0x3] %vm7753_vm1, %v3029_v31  ;;  %v2872_v40 = vld [vmem:[%s13878_s25] ss:$8 sm:$0x3] }
 0x5a9   :  { %v2896_v49 = vld [vmem:[%s13879_s12] ss:$8 sm:$0x3]  ;;  %2873 = vst.msk [vmem:[#allocation2 + $0x10] ss:$8 sm:$0x3] %vm7753_vm1, %v2872_v40 }
 0x5aa   :  { %2897 = vst.msk [vmem:[#allocation2 + $0x11] ss:$8 sm:$0x3] %vm7753_vm1, %v2896_v49  ;;  %v2920_v2 = vld [vmem:[%s2919_s13] ss:$8 sm:$0x3] }
 0x5ab   :  { %v2944_v24 = vld [vmem:[%s2943_s28] ss:$8 sm:$0x3]  ;;  %2921 = vst.msk [vmem:[#allocation2 + $0x12] ss:$8 sm:$0x3] %vm7753_vm1, %v2920_v2 }
 0x5ac   :  { %2945 = vst.msk [vmem:[#allocation2 + $0x13] ss:$8 sm:$0x3] %vm7753_vm1, %v2944_v24  ;;  %v2968_v38 = vld [vmem:[%s2967_s11] ss:$8 sm:$0x3] }
 0x5ad   :  { %v2992_v27 = vld [vmem:[%s2991_s5] ss:$8 sm:$0x3]  ;;  %2969 = vst.msk [vmem:[#allocation2 + $0x14] ss:$8 sm:$0x3] %vm7753_vm1, %v2968_v38 }
 0x5ae   :  { %2993 = vst.msk [vmem:[#allocation2 + $0x15] ss:$8 sm:$0x3] %vm7753_vm1, %v2992_v27  ;;  %v3016_v3 = vld [vmem:[%s3015_s17] ss:$8 sm:$0x3] }
 0x5af   :  { %v3040_v4 = vld [vmem:[%s3039_s4] ss:$8 sm:$0x3]  ;;  %3017 = vst.msk [vmem:[#allocation2 + $0x16] ss:$8 sm:$0x3] %vm7753_vm1, %v3016_v3 }
 0x5b0   :  { %3041 = vst.msk [vmem:[#allocation2 + $0x17] ss:$8 sm:$0x3] %vm7753_vm1, %v3040_v4  ;;  %v10611_v5 = vld [vmem:[#allocation2 + $0x8] sm:$0xff]  ;;  %v3043_v6 = vld [vmem:[#allocation2] sm:$0xff]  ;;  %v13908_v55 = vld [vmem:[#allocation40_spill] sm:$0xff] }
 0x5b1   :  { %v10615_v7 = vpack.c.bf16 %v10611_v5, %v10611_v5  ;;  %v10617_v8 = vpack.c.bf16 %v3043_v6, %v3043_v6  ;;  %v13909_v56 = vld [vmem:[#allocation41_spill] sm:$0xff]  ;;  %v13910_v57 = vld [vmem:[#allocation42_spill] sm:$0xff]  ;;  %v13911_v58 = vld [vmem:[#allocation43_spill] sm:$0xff]  ;;  %s11012_s4 = sld [smem:[#allocation4 + $0x22]]  ;;  %s11018_s8 = sld [smem:[#allocation4 + $0x24]] }
 0x5b2   :  { %v13912_v59 = vld [vmem:[#allocation44_spill] sm:$0xff]  ;;  %v13913_v60 = vld [vmem:[#allocation45_spill] sm:$0xff]  ;;  %v13914_v62 = vld [vmem:[#allocation46_spill] sm:$0xff]  ;;  %s11020_s13 = sld [smem:[#allocation4 + $0x25]]  ;;  %s11022_s28 = sld [smem:[#allocation4 + $0x26]] }
 0x5b3   :  { %3083 = vmatprep.mubr.bf16.mxu0 %v10615_v7  ;;  %3165 = vmatprep.mubr.bf16.mxu1 %v10615_v7  ;;  %v13915_v31 = vld [vmem:[#allocation47_spill] sm:$0xff]  ;;  %v13916_v40 = vld [vmem:[#allocation48_spill] sm:$0xff]  ;;  %v13917_v49 = vld [vmem:[#allocation49_spill] sm:$0xff]  ;;  %s3337_s27 = sand.u32 7, %s11008_s10  ;;  %s3358_s16 = sshra.s32 %s11010_s3, 3 }
 0x5b4   :  { %3084 = vmatmul.mubr.bf16.vlgmr.msra.gmra.mrb[28].mxu0 %v10617_v8  ;;  %3166 = vmatmul.mubr.bf16.vlgmr.msra.gmra.mrb[28].mxu1 %v10617_v8  ;;  %v13918_v2 = vld [vmem:[#allocation50_spill] sm:$0xff]  ;;  %v13919_v24 = vld [vmem:[#allocation51_spill] sm:$0xff]  ;;  %v13920_v38 = vld [vmem:[#allocation52_spill] sm:$0xff]  ;;  %s11030_s22 = sld [smem:[#allocation5 + $0x21]]  ;;  %s11035_s11 = sadd.s32 %s5751_s18, %s3337_s27 }
 0x5b5   :  { %3093 = vmatpush1.bf16.msra.mxu0 %v9595_v20  ;;  %3175 = vmatpush1.bf16.msra.mxu1 %v9601_v32  ;;  %v13880_v20 = vld [vmem:[#allocation12_spill] sm:$0xff]  ;;  %v13881_v32 = vld [vmem:[#allocation13_spill] sm:$0xff]  ;;  %v13922_v3 = vld [vmem:[#allocation54_spill] sm:$0xff]  ;;  %s11037_s19 = sld [smem:[#allocation5 + $0x23]]  ;;  %s3361_s9 = sand.u32 7, %s11010_s3 }
 0x5b6   :  { %3094 = vmatprep.subr.bf16.mxu0 %v9611_v39  ;;  %3176 = vmatprep.subr.bf16.mxu1 %v9617_v25  ;;  %v13882_v39 = vld [vmem:[#allocation14_spill] sm:$0xff]  ;;  %v13883_v25 = vld [vmem:[#allocation15_spill] sm:$0xff]  ;;  %v13921_v27 = vld [vmem:[#allocation53_spill] sm:$0xff]  ;;  %s5753_s5 = sshll.u32 %s3358_s16, 4  ;;  %s3406_s12 = sshra.s32 %s11014_s0, 3 }
 0x5b7   :  { %v10623_v10 = vld [vmem:[#allocation2 + $0x18] sm:$0xff]  ;;  %v13923_v4 = vld [vmem:[#allocation55_spill] sm:$0xff]  ;;  %v13924_v6 = vld [vmem:[#allocation56_spill] sm:$0xff]  ;;  %s3382_s24 = sshra.s32 %s11012_s4, 3  ;;  %s3385_s23 = sand.u32 7, %s11012_s4 }
 0x5b8   :  { %v10629_v11 = vpack.c.bf16 %v10623_v10, %v10623_v10  ;;  %s5755_s6 = sshll.u32 %s3382_s24, 4  ;;  %s11046_s26 = sadd.s32 %s5753_s5, %s3361_s9 }
 0x5b9   :  { %3095 = vmatpush1.bf16.msra.mxu0 %v9625_v45  ;;  %3177 = vmatpush1.bf16.msra.mxu1 %v9631_v46  ;;  %v13886_v45 = vld [vmem:[#allocation18_spill] sm:$0xff]  ;;  %v13887_v46 = vld [vmem:[#allocation19_spill] sm:$0xff]  ;;  %s3430_s30 = sshra.s32 %s11018_s8, 3  ;;  %s11049_s17 = sadd.s32 %s5755_s6, %s3385_s23 }
 0x5ba   :  { %3124 = vmatprep.mubr.bf16.mxu0 %v10629_v11  ;;  %3206 = vmatprep.mubr.bf16.mxu1 %v10629_v11  ;;  %s3454_s10 = sshra.s32 %s11020_s13, 3  ;;  %s3409_s3 = sand.u32 7, %s11014_s0 }
 0x5bb   :  { %3096 = vmatprep.subr.bf16.mxu0 %v9637_v37  ;;  %3178 = vmatprep.subr.bf16.mxu1 %v9643_v29  ;;  %v13888_v37 = vld [vmem:[#allocation20_spill] sm:$0xff]  ;;  %v13889_v29 = vld [vmem:[#allocation21_spill] sm:$0xff]  ;;  %s5757_s4 = sshll.u32 %s3406_s12, 4  ;;  %s3433_s21 = sand.u32 7, %s11018_s8 }
 0x5bc   :  { %s5759_s27 = sshll.u32 %s3430_s30, 4  ;;  %s3457_s18 = sand.u32 7, %s11020_s13 }
 0x5bd   :  { %3097 = vmatpush1.bf16.msra.mxu0 %v9649_v21  ;;  %3179 = vmatpush1.bf16.msra.mxu1 %v13880_v20  ;;  %v13890_v21 = vld [vmem:[#allocation22_spill] sm:$0xff]  ;;  %v13925_v20 = vld [vmem:[#allocation57_spill] sm:$0xff]  ;;  %s5761_s16 = sshll.u32 %s3454_s10, 4  ;;  %s3478_s23 = sshra.s32 %s11022_s28, 3 }
 0x5be   :  { %3098 = vmatprep.subr.bf16.mxu0 %v13881_v32  ;;  %3180 = vmatprep.subr.bf16.mxu1 %v13882_v39  ;;  %v13926_v32 = vld [vmem:[#allocation58_spill] sm:$0xff]  ;;  %v13927_v39 = vld [vmem:[#allocation59_spill] sm:$0xff]  ;;  %s11061_s0 = sadd.s32 %s5757_s4, %s3409_s3  ;;  %s11063_s6 = sadd.s32 %s5759_s27, %s3433_s21 }
 0x5bf   :  { %s11070_s14 = sadd.s32 %s5761_s16, %s3457_s18  ;;  %s3481_s12 = sand.u32 7, %s11022_s28 }
 0x5c0   :  { %s5763_s30 = sshll.u32 %s3478_s23, 4  ;;  %s3502_s16 = sshra.s32 %s11024_s29, 3 }
 0x5c1   :  { %3099 = vmatpush1.bf16.msra.mxu0 %v13883_v25  ;;  %3181 = vmatpush1.bf16.msra.mxu1 %v13884_v12  ;;  %v13928_v25 = vld [vmem:[#allocation60_spill] sm:$0xff]  ;;  %v13929_v12 = vld [vmem:[#allocation61_spill] sm:$0xff]  ;;  %s11089_s23 = sadd.s32 %s5763_s30, %s3481_s12  ;;  %s3345_s10 = sshra.s32 %s11026_s20, 3 }
 0x5c2   :  { %3100 = vmatprep.subr.bf16.mxu0 %v13885_v13  ;;  %3182 = vmatprep.subr.bf16.mxu1 %v13886_v45  ;;  %v13930_v13 = vld [vmem:[#allocation62_spill] sm:$0xff]  ;;  %v3045_v45 = vld [vmem:[#allocation2 + $0x10] sm:$0xff]  ;;  %13984 = sst [smem:[#allocation7_spill]] %s11089_s23  ;;  %s3505_s3 = sand.u32 7, %s11024_s29 }
 0x5c3   :  { %s3369_s4 = sshra.s32 %s11030_s22, 3  ;;  %s5765_s21 = sshll.u32 %s3502_s16, 4 }
 0x5c4   :  { %s3348_s27 = sand.u32 7, %s11026_s20  ;;  %s5752_s24 = sshll.u32 %s3345_s10, 4 }
 0x5c5   :  { %3101 = vmatpush1.bf16.msra.mxu0 %v13887_v46  ;;  %3183 = vmatpush1.bf16.msra.mxu1 %v13888_v37  ;;  %v13931_v46 = vld [vmem:[#allocation63_spill] sm:$0xff]  ;;  %v3049_v37 = vpack.c.bf16 %v3045_v45, %v3045_v45  ;;  %s3372_s25 = sand.u32 7, %s11030_s22  ;;  %s5754_s9 = sshll.u32 %s3369_s4, 4 }
 0x5c6   :  { %3102 = vmatprep.subr.bf16.mxu0 %v13889_v29  ;;  %3184 = vmatprep.subr.bf16.mxu1 %v13890_v21  ;;  %v13932_v29 = vld [vmem:[#allocation64_spill] sm:$0xff]  ;;  %v13933_v21 = vld [vmem:[#allocation65_spill] sm:$0xff]  ;;  %s11096_s8 = sld [smem:[#allocation5 + $0x24]]  ;;  %s11098_s18 = sadd.s32 %s5765_s21, %s3505_s3 }
 0x5c7   :  { %v10755_v45 = vld [vmem:[%s13981_s2 + $0xf4] ss:$20 sps:$4 sm:$0xff]   ;;  %13985 = sst [smem:[#allocation8_spill]] %s11098_s18  ;;  %s11100_s13 = sld [smem:[#allocation5 + $0x25]] }
 0x5c8   :  { %s11102_s12 = sadd.s32 %s5752_s24, %s3348_s27  ;;  %s11104_s29 = sld [smem:[#allocation5 + $0x26]] }
 0x5c9   :  { %3103 = vmatpush1.bf16.msra.mxu0 %v13891_v14  ;;  %3185 = vmatpush1.bf16.msra.mxu1 %v13892_v16  ;;  %v13934_v14 = vld [vmem:[#allocation66_spill] sm:$0xff]  ;;  %v13935_v16 = vld [vmem:[#allocation67_spill] sm:$0xff]  ;;  %13986 = sst [smem:[#allocation9_spill]] %s11102_s12  ;;  %s11106_s20 = sadd.s32 %s5754_s9, %s3372_s25 }
 0x5ca   :  { %3104 = vmatprep.subr.bf16.mxu0 %v13893_v17  ;;  %3186 = vmatprep.subr.bf16.mxu1 %v13894_v18  ;;  %v13936_v17 = vld [vmem:[#allocation68_spill] sm:$0xff]  ;;  %v13938_v18 = vld [vmem:[#allocation70_spill] sm:$0xff]  ;;  %13987 = sst [smem:[#allocation111_spill]] %s11106_s20  ;;  %s11108_s22 = sld [smem:[#allocation5 + $0x27]] }
 0x5cb   :  { %s3393_s28 = sshra.s32 %s11033_s15, 3  ;;  %s3417_s4 = sshra.s32 %s11037_s19, 3 }
 0x5cc   :  { %s3396_s16 = sand.u32 7, %s11033_s15  ;;  %s5756_s1 = sshll.u32 %s3393_s28, 4 }
 0x5cd   :  { %3105 = vmatpush1.bf16.msra.mxu0 %v13895_v50  ;;  %3187 = vmatpush1.bf16.msra.mxu1 %v13896_v19  ;;  %v13939_v50 = vld [vmem:[#allocation71_spill] sm:$0xff]  ;;  %v13940_v19 = vld [vmem:[#allocation72_spill] sm:$0xff]  ;;  %s3441_s24 = sshra.s32 %s11096_s8, 3  ;;  %s5758_s21 = sshll.u32 %s3417_s4, 4 }
 0x5ce   :  { %3106 = vmatprep.subr.bf16.mxu0 %v13897_v35  ;;  %3188 = vmatprep.subr.bf16.mxu1 %v13898_v36  ;;  %v13941_v35 = vld [vmem:[#allocation73_spill] sm:$0xff]  ;;  %v13944_v36 = vld [vmem:[#allocation76_spill] sm:$0xff]  ;;  %s3465_s27 = sshra.s32 %s11100_s13, 3  ;;  %s3444_s25 = sand.u32 7, %s11096_s8 }
 0x5cf   :  { %s3489_s12 = sshra.s32 %s11104_s29, 3  ;;  %s5760_s5 = sshll.u32 %s3441_s24, 4 }
 0x5d0   :  { %s3513_s9 = sshra.s32 %s11108_s22, 3  ;;  %s3468_s30 = sand.u32 7, %s11100_s13 }
 0x5d1   :  { %3107 = vmatpush1.bf16.msra.mxu0 %v13899_v34  ;;  %3189 = vmatpush1.bf16.msra.mxu1 %v13900_v43  ;;  %v13946_v34 = vld [vmem:[#allocation78_spill] sm:$0xff]  ;;  %v13947_v43 = vld [vmem:[#allocation79_spill] sm:$0xff]  ;;  %s5762_s20 = sshll.u32 %s3465_s27, 4  ;;  %s3492_s15 = sand.u32 7, %s11104_s29 }
 0x5d2   :  { %3108 = vmatprep.subr.bf16.mxu0 %v13901_v44  ;;  %3190 = vmatprep.subr.bf16.mxu1 %v13902_v42  ;;  %v13948_v44 = vld [vmem:[#allocation80_spill] sm:$0xff]  ;;  %v13949_v42 = vld [vmem:[#allocation81_spill] sm:$0xff]  ;;  %s5764_s28 = sshll.u32 %s3489_s12, 4  ;;  %s5766_s18 = sshll.u32 %s3513_s9, 4 }
 0x5d3   :  { %s11141_s3 = sadd.s32 %s5756_s1, %s3396_s16  ;;  %s13988_s24 = scalar_lea.vmem %s13143_s7, %s11035_s11 }
 0x5d4   :  { %s13989_s29 = scalar_lea.vmem %s13143_s7, %s11046_s26  ;;  %s11155_s12 = sadd.s32 %s5760_s5, %s3444_s25 }
 0x5d5   :  { %3109 = vmatpush1.bf16.msra.mxu0 %v13903_v33  ;;  %3191 = vmatpush1.bf16.msra.mxu1 %v13904_v26  ;;  %v13950_v33 = vld [vmem:[#allocation82_spill] sm:$0xff]  ;;  %v13951_v26 = vld [vmem:[#allocation83_spill] sm:$0xff]  ;;  %s11157_s27 = sadd.s32 %s5762_s20, %s3468_s30  ;;  %s13992_s16 = scalar_lea.vmem %s13143_s7, %s11049_s17 }
 0x5d6   :  { %3110 = vmatprep.subr.bf16.mxu0 %v13905_v52  ;;  %3192 = vmatprep.subr.bf16.mxu1 %v13906_v53  ;;  %v13952_v52 = vld [vmem:[#allocation84_spill] sm:$0xff]  ;;  %v13953_v53 = vld [vmem:[#allocation85_spill] sm:$0xff]  ;;  %s13993_s25 = scalar_lea.vmem %s13143_s7, %s11061_s0  ;;  %s11173_s20 = sadd.s32 %s5764_s28, %s3492_s15 }
 0x5d7   :  { %s13994_s30 = sld [smem:[#allocation9_spill]]  ;;  %s13995_s5 = sld [smem:[#allocation111_spill]] }
 0x5d8   :  { %s13996_s4 = scalar_lea.vmem %s13143_s7, %s11063_s6  ;;  %s13997_s28 = scalar_lea.vmem %s13143_s7, %s11070_s14 }
 0x5d9   :  { %3111 = vmatpush1.bf16.msra.mxu0 %v13907_v54  ;;  %3193 = vmatpush1.bf16.msra.mxu1 %v13908_v55  ;;  %v13954_v54 = vld [vmem:[#allocation86_spill] sm:$0xff]  ;;  %v13955_v55 = vld [vmem:[#allocation87_spill] sm:$0xff]  ;;  %s3400_s8 = scalar_lea.vmem %s13143_s7, %s11141_s3  ;;  %s3472_s9 = scalar_lea.vmem %s13143_s7, %s11157_s27 }
 0x5da   :  { %3112 = vmatprep.subr.bf16.mxu0 %v13909_v56  ;;  %3194 = vmatprep.subr.bf16.mxu1 %v13910_v57  ;;  %v13956_v56 = vld [vmem:[#allocation88_spill] sm:$0xff]  ;;  %v13957_v57 = vld [vmem:[#allocation89_spill] sm:$0xff]  ;;  %s3496_s27 = scalar_lea.vmem %s13143_s7, %s11173_s20  ;;  %s12043_s6 = sld [smem:[#allocation4 + $0x29]] }
 0x5db   :  { %s12045_s11 = sld [smem:[#allocation4 + $0x2a]]  ;;  %s12055_s3 = sld [smem:[#allocation4 + $0x2e]] }
 0x5dc   :  { %s12057_s23 = sld [smem:[#allocation4 + $0x2f]]  ;;  %s12070_s15 = sld [smem:[#allocation5 + $0x2b]] }
 0x5dd   :  { %3113 = vmatpush1.bf16.msra.mxu0 %v13911_v58  ;;  %3195 = vmatpush1.bf16.msra.mxu1 %v13912_v59  ;;  %v13958_v58 = vld [vmem:[#allocation90_spill] sm:$0xff]  ;;  %v13959_v59 = vld [vmem:[#allocation91_spill] sm:$0xff]  ;;  %s14000_s0 = scalar_lea.vmem %s13143_s7, %s13994_s30 }
 0x5de   :  { %3114 = vmatprep.subr.bf16.mxu0 %v13913_v60  ;;  %3196 = vmatprep.subr.bf16.mxu1 %v13914_v62  ;;  %v13960_v60 = vld [vmem:[#allocation92_spill] sm:$0xff]  ;;  %v13961_v62 = vld [vmem:[#allocation93_spill] sm:$0xff] }
 0x5e1   :  { %3115 = vmatpush1.bf16.msra.mxu0 %v13915_v31  ;;  %3197 = vmatpush1.bf16.msra.mxu1 %v13916_v40  ;;  %v13962_v31 = vld [vmem:[#allocation94_spill] sm:$0xff]  ;;  %v13963_v40 = vld [vmem:[#allocation95_spill] sm:$0xff] }
 0x5e2   :  { %3116 = vmatprep.subr.bf16.mxu0 %v13917_v49  ;;  %3198 = vmatprep.subr.bf16.mxu1 %v13918_v2  ;;  %v13964_v49 = vld [vmem:[#allocation96_spill] sm:$0xff]  ;;  %v13965_v2 = vld [vmem:[#allocation97_spill] sm:$0xff] }
 0x5e5   :  { %3117 = vmatpush1.bf16.msra.mxu0 %v13919_v24  ;;  %3199 = vmatpush1.bf16.msra.mxu1 %v13920_v38  ;;  %v13966_v24 = vld [vmem:[#allocation98_spill] sm:$0xff]  ;;  %v13967_v38 = vld [vmem:[#allocation99_spill] sm:$0xff] }
 0x5e6   :  { %3118 = vmatprep.subr.bf16.mxu0 %v13921_v27  ;;  %3200 = vmatprep.subr.bf16.mxu1 %v13922_v3  ;;  %v13969_v27 = vld [vmem:[#allocation101_spill] sm:$0xff]  ;;  %v13970_v3 = vld [vmem:[#allocation102_spill] sm:$0xff] }
 0x5e9   :  { %3119 = vmatpush1.bf16.msra.mxu0 %v13923_v4  ;;  %3201 = vmatpush1.bf16.msra.mxu1 %v13924_v6  ;;  %v13973_v4 = vld [vmem:[#allocation105_spill] sm:$0xff]  ;;  %v13974_v6 = vld [vmem:[#allocation106_spill] sm:$0xff] }
 0x5ea   :  { %3120 = vmatprep.subr.bf16.mxu0 %v13925_v20  ;;  %3202 = vmatprep.subr.bf16.mxu1 %v13926_v32  ;;  %v13975_v20 = vld [vmem:[#allocation107_spill] sm:$0xff]  ;;  %v13976_v32 = vld [vmem:[#allocation108_spill] sm:$0xff] }
 0x5ed   :  { %3121 = vmatpush1.bf16.msra.mxu0 %v13927_v39  ;;  %3203 = vmatpush1.bf16.msra.mxu1 %v13928_v25  ;;  %v13977_v39 = vld [vmem:[#allocation109_spill] sm:$0xff]  ;;  %v13978_v25 = vld [vmem:[#allocation112_spill] sm:$0xff] }
 0x5ee   :  { %3122 = vmatprep.subr.bf16.mxu0 %v13929_v12  ;;  %3204 = vmatprep.subr.bf16.mxu1 %v13930_v13  ;;  %v13979_v12 = vld [vmem:[#allocation113_spill] sm:$0xff]  ;;  %v13980_v13 = vld [vmem:[#allocation114_spill] sm:$0xff] }
 0x5f1   :  { %3123 = vmatpush1.bf16.msra.mxu0 %v13931_v46  ;;  %3205 = vmatpush1.bf16.msra.mxu1 %v9967_v48  ;;  %v13937_v48 = vld [vmem:[#allocation69_spill] sm:$0xff] }
 0x5f2   :  { %5940 = vmatprep.subr.bf16.mxu0 %v13932_v29  ;;  %5962 = vmatprep.subr.bf16.mxu1 %v13933_v21  ;;  %v10761_v46 = vld [vmem:[%s13981_s2 + $0xfc] ss:$20 sps:$4 sm:$0xff]   ;;  %v10797_v29 = vld [vmem:[%s13981_s2 + $0x120] ss:$20 sps:$4 sm:$0xff]   ;;  %v10803_v21 = vld [vmem:[%s13981_s2 + $0x144] ss:$20 sps:$4 sm:$0xff]  }
 0x5f4   :  { %3125 = vmatmul.mubr.bf16.vlgmr.msra.gmra.mrb[28].mxu0 %v3049_v37  ;;  %3207 = vmatmul.mubr.bf16.vlgmr.msra.gmra.mrb[28].mxu1 %v3049_v37 }
 0x5f5   :  { %5941 = vmatpush3.bf16.msra.mxu0 %v9989_v22  ;;  %3247 = vmatprep.mubr.bf16.mxu0 %v10615_v7  ;;  %v13942_v22 = vld [vmem:[#allocation74_spill] sm:$0xff]  ;;  %v13943_v7 = vld [vmem:[#allocation75_spill] sm:$0xff] }
 0x5f6   :  { %5963 = vmatpush3.bf16.msra.mxu1 %v13934_v14  ;;  %3287 = vmatprep.mubr.bf16.mxu1 %v10629_v11  ;;  %v13945_v11 = vld [vmem:[#allocation77_spill] sm:$0xff]  ;;  %v10809_v14 = vld [vmem:[%s13981_s2 + $0x14c] ss:$20 sps:$4 sm:$0xff]  }
 0x5f7   :  { %5942 = vmatprep.subr.bf16.mxu0 %v13935_v16  ;;  %5964 = vmatprep.subr.bf16.mxu1 %v13936_v17  ;;  %v10815_v16 = vld [vmem:[%s13981_s2 + $0x140] ss:$20 sps:$4 sm:$0xff]   ;;  %v10821_v17 = vld [vmem:[%s13981_s2 + $0x148] ss:$20 sps:$4 sm:$0xff]  }
 0x5f9   :  { %5943 = vmatpush3.bf16.msra.mxu0 %v13937_v48  ;;  %v10827_v48 = vld [vmem:[%s13981_s2 + $0x16c] ss:$20 sps:$4 sm:$0xff]  }
 0x5fa   :  { %5965 = vmatpush3.bf16.msra.mxu1 %v13938_v18  ;;  %5944 = vmatprep.subr.bf16.mxu0 %v13939_v50  ;;  %v10833_v18 = vld [vmem:[%s13981_s2 + $0x174] ss:$20 sps:$4 sm:$0xff]  }
 0x5fb   :  { %5966 = vmatprep.subr.bf16.mxu1 %v13940_v19  ;;  %v10839_v50 = vld [vmem:[%s13981_s2 + $0x168] ss:$20 sps:$4 sm:$0xff]   ;;  %v10845_v19 = vld [vmem:[%s13981_s2 + $0x170] ss:$20 sps:$4 sm:$0xff]  }
 0x5fd   :  { %5945 = vmatpush3.bf16.msra.mxu0 %v13941_v35  ;;  %v10851_v35 = vld [vmem:[%s13981_s2 + $0x194] ss:$20 sps:$4 sm:$0xff]  }
 0x5fe   :  { %5967 = vmatpush3.bf16.msra.mxu1 %v13942_v22  ;;  %5946 = vmatprep.subr.bf16.mxu0 %v13943_v7  ;;  %v10857_v22 = vld [vmem:[%s13981_s2 + $0x19c] ss:$20 sps:$4 sm:$0xff]  }
 0x5ff   :  { %5968 = vmatprep.subr.bf16.mxu1 %v13944_v36  ;;  %v10863_v7 = vld [vmem:[%s13981_s2 + $0x190] ss:$20 sps:$4 sm:$0xff]   ;;  %v10869_v36 = vld [vmem:[%s13981_s2 + $0x198] ss:$20 sps:$4 sm:$0xff]  }
 0x601   :  { %5947 = vmatpush3.bf16.msra.mxu0 %v13945_v11  ;;  %v10875_v11 = vld [vmem:[%s13981_s2 + $0x1bc] ss:$20 sps:$4 sm:$0xff]  }
 0x602   :  { %5969 = vmatpush3.bf16.msra.mxu1 %v13946_v34  ;;  %5948 = vmatprep.subr.bf16.mxu0 %v13947_v43  ;;  %v10881_v34 = vld [vmem:[%s13981_s2 + $0x1c4] ss:$20 sps:$4 sm:$0xff]  }
 0x603   :  { %5970 = vmatprep.subr.bf16.mxu1 %v13948_v44  ;;  %v10887_v43 = vld [vmem:[%s13981_s2 + $0x1b8] ss:$20 sps:$4 sm:$0xff]   ;;  %v10893_v44 = vld [vmem:[%s13981_s2 + $0x1c0] ss:$20 sps:$4 sm:$0xff]  }
 0x605   :  { %5949 = vmatpush3.bf16.msra.mxu0 %v13949_v42  ;;  %v10899_v42 = vld [vmem:[%s13981_s2 + $0x1e4] ss:$20 sps:$4 sm:$0xff]  }
 0x606   :  { %5971 = vmatpush3.bf16.msra.mxu1 %v13950_v33  ;;  %5950 = vmatprep.subr.bf16.mxu0 %v13951_v26  ;;  %v10905_v33 = vld [vmem:[%s13981_s2 + $0x1ec] ss:$20 sps:$4 sm:$0xff]  }
 0x607   :  { %5972 = vmatprep.subr.bf16.mxu1 %v13952_v52  ;;  %v10911_v26 = vld [vmem:[%s13981_s2 + $0x1e0] ss:$20 sps:$4 sm:$0xff]   ;;  %v10917_v52 = vld [vmem:[%s13981_s2 + $0x1e8] ss:$20 sps:$4 sm:$0xff]  }
 0x609   :  { %5951 = vmatpush3.bf16.msra.mxu0 %v13953_v53  ;;  %v10923_v53 = vld [vmem:[%s13981_s2 + $0x20c] ss:$20 sps:$4 sm:$0xff]  }
 0x60a   :  { %5973 = vmatpush3.bf16.msra.mxu1 %v13954_v54  ;;  %5952 = vmatprep.subr.bf16.mxu0 %v13955_v55  ;;  %v10929_v54 = vld [vmem:[%s13981_s2 + $0x214] ss:$20 sps:$4 sm:$0xff]  }
 0x60b   :  { %5974 = vmatprep.subr.bf16.mxu1 %v13956_v56  ;;  %v10935_v55 = vld [vmem:[%s13981_s2 + $0x208] ss:$20 sps:$4 sm:$0xff]   ;;  %v10941_v56 = vld [vmem:[%s13981_s2 + $0x210] ss:$20 sps:$4 sm:$0xff]  }
 0x60d   :  { %5953 = vmatpush3.bf16.msra.mxu0 %v13957_v57  ;;  %v10947_v57 = vld [vmem:[%s13981_s2 + $0x234] ss:$20 sps:$4 sm:$0xff]  }
 0x60e   :  { %5975 = vmatpush3.bf16.msra.mxu1 %v13958_v58  ;;  %5954 = vmatprep.subr.bf16.mxu0 %v13959_v59  ;;  %v10953_v58 = vld [vmem:[%s13981_s2 + $0x23c] ss:$20 sps:$4 sm:$0xff]  }
 0x60f   :  { %5976 = vmatprep.subr.bf16.mxu1 %v13960_v60  ;;  %v10959_v59 = vld [vmem:[%s13981_s2 + $0x230] ss:$20 sps:$4 sm:$0xff]   ;;  %v10965_v60 = vld [vmem:[%s13981_s2 + $0x238] ss:$20 sps:$4 sm:$0xff]  }
 0x611   :  { %5955 = vmatpush3.bf16.msra.mxu0 %v10159_v47  ;;  %v13968_v47 = vld [vmem:[#allocation100_spill] sm:$0xff] }
 0x612   :  { %5977 = vmatpush3.bf16.msra.mxu1 %v13961_v62  ;;  %3532 = vmatprep.subr.bf16.mxu0 %v13962_v31  ;;  %v10971_v62 = vld [vmem:[%s13981_s2 + $0x25c] ss:$20 sps:$4 sm:$0xff]   ;;  %v10977_v31 = vld [vmem:[%s13981_s2 + $0x264] ss:$20 sps:$4 sm:$0xff]  }
 0x613   :  { %3614 = vmatprep.subr.bf16.mxu1 %v10177_v23  ;;  %v13971_v23 = vld [vmem:[#allocation103_spill] sm:$0xff] }
 0x614   :  { %3248 = vmatmul.mubr.bf16.vlgmr.msra.gmra.mrb[32].mxu0 %v10617_v8  ;;  %v13972_v8 = vld [vmem:[#allocation104_spill] sm:$0xff] }
 0x615   :  { %3288 = vmatmul.mubr.bf16.vlgmr.msra.gmra.mrb[32].mxu1 %v3049_v37  ;;  %3533 = vmatpush1.bf16.msra.mxu0 %v13963_v40  ;;  %v10791_v37 = vld [vmem:[%s13981_s2 + $0x118] ss:$20 sps:$4 sm:$0xff]  }
 0x616   :  { %3615 = vmatpush1.bf16.msra.mxu1 %v13964_v49  ;;  %3534 = vmatprep.subr.bf16.mxu0 %v13965_v2  ;;  %v10983_v40 = vld [vmem:[%s13981_s2 + $0x258] ss:$20 sps:$4 sm:$0xff]   ;;  %v10989_v49 = vld [vmem:[%s13981_s2 + $0x260] ss:$20 sps:$4 sm:$0xff]  }
 0x617   :  { %3616 = vmatprep.subr.bf16.mxu1 %v13966_v24  ;;  %v10995_v2 = vld [vmem:[%s13981_s2 + $0x284] ss:$20 sps:$4 sm:$0xff]   ;;  %v11001_v24 = vld [vmem:[%s13981_s2 + $0x28c] ss:$20 sps:$4 sm:$0xff]  }
 0x618   :  { %13982 = vst [vmem:[#allocation10_spill] sm:$0xff] %v10995_v2  ;;  %13983 = vst [vmem:[#allocation11_spill] sm:$0xff] %v11001_v24 }
 0x619   :  { %3535 = vmatpush1.bf16.msra.mxu0 %v13967_v38 }
 0x61a   :  { %3617 = vmatpush1.bf16.msra.mxu1 %v13968_v47  ;;  %3536 = vmatprep.subr.bf16.mxu0 %v13969_v27 }
 0x61b   :  { %3618 = vmatprep.subr.bf16.mxu1 %v13970_v3 }
 0x61d   :  { %3537 = vmatpush1.bf16.msra.mxu0 %v13971_v23 }
 0x61e   :  { %3619 = vmatpush1.bf16.msra.mxu1 %v13972_v8  ;;  %3538 = vmatprep.subr.bf16.mxu0 %v13973_v4 }
 0x61f   :  { %3620 = vmatprep.subr.bf16.mxu1 %v13974_v6 }
 0x621   :  { %3539 = vmatpush1.bf16.msra.mxu0 %v13975_v20 }
 0x622   :  { %3621 = vmatpush1.bf16.msra.mxu1 %v13976_v32  ;;  %3540 = vmatprep.subr.bf16.mxu0 %v13977_v39 }
 0x623   :  { %3622 = vmatprep.subr.bf16.mxu1 %v13978_v25 }
 0x625   :  { %3541 = vmatpush1.bf16.msra.mxu0 %v13979_v12 }
 0x626   :  { %3623 = vmatpush1.bf16.msra.mxu1 %v13980_v13  ;;  %3542 = vmatprep.subr.bf16.mxu0 %v10293_v51  ;;  %v10779_v51 = vld [vmem:[%s13981_s2 + $0x11c] ss:$20 sps:$4 sm:$0xff]  }
 0x627   :  { %3624 = vmatprep.subr.bf16.mxu1 %v10299_v30  ;;  %v10785_v30 = vld [vmem:[%s13981_s2 + $0x124] ss:$20 sps:$4 sm:$0xff]  }
 0x629   :  { %3543 = vmatpush1.bf16.msra.mxu0 %v10305_v9  ;;  %v10767_v9 = vld [vmem:[%s13981_s2 + $0xf0] ss:$20 sps:$4 sm:$0xff]  }
 0x62a   :  { %3625 = vmatpush1.bf16.msra.mxu1 %v10311_v28  ;;  %3544 = vmatprep.subr.bf16.mxu0 %v10755_v45  ;;  %v10773_v28 = vld [vmem:[%s13981_s2 + $0xf8] ss:$20 sps:$4 sm:$0xff]   ;;  %s3420_s2 = sand.u32 7, %s11037_s19  ;;  %s3516_s19 = sand.u32 7, %s11108_s22 }
 0x62b   :  { %3626 = vmatprep.subr.bf16.mxu1 %v10761_v46  ;;  %s11143_s10 = sadd.s32 %s5758_s21, %s3420_s2  ;;  %s13990_s22 = sld [smem:[#allocation7_spill]] }
 0x62c   :  { %s13991_s2 = sld [smem:[#allocation8_spill]]  ;;  %s11175_s21 = sadd.s32 %s5766_s18, %s3516_s19 }
 0x62d   :  { %3545 = vmatpush1.bf16.msra.mxu0 %v10767_v9  ;;  %s3520_s13 = scalar_lea.vmem %s13143_s7, %s11175_s21  ;;  %s14002_s21 = sld [smem:[#allocation115_spill]] }
 0x62e   :  { %3627 = vmatpush1.bf16.msra.mxu1 %v10773_v28  ;;  %3546 = vmatprep.subr.bf16.mxu0 %v10779_v51  ;;  %s3866_s18 = sand.u32 7, %s12045_s11 }
 0x62f   :  { %3628 = vmatprep.subr.bf16.mxu1 %v10785_v30 }
 0x631   :  { %3547 = vmatpush1.bf16.msra.mxu0 %v10791_v37  ;;  %s13998_s1 = scalar_lea.vmem %s13143_s7, %s13990_s22  ;;  %s12063_s22 = sld [smem:[#allocation5 + $0x29]] }
 0x632   :  { %3629 = vmatpush1.bf16.msra.mxu1 %v10797_v29  ;;  %3548 = vmatprep.subr.bf16.mxu0 %v10803_v21  ;;  %s13999_s26 = scalar_lea.vmem %s13143_s7, %s13991_s2 }
 0x633   :  { %3630 = vmatprep.subr.bf16.mxu1 %v10809_v14 }
 0x635   :  { %3549 = vmatpush1.bf16.msra.mxu0 %v10815_v16 }
 0x636   :  { %3631 = vmatpush1.bf16.msra.mxu1 %v10821_v17  ;;  %3550 = vmatprep.subr.bf16.mxu0 %v10827_v48 }
 0x637   :  { %3632 = vmatprep.subr.bf16.mxu1 %v10833_v18  ;;  %s3853_s19 = sand.u32 7, %s12063_s22 }
 0x639   :  { %3551 = vmatpush1.bf16.msra.mxu0 %v10839_v50 }
 0x63a   :  { %3633 = vmatpush1.bf16.msra.mxu1 %v10845_v19  ;;  %3552 = vmatprep.subr.bf16.mxu0 %v10851_v35 }
 0x63b   :  { %3634 = vmatprep.subr.bf16.mxu1 %v10857_v22 }
 0x63d   :  { %3553 = vmatpush1.bf16.msra.mxu0 %v10863_v7 }
 0x63e   :  { %3635 = vmatpush1.bf16.msra.mxu1 %v10869_v36  ;;  %3554 = vmatprep.subr.bf16.mxu0 %v10875_v11 }
 0x63f   :  { %3636 = vmatprep.subr.bf16.mxu1 %v10881_v34 }
 0x641   :  { %3555 = vmatpush1.bf16.msra.mxu0 %v10887_v43 }
 0x642   :  { %3637 = vmatpush1.bf16.msra.mxu1 %v10893_v44  ;;  %3556 = vmatprep.subr.bf16.mxu0 %v10899_v42 }
 0x643   :  { %3638 = vmatprep.subr.bf16.mxu1 %v10905_v33 }
 0x645   :  { %3557 = vmatpush1.bf16.msra.mxu0 %v10911_v26 }
 0x646   :  { %3639 = vmatpush1.bf16.msra.mxu1 %v10917_v52  ;;  %3558 = vmatprep.subr.bf16.mxu0 %v10923_v53 }
 0x647   :  { %3640 = vmatprep.subr.bf16.mxu1 %v10929_v54 }
 0x649   :  { %3559 = vmatpush1.bf16.msra.mxu0 %v10935_v55 }
 0x64a   :  { %3641 = vmatpush1.bf16.msra.mxu1 %v10941_v56  ;;  %3560 = vmatprep.subr.bf16.mxu0 %v10947_v57 }
 0x64b   :  { %3642 = vmatprep.subr.bf16.mxu1 %v10953_v58 }
 0x64d   :  { %3561 = vmatpush1.bf16.msra.mxu0 %v10959_v59 }
 0x64e   :  { %3643 = vmatpush1.bf16.msra.mxu1 %v10965_v60  ;;  %3562 = vmatprep.subr.bf16.mxu0 %v10971_v62 }
 0x64f   :  { %3644 = vmatprep.subr.bf16.mxu1 %v10977_v31 }
 0x651   :  { %3563 = vmatpush1.bf16.msra.mxu0 %v10983_v40 }
 0x652   :  { %3645 = vmatpush1.bf16.msra.mxu1 %v10989_v49  ;;  %3573 = vmatprep.subr.bf16.mxu0 %v10995_v2 }
 0x653   :  { %3655 = vmatprep.subr.bf16.mxu1 %v11001_v24 }
 0x6c7   :  { %v3126_v38 = vpop.f32.mrb[28].mxu0  ;;  %v3208_v47 = vpop.f32.mrb[28].mxu1 }
 0x6c8   :  { %v3128_v27 = vpop.f32.mrb[29].mxu0  ;;  %v3210_v3 = vpop.f32.mrb[29].mxu1  ;;  %v6148_v20 = vadd.f32 %v3126_v38, %v8659_v61  ;;  %v6150_v39 = vadd.f32 %v3208_v47, %v8667_v1 }
 0x6c9   :  { %v3130_v23 = vpop.f32.mrb[30].mxu0  ;;  %v3212_v8 = vpop.f32.mrb[30].mxu1  ;;  %v6149_v32 = vadd.f32 %v3128_v27, %v8663_v63  ;;  %v6151_v24 = vadd.f32 %v3210_v3, %v13861_v0 }
 0x6ca   :  { %v3131_v4 = vpop.f32.mrb[31].mxu0  ;;  %v3213_v6 = vpop.f32.mrb[31].mxu1  ;;  %v5519_v25 = vmul.f32 -1.442695, %v6148_v20  ;;  %v5521_v13 = vmul.f32 -1.442695, %v6150_v39 }
 0x6cb   :  { %v5520_v12 = vmul.f32 -1.442695, %v6149_v32  ;;  %v5522_v6 = vmul.f32 -1.442695, %v6151_v24 }
 0x6cc   :  { %6566 = vpow2.f32 %v5519_v25 }
 0x6cd   :  { %6568 = vpow2.f32 %v5520_v12 }
 0x6ce   :  { %6570 = vpow2.f32 %v5521_v13 }
 0x6cf   :  { %6572 = vpow2.f32 %v5522_v6 }
 0x6d6   :  { %v6567_v23 = vpop.eup %6566 }
 0x6d7   :  { %v6569_v8 = vpop.eup %6568  ;;  %v3298_v38 = vadd.f32 1.0, %v6567_v23 }
 0x6d8   :  { %v6571_v4 = vpop.eup %6570  ;;  %v3304_v20 = vadd.f32 1.0, %v6569_v8 }
 0x6d9   :  { %v3310_v3 = vadd.f32 1.0, %v6571_v4  ;;  %6574 = vrcp.f32 %v3298_v38 }
 0x6da   :  { %6576 = vrcp.f32 %v3304_v20 }
 0x6db   :  { %6578 = vrcp.f32 %v3310_v3 }
 0x6e7   :  { %v5956_v2 = vpop.f32.mrb[32].mxu0 }
 0x6e8   :  { %v5978_v47 = vpop.f32.mrb[32].mxu1  ;;  %v5957_v27 = vpop.f32.mrb[33].mxu0 }
 0x6e9   :  { %v5958_v32 = vadd.f32 %v5957_v27, %v5956_v2  ;;  %v5979_v39 = vpop.f32.mrb[33].mxu1  ;;  %v5959_v25 = vpop.f32.mrb[34].mxu0 }
 0x6ea   :  { %v5980_v12 = vadd.f32 %v5979_v39, %v5978_v47  ;;  %v5981_v13 = vpop.f32.mrb[34].mxu1  ;;  %v5960_v0 = vpop.f32.mrb[35].mxu0 }
 0x6eb   :  { %v3250_v24 = vadd.f32 %v5958_v32, %v8679_v15  ;;  %v5982_v23 = vpop.f32.mrb[35].mxu1  ;;  %v6573_v2 = vpop.eup %6572 }
 0x6ec   :  { %v6575_v8 = vpop.eup %6574  ;;  %v3316_v20 = vadd.f32 1.0, %v6573_v2 }
 0x6ed   :  { %v3290_v0 = vadd.f32 %v5980_v12, %v3250_v24  ;;  %v6577_v4 = vpop.eup %6576 }
 0x6ee   :  { %v6579_v6 = vpop.eup %6578  ;;  %v3321_v47 = vmul.f32 %v6577_v4, %v10611_v5 }
 0x6ef   :  { %6580 = vtanh.f32 %v3290_v0  ;;  %v3323_v32 = vmul.f32 %v6579_v6, %v10623_v10 }
 0x6f0   :  { %6582 = vrcp.f32 %v3316_v20 }
 0x6f9   :  { %v6581_v38 = vpop.eup %6580 }
 0x6fa   :  { %v3320_v27 = vmul.f32 %v6581_v38, %v6575_v8  ;;  %v6583_v10 = vpop.eup %6582 }
 0x6fc   :  { %v3322_v39 = vadd.f32 %v3321_v47, %v3320_v27 }
 0x6fe   :  { %v3324_v5 = vadd.f32 %v3323_v32, %v3322_v39 }
 0x700   :  { %6584 = vtanh.f32 %v3324_v5  ;;  %5524 = vst [vmem:[%s13143_s7 + $0x58] sm:$0xff] %v3324_v5 }
 0x70a   :  { %v6585_v25 = vpop.eup %6584 }
 0x70b   :  { %v3326_v3 = vmul.f32 %v6585_v25, %v6583_v10 }
 0x70d   :  { %5523 = vst [vmem:[%s13143_s7 + $0x50] sm:$0xff] %v3326_v3 }
 0x714   :  { %v3342_v12 = vld [vmem:[%s13988_s24] ss:$8 sm:$0x3] }
 0x715   :  { %v3366_v13 = vld [vmem:[%s13989_s29] ss:$8 sm:$0x3]  ;;  %3343 = vst.msk [vmem:[#allocation2] ss:$8 sm:$0x3] %vm7753_vm1, %v3342_v12  ;;  %s3424_s29 = scalar_lea.vmem %s13143_s7, %s11143_s10  ;;  %s3448_s10 = scalar_lea.vmem %s13143_s7, %s11155_s12 }
 0x716   :  { %3367 = vst.msk [vmem:[#allocation2 + $0x1] ss:$8 sm:$0x3] %vm7753_vm1, %v3366_v13  ;;  %v3390_v24 = vld [vmem:[%s13992_s16] ss:$8 sm:$0x3] }
 0x717   :  { %v3414_v23 = vld [vmem:[%s13993_s25] ss:$8 sm:$0x3]  ;;  %3391 = vst.msk [vmem:[#allocation2 + $0x2] ss:$8 sm:$0x3] %vm7753_vm1, %v3390_v24 }
 0x718   :  { %3415 = vst.msk [vmem:[#allocation2 + $0x3] ss:$8 sm:$0x3] %vm7753_vm1, %v3414_v23  ;;  %v3438_v0 = vld [vmem:[%s13996_s4] ss:$8 sm:$0x3] }
 0x719   :  { %v3462_v2 = vld [vmem:[%s13997_s28] ss:$8 sm:$0x3]  ;;  %3439 = vst.msk [vmem:[#allocation2 + $0x4] ss:$8 sm:$0x3] %vm7753_vm1, %v3438_v0  ;;  %s14001_s28 = scalar_lea.vmem %s13143_s7, %s13995_s5 }
 0x71a   :  { %3463 = vst.msk [vmem:[#allocation2 + $0x5] ss:$8 sm:$0x3] %vm7753_vm1, %v3462_v2  ;;  %v3486_v8 = vld [vmem:[%s13998_s1] ss:$8 sm:$0x3] }
 0x71b   :  { %v3510_v4 = vld [vmem:[%s13999_s26] ss:$8 sm:$0x3]  ;;  %3487 = vst.msk [vmem:[#allocation2 + $0x6] ss:$8 sm:$0x3] %vm7753_vm1, %v3486_v8 }
 0x71c   :  { %3511 = vst.msk [vmem:[#allocation2 + $0x7] ss:$8 sm:$0x3] %vm7753_vm1, %v3510_v4  ;;  %v3353_v6 = vld [vmem:[%s14000_s0] ss:$8 sm:$0x3] }
 0x71d   :  { %v3377_v38 = vld [vmem:[%s14001_s28] ss:$8 sm:$0x3]  ;;  %3354 = vst.msk [vmem:[#allocation2 + $0x10] ss:$8 sm:$0x3] %vm7753_vm1, %v3353_v6 }
 0x71e   :  { %3378 = vst.msk [vmem:[#allocation2 + $0x11] ss:$8 sm:$0x3] %vm7753_vm1, %v3377_v38  ;;  %v3401_v47 = vld [vmem:[%s3400_s8] ss:$8 sm:$0x3] }
 0x71f   :  { %v3425_v27 = vld [vmem:[%s3424_s29] ss:$8 sm:$0x3]  ;;  %3402 = vst.msk [vmem:[#allocation2 + $0x12] ss:$8 sm:$0x3] %vm7753_vm1, %v3401_v47 }
 0x720   :  { %3426 = vst.msk [vmem:[#allocation2 + $0x13] ss:$8 sm:$0x3] %vm7753_vm1, %v3425_v27  ;;  %v3449_v20 = vld [vmem:[%s3448_s10] ss:$8 sm:$0x3] }
 0x721   :  { %v3473_v32 = vld [vmem:[%s3472_s9] ss:$8 sm:$0x3]  ;;  %3450 = vst.msk [vmem:[#allocation2 + $0x14] ss:$8 sm:$0x3] %vm7753_vm1, %v3449_v20 }
 0x722   :  { %3474 = vst.msk [vmem:[#allocation2 + $0x15] ss:$8 sm:$0x3] %vm7753_vm1, %v3473_v32  ;;  %v3497_v39 = vld [vmem:[%s3496_s27] ss:$8 sm:$0x3] }
 0x723   :  { %v3521_v5 = vld [vmem:[%s3520_s13] ss:$8 sm:$0x3]  ;;  %3498 = vst.msk [vmem:[#allocation2 + $0x16] ss:$8 sm:$0x3] %vm7753_vm1, %v3497_v39 }
 0x724   :  { %3522 = vst.msk [vmem:[#allocation2 + $0x17] ss:$8 sm:$0x3] %vm7753_vm1, %v3521_v5  ;;  %v11259_v10 = vld [vmem:[#allocation2 + $0x8] sm:$0xff]  ;;  %v3524_v25 = vld [vmem:[#allocation2] sm:$0xff]  ;;  %s12041_s29 = sld [smem:[#allocation4 + $0x28]] }
 0x725   :  { %v11263_v3 = vpack.c.bf16 %v11259_v10, %v11259_v10  ;;  %v11265_v12 = vpack.c.bf16 %v3524_v25, %v3524_v25  ;;  %v11276_v24 = vld [vmem:[%s14002_s21 + $0x280] ss:$20 sps:$4 sm:$0xff]   ;;  %v11282_v23 = vld [vmem:[%s14002_s21 + $0x288] ss:$20 sps:$4 sm:$0xff]   ;;  %v11312_v6 = vld [vmem:[%s14002_s21 + $0x2b0] ss:$20 sps:$4 sm:$0xff]  }
 0x726   :  { %v11292_v2 = vld [vmem:[%s14002_s21 + $0x2ac] ss:$20 sps:$4 sm:$0xff]   ;;  %v11298_v8 = vld [vmem:[%s14002_s21 + $0x2b4] ss:$20 sps:$4 sm:$0xff]   ;;  %v11324_v47 = vld [vmem:[%s14002_s21 + $0x2dc] ss:$20 sps:$4 sm:$0xff]  }
 0x727   :  { %3564 = vmatprep.mubr.bf16.mxu0 %v11263_v3  ;;  %3646 = vmatprep.mubr.bf16.mxu1 %v11263_v3  ;;  %v11306_v4 = vld [vmem:[%s14002_s21 + $0x2a8] ss:$20 sps:$4 sm:$0xff]   ;;  %v11330_v27 = vld [vmem:[%s14002_s21 + $0x2d0] ss:$20 sps:$4 sm:$0xff]   ;;  %v11336_v20 = vld [vmem:[%s14002_s21 + $0x2d8] ss:$20 sps:$4 sm:$0xff]  }
 0x728   :  { %3565 = vmatmul.mubr.bf16.vlgmr.msra.gmra.mrb[36].mxu0 %v11265_v12  ;;  %3647 = vmatmul.mubr.bf16.vlgmr.msra.gmra.mrb[36].mxu1 %v11265_v12  ;;  %v11318_v38 = vld [vmem:[%s14002_s21 + $0x2d4] ss:$20 sps:$4 sm:$0xff]   ;;  %14003 = vst [vmem:[#allocation12_spill] sm:$0xff] %v11336_v20  ;;  %v11342_v32 = vld [vmem:[%s14002_s21 + $0x2fc] ss:$20 sps:$4 sm:$0xff]   ;;  %s12047_s1 = sld [smem:[#allocation4 + $0x2b]] }
 0x729   :  { %3574 = vmatpush1.bf16.msra.mxu0 %v11276_v24  ;;  %3656 = vmatpush1.bf16.msra.mxu1 %v11282_v23  ;;  %14004 = vst [vmem:[#allocation13_spill] sm:$0xff] %v11342_v32  ;;  %v11348_v39 = vld [vmem:[%s14002_s21 + $0x304] ss:$20 sps:$4 sm:$0xff]   ;;  %v11360_v25 = vld [vmem:[%s14002_s21 + $0x300] ss:$20 sps:$4 sm:$0xff]   ;;  %s12051_s16 = sld [smem:[#allocation4 + $0x2c]] }
 0x72a   :  { %3575 = vmatprep.subr.bf16.mxu0 %v11292_v2  ;;  %3657 = vmatprep.subr.bf16.mxu1 %v11298_v8  ;;  %14005 = vst [vmem:[#allocation14_spill] sm:$0xff] %v11348_v39  ;;  %v11354_v5 = vld [vmem:[%s14002_s21 + $0x2f8] ss:$20 sps:$4 sm:$0xff]   ;;  %14007 = vst [vmem:[#allocation16_spill] sm:$0xff] %v11360_v25  ;;  %s3815_s14 = sshra.s32 %s12041_s29, 3  ;;  %s12053_s26 = sld [smem:[#allocation4 + $0x2d]] }
 0x72b   :  { %v11271_v13 = vld [vmem:[#allocation2 + $0x18] sm:$0xff]  ;;  %14006 = vst [vmem:[#allocation15_spill] sm:$0xff] %v11354_v5  ;;  %s12059_s10 = sld [smem:[#allocation5 + $0x28]]  ;;  %s3818_s25 = sand.u32 7, %s12041_s29 }
 0x72c   :  { %v11287_v0 = vpack.c.bf16 %v11271_v13, %v11271_v13  ;;  %s5767_s17 = sshll.u32 %s3815_s14, 4  ;;  %s3839_s9 = sshra.s32 %s12043_s6, 3 }
 0x72d   :  { %3576 = vmatpush1.bf16.msra.mxu0 %v11306_v4  ;;  %3658 = vmatpush1.bf16.msra.mxu1 %v11312_v6  ;;  %s3863_s4 = sshra.s32 %s12045_s11, 3  ;;  %s12066_s0 = sld [smem:[#allocation5 + $0x2a]] }
 0x72e   :  { %3605 = vmatprep.mubr.bf16.mxu0 %v11287_v0  ;;  %3687 = vmatprep.mubr.bf16.mxu1 %v11287_v0  ;;  %s12068_s2 = sadd.s32 %s5767_s17, %s3818_s25  ;;  %s3842_s28 = sand.u32 7, %s12043_s6 }
 0x72f   :  { %3577 = vmatprep.subr.bf16.mxu0 %v11318_v38  ;;  %3659 = vmatprep.subr.bf16.mxu1 %v11324_v47  ;;  %s5769_s12 = sshll.u32 %s3839_s9, 4  ;;  %s5771_s27 = sshll.u32 %s3863_s4, 4 }
 0x730   :  { %s3887_s20 = sshra.s32 %s12047_s1, 3  ;;  %s12079_s30 = sadd.s32 %s5769_s12, %s3842_s28 }
 0x731   :  { %3578 = vmatpush1.bf16.msra.mxu0 %v11330_v27  ;;  %3660 = vmatpush1.bf16.msra.mxu1 %v11336_v20  ;;  %v11642_v20 = vld [vmem:[%s14002_s21 + $0x4d8] ss:$20 sps:$4 sm:$0xff]   ;;  %s3911_s5 = sshra.s32 %s12051_s16, 3  ;;  %s12082_s8 = sadd.s32 %s5771_s27, %s3866_s18 }
 0x732   :  { %3579 = vmatprep.subr.bf16.mxu0 %v11342_v32  ;;  %3661 = vmatprep.subr.bf16.mxu1 %v11348_v39  ;;  %v11366_v32 = vld [vmem:[%s14002_s21 + $0x324] ss:$20 sps:$4 sm:$0xff]   ;;  %v11372_v39 = vld [vmem:[%s14002_s21 + $0x32c] ss:$20 sps:$4 sm:$0xff]   ;;  %14054 = vst [vmem:[#allocation63_spill] sm:$0xff] %v11642_v20  ;;  %s3935_s29 = sshra.s32 %s12053_s26, 3 }
 0x733   :  { %14008 = vst [vmem:[#allocation17_spill] sm:$0xff] %v11366_v32  ;;  %14009 = vst [vmem:[#allocation18_spill] sm:$0xff] %v11372_v39  ;;  %s3890_s6 = sand.u32 7, %s12047_s1  ;;  %s5773_s11 = sshll.u32 %s3887_s20, 4 }
 0x734   :  { %s3914_s14 = sand.u32 7, %s12051_s16  ;;  %s5775_s25 = sshll.u32 %s3911_s5, 4 }
 0x735   :  { %3580 = vmatpush1.bf16.msra.mxu0 %v11354_v5  ;;  %3662 = vmatpush1.bf16.msra.mxu1 %v11360_v25  ;;  %v11378_v5 = vld [vmem:[%s14002_s21 + $0x320] ss:$20 sps:$4 sm:$0xff]   ;;  %v11384_v25 = vld [vmem:[%s14002_s21 + $0x328] ss:$20 sps:$4 sm:$0xff]   ;;  %s3938_s17 = sand.u32 7, %s12053_s26  ;;  %s5777_s9 = sshll.u32 %s3935_s29, 4 }
 0x736   :  { %3581 = vmatprep.subr.bf16.mxu0 %v11366_v32  ;;  %3663 = vmatprep.subr.bf16.mxu1 %v11372_v39  ;;  %14010 = vst [vmem:[#allocation19_spill] sm:$0xff] %v11378_v5  ;;  %14011 = vst [vmem:[#allocation20_spill] sm:$0xff] %v11384_v25  ;;  %v11390_v32 = vld [vmem:[%s14002_s21 + $0x34c] ss:$20 sps:$4 sm:$0xff]   ;;  %v11396_v39 = vld [vmem:[%s14002_s21 + $0x354] ss:$20 sps:$4 sm:$0xff]   ;;  %s12094_s1 = sadd.s32 %s5773_s11, %s3890_s6  ;;  %s12096_s27 = sadd.s32 %s5775_s25, %s3914_s14 }
 0x737   :  { %14012 = vst [vmem:[#allocation21_spill] sm:$0xff] %v11390_v32  ;;  %14013 = vst [vmem:[#allocation22_spill] sm:$0xff] %v11396_v39  ;;  %s3959_s18 = sshra.s32 %s12055_s3, 3  ;;  %s12103_s24 = sadd.s32 %s5777_s9, %s3938_s17 }
 0x738   :  { %s3962_s20 = sand.u32 7, %s12055_s3  ;;  %s5779_s5 = sshll.u32 %s3959_s18, 4 }
 0x739   :  { %3582 = vmatpush1.bf16.msra.mxu0 %v11378_v5  ;;  %3664 = vmatpush1.bf16.msra.mxu1 %v11384_v25  ;;  %v11402_v5 = vld [vmem:[%s14002_s21 + $0x348] ss:$20 sps:$4 sm:$0xff]   ;;  %v11408_v25 = vld [vmem:[%s14002_s21 + $0x350] ss:$20 sps:$4 sm:$0xff]   ;;  %s3983_s9 = sshra.s32 %s12057_s23, 3  ;;  %s12122_s18 = sadd.s32 %s5779_s5, %s3962_s20 }
 0x73a   :  { %3583 = vmatprep.subr.bf16.mxu0 %v11390_v32  ;;  %3665 = vmatprep.subr.bf16.mxu1 %v11396_v39  ;;  %14014 = vst [vmem:[#allocation23_spill] sm:$0xff] %v11402_v5  ;;  %14015 = vst [vmem:[#allocation24_spill] sm:$0xff] %v11408_v25  ;;  %v11414_v32 = vld [vmem:[%s14002_s21 + $0x374] ss:$20 sps:$4 sm:$0xff]   ;;  %v11420_v39 = vld [vmem:[%s14002_s21 + $0x37c] ss:$20 sps:$4 sm:$0xff]  }
 0x73b   :  { %14016 = vst [vmem:[#allocation25_spill] sm:$0xff] %v11414_v32  ;;  %14017 = vst [vmem:[#allocation26_spill] sm:$0xff] %v11420_v39  ;;  %14107 = sst [smem:[#allocation7_spill]] %s12122_s18  ;;  %s3826_s29 = sshra.s32 %s12059_s10, 3 }
 0x73c   :  { %s3986_s6 = sand.u32 7, %s12057_s23  ;;  %s3850_s11 = sshra.s32 %s12063_s22, 3 }
 0x73d   :  { %3584 = vmatpush1.bf16.msra.mxu0 %v11402_v5  ;;  %3666 = vmatpush1.bf16.msra.mxu1 %v11408_v25  ;;  %v11426_v5 = vld [vmem:[%s14002_s21 + $0x370] ss:$20 sps:$4 sm:$0xff]   ;;  %v11432_v25 = vld [vmem:[%s14002_s21 + $0x378] ss:$20 sps:$4 sm:$0xff]   ;;  %s5781_s14 = sshll.u32 %s3983_s9, 4  ;;  %s3829_s25 = sand.u32 7, %s12059_s10 }
 0x73e   :  { %3585 = vmatprep.subr.bf16.mxu0 %v11414_v32  ;;  %3667 = vmatprep.subr.bf16.mxu1 %v11420_v39  ;;  %14018 = vst [vmem:[#allocation27_spill] sm:$0xff] %v11426_v5  ;;  %14019 = vst [vmem:[#allocation28_spill] sm:$0xff] %v11432_v25  ;;  %v11438_v32 = vld [vmem:[%s14002_s21 + $0x39c] ss:$20 sps:$4 sm:$0xff]   ;;  %v11444_v39 = vld [vmem:[%s14002_s21 + $0x3a4] ss:$20 sps:$4 sm:$0xff]   ;;  %s12131_s17 = sadd.s32 %s5781_s14, %s3986_s6 }
 0x73f   :  { %14020 = vst [vmem:[#allocation29_spill] sm:$0xff] %v11438_v32  ;;  %14021 = vst [vmem:[#allocation30_spill] sm:$0xff] %v11444_v39  ;;  %s5768_s4 = sshll.u32 %s3826_s29, 4  ;;  %s5770_s28 = sshll.u32 %s3850_s11, 4 }
 0x740   :  { %s12129_s16 = sld [smem:[#allocation5 + $0x2c]]  ;;  %14108 = sst [smem:[#allocation8_spill]] %s12131_s17 }
 0x741   :  { %3586 = vmatpush1.bf16.msra.mxu0 %v11426_v5  ;;  %3668 = vmatpush1.bf16.msra.mxu1 %v11432_v25  ;;  %v11450_v5 = vld [vmem:[%s14002_s21 + $0x398] ss:$20 sps:$4 sm:$0xff]   ;;  %v11456_v25 = vld [vmem:[%s14002_s21 + $0x3a0] ss:$20 sps:$4 sm:$0xff]   ;;  %s12133_s26 = sld [smem:[#allocation5 + $0x2d]]  ;;  %s12135_s20 = sadd.s32 %s5768_s4, %s3829_s25 }
 0x742   :  { %3587 = vmatprep.subr.bf16.mxu0 %v11438_v32  ;;  %3669 = vmatprep.subr.bf16.mxu1 %v11444_v39  ;;  %14022 = vst [vmem:[#allocation31_spill] sm:$0xff] %v11450_v5  ;;  %14023 = vst [vmem:[#allocation32_spill] sm:$0xff] %v11456_v25  ;;  %v11462_v32 = vld [vmem:[%s14002_s21 + $0x3c4] ss:$20 sps:$4 sm:$0xff]   ;;  %v11468_v39 = vld [vmem:[%s14002_s21 + $0x3cc] ss:$20 sps:$4 sm:$0xff]   ;;  %s12139_s10 = sadd.s32 %s5770_s28, %s3853_s19 }
 0x743   :  { %14024 = vst [vmem:[#allocation33_spill] sm:$0xff] %v11462_v32  ;;  %14025 = vst [vmem:[#allocation34_spill] sm:$0xff] %v11468_v39  ;;  %14109 = sst [smem:[#allocation9_spill]] %s12135_s20  ;;  %s12137_s23 = sld [smem:[#allocation5 + $0x2e]] }
 0x744   :  { %14110 = sst [smem:[#allocation111_spill]] %s12139_s10  ;;  %s12141_s22 = sld [smem:[#allocation5 + $0x2f]] }
 0x745   :  { %3588 = vmatpush1.bf16.msra.mxu0 %v11450_v5  ;;  %3670 = vmatpush1.bf16.msra.mxu1 %v11456_v25  ;;  %v11474_v5 = vld [vmem:[%s14002_s21 + $0x3c0] ss:$20 sps:$4 sm:$0xff]   ;;  %v11480_v25 = vld [vmem:[%s14002_s21 + $0x3c8] ss:$20 sps:$4 sm:$0xff]   ;;  %s3874_s3 = sshra.s32 %s12066_s0, 3  ;;  %s3898_s11 = sshra.s32 %s12070_s15, 3 }
 0x746   :  { %3589 = vmatprep.subr.bf16.mxu0 %v11462_v32  ;;  %3671 = vmatprep.subr.bf16.mxu1 %v11468_v39  ;;  %14026 = vst [vmem:[#allocation35_spill] sm:$0xff] %v11474_v5  ;;  %14027 = vst [vmem:[#allocation36_spill] sm:$0xff] %v11480_v25  ;;  %v11486_v32 = vld [vmem:[%s14002_s21 + $0x3ec] ss:$20 sps:$4 sm:$0xff]   ;;  %v11492_v39 = vld [vmem:[%s14002_s21 + $0x3f4] ss:$20 sps:$4 sm:$0xff]  }
 0x747   :  { %14028 = vst [vmem:[#allocation37_spill] sm:$0xff] %v11486_v32  ;;  %14029 = vst [vmem:[#allocation38_spill] sm:$0xff] %v11492_v39  ;;  %s3877_s9 = sand.u32 7, %s12066_s0  ;;  %s5772_s13 = sshll.u32 %s3874_s3, 4 }
 0x748   :  { %s3922_s4 = sshra.s32 %s12129_s16, 3  ;;  %s5774_s14 = sshll.u32 %s3898_s11, 4 }
 0x749   :  { %3590 = vmatpush1.bf16.msra.mxu0 %v11474_v5  ;;  %3672 = vmatpush1.bf16.msra.mxu1 %v11480_v25  ;;  %v11498_v5 = vld [vmem:[%s14002_s21 + $0x3e8] ss:$20 sps:$4 sm:$0xff]   ;;  %v11504_v25 = vld [vmem:[%s14002_s21 + $0x3f0] ss:$20 sps:$4 sm:$0xff]   ;;  %s3946_s25 = sshra.s32 %s12133_s26, 3  ;;  %s3925_s19 = sand.u32 7, %s12129_s16 }
 0x74a   :  { %3591 = vmatprep.subr.bf16.mxu0 %v11486_v32  ;;  %3673 = vmatprep.subr.bf16.mxu1 %v11492_v39  ;;  %14030 = vst [vmem:[#allocation39_spill] sm:$0xff] %v11498_v5  ;;  %14031 = vst [vmem:[#allocation40_spill] sm:$0xff] %v11504_v25  ;;  %v11510_v32 = vld [vmem:[%s14002_s21 + $0x414] ss:$20 sps:$4 sm:$0xff]   ;;  %v11516_v39 = vld [vmem:[%s14002_s21 + $0x41c] ss:$20 sps:$4 sm:$0xff]   ;;  %s12174_s6 = sadd.s32 %s5772_s13, %s3877_s9  ;;  %s14115_s9 = scalar_lea.vmem %s13143_s7, %s12082_s8 }
 0x74b   :  { %14032 = vst [vmem:[#allocation41_spill] sm:$0xff] %v11510_v32  ;;  %14033 = vst [vmem:[#allocation42_spill] sm:$0xff] %v11516_v39  ;;  %s3970_s20 = sshra.s32 %s12137_s23, 3  ;;  %s5776_s12 = sshll.u32 %s3922_s4, 4 }
 0x74c   :  { %s3994_s28 = sshra.s32 %s12141_s22, 3  ;;  %s3949_s5 = sand.u32 7, %s12133_s26 }
 0x74d   :  { %3592 = vmatpush1.bf16.msra.mxu0 %v11498_v5  ;;  %3674 = vmatpush1.bf16.msra.mxu1 %v11504_v25  ;;  %v11522_v5 = vld [vmem:[%s14002_s21 + $0x410] ss:$20 sps:$4 sm:$0xff]   ;;  %v11528_v25 = vld [vmem:[%s14002_s21 + $0x418] ss:$20 sps:$4 sm:$0xff]   ;;  %s5778_s10 = sshll.u32 %s3946_s25, 4  ;;  %s3973_s0 = sand.u32 7, %s12137_s23 }
 0x74e   :  { %3593 = vmatprep.subr.bf16.mxu0 %v11510_v32  ;;  %3675 = vmatprep.subr.bf16.mxu1 %v11516_v39  ;;  %14034 = vst [vmem:[#allocation43_spill] sm:$0xff] %v11522_v5  ;;  %14035 = vst [vmem:[#allocation44_spill] sm:$0xff] %v11528_v25  ;;  %v11534_v32 = vld [vmem:[%s14002_s21 + $0x43c] ss:$20 sps:$4 sm:$0xff]   ;;  %v11540_v39 = vld [vmem:[%s14002_s21 + $0x444] ss:$20 sps:$4 sm:$0xff]   ;;  %s14111_s4 = scalar_lea.vmem %s13143_s7, %s12068_s2  ;;  %s14112_s23 = scalar_lea.vmem %s13143_s7, %s12079_s30 }
 0x74f   :  { %14036 = vst [vmem:[#allocation45_spill] sm:$0xff] %v11534_v32  ;;  %14037 = vst [vmem:[#allocation46_spill] sm:$0xff] %v11540_v39  ;;  %s5780_s3 = sshll.u32 %s3970_s20, 4  ;;  %s5782_s17 = sshll.u32 %s3994_s28, 4 }
 0x750   :  { %s12188_s20 = sadd.s32 %s5776_s12, %s3925_s19  ;;  %s12190_s25 = sadd.s32 %s5778_s10, %s3949_s5 }
 0x751   :  { %3594 = vmatpush1.bf16.msra.mxu0 %v11522_v5  ;;  %3676 = vmatpush1.bf16.msra.mxu1 %v11528_v25  ;;  %v11546_v5 = vld [vmem:[%s14002_s21 + $0x438] ss:$20 sps:$4 sm:$0xff]   ;;  %v11552_v25 = vld [vmem:[%s14002_s21 + $0x440] ss:$20 sps:$4 sm:$0xff]   ;;  %s14116_s19 = scalar_lea.vmem %s13143_s7, %s12094_s1  ;;  %s12206_s10 = sadd.s32 %s5780_s3, %s3973_s0 }
 0x752   :  { %3595 = vmatprep.subr.bf16.mxu0 %v11534_v32  ;;  %3677 = vmatprep.subr.bf16.mxu1 %v11540_v39  ;;  %14038 = vst [vmem:[#allocation47_spill] sm:$0xff] %v11546_v5  ;;  %14039 = vst [vmem:[#allocation48_spill] sm:$0xff] %v11552_v25  ;;  %v11558_v32 = vld [vmem:[%s14002_s21 + $0x464] ss:$20 sps:$4 sm:$0xff]   ;;  %v11564_v39 = vld [vmem:[%s14002_s21 + $0x46c] ss:$20 sps:$4 sm:$0xff]   ;;  %s14119_s11 = scalar_lea.vmem %s13143_s7, %s12096_s27  ;;  %s14120_s3 = scalar_lea.vmem %s13143_s7, %s12103_s24 }
 0x753   :  { %14040 = vst [vmem:[#allocation49_spill] sm:$0xff] %v11558_v32  ;;  %14041 = vst [vmem:[#allocation50_spill] sm:$0xff] %v11564_v39  ;;  %s14117_s5 = sld [smem:[#allocation9_spill]]  ;;  %s14118_s12 = sld [smem:[#allocation111_spill]] }
 0x754   :  { %s3881_s16 = scalar_lea.vmem %s13143_s7, %s12174_s6  ;;  %s3953_s28 = scalar_lea.vmem %s13143_s7, %s12190_s25 }
 0x755   :  { %3596 = vmatpush1.bf16.msra.mxu0 %v11546_v5  ;;  %3678 = vmatpush1.bf16.msra.mxu1 %v11552_v25  ;;  %v11570_v5 = vld [vmem:[%s14002_s21 + $0x460] ss:$20 sps:$4 sm:$0xff]   ;;  %v11576_v25 = vld [vmem:[%s14002_s21 + $0x468] ss:$20 sps:$4 sm:$0xff]   ;;  %s3977_s25 = scalar_lea.vmem %s13143_s7, %s12206_s10  ;;  %s12569_s10 = sld [smem:[#allocation4 + $0x33]] }
 0x756   :  { %3597 = vmatprep.subr.bf16.mxu0 %v11558_v32  ;;  %3679 = vmatprep.subr.bf16.mxu1 %v11564_v39  ;;  %14042 = vst [vmem:[#allocation51_spill] sm:$0xff] %v11570_v5  ;;  %14043 = vst [vmem:[#allocation52_spill] sm:$0xff] %v11576_v25  ;;  %v11582_v32 = vld [vmem:[%s14002_s21 + $0x48c] ss:$20 sps:$4 sm:$0xff]   ;;  %v11588_v39 = vld [vmem:[%s14002_s21 + $0x494] ss:$20 sps:$4 sm:$0xff]  }
 0x757   :  { %14044 = vst [vmem:[#allocation53_spill] sm:$0xff] %v11582_v32  ;;  %14045 = vst [vmem:[#allocation54_spill] sm:$0xff] %v11588_v39  ;;  %s12579_s27 = sld [smem:[#allocation4 + $0x37]]  ;;  %s12581_s2 = sld [smem:[#allocation5 + $0x30]] }
 0x758   :  { %s12588_s18 = sld [smem:[#allocation5 + $0x32]] }
 0x759   :  { %3598 = vmatpush1.bf16.msra.mxu0 %v11570_v5  ;;  %3680 = vmatpush1.bf16.msra.mxu1 %v11576_v25  ;;  %v11594_v5 = vld [vmem:[%s14002_s21 + $0x488] ss:$20 sps:$4 sm:$0xff]   ;;  %v11600_v25 = vld [vmem:[%s14002_s21 + $0x490] ss:$20 sps:$4 sm:$0xff]   ;;  %s14123_s1 = scalar_lea.vmem %s13143_s7, %s14117_s5 }
 0x75a   :  { %3599 = vmatprep.subr.bf16.mxu0 %v11582_v32  ;;  %3681 = vmatprep.subr.bf16.mxu1 %v11588_v39  ;;  %14046 = vst [vmem:[#allocation55_spill] sm:$0xff] %v11594_v5  ;;  %14047 = vst [vmem:[#allocation56_spill] sm:$0xff] %v11600_v25  ;;  %v11606_v32 = vld [vmem:[%s14002_s21 + $0x4b4] ss:$20 sps:$4 sm:$0xff]   ;;  %v11612_v39 = vld [vmem:[%s14002_s21 + $0x4bc] ss:$20 sps:$4 sm:$0xff]  }
 0x75b   :  { %14048 = vst [vmem:[#allocation57_spill] sm:$0xff] %v11606_v32  ;;  %14049 = vst [vmem:[#allocation58_spill] sm:$0xff] %v11612_v39 }
 0x75d   :  { %3600 = vmatpush1.bf16.msra.mxu0 %v11594_v5  ;;  %3682 = vmatpush1.bf16.msra.mxu1 %v11600_v25  ;;  %v11618_v5 = vld [vmem:[%s14002_s21 + $0x4b0] ss:$20 sps:$4 sm:$0xff]   ;;  %v11624_v25 = vld [vmem:[%s14002_s21 + $0x4b8] ss:$20 sps:$4 sm:$0xff]  }
 0x75e   :  { %3601 = vmatprep.subr.bf16.mxu0 %v11606_v32  ;;  %3683 = vmatprep.subr.bf16.mxu1 %v11612_v39  ;;  %14050 = vst [vmem:[#allocation59_spill] sm:$0xff] %v11618_v5  ;;  %14051 = vst [vmem:[#allocation60_spill] sm:$0xff] %v11624_v25  ;;  %v11630_v32 = vld [vmem:[%s14002_s21 + $0x4dc] ss:$20 sps:$4 sm:$0xff]   ;;  %v11636_v39 = vld [vmem:[%s14002_s21 + $0x4e4] ss:$20 sps:$4 sm:$0xff]  }
 0x75f   :  { %14052 = vst [vmem:[#allocation61_spill] sm:$0xff] %v11630_v32  ;;  %14053 = vst [vmem:[#allocation62_spill] sm:$0xff] %v11636_v39 }
 0x761   :  { %3602 = vmatpush1.bf16.msra.mxu0 %v11618_v5  ;;  %3684 = vmatpush1.bf16.msra.mxu1 %v11624_v25  ;;  %v3526_v5 = vld [vmem:[#allocation2 + $0x10] sm:$0xff] }
 0x762   :  { %3603 = vmatprep.subr.bf16.mxu0 %v11630_v32  ;;  %3685 = vmatprep.subr.bf16.mxu1 %v11636_v39  ;;  %v11648_v25 = vld [vmem:[%s14002_s21 + $0x4e0] ss:$20 sps:$4 sm:$0xff]   ;;  %v11651_v32 = vpack.c.bf16 %v3526_v5, %v3526_v5  ;;  %v11656_v39 = vld [vmem:[%s14002_s21 + $0x150] ss:$20 sps:$4 sm:$0xff]  }
 0x763   :  { %14055 = vst [vmem:[#allocation64_spill] sm:$0xff] %v11656_v39  ;;  %v11670_v5 = vld [vmem:[%s14002_s21 + $0x10] ss:$20 sps:$4 sm:$0xff]  }
 0x765   :  { %3604 = vmatpush1.bf16.msra.mxu0 %v11642_v20  ;;  %3686 = vmatpush1.bf16.msra.mxu1 %v11648_v25  ;;  %v11662_v20 = vld [vmem:[%s14002_s21 + $0x3d0] ss:$20 sps:$4 sm:$0xff]  }
 0x766   :  { %5984 = vmatprep.subr.bf16.mxu0 %v11656_v39  ;;  %14056 = vst [vmem:[#allocation65_spill] sm:$0xff] %v11662_v20  ;;  %6006 = vmatprep.subr.bf16.mxu1 %v11662_v20  ;;  %v11677_v39 = vld [vmem:[%s14002_s21 + $0x290] ss:$20 sps:$4 sm:$0xff]   ;;  %v11684_v20 = vld [vmem:[%s14002_s21 + $0x178] ss:$20 sps:$4 sm:$0xff]  }
 0x767   :  { %14057 = vst [vmem:[#allocation66_spill] sm:$0xff] %v11677_v39  ;;  %14058 = vst [vmem:[#allocation67_spill] sm:$0xff] %v11684_v20 }
 0x768   :  { %3606 = vmatmul.mubr.bf16.vlgmr.msra.gmra.mrb[36].mxu0 %v11651_v32  ;;  %3688 = vmatmul.mubr.bf16.vlgmr.msra.gmra.mrb[36].mxu1 %v11651_v32 }
 0x769   :  { %5985 = vmatpush3.bf16.msra.mxu0 %v11670_v5  ;;  %3728 = vmatprep.mubr.bf16.mxu0 %v11263_v3  ;;  %v11690_v3 = vld [vmem:[%s14002_s21 + $0x3f8] ss:$20 sps:$4 sm:$0xff]  }
 0x76a   :  { %6007 = vmatpush3.bf16.msra.mxu1 %v11677_v39  ;;  %3768 = vmatprep.mubr.bf16.mxu1 %v11287_v0  ;;  %14059 = vst [vmem:[#allocation68_spill] sm:$0xff] %v11690_v3  ;;  %v11696_v39 = vld [vmem:[%s14002_s21 + $0x38] ss:$20 sps:$4 sm:$0xff]  }
 0x76b   :  { %5986 = vmatprep.subr.bf16.mxu0 %v11684_v20  ;;  %6008 = vmatprep.subr.bf16.mxu1 %v11690_v3  ;;  %14060 = vst [vmem:[#allocation69_spill] sm:$0xff] %v11696_v39  ;;  %v11702_v0 = vld [vmem:[%s14002_s21 + $0x2b8] ss:$20 sps:$4 sm:$0xff]   ;;  %v11708_v20 = vld [vmem:[%s14002_s21 + $0x1a0] ss:$20 sps:$4 sm:$0xff]  }
 0x76c   :  { %14061 = vst [vmem:[#allocation70_spill] sm:$0xff] %v11702_v0  ;;  %14062 = vst [vmem:[#allocation71_spill] sm:$0xff] %v11708_v20  ;;  %v11714_v3 = vld [vmem:[%s14002_s21 + $0x420] ss:$20 sps:$4 sm:$0xff]  }
 0x76d   :  { %5987 = vmatpush3.bf16.msra.mxu0 %v11696_v39  ;;  %14063 = vst [vmem:[#allocation72_spill] sm:$0xff] %v11714_v3  ;;  %v11720_v39 = vld [vmem:[%s14002_s21 + $0x60] ss:$20 sps:$4 sm:$0xff]  }
 0x76e   :  { %6009 = vmatpush3.bf16.msra.mxu1 %v11702_v0  ;;  %5988 = vmatprep.subr.bf16.mxu0 %v11708_v20  ;;  %14064 = vst [vmem:[#allocation73_spill] sm:$0xff] %v11720_v39  ;;  %v11726_v0 = vld [vmem:[%s14002_s21 + $0x2e0] ss:$20 sps:$4 sm:$0xff]   ;;  %v11732_v20 = vld [vmem:[%s14002_s21 + $0x1c8] ss:$20 sps:$4 sm:$0xff]  }
 0x76f   :  { %6010 = vmatprep.subr.bf16.mxu1 %v11714_v3  ;;  %14065 = vst [vmem:[#allocation74_spill] sm:$0xff] %v11726_v0  ;;  %14066 = vst [vmem:[#allocation75_spill] sm:$0xff] %v11732_v20  ;;  %v11738_v3 = vld [vmem:[%s14002_s21 + $0x448] ss:$20 sps:$4 sm:$0xff]  }
 0x770   :  { %14067 = vst [vmem:[#allocation76_spill] sm:$0xff] %v11738_v3 }
 0x771   :  { %5989 = vmatpush3.bf16.msra.mxu0 %v11720_v39  ;;  %v11744_v39 = vld [vmem:[%s14002_s21 + $0x88] ss:$20 sps:$4 sm:$0xff]  }
 0x772   :  { %6011 = vmatpush3.bf16.msra.mxu1 %v11726_v0  ;;  %5990 = vmatprep.subr.bf16.mxu0 %v11732_v20  ;;  %14068 = vst [vmem:[#allocation77_spill] sm:$0xff] %v11744_v39  ;;  %v11750_v0 = vld [vmem:[%s14002_s21 + $0x308] ss:$20 sps:$4 sm:$0xff]   ;;  %v11756_v20 = vld [vmem:[%s14002_s21 + $0x1f0] ss:$20 sps:$4 sm:$0xff]  }
 0x773   :  { %6012 = vmatprep.subr.bf16.mxu1 %v11738_v3  ;;  %14069 = vst [vmem:[#allocation78_spill] sm:$0xff] %v11750_v0  ;;  %14070 = vst [vmem:[#allocation79_spill] sm:$0xff] %v11756_v20  ;;  %v11762_v3 = vld [vmem:[%s14002_s21 + $0x470] ss:$20 sps:$4 sm:$0xff]  }
 0x774   :  { %14071 = vst [vmem:[#allocation80_spill] sm:$0xff] %v11762_v3 }
 0x775   :  { %5991 = vmatpush3.bf16.msra.mxu0 %v11744_v39  ;;  %v11768_v39 = vld [vmem:[%s14002_s21 + $0xb0] ss:$20 sps:$4 sm:$0xff]  }
 0x776   :  { %6013 = vmatpush3.bf16.msra.mxu1 %v11750_v0  ;;  %5992 = vmatprep.subr.bf16.mxu0 %v11756_v20  ;;  %14072 = vst [vmem:[#allocation81_spill] sm:$0xff] %v11768_v39  ;;  %v11774_v0 = vld [vmem:[%s14002_s21 + $0x330] ss:$20 sps:$4 sm:$0xff]   ;;  %v11780_v20 = vld [vmem:[%s14002_s21 + $0x218] ss:$20 sps:$4 sm:$0xff]  }
 0x777   :  { %6014 = vmatprep.subr.bf16.mxu1 %v11762_v3  ;;  %14073 = vst [vmem:[#allocation82_spill] sm:$0xff] %v11774_v0  ;;  %14074 = vst [vmem:[#allocation83_spill] sm:$0xff] %v11780_v20  ;;  %v11786_v3 = vld [vmem:[%s14002_s21 + $0x498] ss:$20 sps:$4 sm:$0xff]  }
 0x778   :  { %14075 = vst [vmem:[#allocation84_spill] sm:$0xff] %v11786_v3 }
 0x779   :  { %5993 = vmatpush3.bf16.msra.mxu0 %v11768_v39  ;;  %v11792_v39 = vld [vmem:[%s14002_s21 + $0xd8] ss:$20 sps:$4 sm:$0xff]  }
 0x77a   :  { %6015 = vmatpush3.bf16.msra.mxu1 %v11774_v0  ;;  %5994 = vmatprep.subr.bf16.mxu0 %v11780_v20  ;;  %14076 = vst [vmem:[#allocation85_spill] sm:$0xff] %v11792_v39  ;;  %v11798_v0 = vld [vmem:[%s14002_s21 + $0x358] ss:$20 sps:$4 sm:$0xff]   ;;  %v11804_v20 = vld [vmem:[%s14002_s21 + $0x240] ss:$20 sps:$4 sm:$0xff]  }
 0x77b   :  { %6016 = vmatprep.subr.bf16.mxu1 %v11786_v3  ;;  %14077 = vst [vmem:[#allocation86_spill] sm:$0xff] %v11798_v0  ;;  %14078 = vst [vmem:[#allocation87_spill] sm:$0xff] %v11804_v20  ;;  %v11810_v3 = vld [vmem:[%s14002_s21 + $0x4c0] ss:$20 sps:$4 sm:$0xff]  }
 0x77c   :  { %14079 = vst [vmem:[#allocation88_spill] sm:$0xff] %v11810_v3 }
 0x77d   :  { %5995 = vmatpush3.bf16.msra.mxu0 %v11792_v39  ;;  %v11816_v39 = vld [vmem:[%s14002_s21 + $0x100] ss:$20 sps:$4 sm:$0xff]  }
 0x77e   :  { %6017 = vmatpush3.bf16.msra.mxu1 %v11798_v0  ;;  %5996 = vmatprep.subr.bf16.mxu0 %v11804_v20  ;;  %14080 = vst [vmem:[#allocation89_spill] sm:$0xff] %v11816_v39  ;;  %v11822_v0 = vld [vmem:[%s14002_s21 + $0x380] ss:$20 sps:$4 sm:$0xff]   ;;  %v11828_v20 = vld [vmem:[%s14002_s21 + $0x268] ss:$20 sps:$4 sm:$0xff]  }
 0x77f   :  { %6018 = vmatprep.subr.bf16.mxu1 %v11810_v3  ;;  %14081 = vst [vmem:[#allocation90_spill] sm:$0xff] %v11822_v0  ;;  %14082 = vst [vmem:[#allocation91_spill] sm:$0xff] %v11828_v20  ;;  %v11834_v3 = vld [vmem:[%s14002_s21 + $0x4e8] ss:$20 sps:$4 sm:$0xff]  }
 0x780   :  { %14083 = vst [vmem:[#allocation92_spill] sm:$0xff] %v11834_v3 }
 0x781   :  { %5997 = vmatpush3.bf16.msra.mxu0 %v11816_v39  ;;  %v11840_v39 = vld [vmem:[%s14002_s21 + $0x128] ss:$20 sps:$4 sm:$0xff]  }
 0x782   :  { %6019 = vmatpush3.bf16.msra.mxu1 %v11822_v0  ;;  %5998 = vmatprep.subr.bf16.mxu0 %v11828_v20  ;;  %v11846_v0 = vld [vmem:[%s14002_s21 + $0x3a8] ss:$20 sps:$4 sm:$0xff]   ;;  %v11852_v20 = vld [vmem:[%s14002_s21 + $0x4] ss:$20 sps:$4 sm:$0xff]  }
 0x783   :  { %6020 = vmatprep.subr.bf16.mxu1 %v11834_v3  ;;  %14084 = vst [vmem:[#allocation93_spill] sm:$0xff] %v11846_v0  ;;  %14085 = vst [vmem:[#allocation94_spill] sm:$0xff] %v11852_v20  ;;  %v11858_v3 = vld [vmem:[%s14002_s21 + $0xc] ss:$20 sps:$4 sm:$0xff]  }
 0x785   :  { %5999 = vmatpush3.bf16.msra.mxu0 %v11840_v39 }
 0x786   :  { %6021 = vmatpush3.bf16.msra.mxu1 %v11846_v0  ;;  %4013 = vmatprep.subr.bf16.mxu0 %v11852_v20  ;;  %v11866_v0 = vld [vmem:[%s14002_s21] ss:$20 sps:$4 sm:$0xff]   ;;  %v11872_v20 = vld [vmem:[%s14002_s21 + $0x8] ss:$20 sps:$4 sm:$0xff]  }
 0x787   :  { %4095 = vmatprep.subr.bf16.mxu1 %v11858_v3  ;;  %14086 = vst [vmem:[#allocation95_spill] sm:$0xff] %v11866_v0  ;;  %14087 = vst [vmem:[#allocation96_spill] sm:$0xff] %v11872_v20 }
 0x788   :  { %3729 = vmatmul.mubr.bf16.vlgmr.msra.gmra.mrb[40].mxu0 %v11265_v12  ;;  %v11878_v12 = vld [vmem:[%s14002_s21 + $0x2c] ss:$20 sps:$4 sm:$0xff]  }
 0x789   :  { %3769 = vmatmul.mubr.bf16.vlgmr.msra.gmra.mrb[40].mxu1 %v11651_v32  ;;  %4014 = vmatpush1.bf16.msra.mxu0 %v11866_v0  ;;  %14088 = vst [vmem:[#allocation97_spill] sm:$0xff] %v11878_v12  ;;  %v11884_v32 = vld [vmem:[%s14002_s21 + $0x34] ss:$20 sps:$4 sm:$0xff]  }
 0x78a   :  { %4096 = vmatpush1.bf16.msra.mxu1 %v11872_v20  ;;  %4015 = vmatprep.subr.bf16.mxu0 %v11878_v12  ;;  %14089 = vst [vmem:[#allocation98_spill] sm:$0xff] %v11884_v32  ;;  %v11890_v0 = vld [vmem:[%s14002_s21 + $0x28] ss:$20 sps:$4 sm:$0xff]   ;;  %v11896_v20 = vld [vmem:[%s14002_s21 + $0x30] ss:$20 sps:$4 sm:$0xff]  }
 0x78b   :  { %4097 = vmatprep.subr.bf16.mxu1 %v11884_v32  ;;  %14090 = vst [vmem:[#allocation99_spill] sm:$0xff] %v11890_v0  ;;  %14091 = vst [vmem:[#allocation100_spill] sm:$0xff] %v11896_v20  ;;  %v11902_v12 = vld [vmem:[%s14002_s21 + $0x54] ss:$20 sps:$4 sm:$0xff]   ;;  %v11908_v32 = vld [vmem:[%s14002_s21 + $0x5c] ss:$20 sps:$4 sm:$0xff]  }
 0x78c   :  { %14092 = vst [vmem:[#allocation101_spill] sm:$0xff] %v11902_v12  ;;  %14093 = vst [vmem:[#allocation102_spill] sm:$0xff] %v11908_v32 }
 0x78d   :  { %4016 = vmatpush1.bf16.msra.mxu0 %v11890_v0  ;;  %v11914_v0 = vld [vmem:[%s14002_s21 + $0x50] ss:$20 sps:$4 sm:$0xff]  }
 0x78e   :  { %4098 = vmatpush1.bf16.msra.mxu1 %v11896_v20  ;;  %4017 = vmatprep.subr.bf16.mxu0 %v11902_v12  ;;  %14094 = vst [vmem:[#allocation103_spill] sm:$0xff] %v11914_v0  ;;  %v11920_v20 = vld [vmem:[%s14002_s21 + $0x58] ss:$20 sps:$4 sm:$0xff]   ;;  %v11926_v12 = vld [vmem:[%s14002_s21 + $0x7c] ss:$20 sps:$4 sm:$0xff]  }
 0x78f   :  { %4099 = vmatprep.subr.bf16.mxu1 %v11908_v32  ;;  %14095 = vst [vmem:[#allocation104_spill] sm:$0xff] %v11920_v20  ;;  %14096 = vst [vmem:[#allocation105_spill] sm:$0xff] %v11926_v12  ;;  %v11932_v32 = vld [vmem:[%s14002_s21 + $0x84] ss:$20 sps:$4 sm:$0xff]  }
 0x790   :  { %14097 = vst [vmem:[#allocation106_spill] sm:$0xff] %v11932_v32 }
 0x791   :  { %4018 = vmatpush1.bf16.msra.mxu0 %v11914_v0  ;;  %v11938_v0 = vld [vmem:[%s14002_s21 + $0x78] ss:$20 sps:$4 sm:$0xff]  }
 0x792   :  { %4100 = vmatpush1.bf16.msra.mxu1 %v11920_v20  ;;  %4019 = vmatprep.subr.bf16.mxu0 %v11926_v12  ;;  %14098 = vst [vmem:[#allocation107_spill] sm:$0xff] %v11938_v0  ;;  %v11944_v20 = vld [vmem:[%s14002_s21 + $0x80] ss:$20 sps:$4 sm:$0xff]   ;;  %v11950_v12 = vld [vmem:[%s14002_s21 + $0xa4] ss:$20 sps:$4 sm:$0xff]  }
 0x793   :  { %4101 = vmatprep.subr.bf16.mxu1 %v11932_v32  ;;  %14099 = vst [vmem:[#allocation108_spill] sm:$0xff] %v11944_v20  ;;  %14100 = vst [vmem:[#allocation109_spill] sm:$0xff] %v11950_v12  ;;  %v11956_v32 = vld [vmem:[%s14002_s21 + $0xac] ss:$20 sps:$4 sm:$0xff]  }
 0x794   :  { %14101 = vst [vmem:[#allocation112_spill] sm:$0xff] %v11956_v32 }
 0x795   :  { %4020 = vmatpush1.bf16.msra.mxu0 %v11938_v0  ;;  %v11962_v0 = vld [vmem:[%s14002_s21 + $0xa0] ss:$20 sps:$4 sm:$0xff]  }
 0x796   :  { %4102 = vmatpush1.bf16.msra.mxu1 %v11944_v20  ;;  %4021 = vmatprep.subr.bf16.mxu0 %v11950_v12  ;;  %14102 = vst [vmem:[#allocation113_spill] sm:$0xff] %v11962_v0  ;;  %v11968_v20 = vld [vmem:[%s14002_s21 + $0xa8] ss:$20 sps:$4 sm:$0xff]   ;;  %v11974_v12 = vld [vmem:[%s14002_s21 + $0xcc] ss:$20 sps:$4 sm:$0xff]  }
 0x797   :  { %4103 = vmatprep.subr.bf16.mxu1 %v11956_v32  ;;  %14103 = vst [vmem:[#allocation114_spill] sm:$0xff] %v11968_v20  ;;  %v11980_v32 = vld [vmem:[%s14002_s21 + $0xd4] ss:$20 sps:$4 sm:$0xff]  }
 0x799   :  { %4022 = vmatpush1.bf16.msra.mxu0 %v11962_v0  ;;  %v11986_v0 = vld [vmem:[%s14002_s21 + $0xc8] ss:$20 sps:$4 sm:$0xff]  }
 0x79a   :  { %4104 = vmatpush1.bf16.msra.mxu1 %v11968_v20  ;;  %4023 = vmatprep.subr.bf16.mxu0 %v11974_v12  ;;  %v11992_v20 = vld [vmem:[%s14002_s21 + $0xd0] ss:$20 sps:$4 sm:$0xff]   ;;  %s3901_s21 = sand.u32 7, %s12070_s15  ;;  %s3997_s15 = sand.u32 7, %s12141_s22 }
 0x79b   :  { %4105 = vmatprep.subr.bf16.mxu1 %v11980_v32  ;;  %s12176_s29 = sadd.s32 %s5774_s14, %s3901_s21  ;;  %s14113_s22 = sld [smem:[#allocation7_spill]] }
 0x79c   :  { %s14114_s21 = sld [smem:[#allocation8_spill]]  ;;  %s12208_s14 = sadd.s32 %s5782_s17, %s3997_s15 }
 0x79d   :  { %4024 = vmatpush1.bf16.msra.mxu0 %v11986_v0  ;;  %s4001_s26 = scalar_lea.vmem %s13143_s7, %s12208_s14  ;;  %s14226_s14 = sld [smem:[#allocation115_spill]] }
 0x79e   :  { %4106 = vmatpush1.bf16.msra.mxu1 %v11992_v20  ;;  %4025 = vmatprep.subr.bf16.mxu0 %v10755_v45  ;;  %v14104_v45 = vld [vmem:[#allocation10_spill] sm:$0xff]  ;;  %s12563_s15 = sld [smem:[#allocation4 + $0x30]] }
 0x79f   :  { %4107 = vmatprep.subr.bf16.mxu1 %v10761_v46  ;;  %v14105_v46 = vld [vmem:[#allocation11_spill] sm:$0xff] }
 0x7a1   :  { %4026 = vmatpush1.bf16.msra.mxu0 %v10767_v9  ;;  %s14121_s13 = scalar_lea.vmem %s13143_s7, %s14113_s22 }
 0x7a2   :  { %4108 = vmatpush1.bf16.msra.mxu1 %v10773_v28  ;;  %4027 = vmatprep.subr.bf16.mxu0 %v10779_v51  ;;  %s14122_s30 = scalar_lea.vmem %s13143_s7, %s14114_s21 }
 0x7a3   :  { %4109 = vmatprep.subr.bf16.mxu1 %v10785_v30 }
 0x7a4   :  { %s4296_s5 = sshra.s32 %s12563_s15, 3 }
 0x7a5   :  { %4028 = vmatpush1.bf16.msra.mxu0 %v10791_v37  ;;  %s5783_s24 = sshll.u32 %s4296_s5, 4 }
 0x7a6   :  { %4110 = vmatpush1.bf16.msra.mxu1 %v10797_v29  ;;  %4029 = vmatprep.subr.bf16.mxu0 %v10803_v21 }
 0x7a7   :  { %4111 = vmatprep.subr.bf16.mxu1 %v10809_v14 }
 0x7a9   :  { %4030 = vmatpush1.bf16.msra.mxu0 %v10815_v16 }
 0x7aa   :  { %4112 = vmatpush1.bf16.msra.mxu1 %v10821_v17  ;;  %4031 = vmatprep.subr.bf16.mxu0 %v10827_v48 }
 0x7ab   :  { %4113 = vmatprep.subr.bf16.mxu1 %v10833_v18 }
 0x7ad   :  { %4032 = vmatpush1.bf16.msra.mxu0 %v10839_v50 }
 0x7ae   :  { %4114 = vmatpush1.bf16.msra.mxu1 %v10845_v19  ;;  %4033 = vmatprep.subr.bf16.mxu0 %v10851_v35  ;;  %v14106_v35 = vld [vmem:[#allocation110_spill] sm:$0xff] }
 0x7af   :  { %4115 = vmatprep.subr.bf16.mxu1 %v10857_v22 }
 0x7b1   :  { %4034 = vmatpush1.bf16.msra.mxu0 %v10863_v7 }
 0x7b2   :  { %4116 = vmatpush1.bf16.msra.mxu1 %v10869_v36  ;;  %4035 = vmatprep.subr.bf16.mxu0 %v10875_v11 }
 0x7b3   :  { %4117 = vmatprep.subr.bf16.mxu1 %v10881_v34 }
 0x7b5   :  { %4036 = vmatpush1.bf16.msra.mxu0 %v10887_v43 }
 0x7b6   :  { %4118 = vmatpush1.bf16.msra.mxu1 %v10893_v44  ;;  %4037 = vmatprep.subr.bf16.mxu0 %v10899_v42 }
 0x7b7   :  { %4119 = vmatprep.subr.bf16.mxu1 %v10905_v33 }
 0x7b9   :  { %4038 = vmatpush1.bf16.msra.mxu0 %v10911_v26 }
 0x7ba   :  { %4120 = vmatpush1.bf16.msra.mxu1 %v10917_v52  ;;  %4039 = vmatprep.subr.bf16.mxu0 %v10923_v53 }
 0x7bb   :  { %4121 = vmatprep.subr.bf16.mxu1 %v10929_v54 }
 0x7bd   :  { %4040 = vmatpush1.bf16.msra.mxu0 %v10935_v55 }
 0x7be   :  { %4122 = vmatpush1.bf16.msra.mxu1 %v10941_v56  ;;  %4041 = vmatprep.subr.bf16.mxu0 %v10947_v57 }
 0x7bf   :  { %4123 = vmatprep.subr.bf16.mxu1 %v10953_v58 }
 0x7c1   :  { %4042 = vmatpush1.bf16.msra.mxu0 %v10959_v59 }
 0x7c2   :  { %4124 = vmatpush1.bf16.msra.mxu1 %v10965_v60  ;;  %4043 = vmatprep.subr.bf16.mxu0 %v10971_v62 }
 0x7c3   :  { %4125 = vmatprep.subr.bf16.mxu1 %v10977_v31 }
 0x7c5   :  { %4044 = vmatpush1.bf16.msra.mxu0 %v10983_v40 }
 0x7c6   :  { %4126 = vmatpush1.bf16.msra.mxu1 %v10989_v49  ;;  %4054 = vmatprep.subr.bf16.mxu0 %v14104_v45 }
 0x7c7   :  { %4136 = vmatprep.subr.bf16.mxu1 %v14105_v46 }
 0x83b   :  { %v3607_v9 = vpop.f32.mrb[36].mxu0  ;;  %v3689_v28 = vpop.f32.mrb[36].mxu1 }
 0x83c   :  { %v3609_v51 = vpop.f32.mrb[37].mxu0  ;;  %v3691_v30 = vpop.f32.mrb[37].mxu1  ;;  %v6152_v16 = vadd.f32 %v3607_v9, %v8659_v61  ;;  %v6154_v48 = vadd.f32 %v3689_v28, %v8667_v1 }
 0x83d   :  { %v3611_v37 = vpop.f32.mrb[38].mxu0  ;;  %v3693_v29 = vpop.f32.mrb[38].mxu1  ;;  %v6153_v17 = vadd.f32 %v3609_v51, %v8663_v63  ;;  %v6155_v22 = vadd.f32 %v3691_v30, %v14106_v35 }
 0x83e   :  { %v3612_v21 = vpop.f32.mrb[39].mxu0  ;;  %v3694_v14 = vpop.f32.mrb[39].mxu1  ;;  %v5573_v18 = vmul.f32 -1.442695, %v6152_v16  ;;  %v5575_v19 = vmul.f32 -1.442695, %v6154_v48 }
 0x83f   :  { %v5574_v50 = vmul.f32 -1.442695, %v6153_v17  ;;  %v5576_v34 = vmul.f32 -1.442695, %v6155_v22 }
 0x840   :  { %6586 = vpow2.f32 %v5573_v18 }
 0x841   :  { %6588 = vpow2.f32 %v5574_v50 }
 0x842   :  { %6590 = vpow2.f32 %v5575_v19 }
 0x843   :  { %6592 = vpow2.f32 %v5576_v34 }
 0x84a   :  { %v6587_v7 = vpop.eup %6586 }
 0x84b   :  { %v6589_v36 = vpop.eup %6588  ;;  %v3779_v44 = vadd.f32 1.0, %v6587_v7 }
 0x84c   :  { %v6591_v11 = vpop.eup %6590  ;;  %v3785_v26 = vadd.f32 1.0, %v6589_v36 }
 0x84d   :  { %v3791_v55 = vadd.f32 1.0, %v6591_v11  ;;  %6594 = vrcp.f32 %v3779_v44  ;;  %v6593_v31 = vpop.eup %6592 }
 0x84e   :  { %6596 = vrcp.f32 %v3785_v26  ;;  %v3797_v51 = vadd.f32 1.0, %v6593_v31  ;;  %v14139_v31 = vld [vmem:[#allocation26_spill] sm:$0xff] }
 0x84f   :  { %6598 = vrcp.f32 %v3791_v55 }
 0x857   :  { %v6595_v40 = vpop.eup %6594 }
 0x858   :  { %v6597_v49 = vpop.eup %6596 }
 0x859   :  { %v6599_v45 = vpop.eup %6598  ;;  %v3802_v9 = vmul.f32 %v6597_v49, %v11259_v10  ;;  %v14141_v49 = vld [vmem:[#allocation28_spill] sm:$0xff] }
 0x85a   :  { %v3804_v30 = vmul.f32 %v6599_v45, %v11271_v13  ;;  %v14142_v45 = vld [vmem:[#allocation29_spill] sm:$0xff] }
 0x85b   :  { %v6000_v43 = vpop.f32.mrb[40].mxu0 }
 0x85c   :  { %v6022_v42 = vpop.f32.mrb[40].mxu1  ;;  %v6001_v33 = vpop.f32.mrb[41].mxu0 }
 0x85d   :  { %v6002_v52 = vadd.f32 %v6001_v33, %v6000_v43  ;;  %v6023_v53 = vpop.f32.mrb[41].mxu1  ;;  %v6003_v54 = vpop.f32.mrb[42].mxu0 }
 0x85e   :  { %v6024_v56 = vadd.f32 %v6023_v53, %v6022_v42  ;;  %v6025_v57 = vpop.f32.mrb[42].mxu1  ;;  %v6004_v58 = vpop.f32.mrb[43].mxu0 }
 0x85f   :  { %v3731_v59 = vadd.f32 %v6002_v52, %v8679_v15  ;;  %v6026_v60 = vpop.f32.mrb[43].mxu1  ;;  %v14129_v57 = vld [vmem:[#allocation16_spill] sm:$0xff]  ;;  %v14130_v58 = vld [vmem:[#allocation17_spill] sm:$0xff] }
 0x860   :  { %v14137_v60 = vld [vmem:[#allocation24_spill] sm:$0xff] }
 0x861   :  { %v3771_v62 = vadd.f32 %v6024_v56, %v3731_v59  ;;  %v14136_v59 = vld [vmem:[#allocation23_spill] sm:$0xff] }
 0x863   :  { %6600 = vtanh.f32 %v3771_v62  ;;  %v14138_v62 = vld [vmem:[#allocation25_spill] sm:$0xff] }
 0x864   :  { %6602 = vrcp.f32 %v3797_v51  ;;  %v14146_v51 = vld [vmem:[#allocation33_spill] sm:$0xff] }
 0x86d   :  { %v6601_v46 = vpop.eup %6600 }
 0x86e   :  { %v3801_v28 = vmul.f32 %v6601_v46, %v6595_v40  ;;  %v6603_v13 = vpop.eup %6602  ;;  %v14140_v40 = vld [vmem:[#allocation27_spill] sm:$0xff]  ;;  %v14143_v46 = vld [vmem:[#allocation30_spill] sm:$0xff] }
 0x870   :  { %v3803_v37 = vadd.f32 %v3802_v9, %v3801_v28  ;;  %v14144_v9 = vld [vmem:[#allocation31_spill] sm:$0xff]  ;;  %v14145_v28 = vld [vmem:[#allocation32_spill] sm:$0xff] }
 0x872   :  { %v3805_v10 = vadd.f32 %v3804_v30, %v3803_v37  ;;  %v14147_v30 = vld [vmem:[#allocation34_spill] sm:$0xff]  ;;  %v14148_v37 = vld [vmem:[#allocation35_spill] sm:$0xff] }
 0x874   :  { %6604 = vtanh.f32 %v3805_v10  ;;  %5578 = vst [vmem:[%s13143_s7 + $0x68] sm:$0xff] %v3805_v10  ;;  %v14149_v10 = vld [vmem:[#allocation36_spill] sm:$0xff] }
 0x87e   :  { %v6605_v29 = vpop.eup %6604 }
 0x87f   :  { %v3807_v21 = vmul.f32 %v6605_v29, %v6603_v13  ;;  %v14150_v13 = vld [vmem:[#allocation37_spill] sm:$0xff]  ;;  %v14151_v29 = vld [vmem:[#allocation38_spill] sm:$0xff] }
 0x881   :  { %5577 = vst [vmem:[%s13143_s7 + $0x60] sm:$0xff] %v3807_v21  ;;  %v14152_v21 = vld [vmem:[#allocation39_spill] sm:$0xff] }
 0x888   :  { %v3823_v14 = vld [vmem:[%s14111_s4] ss:$8 sm:$0x3]  ;;  %s12565_s4 = sld [smem:[#allocation4 + $0x31]] }
 0x889   :  { %v3847_v16 = vld [vmem:[%s14112_s23] ss:$8 sm:$0x3]  ;;  %3824 = vst.msk [vmem:[#allocation2] ss:$8 sm:$0x3] %vm7753_vm1, %v3823_v14  ;;  %s3905_s23 = scalar_lea.vmem %s13143_s7, %s12176_s29  ;;  %s3929_s29 = scalar_lea.vmem %s13143_s7, %s12188_s20 }
 0x88a   :  { %3848 = vst.msk [vmem:[#allocation2 + $0x1] ss:$8 sm:$0x3] %vm7753_vm1, %v3847_v16  ;;  %v3871_v17 = vld [vmem:[%s14115_s9] ss:$8 sm:$0x3] }
 0x88b   :  { %v3895_v48 = vld [vmem:[%s14116_s19] ss:$8 sm:$0x3]  ;;  %3872 = vst.msk [vmem:[#allocation2 + $0x2] ss:$8 sm:$0x3] %vm7753_vm1, %v3871_v17 }
 0x88c   :  { %3896 = vst.msk [vmem:[#allocation2 + $0x3] ss:$8 sm:$0x3] %vm7753_vm1, %v3895_v48  ;;  %v3919_v18 = vld [vmem:[%s14119_s11] ss:$8 sm:$0x3] }
 0x88d   :  { %v3943_v50 = vld [vmem:[%s14120_s3] ss:$8 sm:$0x3]  ;;  %3920 = vst.msk [vmem:[#allocation2 + $0x4] ss:$8 sm:$0x3] %vm7753_vm1, %v3919_v18  ;;  %s14124_s3 = scalar_lea.vmem %s13143_s7, %s14118_s12 }
 0x88e   :  { %3944 = vst.msk [vmem:[#allocation2 + $0x5] ss:$8 sm:$0x3] %vm7753_vm1, %v3943_v50  ;;  %v3967_v19 = vld [vmem:[%s14121_s13] ss:$8 sm:$0x3] }
 0x88f   :  { %v3991_v22 = vld [vmem:[%s14122_s30] ss:$8 sm:$0x3]  ;;  %3968 = vst.msk [vmem:[#allocation2 + $0x6] ss:$8 sm:$0x3] %vm7753_vm1, %v3967_v19 }
 0x890   :  { %3992 = vst.msk [vmem:[#allocation2 + $0x7] ss:$8 sm:$0x3] %vm7753_vm1, %v3991_v22  ;;  %v3834_v7 = vld [vmem:[%s14123_s1] ss:$8 sm:$0x3] }
 0x891   :  { %v3858_v36 = vld [vmem:[%s14124_s3] ss:$8 sm:$0x3]  ;;  %3835 = vst.msk [vmem:[#allocation2 + $0x10] ss:$8 sm:$0x3] %vm7753_vm1, %v3834_v7 }
 0x892   :  { %3859 = vst.msk [vmem:[#allocation2 + $0x11] ss:$8 sm:$0x3] %vm7753_vm1, %v3858_v36  ;;  %v3882_v11 = vld [vmem:[%s3881_s16] ss:$8 sm:$0x3] }
 0x893   :  { %v3906_v34 = vld [vmem:[%s3905_s23] ss:$8 sm:$0x3]  ;;  %3883 = vst.msk [vmem:[#allocation2 + $0x12] ss:$8 sm:$0x3] %vm7753_vm1, %v3882_v11 }
 0x894   :  { %3907 = vst.msk [vmem:[#allocation2 + $0x13] ss:$8 sm:$0x3] %vm7753_vm1, %v3906_v34  ;;  %v3930_v43 = vld [vmem:[%s3929_s29] ss:$8 sm:$0x3] }
 0x895   :  { %v3954_v44 = vld [vmem:[%s3953_s28] ss:$8 sm:$0x3]  ;;  %3931 = vst.msk [vmem:[#allocation2 + $0x14] ss:$8 sm:$0x3] %vm7753_vm1, %v3930_v43 }
 0x896   :  { %3955 = vst.msk [vmem:[#allocation2 + $0x15] ss:$8 sm:$0x3] %vm7753_vm1, %v3954_v44  ;;  %v3978_v42 = vld [vmem:[%s3977_s25] ss:$8 sm:$0x3] }
 0x897   :  { %v4002_v33 = vld [vmem:[%s4001_s26] ss:$8 sm:$0x3]  ;;  %3979 = vst.msk [vmem:[#allocation2 + $0x16] ss:$8 sm:$0x3] %vm7753_vm1, %v3978_v42 }
 0x898   :  { %4003 = vst.msk [vmem:[#allocation2 + $0x17] ss:$8 sm:$0x3] %vm7753_vm1, %v4002_v33  ;;  %v12292_v26 = vld [vmem:[#allocation2 + $0x8] sm:$0xff]  ;;  %v4005_v52 = vld [vmem:[#allocation2] sm:$0xff]  ;;  %v14153_v14 = vld [vmem:[#allocation40_spill] sm:$0xff] }
 0x899   :  { %v12296_v53 = vpack.c.bf16 %v12292_v26, %v12292_v26  ;;  %v12298_v54 = vpack.c.bf16 %v4005_v52, %v4005_v52  ;;  %v14154_v16 = vld [vmem:[#allocation41_spill] sm:$0xff]  ;;  %v14155_v17 = vld [vmem:[#allocation42_spill] sm:$0xff]  ;;  %v14156_v48 = vld [vmem:[#allocation43_spill] sm:$0xff]  ;;  %s12567_s26 = sld [smem:[#allocation4 + $0x32]]  ;;  %s12573_s12 = sld [smem:[#allocation4 + $0x34]] }
 0x89a   :  { %v14157_v18 = vld [vmem:[#allocation44_spill] sm:$0xff]  ;;  %v14158_v50 = vld [vmem:[#allocation45_spill] sm:$0xff]  ;;  %v14159_v19 = vld [vmem:[#allocation46_spill] sm:$0xff]  ;;  %s12575_s16 = sld [smem:[#allocation4 + $0x35]]  ;;  %s12577_s23 = sld [smem:[#allocation4 + $0x36]] }
 0x89b   :  { %4045 = vmatprep.mubr.bf16.mxu0 %v12296_v53  ;;  %4127 = vmatprep.mubr.bf16.mxu1 %v12296_v53  ;;  %v14160_v22 = vld [vmem:[#allocation47_spill] sm:$0xff]  ;;  %v14161_v7 = vld [vmem:[#allocation48_spill] sm:$0xff]  ;;  %v14162_v36 = vld [vmem:[#allocation49_spill] sm:$0xff]  ;;  %s4299_s13 = sand.u32 7, %s12563_s15  ;;  %s4320_s9 = sshra.s32 %s12565_s4, 3 }
 0x89c   :  { %4046 = vmatmul.mubr.bf16.vlgmr.msra.gmra.mrb[44].mxu0 %v12298_v54  ;;  %4128 = vmatmul.mubr.bf16.vlgmr.msra.gmra.mrb[44].mxu1 %v12298_v54  ;;  %v14163_v11 = vld [vmem:[#allocation50_spill] sm:$0xff]  ;;  %v14164_v34 = vld [vmem:[#allocation51_spill] sm:$0xff]  ;;  %v14165_v43 = vld [vmem:[#allocation52_spill] sm:$0xff]  ;;  %s12585_s30 = sld [smem:[#allocation5 + $0x31]]  ;;  %s12590_s29 = sadd.s32 %s5783_s24, %s4299_s13 }
 0x89d   :  { %4055 = vmatpush1.bf16.msra.mxu0 %v11276_v24  ;;  %4137 = vmatpush1.bf16.msra.mxu1 %v11282_v23  ;;  %v14125_v24 = vld [vmem:[#allocation12_spill] sm:$0xff]  ;;  %v14126_v23 = vld [vmem:[#allocation13_spill] sm:$0xff]  ;;  %v14167_v42 = vld [vmem:[#allocation54_spill] sm:$0xff]  ;;  %s12592_s19 = sld [smem:[#allocation5 + $0x33]]  ;;  %s4323_s8 = sand.u32 7, %s12565_s4 }
 0x89e   :  { %4056 = vmatprep.subr.bf16.mxu0 %v11292_v2  ;;  %4138 = vmatprep.subr.bf16.mxu1 %v11298_v8  ;;  %v14127_v2 = vld [vmem:[#allocation14_spill] sm:$0xff]  ;;  %v14128_v8 = vld [vmem:[#allocation15_spill] sm:$0xff]  ;;  %v14166_v44 = vld [vmem:[#allocation53_spill] sm:$0xff]  ;;  %s5785_s28 = sshll.u32 %s4320_s9, 4  ;;  %s4368_s3 = sshra.s32 %s12569_s10, 3 }
 0x89f   :  { %v12304_v55 = vld [vmem:[#allocation2 + $0x18] sm:$0xff]  ;;  %v14168_v33 = vld [vmem:[#allocation55_spill] sm:$0xff]  ;;  %v14169_v52 = vld [vmem:[#allocation56_spill] sm:$0xff]  ;;  %s4344_s6 = sshra.s32 %s12567_s26, 3  ;;  %s4347_s22 = sand.u32 7, %s12567_s26 }
 0x8a0   :  { %v12310_v56 = vpack.c.bf16 %v12304_v55, %v12304_v55  ;;  %s5787_s11 = sshll.u32 %s4344_s6, 4  ;;  %s12601_s20 = sadd.s32 %s5785_s28, %s4323_s8 }
 0x8a1   :  { %4057 = vmatpush1.bf16.msra.mxu0 %v11306_v4  ;;  %4139 = vmatpush1.bf16.msra.mxu1 %v11312_v6  ;;  %v14131_v4 = vld [vmem:[#allocation18_spill] sm:$0xff]  ;;  %v14132_v6 = vld [vmem:[#allocation19_spill] sm:$0xff]  ;;  %s4392_s17 = sshra.s32 %s12573_s12, 3  ;;  %s12604_s25 = sadd.s32 %s5787_s11, %s4347_s22 }
 0x8a2   :  { %4086 = vmatprep.mubr.bf16.mxu0 %v12310_v56  ;;  %4168 = vmatprep.mubr.bf16.mxu1 %v12310_v56  ;;  %s4416_s15 = sshra.s32 %s12575_s16, 3  ;;  %s4371_s4 = sand.u32 7, %s12569_s10 }
 0x8a3   :  { %4058 = vmatprep.subr.bf16.mxu0 %v11318_v38  ;;  %4140 = vmatprep.subr.bf16.mxu1 %v11324_v47  ;;  %v14133_v38 = vld [vmem:[#allocation20_spill] sm:$0xff]  ;;  %v14134_v47 = vld [vmem:[#allocation21_spill] sm:$0xff]  ;;  %s5789_s26 = sshll.u32 %s4368_s3, 4  ;;  %s4395_s5 = sand.u32 7, %s12573_s12 }
 0x8a4   :  { %s5791_s13 = sshll.u32 %s4392_s17, 4  ;;  %s4419_s24 = sand.u32 7, %s12575_s16 }
 0x8a5   :  { %4059 = vmatpush1.bf16.msra.mxu0 %v11330_v27  ;;  %4141 = vmatpush1.bf16.msra.mxu1 %v14125_v24  ;;  %v14135_v27 = vld [vmem:[#allocation22_spill] sm:$0xff]  ;;  %v14170_v24 = vld [vmem:[#allocation57_spill] sm:$0xff]  ;;  %s5793_s9 = sshll.u32 %s4416_s15, 4  ;;  %s4440_s22 = sshra.s32 %s12577_s23, 3 }
 0x8a6   :  { %4060 = vmatprep.subr.bf16.mxu0 %v14126_v23  ;;  %4142 = vmatprep.subr.bf16.mxu1 %v14127_v2  ;;  %v14171_v23 = vld [vmem:[#allocation58_spill] sm:$0xff]  ;;  %v14172_v2 = vld [vmem:[#allocation59_spill] sm:$0xff]  ;;  %s12616_s10 = sadd.s32 %s5789_s26, %s4371_s4  ;;  %s12618_s11 = sadd.s32 %s5791_s13, %s4395_s5 }
 0x8a7   :  { %s12625_s21 = sadd.s32 %s5793_s9, %s4419_s24  ;;  %s4443_s3 = sand.u32 7, %s12577_s23 }
 0x8a8   :  { %s5795_s17 = sshll.u32 %s4440_s22, 4  ;;  %s4464_s9 = sshra.s32 %s12579_s27, 3 }
 0x8a9   :  { %4061 = vmatpush1.bf16.msra.mxu0 %v14128_v8  ;;  %4143 = vmatpush1.bf16.msra.mxu1 %v14129_v57  ;;  %v14173_v8 = vld [vmem:[#allocation60_spill] sm:$0xff]  ;;  %v14174_v57 = vld [vmem:[#allocation61_spill] sm:$0xff]  ;;  %s12644_s22 = sadd.s32 %s5795_s17, %s4443_s3  ;;  %s4307_s15 = sshra.s32 %s12581_s2, 3 }
 0x8aa   :  { %4062 = vmatprep.subr.bf16.mxu0 %v14130_v58  ;;  %4144 = vmatprep.subr.bf16.mxu1 %v14131_v4  ;;  %v14175_v58 = vld [vmem:[#allocation62_spill] sm:$0xff]  ;;  %v4007_v4 = vld [vmem:[#allocation2 + $0x10] sm:$0xff]  ;;  %14227 = sst [smem:[#allocation7_spill]] %s12644_s22  ;;  %s4467_s4 = sand.u32 7, %s12579_s27 }
 0x8ab   :  { %s4331_s26 = sshra.s32 %s12585_s30, 3  ;;  %s5797_s5 = sshll.u32 %s4464_s9, 4 }
 0x8ac   :  { %s4310_s13 = sand.u32 7, %s12581_s2  ;;  %s5784_s6 = sshll.u32 %s4307_s15, 4 }
 0x8ad   :  { %4063 = vmatpush1.bf16.msra.mxu0 %v14132_v6  ;;  %4145 = vmatpush1.bf16.msra.mxu1 %v14133_v38  ;;  %v14176_v6 = vld [vmem:[#allocation63_spill] sm:$0xff]  ;;  %v4011_v38 = vpack.c.bf16 %v4007_v4, %v4007_v4  ;;  %s4334_s1 = sand.u32 7, %s12585_s30  ;;  %s5786_s8 = sshll.u32 %s4331_s26, 4 }
 0x8ae   :  { %4064 = vmatprep.subr.bf16.mxu0 %v14134_v47  ;;  %4146 = vmatprep.subr.bf16.mxu1 %v14135_v27  ;;  %v14177_v47 = vld [vmem:[#allocation64_spill] sm:$0xff]  ;;  %v14178_v27 = vld [vmem:[#allocation65_spill] sm:$0xff]  ;;  %s12651_s12 = sld [smem:[#allocation5 + $0x34]]  ;;  %s12653_s24 = sadd.s32 %s5797_s5, %s4467_s4 }
 0x8af   :  { %v6990_v4 = vld [vmem:[%s14226_s14 + $0xf4] ss:$20 sps:$4 sm:$0xff]   ;;  %14228 = sst [smem:[#allocation8_spill]] %s12653_s24  ;;  %s12655_s16 = sld [smem:[#allocation5 + $0x35]] }
 0x8b0   :  { %s12657_s3 = sadd.s32 %s5784_s6, %s4310_s13  ;;  %s12659_s27 = sld [smem:[#allocation5 + $0x36]] }
 0x8b1   :  { %4065 = vmatpush1.bf16.msra.mxu0 %v14136_v59  ;;  %4147 = vmatpush1.bf16.msra.mxu1 %v14137_v60  ;;  %v14179_v59 = vld [vmem:[#allocation66_spill] sm:$0xff]  ;;  %v14180_v60 = vld [vmem:[#allocation67_spill] sm:$0xff]  ;;  %14229 = sst [smem:[#allocation9_spill]] %s12657_s3  ;;  %s12661_s2 = sadd.s32 %s5786_s8, %s4334_s1 }
 0x8b2   :  { %4066 = vmatprep.subr.bf16.mxu0 %v14138_v62  ;;  %4148 = vmatprep.subr.bf16.mxu1 %v14139_v31  ;;  %v14181_v62 = vld [vmem:[#allocation68_spill] sm:$0xff]  ;;  %v14183_v31 = vld [vmem:[#allocation70_spill] sm:$0xff]  ;;  %14230 = sst [smem:[#allocation111_spill]] %s12661_s2  ;;  %s12663_s30 = sld [smem:[#allocation5 + $0x37]] }
 0x8b3   :  { %s4355_s23 = sshra.s32 %s12588_s18, 3  ;;  %s4379_s26 = sshra.s32 %s12592_s19, 3 }
 0x8b4   :  { %s4358_s9 = sand.u32 7, %s12588_s18  ;;  %s5788_s0 = sshll.u32 %s4355_s23, 4 }
 0x8b5   :  { %4067 = vmatpush1.bf16.msra.mxu0 %v14140_v40  ;;  %4149 = vmatpush1.bf16.msra.mxu1 %v14141_v49  ;;  %v14184_v40 = vld [vmem:[#allocation71_spill] sm:$0xff]  ;;  %v14185_v49 = vld [vmem:[#allocation72_spill] sm:$0xff]  ;;  %s4403_s6 = sshra.s32 %s12651_s12, 3  ;;  %s5790_s5 = sshll.u32 %s4379_s26, 4 }
 0x8b6   :  { %4068 = vmatprep.subr.bf16.mxu0 %v14142_v45  ;;  %4150 = vmatprep.subr.bf16.mxu1 %v14143_v46  ;;  %v14186_v45 = vld [vmem:[#allocation73_spill] sm:$0xff]  ;;  %v14189_v46 = vld [vmem:[#allocation76_spill] sm:$0xff]  ;;  %s4427_s13 = sshra.s32 %s12655_s16, 3  ;;  %s4406_s1 = sand.u32 7, %s12651_s12 }
 0x8b7   :  { %s4451_s3 = sshra.s32 %s12659_s27, 3  ;;  %s5792_s28 = sshll.u32 %s4403_s6, 4 }
 0x8b8   :  { %s4475_s8 = sshra.s32 %s12663_s30, 3  ;;  %s4430_s17 = sand.u32 7, %s12655_s16 }
 0x8b9   :  { %4069 = vmatpush1.bf16.msra.mxu0 %v14144_v9  ;;  %4151 = vmatpush1.bf16.msra.mxu1 %v14145_v28  ;;  %v14191_v9 = vld [vmem:[#allocation78_spill] sm:$0xff]  ;;  %v14192_v28 = vld [vmem:[#allocation79_spill] sm:$0xff]  ;;  %s5794_s2 = sshll.u32 %s4427_s13, 4  ;;  %s4454_s18 = sand.u32 7, %s12659_s27 }
 0x8ba   :  { %4070 = vmatprep.subr.bf16.mxu0 %v14146_v51  ;;  %4152 = vmatprep.subr.bf16.mxu1 %v14147_v30  ;;  %v14193_v51 = vld [vmem:[#allocation80_spill] sm:$0xff]  ;;  %v14194_v30 = vld [vmem:[#allocation81_spill] sm:$0xff]  ;;  %s5796_s23 = sshll.u32 %s4451_s3, 4  ;;  %s5798_s24 = sshll.u32 %s4475_s8, 4 }
 0x8bb   :  { %s12696_s4 = sadd.s32 %s5788_s0, %s4358_s9  ;;  %s14231_s6 = scalar_lea.vmem %s13143_s7, %s12590_s29 }
 0x8bc   :  { %s14232_s27 = scalar_lea.vmem %s13143_s7, %s12601_s20  ;;  %s12710_s3 = sadd.s32 %s5792_s28, %s4406_s1 }
 0x8bd   :  { %4071 = vmatpush1.bf16.msra.mxu0 %v14148_v37  ;;  %4153 = vmatpush1.bf16.msra.mxu1 %v14149_v10  ;;  %v14195_v37 = vld [vmem:[#allocation82_spill] sm:$0xff]  ;;  %v14196_v10 = vld [vmem:[#allocation83_spill] sm:$0xff]  ;;  %s12712_s13 = sadd.s32 %s5794_s2, %s4430_s17  ;;  %s14235_s9 = scalar_lea.vmem %s13143_s7, %s12604_s25 }
 0x8be   :  { %4072 = vmatprep.subr.bf16.mxu0 %v14150_v13  ;;  %4154 = vmatprep.subr.bf16.mxu1 %v14151_v29  ;;  %v14197_v13 = vld [vmem:[#allocation84_spill] sm:$0xff]  ;;  %v14198_v29 = vld [vmem:[#allocation85_spill] sm:$0xff]  ;;  %s14236_s1 = scalar_lea.vmem %s13143_s7, %s12616_s10  ;;  %s12728_s2 = sadd.s32 %s5796_s23, %s4454_s18 }
 0x8bf   :  { %s14237_s17 = sld [smem:[#allocation9_spill]]  ;;  %s14238_s28 = sld [smem:[#allocation111_spill]] }
 0x8c0   :  { %s14239_s26 = scalar_lea.vmem %s13143_s7, %s12618_s11  ;;  %s14240_s23 = scalar_lea.vmem %s13143_s7, %s12625_s21 }
 0x8c1   :  { %4073 = vmatpush1.bf16.msra.mxu0 %v14152_v21  ;;  %4155 = vmatpush1.bf16.msra.mxu1 %v14153_v14  ;;  %v14199_v21 = vld [vmem:[#allocation86_spill] sm:$0xff]  ;;  %v14200_v14 = vld [vmem:[#allocation87_spill] sm:$0xff]  ;;  %s4362_s12 = scalar_lea.vmem %s13143_s7, %s12696_s4  ;;  %s4434_s8 = scalar_lea.vmem %s13143_s7, %s12712_s13 }
 0x8c2   :  { %4074 = vmatprep.subr.bf16.mxu0 %v14154_v16  ;;  %4156 = vmatprep.subr.bf16.mxu1 %v14155_v17  ;;  %v14201_v16 = vld [vmem:[#allocation88_spill] sm:$0xff]  ;;  %v14202_v17 = vld [vmem:[#allocation89_spill] sm:$0xff]  ;;  %s4458_s13 = scalar_lea.vmem %s13143_s7, %s12728_s2 }
 0x8c5   :  { %4075 = vmatpush1.bf16.msra.mxu0 %v14156_v48  ;;  %4157 = vmatpush1.bf16.msra.mxu1 %v14157_v18  ;;  %v14203_v48 = vld [vmem:[#allocation90_spill] sm:$0xff]  ;;  %v14204_v18 = vld [vmem:[#allocation91_spill] sm:$0xff]  ;;  %s14243_s10 = scalar_lea.vmem %s13143_s7, %s14237_s17 }
 0x8c6   :  { %4076 = vmatprep.subr.bf16.mxu0 %v14158_v50  ;;  %4158 = vmatprep.subr.bf16.mxu1 %v14159_v19  ;;  %v14205_v50 = vld [vmem:[#allocation92_spill] sm:$0xff]  ;;  %v14206_v19 = vld [vmem:[#allocation93_spill] sm:$0xff] }
 0x8c9   :  { %4077 = vmatpush1.bf16.msra.mxu0 %v14160_v22  ;;  %4159 = vmatpush1.bf16.msra.mxu1 %v14161_v7  ;;  %v14207_v22 = vld [vmem:[#allocation94_spill] sm:$0xff]  ;;  %v14208_v7 = vld [vmem:[#allocation95_spill] sm:$0xff] }
 0x8ca   :  { %4078 = vmatprep.subr.bf16.mxu0 %v14162_v36  ;;  %4160 = vmatprep.subr.bf16.mxu1 %v14163_v11  ;;  %v14209_v36 = vld [vmem:[#allocation96_spill] sm:$0xff]  ;;  %v14210_v11 = vld [vmem:[#allocation97_spill] sm:$0xff] }
 0x8cd   :  { %4079 = vmatpush1.bf16.msra.mxu0 %v14164_v34  ;;  %4161 = vmatpush1.bf16.msra.mxu1 %v14165_v43  ;;  %v14211_v34 = vld [vmem:[#allocation98_spill] sm:$0xff]  ;;  %v14212_v43 = vld [vmem:[#allocation99_spill] sm:$0xff] }
 0x8ce   :  { %4080 = vmatprep.subr.bf16.mxu0 %v14166_v44  ;;  %4162 = vmatprep.subr.bf16.mxu1 %v14167_v42  ;;  %v14214_v44 = vld [vmem:[#allocation101_spill] sm:$0xff]  ;;  %v14215_v42 = vld [vmem:[#allocation102_spill] sm:$0xff] }
 0x8d1   :  { %4081 = vmatpush1.bf16.msra.mxu0 %v14168_v33  ;;  %4163 = vmatpush1.bf16.msra.mxu1 %v14169_v52  ;;  %v14218_v33 = vld [vmem:[#allocation105_spill] sm:$0xff]  ;;  %v14219_v52 = vld [vmem:[#allocation106_spill] sm:$0xff] }
 0x8d2   :  { %4082 = vmatprep.subr.bf16.mxu0 %v14170_v24  ;;  %4164 = vmatprep.subr.bf16.mxu1 %v14171_v23  ;;  %v14220_v24 = vld [vmem:[#allocation107_spill] sm:$0xff]  ;;  %v14221_v23 = vld [vmem:[#allocation108_spill] sm:$0xff] }
 0x8d5   :  { %4083 = vmatpush1.bf16.msra.mxu0 %v14172_v2  ;;  %4165 = vmatpush1.bf16.msra.mxu1 %v14173_v8  ;;  %v14222_v2 = vld [vmem:[#allocation109_spill] sm:$0xff]  ;;  %v14223_v8 = vld [vmem:[#allocation112_spill] sm:$0xff] }
 0x8d6   :  { %4084 = vmatprep.subr.bf16.mxu0 %v14174_v57  ;;  %4166 = vmatprep.subr.bf16.mxu1 %v14175_v58  ;;  %v14224_v57 = vld [vmem:[#allocation113_spill] sm:$0xff]  ;;  %v14225_v58 = vld [vmem:[#allocation114_spill] sm:$0xff] }
 0x8d9   :  { %4085 = vmatpush1.bf16.msra.mxu0 %v14176_v6  ;;  %4167 = vmatpush1.bf16.msra.mxu1 %v11648_v25  ;;  %v14182_v25 = vld [vmem:[#allocation69_spill] sm:$0xff] }
 0x8da   :  { %6028 = vmatprep.subr.bf16.mxu0 %v14177_v47  ;;  %6050 = vmatprep.subr.bf16.mxu1 %v14178_v27  ;;  %v6991_v6 = vld [vmem:[%s14226_s14 + $0xfc] ss:$20 sps:$4 sm:$0xff]   ;;  %v6997_v47 = vld [vmem:[%s14226_s14 + $0x120] ss:$20 sps:$4 sm:$0xff]   ;;  %v6998_v27 = vld [vmem:[%s14226_s14 + $0x144] ss:$20 sps:$4 sm:$0xff]  }
 0x8dc   :  { %4087 = vmatmul.mubr.bf16.vlgmr.msra.gmra.mrb[44].mxu0 %v4011_v38  ;;  %4169 = vmatmul.mubr.bf16.vlgmr.msra.gmra.mrb[44].mxu1 %v4011_v38 }
 0x8dd   :  { %6029 = vmatpush3.bf16.msra.mxu0 %v11670_v5  ;;  %4209 = vmatprep.mubr.bf16.mxu0 %v12296_v53  ;;  %v14187_v5 = vld [vmem:[#allocation74_spill] sm:$0xff]  ;;  %v14188_v53 = vld [vmem:[#allocation75_spill] sm:$0xff] }
 0x8de   :  { %6051 = vmatpush3.bf16.msra.mxu1 %v14179_v59  ;;  %4249 = vmatprep.mubr.bf16.mxu1 %v12310_v56  ;;  %v14190_v56 = vld [vmem:[#allocation77_spill] sm:$0xff]  ;;  %v6999_v59 = vld [vmem:[%s14226_s14 + $0x14c] ss:$20 sps:$4 sm:$0xff]  }
 0x8df   :  { %6030 = vmatprep.subr.bf16.mxu0 %v14180_v60  ;;  %6052 = vmatprep.subr.bf16.mxu1 %v14181_v62  ;;  %v7000_v60 = vld [vmem:[%s14226_s14 + $0x140] ss:$20 sps:$4 sm:$0xff]   ;;  %v7001_v62 = vld [vmem:[%s14226_s14 + $0x148] ss:$20 sps:$4 sm:$0xff]  }
 0x8e1   :  { %6031 = vmatpush3.bf16.msra.mxu0 %v14182_v25  ;;  %v7002_v25 = vld [vmem:[%s14226_s14 + $0x16c] ss:$20 sps:$4 sm:$0xff]  }
 0x8e2   :  { %6053 = vmatpush3.bf16.msra.mxu1 %v14183_v31  ;;  %6032 = vmatprep.subr.bf16.mxu0 %v14184_v40  ;;  %v7003_v31 = vld [vmem:[%s14226_s14 + $0x174] ss:$20 sps:$4 sm:$0xff]  }
 0x8e3   :  { %6054 = vmatprep.subr.bf16.mxu1 %v14185_v49  ;;  %v7004_v40 = vld [vmem:[%s14226_s14 + $0x168] ss:$20 sps:$4 sm:$0xff]   ;;  %v7005_v49 = vld [vmem:[%s14226_s14 + $0x170] ss:$20 sps:$4 sm:$0xff]  }
 0x8e5   :  { %6033 = vmatpush3.bf16.msra.mxu0 %v14186_v45  ;;  %v7006_v45 = vld [vmem:[%s14226_s14 + $0x194] ss:$20 sps:$4 sm:$0xff]  }
 0x8e6   :  { %6055 = vmatpush3.bf16.msra.mxu1 %v14187_v5  ;;  %6034 = vmatprep.subr.bf16.mxu0 %v14188_v53  ;;  %v7007_v5 = vld [vmem:[%s14226_s14 + $0x19c] ss:$20 sps:$4 sm:$0xff]  }
 0x8e7   :  { %6056 = vmatprep.subr.bf16.mxu1 %v14189_v46  ;;  %v7008_v53 = vld [vmem:[%s14226_s14 + $0x190] ss:$20 sps:$4 sm:$0xff]   ;;  %v7009_v46 = vld [vmem:[%s14226_s14 + $0x198] ss:$20 sps:$4 sm:$0xff]  }
 0x8e9   :  { %6035 = vmatpush3.bf16.msra.mxu0 %v14190_v56  ;;  %v7010_v56 = vld [vmem:[%s14226_s14 + $0x1bc] ss:$20 sps:$4 sm:$0xff]  }
 0x8ea   :  { %6057 = vmatpush3.bf16.msra.mxu1 %v14191_v9  ;;  %6036 = vmatprep.subr.bf16.mxu0 %v14192_v28  ;;  %v7011_v9 = vld [vmem:[%s14226_s14 + $0x1c4] ss:$20 sps:$4 sm:$0xff]  }
 0x8eb   :  { %6058 = vmatprep.subr.bf16.mxu1 %v14193_v51  ;;  %v7012_v28 = vld [vmem:[%s14226_s14 + $0x1b8] ss:$20 sps:$4 sm:$0xff]   ;;  %v7013_v51 = vld [vmem:[%s14226_s14 + $0x1c0] ss:$20 sps:$4 sm:$0xff]  }
 0x8ed   :  { %6037 = vmatpush3.bf16.msra.mxu0 %v14194_v30  ;;  %v7014_v30 = vld [vmem:[%s14226_s14 + $0x1e4] ss:$20 sps:$4 sm:$0xff]  }
 0x8ee   :  { %6059 = vmatpush3.bf16.msra.mxu1 %v14195_v37  ;;  %6038 = vmatprep.subr.bf16.mxu0 %v14196_v10  ;;  %v7015_v37 = vld [vmem:[%s14226_s14 + $0x1ec] ss:$20 sps:$4 sm:$0xff]  }
 0x8ef   :  { %6060 = vmatprep.subr.bf16.mxu1 %v14197_v13  ;;  %v7016_v10 = vld [vmem:[%s14226_s14 + $0x1e0] ss:$20 sps:$4 sm:$0xff]   ;;  %v7017_v13 = vld [vmem:[%s14226_s14 + $0x1e8] ss:$20 sps:$4 sm:$0xff]  }
 0x8f1   :  { %6039 = vmatpush3.bf16.msra.mxu0 %v14198_v29  ;;  %v7018_v29 = vld [vmem:[%s14226_s14 + $0x20c] ss:$20 sps:$4 sm:$0xff]  }
 0x8f2   :  { %6061 = vmatpush3.bf16.msra.mxu1 %v14199_v21  ;;  %6040 = vmatprep.subr.bf16.mxu0 %v14200_v14  ;;  %v7019_v21 = vld [vmem:[%s14226_s14 + $0x214] ss:$20 sps:$4 sm:$0xff]  }
 0x8f3   :  { %6062 = vmatprep.subr.bf16.mxu1 %v14201_v16  ;;  %v7020_v14 = vld [vmem:[%s14226_s14 + $0x208] ss:$20 sps:$4 sm:$0xff]   ;;  %v7021_v16 = vld [vmem:[%s14226_s14 + $0x210] ss:$20 sps:$4 sm:$0xff]  }
 0x8f5   :  { %6041 = vmatpush3.bf16.msra.mxu0 %v14202_v17  ;;  %v7022_v17 = vld [vmem:[%s14226_s14 + $0x234] ss:$20 sps:$4 sm:$0xff]  }
 0x8f6   :  { %6063 = vmatpush3.bf16.msra.mxu1 %v14203_v48  ;;  %6042 = vmatprep.subr.bf16.mxu0 %v14204_v18  ;;  %v7023_v48 = vld [vmem:[%s14226_s14 + $0x23c] ss:$20 sps:$4 sm:$0xff]  }
 0x8f7   :  { %6064 = vmatprep.subr.bf16.mxu1 %v14205_v50  ;;  %v7024_v18 = vld [vmem:[%s14226_s14 + $0x230] ss:$20 sps:$4 sm:$0xff]   ;;  %v7025_v50 = vld [vmem:[%s14226_s14 + $0x238] ss:$20 sps:$4 sm:$0xff]  }
 0x8f9   :  { %6043 = vmatpush3.bf16.msra.mxu0 %v11840_v39  ;;  %v14213_v39 = vld [vmem:[#allocation100_spill] sm:$0xff] }
 0x8fa   :  { %6065 = vmatpush3.bf16.msra.mxu1 %v14206_v19  ;;  %4494 = vmatprep.subr.bf16.mxu0 %v14207_v22  ;;  %v7026_v19 = vld [vmem:[%s14226_s14 + $0x25c] ss:$20 sps:$4 sm:$0xff]   ;;  %v7027_v22 = vld [vmem:[%s14226_s14 + $0x264] ss:$20 sps:$4 sm:$0xff]  }
 0x8fb   :  { %4576 = vmatprep.subr.bf16.mxu1 %v11858_v3  ;;  %v14216_v3 = vld [vmem:[#allocation103_spill] sm:$0xff] }
 0x8fc   :  { %4210 = vmatmul.mubr.bf16.vlgmr.msra.gmra.mrb[48].mxu0 %v12298_v54  ;;  %v14217_v54 = vld [vmem:[#allocation104_spill] sm:$0xff] }
 0x8fd   :  { %4250 = vmatmul.mubr.bf16.vlgmr.msra.gmra.mrb[48].mxu1 %v4011_v38  ;;  %4495 = vmatpush1.bf16.msra.mxu0 %v14208_v7  ;;  %v6996_v38 = vld [vmem:[%s14226_s14 + $0x118] ss:$20 sps:$4 sm:$0xff]  }
 0x8fe   :  { %4577 = vmatpush1.bf16.msra.mxu1 %v14209_v36  ;;  %4496 = vmatprep.subr.bf16.mxu0 %v14210_v11  ;;  %v7028_v7 = vld [vmem:[%s14226_s14 + $0x258] ss:$20 sps:$4 sm:$0xff]   ;;  %v7029_v36 = vld [vmem:[%s14226_s14 + $0x260] ss:$20 sps:$4 sm:$0xff]  }
 0x8ff   :  { %4578 = vmatprep.subr.bf16.mxu1 %v14211_v34  ;;  %v7030_v11 = vld [vmem:[%s14226_s14 + $0x284] ss:$20 sps:$4 sm:$0xff]   ;;  %v7031_v34 = vld [vmem:[%s14226_s14 + $0x28c] ss:$20 sps:$4 sm:$0xff]  }
 0x901   :  { %4497 = vmatpush1.bf16.msra.mxu0 %v14212_v43 }
 0x902   :  { %4579 = vmatpush1.bf16.msra.mxu1 %v14213_v39  ;;  %4498 = vmatprep.subr.bf16.mxu0 %v14214_v44 }
 0x903   :  { %4580 = vmatprep.subr.bf16.mxu1 %v14215_v42 }
 0x905   :  { %4499 = vmatpush1.bf16.msra.mxu0 %v14216_v3 }
 0x906   :  { %4581 = vmatpush1.bf16.msra.mxu1 %v14217_v54  ;;  %4500 = vmatprep.subr.bf16.mxu0 %v14218_v33 }
 0x907   :  { %4582 = vmatprep.subr.bf16.mxu1 %v14219_v52 }
 0x909   :  { %4501 = vmatpush1.bf16.msra.mxu0 %v14220_v24 }
 0x90a   :  { %4583 = vmatpush1.bf16.msra.mxu1 %v14221_v23  ;;  %4502 = vmatprep.subr.bf16.mxu0 %v14222_v2 }
 0x90b   :  { %4584 = vmatprep.subr.bf16.mxu1 %v14223_v8 }
 0x90d   :  { %4503 = vmatpush1.bf16.msra.mxu0 %v14224_v57 }
 0x90e   :  { %4585 = vmatpush1.bf16.msra.mxu1 %v14225_v58  ;;  %4504 = vmatprep.subr.bf16.mxu0 %v11974_v12  ;;  %v6992_v12 = vld [vmem:[%s14226_s14 + $0xf0] ss:$20 sps:$4 sm:$0xff]  }
 0x90f   :  { %4586 = vmatprep.subr.bf16.mxu1 %v11980_v32  ;;  %v6995_v32 = vld [vmem:[%s14226_s14 + $0x124] ss:$20 sps:$4 sm:$0xff]  }
 0x911   :  { %4505 = vmatpush1.bf16.msra.mxu0 %v11986_v0  ;;  %v6993_v0 = vld [vmem:[%s14226_s14 + $0xf8] ss:$20 sps:$4 sm:$0xff]  }
 0x912   :  { %4587 = vmatpush1.bf16.msra.mxu1 %v11992_v20  ;;  %4506 = vmatprep.subr.bf16.mxu0 %v6990_v4  ;;  %v6994_v20 = vld [vmem:[%s14226_s14 + $0x11c] ss:$20 sps:$4 sm:$0xff]   ;;  %s4382_s14 = sand.u32 7, %s12592_s19  ;;  %s4478_s19 = sand.u32 7, %s12663_s30 }
 0x913   :  { %4588 = vmatprep.subr.bf16.mxu1 %v6991_v6  ;;  %s12698_s15 = sadd.s32 %s5790_s5, %s4382_s14  ;;  %s14233_s30 = sld [smem:[#allocation7_spill]] }
 0x914   :  { %s14234_s14 = sld [smem:[#allocation8_spill]]  ;;  %s12730_s5 = sadd.s32 %s5798_s24, %s4478_s19 }
 0x915   :  { %4507 = vmatpush1.bf16.msra.mxu0 %v6992_v12  ;;  %s4482_s16 = scalar_lea.vmem %s13143_s7, %s12730_s5  ;;  %s14245_s5 = sld [smem:[#allocation115_spill]] }
 0x916   :  { %4589 = vmatpush1.bf16.msra.mxu1 %v6993_v0  ;;  %4508 = vmatprep.subr.bf16.mxu0 %v6994_v20 }
 0x917   :  { %4590 = vmatprep.subr.bf16.mxu1 %v6995_v32 }
 0x919   :  { %4509 = vmatpush1.bf16.msra.mxu0 %v6996_v38  ;;  %s14241_s0 = scalar_lea.vmem %s13143_s7, %s14233_s30 }
 0x91a   :  { %4591 = vmatpush1.bf16.msra.mxu1 %v6997_v47  ;;  %4510 = vmatprep.subr.bf16.mxu0 %v6998_v27  ;;  %s14242_s20 = scalar_lea.vmem %s13143_s7, %s14234_s14 }
 0x91b   :  { %4592 = vmatprep.subr.bf16.mxu1 %v6999_v59  ;;  %v7032_v41 = vld [vmem:[%s14245_s5 + $0x280] ss:$20 sps:$4 sm:$0xff]  }
 0x91d   :  { %4511 = vmatpush1.bf16.msra.mxu0 %v7000_v60 }
 0x91e   :  { %4593 = vmatpush1.bf16.msra.mxu1 %v7001_v62  ;;  %4512 = vmatprep.subr.bf16.mxu0 %v7002_v25 }
 0x91f   :  { %4594 = vmatprep.subr.bf16.mxu1 %v7003_v31 }
 0x921   :  { %4513 = vmatpush1.bf16.msra.mxu0 %v7004_v40 }
 0x922   :  { %4595 = vmatpush1.bf16.msra.mxu1 %v7005_v49  ;;  %4514 = vmatprep.subr.bf16.mxu0 %v7006_v45 }
 0x923   :  { %4596 = vmatprep.subr.bf16.mxu1 %v7007_v5 }
 0x925   :  { %4515 = vmatpush1.bf16.msra.mxu0 %v7008_v53 }
 0x926   :  { %4597 = vmatpush1.bf16.msra.mxu1 %v7009_v46  ;;  %4516 = vmatprep.subr.bf16.mxu0 %v7010_v56 }
 0x927   :  { %4598 = vmatprep.subr.bf16.mxu1 %v7011_v9 }
 0x929   :  { %4517 = vmatpush1.bf16.msra.mxu0 %v7012_v28 }
 0x92a   :  { %4599 = vmatpush1.bf16.msra.mxu1 %v7013_v51  ;;  %4518 = vmatprep.subr.bf16.mxu0 %v7014_v30 }
 0x92b   :  { %4600 = vmatprep.subr.bf16.mxu1 %v7015_v37 }
 0x92d   :  { %4519 = vmatpush1.bf16.msra.mxu0 %v7016_v10 }
 0x92e   :  { %4601 = vmatpush1.bf16.msra.mxu1 %v7017_v13  ;;  %4520 = vmatprep.subr.bf16.mxu0 %v7018_v29 }
 0x92f   :  { %4602 = vmatprep.subr.bf16.mxu1 %v7019_v21 }
 0x931   :  { %4521 = vmatpush1.bf16.msra.mxu0 %v7020_v14 }
 0x932   :  { %4603 = vmatpush1.bf16.msra.mxu1 %v7021_v16  ;;  %4522 = vmatprep.subr.bf16.mxu0 %v7022_v17 }
 0x933   :  { %4604 = vmatprep.subr.bf16.mxu1 %v7023_v48 }
 0x935   :  { %4523 = vmatpush1.bf16.msra.mxu0 %v7024_v18 }
 0x936   :  { %4605 = vmatpush1.bf16.msra.mxu1 %v7025_v50  ;;  %4524 = vmatprep.subr.bf16.mxu0 %v7026_v19 }
 0x937   :  { %4606 = vmatprep.subr.bf16.mxu1 %v7027_v22 }
 0x939   :  { %4525 = vmatpush1.bf16.msra.mxu0 %v7028_v7 }
 0x93a   :  { %4607 = vmatpush1.bf16.msra.mxu1 %v7029_v36  ;;  %4535 = vmatprep.subr.bf16.mxu0 %v7030_v11 }
 0x93b   :  { %4617 = vmatprep.subr.bf16.mxu1 %v7031_v34 }
 0x9af   :  { %v4088_v43 = vpop.f32.mrb[44].mxu0  ;;  %v4170_v39 = vpop.f32.mrb[44].mxu1 }
 0x9b0   :  { %v4090_v44 = vpop.f32.mrb[45].mxu0  ;;  %v4172_v42 = vpop.f32.mrb[45].mxu1  ;;  %v6156_v24 = vadd.f32 %v4088_v43, %v8659_v61  ;;  %v6158_v2 = vadd.f32 %v4170_v39, %v8667_v1 }
 0x9b1   :  { %v4092_v3 = vpop.f32.mrb[46].mxu0  ;;  %v4174_v54 = vpop.f32.mrb[46].mxu1  ;;  %v6157_v23 = vadd.f32 %v4090_v44, %v8663_v63  ;;  %v6159_v4 = vadd.f32 %v4172_v42, %v14106_v35 }
 0x9b2   :  { %v4093_v33 = vpop.f32.mrb[47].mxu0  ;;  %v4175_v52 = vpop.f32.mrb[47].mxu1  ;;  %v5627_v8 = vmul.f32 -1.442695, %v6156_v24  ;;  %v5629_v58 = vmul.f32 -1.442695, %v6158_v2 }
 0x9b3   :  { %v5628_v57 = vmul.f32 -1.442695, %v6157_v23  ;;  %v5630_v20 = vmul.f32 -1.442695, %v6159_v4  ;;  %v7035_v4 = vld [vmem:[%s14245_s5 + $0x2b4] ss:$20 sps:$4 sm:$0xff]  }
 0x9b4   :  { %6606 = vpow2.f32 %v5627_v8  ;;  %v7033_v8 = vld [vmem:[%s14245_s5 + $0x288] ss:$20 sps:$4 sm:$0xff]  }
 0x9b5   :  { %6608 = vpow2.f32 %v5628_v57 }
 0x9b6   :  { %6610 = vpow2.f32 %v5629_v58  ;;  %v7034_v58 = vld [vmem:[%s14245_s5 + $0x2ac] ss:$20 sps:$4 sm:$0xff]  }
 0x9b7   :  { %6612 = vpow2.f32 %v5630_v20  ;;  %v7039_v20 = vld [vmem:[%s14245_s5 + $0x2dc] ss:$20 sps:$4 sm:$0xff]  }
 0x9be   :  { %v6607_v6 = vpop.eup %6606 }
 0x9bf   :  { %v6609_v12 = vpop.eup %6608  ;;  %v4260_v38 = vadd.f32 1.0, %v6607_v6  ;;  %v7036_v6 = vld [vmem:[%s14245_s5 + $0x2a8] ss:$20 sps:$4 sm:$0xff]  }
 0x9c0   :  { %v6611_v0 = vpop.eup %6610  ;;  %v4266_v59 = vadd.f32 1.0, %v6609_v12  ;;  %v7037_v12 = vld [vmem:[%s14245_s5 + $0x2b0] ss:$20 sps:$4 sm:$0xff]  }
 0x9c1   :  { %v4272_v31 = vadd.f32 1.0, %v6611_v0  ;;  %6614 = vrcp.f32 %v4260_v38  ;;  %v6613_v56 = vpop.eup %6612  ;;  %v7038_v0 = vld [vmem:[%s14245_s5 + $0x2d4] ss:$20 sps:$4 sm:$0xff]   ;;  %v7041_v38 = vld [vmem:[%s14245_s5 + $0x2d8] ss:$20 sps:$4 sm:$0xff]  }
 0x9c2   :  { %6616 = vrcp.f32 %v4266_v59  ;;  %v4278_v13 = vadd.f32 1.0, %v6613_v56  ;;  %v7044_v59 = vld [vmem:[%s14245_s5 + $0x2f8] ss:$20 sps:$4 sm:$0xff]   ;;  %v7055_v56 = vld [vmem:[%s14245_s5 + $0x37c] ss:$20 sps:$4 sm:$0xff]  }
 0x9c3   :  { %6618 = vrcp.f32 %v4272_v31  ;;  %v7048_v31 = vld [vmem:[%s14245_s5 + $0x320] ss:$20 sps:$4 sm:$0xff]  }
 0x9cb   :  { %v6615_v9 = vpop.eup %6614 }
 0x9cc   :  { %v6617_v28 = vpop.eup %6616 }
 0x9cd   :  { %v6619_v51 = vpop.eup %6618  ;;  %v4283_v37 = vmul.f32 %v6617_v28, %v12292_v26  ;;  %v7057_v28 = vld [vmem:[%s14245_s5 + $0x378] ss:$20 sps:$4 sm:$0xff]  }
 0x9ce   :  { %v4285_v29 = vmul.f32 %v6619_v51, %v12304_v55  ;;  %v7058_v51 = vld [vmem:[%s14245_s5 + $0x39c] ss:$20 sps:$4 sm:$0xff]  }
 0x9cf   :  { %v6044_v32 = vpop.f32.mrb[48].mxu0 }
 0x9d0   :  { %v6066_v47 = vpop.f32.mrb[48].mxu1  ;;  %v6045_v27 = vpop.f32.mrb[49].mxu0 }
 0x9d1   :  { %v6046_v60 = vadd.f32 %v6045_v27, %v6044_v32  ;;  %v6067_v62 = vpop.f32.mrb[49].mxu1  ;;  %v6047_v25 = vpop.f32.mrb[50].mxu0  ;;  %v7040_v32 = vld [vmem:[%s14245_s5 + $0x2d0] ss:$20 sps:$4 sm:$0xff]  }
 0x9d2   :  { %v6068_v40 = vadd.f32 %v6067_v62, %v6066_v47  ;;  %v6069_v49 = vpop.f32.mrb[50].mxu1  ;;  %v6048_v45 = vpop.f32.mrb[51].mxu0  ;;  %v7042_v47 = vld [vmem:[%s14245_s5 + $0x2fc] ss:$20 sps:$4 sm:$0xff]   ;;  %v7043_v27 = vld [vmem:[%s14245_s5 + $0x304] ss:$20 sps:$4 sm:$0xff]  }
 0x9d3   :  { %v4212_v5 = vadd.f32 %v6046_v60, %v8679_v15  ;;  %v6070_v53 = vpop.f32.mrb[51].mxu1  ;;  %v7045_v60 = vld [vmem:[%s14245_s5 + $0x300] ss:$20 sps:$4 sm:$0xff]   ;;  %v7046_v62 = vld [vmem:[%s14245_s5 + $0x324] ss:$20 sps:$4 sm:$0xff]  }
 0x9d4   :  { %v7047_v25 = vld [vmem:[%s14245_s5 + $0x32c] ss:$20 sps:$4 sm:$0xff]   ;;  %v7051_v45 = vld [vmem:[%s14245_s5 + $0x354] ss:$20 sps:$4 sm:$0xff]   ;;  %v7053_v53 = vld [vmem:[%s14245_s5 + $0x350] ss:$20 sps:$4 sm:$0xff]  }
 0x9d5   :  { %v4252_v46 = vadd.f32 %v6068_v40, %v4212_v5  ;;  %v7049_v40 = vld [vmem:[%s14245_s5 + $0x328] ss:$20 sps:$4 sm:$0xff]   ;;  %v7050_v49 = vld [vmem:[%s14245_s5 + $0x34c] ss:$20 sps:$4 sm:$0xff]  }
 0x9d6   :  { %v7052_v5 = vld [vmem:[%s14245_s5 + $0x348] ss:$20 sps:$4 sm:$0xff]  }
 0x9d7   :  { %6620 = vtanh.f32 %v4252_v46  ;;  %v7054_v46 = vld [vmem:[%s14245_s5 + $0x374] ss:$20 sps:$4 sm:$0xff]  }
 0x9d8   :  { %6622 = vrcp.f32 %v4278_v13  ;;  %v7062_v13 = vld [vmem:[%s14245_s5 + $0x3c4] ss:$20 sps:$4 sm:$0xff]  }
 0x9e1   :  { %v6621_v30 = vpop.eup %6620 }
 0x9e2   :  { %v4282_v10 = vmul.f32 %v6621_v30, %v6615_v9  ;;  %v6623_v55 = vpop.eup %6622  ;;  %v7056_v9 = vld [vmem:[%s14245_s5 + $0x370] ss:$20 sps:$4 sm:$0xff]  }
 0x9e3   :  { %v7059_v30 = vld [vmem:[%s14245_s5 + $0x3a4] ss:$20 sps:$4 sm:$0xff]  }
 0x9e4   :  { %v4284_v21 = vadd.f32 %v4283_v37, %v4282_v10  ;;  %v7060_v37 = vld [vmem:[%s14245_s5 + $0x398] ss:$20 sps:$4 sm:$0xff]   ;;  %v7061_v10 = vld [vmem:[%s14245_s5 + $0x3a0] ss:$20 sps:$4 sm:$0xff]  }
 0x9e6   :  { %v4286_v26 = vadd.f32 %v4285_v29, %v4284_v21  ;;  %v7063_v29 = vld [vmem:[%s14245_s5 + $0x3cc] ss:$20 sps:$4 sm:$0xff]  }
 0x9e7   :  { %v7064_v21 = vld [vmem:[%s14245_s5 + $0x3c0] ss:$20 sps:$4 sm:$0xff]  }
 0x9e8   :  { %6624 = vtanh.f32 %v4286_v26  ;;  %5632 = vst [vmem:[%s13143_s7 + $0x78] sm:$0xff] %v4286_v26  ;;  %v7065_v26 = vld [vmem:[%s14245_s5 + $0x3c8] ss:$20 sps:$4 sm:$0xff]  }
 0x9f2   :  { %v6625_v14 = vpop.eup %6624 }
 0x9f3   :  { %v4288_v16 = vmul.f32 %v6625_v14, %v6623_v55  ;;  %v7066_v55 = vld [vmem:[%s14245_s5 + $0x3ec] ss:$20 sps:$4 sm:$0xff]   ;;  %v7067_v14 = vld [vmem:[%s14245_s5 + $0x3f4] ss:$20 sps:$4 sm:$0xff]  }
 0x9f5   :  { %5631 = vst [vmem:[%s13143_s7 + $0x70] sm:$0xff] %v4288_v16  ;;  %v7068_v16 = vld [vmem:[%s14245_s5 + $0x3e8] ss:$20 sps:$4 sm:$0xff]  }
 0x9fc   :  { %v4304_v17 = vld [vmem:[%s14231_s6] ss:$8 sm:$0x3] }
 0x9fd   :  { %v4328_v48 = vld [vmem:[%s14232_s27] ss:$8 sm:$0x3]  ;;  %4305 = vst.msk [vmem:[#allocation2] ss:$8 sm:$0x3] %vm7753_vm1, %v4304_v17  ;;  %s4386_s27 = scalar_lea.vmem %s13143_s7, %s12698_s15  ;;  %s4410_s15 = scalar_lea.vmem %s13143_s7, %s12710_s3 }
 0x9fe   :  { %4329 = vst.msk [vmem:[#allocation2 + $0x1] ss:$8 sm:$0x3] %vm7753_vm1, %v4328_v48  ;;  %v4352_v18 = vld [vmem:[%s14235_s9] ss:$8 sm:$0x3] }
 0x9ff   :  { %v4376_v50 = vld [vmem:[%s14236_s1] ss:$8 sm:$0x3]  ;;  %4353 = vst.msk [vmem:[#allocation2 + $0x2] ss:$8 sm:$0x3] %vm7753_vm1, %v4352_v18 }
 0xa00   :  { %4377 = vst.msk [vmem:[#allocation2 + $0x3] ss:$8 sm:$0x3] %vm7753_vm1, %v4376_v50  ;;  %v4400_v19 = vld [vmem:[%s14239_s26] ss:$8 sm:$0x3] }
 0xa01   :  { %v4424_v22 = vld [vmem:[%s14240_s23] ss:$8 sm:$0x3]  ;;  %4401 = vst.msk [vmem:[#allocation2 + $0x4] ss:$8 sm:$0x3] %vm7753_vm1, %v4400_v19  ;;  %s14244_s23 = scalar_lea.vmem %s13143_s7, %s14238_s28 }
 0xa02   :  { %4425 = vst.msk [vmem:[#allocation2 + $0x5] ss:$8 sm:$0x3] %vm7753_vm1, %v4424_v22  ;;  %v4448_v7 = vld [vmem:[%s14241_s0] ss:$8 sm:$0x3] }
 0xa03   :  { %v4472_v36 = vld [vmem:[%s14242_s20] ss:$8 sm:$0x3]  ;;  %4449 = vst.msk [vmem:[#allocation2 + $0x6] ss:$8 sm:$0x3] %vm7753_vm1, %v4448_v7 }
 0xa04   :  { %4473 = vst.msk [vmem:[#allocation2 + $0x7] ss:$8 sm:$0x3] %vm7753_vm1, %v4472_v36  ;;  %v4315_v11 = vld [vmem:[%s14243_s10] ss:$8 sm:$0x3] }
 0xa05   :  { %v4339_v34 = vld [vmem:[%s14244_s23] ss:$8 sm:$0x3]  ;;  %4316 = vst.msk [vmem:[#allocation2 + $0x10] ss:$8 sm:$0x3] %vm7753_vm1, %v4315_v11 }
 0xa06   :  { %4340 = vst.msk [vmem:[#allocation2 + $0x11] ss:$8 sm:$0x3] %vm7753_vm1, %v4339_v34  ;;  %v4363_v43 = vld [vmem:[%s4362_s12] ss:$8 sm:$0x3] }
 0xa07   :  { %v4387_v39 = vld [vmem:[%s4386_s27] ss:$8 sm:$0x3]  ;;  %4364 = vst.msk [vmem:[#allocation2 + $0x12] ss:$8 sm:$0x3] %vm7753_vm1, %v4363_v43 }
 0xa08   :  { %4388 = vst.msk [vmem:[#allocation2 + $0x13] ss:$8 sm:$0x3] %vm7753_vm1, %v4387_v39  ;;  %v4411_v44 = vld [vmem:[%s4410_s15] ss:$8 sm:$0x3] }
 0xa09   :  { %v4435_v42 = vld [vmem:[%s4434_s8] ss:$8 sm:$0x3]  ;;  %4412 = vst.msk [vmem:[#allocation2 + $0x14] ss:$8 sm:$0x3] %vm7753_vm1, %v4411_v44 }
 0xa0a   :  { %4436 = vst.msk [vmem:[#allocation2 + $0x15] ss:$8 sm:$0x3] %vm7753_vm1, %v4435_v42  ;;  %v4459_v3 = vld [vmem:[%s4458_s13] ss:$8 sm:$0x3] }
 0xa0b   :  { %v4483_v54 = vld [vmem:[%s4482_s16] ss:$8 sm:$0x3]  ;;  %4460 = vst.msk [vmem:[#allocation2 + $0x16] ss:$8 sm:$0x3] %vm7753_vm1, %v4459_v3 }
 0xa0c   :  { %4484 = vst.msk [vmem:[#allocation2 + $0x17] ss:$8 sm:$0x3] %vm7753_vm1, %v4483_v54  ;;  %v12814_v33 = vld [vmem:[#allocation2 + $0x8] sm:$0xff]  ;;  %v4486_v52 = vld [vmem:[#allocation2] sm:$0xff] }
 0xa0d   :  { %v12818_v24 = vpack.c.bf16 %v12814_v33, %v12814_v33  ;;  %v12820_v23 = vpack.c.bf16 %v4486_v52, %v4486_v52  ;;  %v7069_v17 = vld [vmem:[%s14245_s5 + $0x3f0] ss:$20 sps:$4 sm:$0xff]   ;;  %v7070_v48 = vld [vmem:[%s14245_s5 + $0x414] ss:$20 sps:$4 sm:$0xff]   ;;  %v7073_v19 = vld [vmem:[%s14245_s5 + $0x418] ss:$20 sps:$4 sm:$0xff]  }
 0xa0e   :  { %v7071_v18 = vld [vmem:[%s14245_s5 + $0x41c] ss:$20 sps:$4 sm:$0xff]   ;;  %v7075_v7 = vld [vmem:[%s14245_s5 + $0x444] ss:$20 sps:$4 sm:$0xff]   ;;  %v7077_v11 = vld [vmem:[%s14245_s5 + $0x440] ss:$20 sps:$4 sm:$0xff]  }
 0xa0f   :  { %4526 = vmatprep.mubr.bf16.mxu0 %v12818_v24  ;;  %4608 = vmatprep.mubr.bf16.mxu1 %v12818_v24  ;;  %v7072_v50 = vld [vmem:[%s14245_s5 + $0x410] ss:$20 sps:$4 sm:$0xff]   ;;  %v7076_v36 = vld [vmem:[%s14245_s5 + $0x438] ss:$20 sps:$4 sm:$0xff]   ;;  %v7080_v39 = vld [vmem:[%s14245_s5 + $0x460] ss:$20 sps:$4 sm:$0xff]  }
 0xa10   :  { %4527 = vmatmul.mubr.bf16.vlgmr.msra.gmra.mrb[52].mxu0 %v12820_v23  ;;  %4609 = vmatmul.mubr.bf16.vlgmr.msra.gmra.mrb[52].mxu1 %v12820_v23  ;;  %v7074_v22 = vld [vmem:[%s14245_s5 + $0x43c] ss:$20 sps:$4 sm:$0xff]   ;;  %v7078_v34 = vld [vmem:[%s14245_s5 + $0x464] ss:$20 sps:$4 sm:$0xff]   ;;  %v7079_v43 = vld [vmem:[%s14245_s5 + $0x46c] ss:$20 sps:$4 sm:$0xff]  }
 0xa11   :  { %4536 = vmatpush1.bf16.msra.mxu0 %v7032_v41  ;;  %4618 = vmatpush1.bf16.msra.mxu1 %v7033_v8  ;;  %v7081_v44 = vld [vmem:[%s14245_s5 + $0x468] ss:$20 sps:$4 sm:$0xff]   ;;  %v7082_v42 = vld [vmem:[%s14245_s5 + $0x48c] ss:$20 sps:$4 sm:$0xff]   ;;  %v7085_v52 = vld [vmem:[%s14245_s5 + $0x490] ss:$20 sps:$4 sm:$0xff]  }
 0xa12   :  { %4537 = vmatprep.subr.bf16.mxu0 %v7034_v58  ;;  %4619 = vmatprep.subr.bf16.mxu1 %v7035_v4  ;;  %v7083_v3 = vld [vmem:[%s14245_s5 + $0x494] ss:$20 sps:$4 sm:$0xff]   ;;  %v7087_v8 = vld [vmem:[%s14245_s5 + $0x4bc] ss:$20 sps:$4 sm:$0xff]   ;;  %v7089_v4 = vld [vmem:[%s14245_s5 + $0x4b8] ss:$20 sps:$4 sm:$0xff]  }
 0xa13   :  { %v12826_v2 = vld [vmem:[#allocation2 + $0x18] sm:$0xff]  ;;  %v7086_v41 = vld [vmem:[%s14245_s5 + $0x4b4] ss:$20 sps:$4 sm:$0xff]   ;;  %v7088_v58 = vld [vmem:[%s14245_s5 + $0x4b0] ss:$20 sps:$4 sm:$0xff]  }
 0xa14   :  { %v12836_v57 = vpack.c.bf16 %v12826_v2, %v12826_v2  ;;  %v7084_v54 = vld [vmem:[%s14245_s5 + $0x488] ss:$20 sps:$4 sm:$0xff]  }
 0xa15   :  { %4538 = vmatpush1.bf16.msra.mxu0 %v7036_v6  ;;  %4620 = vmatpush1.bf16.msra.mxu1 %v7037_v12  ;;  %v7090_v6 = vld [vmem:[%s14245_s5 + $0x4dc] ss:$20 sps:$4 sm:$0xff]   ;;  %v7091_v12 = vld [vmem:[%s14245_s5 + $0x4e4] ss:$20 sps:$4 sm:$0xff]  }
 0xa16   :  { %4567 = vmatprep.mubr.bf16.mxu0 %v12836_v57  ;;  %4649 = vmatprep.mubr.bf16.mxu1 %v12836_v57 }
 0xa17   :  { %4539 = vmatprep.subr.bf16.mxu0 %v7038_v0  ;;  %4621 = vmatprep.subr.bf16.mxu1 %v7039_v20  ;;  %v4488_v0 = vld [vmem:[#allocation2 + $0x10] sm:$0xff]  ;;  %v7092_v20 = vld [vmem:[%s14245_s5 + $0x4d8] ss:$20 sps:$4 sm:$0xff]  }
 0xa19   :  { %4540 = vmatpush1.bf16.msra.mxu0 %v7040_v32  ;;  %4622 = vmatpush1.bf16.msra.mxu1 %v7041_v38  ;;  %v7093_v32 = vld [vmem:[%s14245_s5 + $0x4e0] ss:$20 sps:$4 sm:$0xff]   ;;  %v13020_v38 = vpack.c.bf16 %v4488_v0, %v4488_v0 }
 0xa1a   :  { %4541 = vmatprep.subr.bf16.mxu0 %v7042_v47  ;;  %4623 = vmatprep.subr.bf16.mxu1 %v7043_v27  ;;  %v7094_v47 = vld [vmem:[%s14245_s5 + $0x150] ss:$20 sps:$4 sm:$0xff]  }
 0xa1b   :  { %v7095_v27 = vld [vmem:[%s14245_s5 + $0x3d0] ss:$20 sps:$4 sm:$0xff]  }
 0xa1d   :  { %4542 = vmatpush1.bf16.msra.mxu0 %v7044_v59  ;;  %4624 = vmatpush1.bf16.msra.mxu1 %v7045_v60  ;;  %v7096_v59 = vld [vmem:[%s14245_s5 + $0x10] ss:$20 sps:$4 sm:$0xff]  }
 0xa1e   :  { %4543 = vmatprep.subr.bf16.mxu0 %v7046_v62  ;;  %4625 = vmatprep.subr.bf16.mxu1 %v7047_v25  ;;  %v7097_v60 = vld [vmem:[%s14245_s5 + $0x290] ss:$20 sps:$4 sm:$0xff]   ;;  %v7098_v62 = vld [vmem:[%s14245_s5 + $0x178] ss:$20 sps:$4 sm:$0xff]  }
 0xa1f   :  { %v7099_v25 = vld [vmem:[%s14245_s5 + $0x3f8] ss:$20 sps:$4 sm:$0xff]  }
 0xa21   :  { %4544 = vmatpush1.bf16.msra.mxu0 %v7048_v31  ;;  %4626 = vmatpush1.bf16.msra.mxu1 %v7049_v40  ;;  %v7101_v31 = vld [vmem:[%s14245_s5 + $0x2b8] ss:$20 sps:$4 sm:$0xff]   ;;  %v7103_v40 = vld [vmem:[%s14245_s5 + $0x420] ss:$20 sps:$4 sm:$0xff]  }
 0xa22   :  { %4545 = vmatprep.subr.bf16.mxu0 %v7050_v49  ;;  %4627 = vmatprep.subr.bf16.mxu1 %v7051_v45  ;;  %v7104_v49 = vld [vmem:[%s14245_s5 + $0x60] ss:$20 sps:$4 sm:$0xff]  }
 0xa23   :  { %v7105_v45 = vld [vmem:[%s14245_s5 + $0x2e0] ss:$20 sps:$4 sm:$0xff]  }
 0xa25   :  { %4546 = vmatpush1.bf16.msra.mxu0 %v7052_v5  ;;  %4628 = vmatpush1.bf16.msra.mxu1 %v7053_v53  ;;  %v7106_v5 = vld [vmem:[%s14245_s5 + $0x1c8] ss:$20 sps:$4 sm:$0xff]  }
 0xa26   :  { %4547 = vmatprep.subr.bf16.mxu0 %v7054_v46  ;;  %4629 = vmatprep.subr.bf16.mxu1 %v7055_v56  ;;  %v7107_v53 = vld [vmem:[%s14245_s5 + $0x448] ss:$20 sps:$4 sm:$0xff]  }
 0xa27   :  { %v7108_v46 = vld [vmem:[%s14245_s5 + $0x88] ss:$20 sps:$4 sm:$0xff]  }
 0xa28   :  { %v7109_v56 = vld [vmem:[%s14245_s5 + $0x308] ss:$20 sps:$4 sm:$0xff]  }
 0xa29   :  { %4548 = vmatpush1.bf16.msra.mxu0 %v7056_v9  ;;  %4630 = vmatpush1.bf16.msra.mxu1 %v7057_v28  ;;  %v7110_v9 = vld [vmem:[%s14245_s5 + $0x1f0] ss:$20 sps:$4 sm:$0xff]  }
 0xa2a   :  { %4549 = vmatprep.subr.bf16.mxu0 %v7058_v51  ;;  %4631 = vmatprep.subr.bf16.mxu1 %v7059_v30  ;;  %v7111_v28 = vld [vmem:[%s14245_s5 + $0x470] ss:$20 sps:$4 sm:$0xff]  }
 0xa2b   :  { %v7112_v51 = vld [vmem:[%s14245_s5 + $0xb0] ss:$20 sps:$4 sm:$0xff]  }
 0xa2c   :  { %v7113_v30 = vld [vmem:[%s14245_s5 + $0x330] ss:$20 sps:$4 sm:$0xff]  }
 0xa2d   :  { %4550 = vmatpush1.bf16.msra.mxu0 %v7060_v37  ;;  %4632 = vmatpush1.bf16.msra.mxu1 %v7061_v10  ;;  %v7114_v37 = vld [vmem:[%s14245_s5 + $0x218] ss:$20 sps:$4 sm:$0xff]  }
 0xa2e   :  { %4551 = vmatprep.subr.bf16.mxu0 %v7062_v13  ;;  %4633 = vmatprep.subr.bf16.mxu1 %v7063_v29  ;;  %v7115_v10 = vld [vmem:[%s14245_s5 + $0x498] ss:$20 sps:$4 sm:$0xff]  }
 0xa2f   :  { %v7116_v13 = vld [vmem:[%s14245_s5 + $0xd8] ss:$20 sps:$4 sm:$0xff]  }
 0xa30   :  { %v7117_v29 = vld [vmem:[%s14245_s5 + $0x358] ss:$20 sps:$4 sm:$0xff]  }
 0xa31   :  { %4552 = vmatpush1.bf16.msra.mxu0 %v7064_v21  ;;  %4634 = vmatpush1.bf16.msra.mxu1 %v7065_v26  ;;  %v7118_v21 = vld [vmem:[%s14245_s5 + $0x240] ss:$20 sps:$4 sm:$0xff]  }
 0xa32   :  { %4553 = vmatprep.subr.bf16.mxu0 %v7066_v55  ;;  %4635 = vmatprep.subr.bf16.mxu1 %v7067_v14  ;;  %v7119_v26 = vld [vmem:[%s14245_s5 + $0x4c0] ss:$20 sps:$4 sm:$0xff]  }
 0xa33   :  { %v7120_v55 = vld [vmem:[%s14245_s5 + $0x100] ss:$20 sps:$4 sm:$0xff]  }
 0xa34   :  { %v7121_v14 = vld [vmem:[%s14245_s5 + $0x380] ss:$20 sps:$4 sm:$0xff]  }
 0xa35   :  { %4554 = vmatpush1.bf16.msra.mxu0 %v7068_v16  ;;  %4636 = vmatpush1.bf16.msra.mxu1 %v7069_v17  ;;  %v7122_v16 = vld [vmem:[%s14245_s5 + $0x268] ss:$20 sps:$4 sm:$0xff]  }
 0xa36   :  { %4555 = vmatprep.subr.bf16.mxu0 %v7070_v48  ;;  %4637 = vmatprep.subr.bf16.mxu1 %v7071_v18  ;;  %v7123_v17 = vld [vmem:[%s14245_s5 + $0x4e8] ss:$20 sps:$4 sm:$0xff]  }
 0xa37   :  { %v7124_v48 = vld [vmem:[%s14245_s5 + $0x128] ss:$20 sps:$4 sm:$0xff]  }
 0xa38   :  { %v7125_v18 = vld [vmem:[%s14245_s5 + $0x3a8] ss:$20 sps:$4 sm:$0xff]  }
 0xa39   :  { %4556 = vmatpush1.bf16.msra.mxu0 %v7072_v50  ;;  %4638 = vmatpush1.bf16.msra.mxu1 %v7073_v19 }
 0xa3a   :  { %4557 = vmatprep.subr.bf16.mxu0 %v7074_v22  ;;  %4639 = vmatprep.subr.bf16.mxu1 %v7075_v7 }
 0xa3d   :  { %4558 = vmatpush1.bf16.msra.mxu0 %v7076_v36  ;;  %4640 = vmatpush1.bf16.msra.mxu1 %v7077_v11 }
 0xa3e   :  { %4559 = vmatprep.subr.bf16.mxu0 %v7078_v34  ;;  %4641 = vmatprep.subr.bf16.mxu1 %v7079_v43 }
 0xa41   :  { %4560 = vmatpush1.bf16.msra.mxu0 %v7080_v39  ;;  %4642 = vmatpush1.bf16.msra.mxu1 %v7081_v44 }
 0xa42   :  { %4561 = vmatprep.subr.bf16.mxu0 %v7082_v42  ;;  %4643 = vmatprep.subr.bf16.mxu1 %v7083_v3 }
 0xa45   :  { %4562 = vmatpush1.bf16.msra.mxu0 %v7084_v54  ;;  %4644 = vmatpush1.bf16.msra.mxu1 %v7085_v52 }
 0xa46   :  { %4563 = vmatprep.subr.bf16.mxu0 %v7086_v41  ;;  %4645 = vmatprep.subr.bf16.mxu1 %v7087_v8 }
 0xa49   :  { %4564 = vmatpush1.bf16.msra.mxu0 %v7088_v58  ;;  %4646 = vmatpush1.bf16.msra.mxu1 %v7089_v4 }
 0xa4a   :  { %4565 = vmatprep.subr.bf16.mxu0 %v7090_v6  ;;  %4647 = vmatprep.subr.bf16.mxu1 %v7091_v12 }
 0xa4d   :  { %4566 = vmatpush1.bf16.msra.mxu0 %v7092_v20  ;;  %4648 = vmatpush1.bf16.msra.mxu1 %v7093_v32 }
 0xa4e   :  { %6072 = vmatprep.subr.bf16.mxu0 %v7094_v47  ;;  %6094 = vmatprep.subr.bf16.mxu1 %v7095_v27 }
 0xa50   :  { %4568 = vmatmul.mubr.bf16.vlgmr.msra.gmra.mrb[52].mxu0 %v13020_v38  ;;  %4650 = vmatmul.mubr.bf16.vlgmr.msra.gmra.mrb[52].mxu1 %v13020_v38 }
 0xa51   :  { %6073 = vmatpush3.bf16.msra.mxu0 %v7096_v59  ;;  %4690 = vmatprep.mubr.bf16.mxu0 %v12818_v24  ;;  %v7100_v24 = vld [vmem:[%s14245_s5 + $0x38] ss:$20 sps:$4 sm:$0xff]  }
 0xa52   :  { %6095 = vmatpush3.bf16.msra.mxu1 %v7097_v60  ;;  %4730 = vmatprep.mubr.bf16.mxu1 %v12836_v57  ;;  %v7102_v57 = vld [vmem:[%s14245_s5 + $0x1a0] ss:$20 sps:$4 sm:$0xff]  }
 0xa53   :  { %6074 = vmatprep.subr.bf16.mxu0 %v7098_v62  ;;  %6096 = vmatprep.subr.bf16.mxu1 %v7099_v25 }
 0xa55   :  { %6075 = vmatpush3.bf16.msra.mxu0 %v7100_v24 }
 0xa56   :  { %6097 = vmatpush3.bf16.msra.mxu1 %v7101_v31  ;;  %6076 = vmatprep.subr.bf16.mxu0 %v7102_v57 }
 0xa57   :  { %6098 = vmatprep.subr.bf16.mxu1 %v7103_v40 }
 0xa59   :  { %6077 = vmatpush3.bf16.msra.mxu0 %v7104_v49 }
 0xa5a   :  { %6099 = vmatpush3.bf16.msra.mxu1 %v7105_v45  ;;  %6078 = vmatprep.subr.bf16.mxu0 %v7106_v5 }
 0xa5b   :  { %6100 = vmatprep.subr.bf16.mxu1 %v7107_v53 }
 0xa5d   :  { %6079 = vmatpush3.bf16.msra.mxu0 %v7108_v46 }
 0xa5e   :  { %6101 = vmatpush3.bf16.msra.mxu1 %v7109_v56  ;;  %6080 = vmatprep.subr.bf16.mxu0 %v7110_v9 }
 0xa5f   :  { %6102 = vmatprep.subr.bf16.mxu1 %v7111_v28 }
 0xa61   :  { %6081 = vmatpush3.bf16.msra.mxu0 %v7112_v51 }
 0xa62   :  { %6103 = vmatpush3.bf16.msra.mxu1 %v7113_v30  ;;  %6082 = vmatprep.subr.bf16.mxu0 %v7114_v37 }
 0xa63   :  { %6104 = vmatprep.subr.bf16.mxu1 %v7115_v10 }
 0xa65   :  { %6083 = vmatpush3.bf16.msra.mxu0 %v7116_v13 }
 0xa66   :  { %6105 = vmatpush3.bf16.msra.mxu1 %v7117_v29  ;;  %6084 = vmatprep.subr.bf16.mxu0 %v7118_v21 }
 0xa67   :  { %6106 = vmatprep.subr.bf16.mxu1 %v7119_v26 }
 0xa69   :  { %6085 = vmatpush3.bf16.msra.mxu0 %v7120_v55 }
 0xa6a   :  { %6107 = vmatpush3.bf16.msra.mxu1 %v7121_v14  ;;  %6086 = vmatprep.subr.bf16.mxu0 %v7122_v16 }
 0xa6b   :  { %6108 = vmatprep.subr.bf16.mxu1 %v7123_v17 }
 0xa6d   :  { %6087 = vmatpush3.bf16.msra.mxu0 %v7124_v48 }
 0xa6e   :  { %6109 = vmatpush3.bf16.msra.mxu1 %v7125_v18 }
 0xa70   :  { %4691 = vmatmul.mubr.bf16.vlgmr.msra.gmra.mrb[56].mxu0 %v12820_v23 }
 0xa71   :  { %4731 = vmatmul.mubr.bf16.vlgmr.msra.gmra.mrb[56].mxu1 %v13020_v38 }
 0xb23   :  { %v4569_v50 = vpop.f32.mrb[52].mxu0  ;;  %v4651_v19 = vpop.f32.mrb[52].mxu1 }
 0xb24   :  { %v4571_v22 = vpop.f32.mrb[53].mxu0  ;;  %v4653_v7 = vpop.f32.mrb[53].mxu1  ;;  %v6160_v39 = vadd.f32 %v4569_v50, %v8659_v61  ;;  %v6162_v42 = vadd.f32 %v4651_v19, %v8667_v1 }
 0xb25   :  { %v4573_v36 = vpop.f32.mrb[54].mxu0  ;;  %v4655_v11 = vpop.f32.mrb[54].mxu1  ;;  %v6161_v44 = vadd.f32 %v4571_v22, %v8663_v63  ;;  %v6163_v23 = vadd.f32 %v4653_v7, %v14106_v35 }
 0xb26   :  { %v4574_v34 = vpop.f32.mrb[55].mxu0  ;;  %v4656_v43 = vpop.f32.mrb[55].mxu1  ;;  %v5681_v3 = vmul.f32 -1.442695, %v6160_v39  ;;  %v5683_v52 = vmul.f32 -1.442695, %v6162_v42 }
 0xb27   :  { %v5682_v54 = vmul.f32 -1.442695, %v6161_v44  ;;  %v5684_v4 = vmul.f32 -1.442695, %v6163_v23 }
 0xb28   :  { %6626 = vpow2.f32 %v5681_v3 }
 0xb29   :  { %6628 = vpow2.f32 %v5682_v54 }
 0xb2a   :  { %6630 = vpow2.f32 %v5683_v52 }
 0xb2b   :  { %6632 = vpow2.f32 %v5684_v4 }
 0xb32   :  { %v6627_v41 = vpop.eup %6626 }
 0xb33   :  { %v6629_v8 = vpop.eup %6628  ;;  %v4741_v12 = vadd.f32 1.0, %v6627_v41 }
 0xb34   :  { %v6631_v58 = vpop.eup %6630  ;;  %v4747_v20 = vadd.f32 1.0, %v6629_v8 }
 0xb35   :  { %v4753_v38 = vadd.f32 1.0, %v6631_v58  ;;  %6634 = vrcp.f32 %v4741_v12  ;;  %v6633_v25 = vpop.eup %6632 }
 0xb36   :  { %6636 = vrcp.f32 %v4747_v20  ;;  %v4759_v5 = vadd.f32 1.0, %v6633_v25 }
 0xb37   :  { %6638 = vrcp.f32 %v4753_v38 }
 0xb3f   :  { %v6635_v24 = vpop.eup %6634 }
 0xb40   :  { %v6637_v31 = vpop.eup %6636 }
 0xb41   :  { %v6639_v57 = vpop.eup %6638  ;;  %v4764_v49 = vmul.f32 %v6637_v31, %v12814_v33 }
 0xb42   :  { %v4766_v53 = vmul.f32 %v6639_v57, %v12826_v2 }
 0xb43   :  { %v6088_v6 = vpop.f32.mrb[56].mxu0 }
 0xb44   :  { %v6110_v0 = vpop.f32.mrb[56].mxu1  ;;  %v6089_v61 = vpop.f32.mrb[57].mxu0 }
 0xb45   :  { %v6090_v63 = vadd.f32 %v6089_v61, %v6088_v6  ;;  %v6111_v32 = vpop.f32.mrb[57].mxu1  ;;  %v6091_v1 = vpop.f32.mrb[58].mxu0 }
 0xb46   :  { %v6112_v47 = vadd.f32 %v6111_v32, %v6110_v0  ;;  %v6113_v27 = vpop.f32.mrb[58].mxu1  ;;  %v6092_v59 = vpop.f32.mrb[59].mxu0 }
 0xb47   :  { %v4693_v60 = vadd.f32 %v6090_v63, %v8679_v15  ;;  %v6114_v35 = vpop.f32.mrb[59].mxu1 }
 0xb49   :  { %v4733_v62 = vadd.f32 %v6112_v47, %v4693_v60 }
 0xb4b   :  { %6640 = vtanh.f32 %v4733_v62 }
 0xb4c   :  { %6642 = vrcp.f32 %v4759_v5 }
 0xb55   :  { %v6641_v40 = vpop.eup %6640 }
 0xb56   :  { %v4763_v45 = vmul.f32 %v6641_v40, %v6635_v24  ;;  %v6643_v15 = vpop.eup %6642 }
 0xb58   :  { %v4765_v46 = vadd.f32 %v4764_v49, %v4763_v45 }
 0xb5a   :  { %v4767_v56 = vadd.f32 %v4766_v53, %v4765_v46 }
 0xb5c   :  { %6644 = vtanh.f32 %v4767_v56  ;;  %5686 = vst [vmem:[%s13143_s7 + $0x88] sm:$0xff] %v4767_v56 }
 0xb66   :  { %v6645_v9 = vpop.eup %6644 }
 0xb67   :  { %v4769_v28 = vmul.f32 %v6645_v9, %v6643_v15 }
 0xb69   :  { %5685 = vst [vmem:[%s13143_s7 + $0x80] sm:$0xff] %v4769_v28 }

</bundles_post_ra>
